<compile_context>
chip_gen: v6e
topology: v6e:2x2x1
jax: 0.10.0
libtpu: 0.0.40
codegen_flags: <defaults>
</compile_context>

<pallas_src>
import jax
import jax.numpy as jnp
from jax.experimental import pallas as pl
from jax.experimental.pallas import tpu as pltpu

BN_EPS = 1e-5
LANE = 128                      # pad Cout to a lane-dense multiple of 128
VMEM_LIMIT = 32 * 1024 * 1024   # safe on v5e/v6e (128 MiB) and v7x (64 MiB)


def _make_fused_kernel(n, h, w, cin, cpad):
    """Fused Conv3x3 (single im2col matmul) + batch-stat BN + ReLU kernel."""
    nhw = n * h * w
    inv_m = 1.0 / float(nhw)

    def kernel(x_ref, w_ref, g_ref, b_ref, o_ref):
        # x_ref: (n, h+2, w+2, cin) bf16, spatially halo-padded.
        # w_ref: (9*cin, cpad)      bf16, tap-major / channel-minor rows.
        # g_ref, b_ref: (1, cpad)   f32 gamma / beta (zero in padded lanes).
        # o_ref: (nhw, cpad)        lane-dense output.
        xb = x_ref[...]

        # In-kernel im2col: two lane-axis concats of shifted views build the
        # (nhw, 9*cin) patch matrix, then ONE MXU matmul does the whole conv
        # (accumulation stays inside the MXU -- no VMEM accumulator RMW).
        cols = jnp.concatenate(
            [xb[:, :, dx:dx + w, :] for dx in range(3)], axis=-1)   # (n,h+2,w,3cin)
        patch = jnp.concatenate(
            [cols[:, dy:dy + h, :, :] for dy in range(3)], axis=-1)  # (n,h,w,9cin)
        patch = patch.reshape(nhw, 9 * cin)

        acc = jnp.dot(patch, w_ref[...],
                      preferred_element_type=jnp.float32)            # (nhw, cpad) f32

        # Training-mode BatchNorm: biased variance over (N, H, W), computed as
        # a centered reduction in f32 (no E[x^2]-E[x]^2 cancellation).
        mean = jnp.sum(acc, axis=0, keepdims=True) * inv_m
        cen = acc - mean
        var = jnp.sum(cen * cen, axis=0, keepdims=True) * inv_m
        scale = g_ref[...] * jax.lax.rsqrt(var + BN_EPS)
        y = cen * scale + b_ref[...]

        o_ref[...] = jnp.maximum(y, 0.0).astype(o_ref.dtype)         # ReLU + cast

    return kernel


def _fused_conv_bn_relu(x_nhwc, w_oihw, gamma, beta, out_dtype):
    """Conv3x3(stride 1, pad 1, no bias) + training-mode BN + ReLU, one kernel.

    x_nhwc may carry trailing zero-padded channels (lane-dense intermediate);
    returns (N, H, W, cpad) with real channels in [:cout] and exact zeros in
    the padded lanes (zero weights / gamma / beta in the pad keep them clean).
    """
    n, h, w, cin = x_nhwc.shape
    cout, cin_w, _, _ = w_oihw.shape
    cpad = ((cout + LANE - 1) // LANE) * LANE
    nhw = n * h * w

    # Whole-batch-per-step fusion needs the f32 pre-BN activation + bf16 patch
    # matrix + weights to fit in VMEM (trivially true at these shapes).
    est_bytes = nhw * cpad * 4 + nhw * 9 * cin * 2 + 9 * cin * cpad * 2
    if est_bytes > 24 * 1024 * 1024:
        # TODO(synk): tiled two-pass (stats, then apply) fallback with an
        # H-tile grid axis and per-TensorCore partial stats for large shapes.
        raise NotImplementedError("activation too large for the fused kernel")

    # OIHW -> (ky, kx, cin, cout) -> (9*cin, cpad): zero-pad in-channels to
    # match x (extra x channels are zero anyway) and out-channels to cpad so
    # stores stay lane-dense and padded lanes come out exactly zero.
    w_taps = jnp.transpose(w_oihw, (2, 3, 1, 0)).reshape(9, cin_w, cout)
    w_taps = jnp.pad(w_taps, ((0, 0), (0, cin - cin_w), (0, cpad - cout)))
    w_mat = w_taps.reshape(9 * cin, cpad).astype(jnp.bfloat16)

    g = jnp.pad(gamma.astype(jnp.float32), (0, cpad - cout)).reshape(1, cpad)
    b = jnp.pad(beta.astype(jnp.float32), (0, cpad - cout)).reshape(1, cpad)

    # 1-pixel spatial halo so the kernel can build all 9 taps locally.
    # TODO(synk): build the halo in-kernel (masked border) and fuse layer-1
    # apply with layer-2 stats to drop this extra HBM round trip entirely.
    xp = jnp.pad(x_nhwc.astype(jnp.bfloat16), ((0, 0), (1, 1), (1, 1), (0, 0)))

    kernel = _make_fused_kernel(n, h, w, cin, cpad)

    out = pl.pallas_call(
        kernel,
        out_shape=jax.ShapeDtypeStruct((nhw, cpad), out_dtype),
        grid_spec=pltpu.PrefetchScalarGridSpec(
            num_scalar_prefetch=0,
            grid=(1,),  # whole batch per step: launch/overhead-bound regime
            in_specs=[
                pl.BlockSpec((n, h + 2, w + 2, cin), lambda i: (0, 0, 0, 0)),
                pl.BlockSpec((9 * cin, cpad), lambda i: (0, 0)),
                pl.BlockSpec((1, cpad), lambda i: (0, 0)),
                pl.BlockSpec((1, cpad), lambda i: (0, 0)),
            ],
            out_specs=pl.BlockSpec((nhw, cpad), lambda i: (0, 0)),
        ),
        compiler_params=pltpu.CompilerParams(
            dimension_semantics=("arbitrary",),
            vmem_limit_bytes=VMEM_LIMIT),
    )(xp, w_mat, g, b)

    return out.reshape(n, h, w, cpad)


def conv_block_forward(x_nchw, params):
    """Equivalent of ConvBlock.forward, NCHW in / NCHW out (f32)."""
    out_c = params["w2"].shape[0]
    x = jnp.transpose(x_nchw, (0, 2, 3, 1))                      # NCHW -> NHWC
    # Layer 1: lane-dense bf16 intermediate, channel-padded to 128 so layer 2
    # consumes it directly (its extra weight rows are zero).
    y1 = _fused_conv_bn_relu(x, params["w1"], params["g1"], params["b1"],
                             out_dtype=jnp.bfloat16)
    # Layer 2: bf16 writeback (half the HBM traffic); f32 cast after the slice.
    y2 = _fused_conv_bn_relu(y1, params["w2"], params["g2"], params["b2"],
                             out_dtype=jnp.bfloat16)
    y2 = y2[..., :out_c].astype(jnp.float32)                     # drop lane pad
    return jnp.transpose(y2, (0, 3, 1, 2))                       # NHWC -> NCHW


def init_params(key, in_c, out_c):
    k1, k2 = jax.random.split(key)
    # Conv2d(in_c, out_c, 3, stride=1, pad=1, bias=False): OIHW weights.
    w1 = jax.random.normal(k1, (out_c, in_c, 3, 3), jnp.float32) * 0.1
    w2 = jax.random.normal(k2, (out_c, out_c, 3, 3), jnp.float32) * 0.1
    # BatchNorm2d default affine init: gamma = 1, beta = 0.
    return {
        "w1": w1, "g1": jnp.ones((out_c,), jnp.float32), "b1": jnp.zeros((out_c,), jnp.float32),
        "w2": w2, "g2": jnp.ones((out_c,), jnp.float32), "b2": jnp.zeros((out_c,), jnp.float32),
    }


if __name__ == "__main__":
    key = jax.random.PRNGKey(0)
    kx, kp = jax.random.split(key)
    in_c, out_c = 4, 8
    x = jax.random.normal(kx, (2, in_c, 16, 16), jnp.float32)    # NCHW input
    params = init_params(kp, in_c, out_c)

    y = jax.jit(conv_block_forward)(x, params)
    jax.block_until_ready(y)
    assert y.shape == (2, out_c, 16, 16)
    assert bool(jnp.all(jnp.isfinite(y)))
    assert bool(jnp.all(y >= 0.0))   # ReLU output is non-negative
    print("KERNEL_OK")
</pallas_src>

<mosaic_0001>
module attributes {stable_mosaic.version = 11 : i64} {
  func.func @kernel(%arg0: i32, %arg1: memref<2x18x18x4xbf16, #tpu.memory_space<vmem>>, %arg2: memref<36x128xbf16, #tpu.memory_space<vmem>>, %arg3: memref<1x128xf32, #tpu.memory_space<vmem>>, %arg4: memref<1x128xf32, #tpu.memory_space<vmem>>, %arg5: memref<512x128xbf16, #tpu.memory_space<vmem>>) attributes {dimension_semantics = [#tpu.dimension_semantics<arbitrary>], iteration_bounds = array<i64: 1>, scalar_prefetch = 0 : i64, scratch_operands = 0 : i64, tpu.core_type = #tpu.core_type<tc>, window_params = [{pipeline_mode = #tpu.pipeline_mode<synchronous>, transform_indices = @transform_0, window_bounds = array<i64: 2, 18, 18, 4>}, {pipeline_mode = #tpu.pipeline_mode<synchronous>, transform_indices = @transform_1, window_bounds = array<i64: 36, 128>}, {pipeline_mode = #tpu.pipeline_mode<synchronous>, transform_indices = @transform_2, window_bounds = array<i64: 1, 128>}, {pipeline_mode = #tpu.pipeline_mode<synchronous>, transform_indices = @transform_3, window_bounds = array<i64: 1, 128>}, {pipeline_mode = #tpu.pipeline_mode<synchronous>, transform_indices = @transform_4, window_bounds = array<i64: 512, 128>}]} {
    %c0 = arith.constant 0 : index
    %c0_0 = arith.constant 0 : index
    %c0_1 = arith.constant 0 : index
    %c0_2 = arith.constant 0 : index
    %0 = vector.load %arg1[%c0, %c0_0, %c0_1, %c0_2] : memref<2x18x18x4xbf16, #tpu.memory_space<vmem>>, vector<2x18x18x4xbf16>
    %1 = vector.extract_strided_slice %0 {offsets = [0, 0, 0, 0], sizes = [2, 18, 16, 4], strides = [1, 1, 1, 1]} : vector<2x18x18x4xbf16> to vector<2x18x16x4xbf16>
    %2 = vector.extract_strided_slice %0 {offsets = [0, 0, 1, 0], sizes = [2, 18, 16, 4], strides = [1, 1, 1, 1]} : vector<2x18x18x4xbf16> to vector<2x18x16x4xbf16>
    %3 = vector.extract_strided_slice %0 {offsets = [0, 0, 2, 0], sizes = [2, 18, 16, 4], strides = [1, 1, 1, 1]} : vector<2x18x18x4xbf16> to vector<2x18x16x4xbf16>
    %4 = tpu.concatenate %1, %2, %3 in 3 : vector<2x18x16x4xbf16>, vector<2x18x16x4xbf16>, vector<2x18x16x4xbf16> -> vector<2x18x16x12xbf16>
    %5 = vector.extract_strided_slice %4 {offsets = [0, 0, 0, 0], sizes = [2, 16, 16, 12], strides = [1, 1, 1, 1]} : vector<2x18x16x12xbf16> to vector<2x16x16x12xbf16>
    %6 = vector.extract_strided_slice %4 {offsets = [0, 1, 0, 0], sizes = [2, 16, 16, 12], strides = [1, 1, 1, 1]} : vector<2x18x16x12xbf16> to vector<2x16x16x12xbf16>
    %7 = vector.extract_strided_slice %4 {offsets = [0, 2, 0, 0], sizes = [2, 16, 16, 12], strides = [1, 1, 1, 1]} : vector<2x18x16x12xbf16> to vector<2x16x16x12xbf16>
    %8 = tpu.concatenate %5, %6, %7 in 3 : vector<2x16x16x12xbf16>, vector<2x16x16x12xbf16>, vector<2x16x16x12xbf16> -> vector<2x16x16x36xbf16>
    %9 = vector.shape_cast %8 : vector<2x16x16x36xbf16> to vector<512x36xbf16>
    %c0_3 = arith.constant 0 : index
    %c0_4 = arith.constant 0 : index
    %10 = vector.load %arg2[%c0_3, %c0_4] : memref<36x128xbf16, #tpu.memory_space<vmem>>, vector<36x128xbf16>
    %cst = arith.constant dense<0.000000e+00> : vector<512x128xf32>
    %11 = tpu.matmul %9, %10, %cst {dimension_numbers = #tpu.dot_dimension_numbers<[1], [0], [0], [1], [0, 0, 1, 1], [], []>} : vector<512x36xbf16>, vector<36x128xbf16>, vector<512x128xf32> -> vector<512x128xf32>
    %cst_5 = arith.constant dense<0.000000e+00> : vector<128xf32>
    %12 = vector.multi_reduction <add>, %11, %cst_5 [0] : vector<512x128xf32> to vector<128xf32>
    %13 = vector.shape_cast %12 : vector<128xf32> to vector<1x128xf32>
    %cst_6 = arith.constant 0.001953125 : f32
    %14 = vector.broadcast %cst_6 : f32 to vector<1x128xf32>
    %15 = arith.mulf %13, %14 : vector<1x128xf32>
    %16 = vector.broadcast %15 : vector<1x128xf32> to vector<512x128xf32>
    %17 = arith.subf %11, %16 : vector<512x128xf32>
    %18 = arith.mulf %17, %17 : vector<512x128xf32>
    %cst_7 = arith.constant dense<0.000000e+00> : vector<128xf32>
    %19 = vector.multi_reduction <add>, %18, %cst_7 [0] : vector<512x128xf32> to vector<128xf32>
    %20 = vector.shape_cast %19 : vector<128xf32> to vector<1x128xf32>
    %cst_8 = arith.constant 0.001953125 : f32
    %21 = vector.broadcast %cst_8 : f32 to vector<1x128xf32>
    %22 = arith.mulf %20, %21 : vector<1x128xf32>
    %c0_9 = arith.constant 0 : index
    %c0_10 = arith.constant 0 : index
    %23 = vector.load %arg3[%c0_9, %c0_10] : memref<1x128xf32, #tpu.memory_space<vmem>>, vector<1x128xf32>
    %cst_11 = arith.constant 9.99999974E-6 : f32
    %24 = vector.broadcast %cst_11 : f32 to vector<1x128xf32>
    %25 = arith.addf %22, %24 : vector<1x128xf32>
    %26 = math.rsqrt %25 : vector<1x128xf32>
    %27 = arith.mulf %23, %26 : vector<1x128xf32>
    %28 = vector.broadcast %27 : vector<1x128xf32> to vector<512x128xf32>
    %29 = arith.mulf %17, %28 : vector<512x128xf32>
    %c0_12 = arith.constant 0 : index
    %c0_13 = arith.constant 0 : index
    %30 = vector.load %arg4[%c0_12, %c0_13] : memref<1x128xf32, #tpu.memory_space<vmem>>, vector<1x128xf32>
    %31 = vector.broadcast %30 : vector<1x128xf32> to vector<512x128xf32>
    %32 = arith.addf %29, %31 : vector<512x128xf32>
    %cst_14 = arith.constant 0.000000e+00 : f32
    %33 = vector.broadcast %cst_14 : f32 to vector<512x128xf32>
    %34 = arith.maximumf %32, %33 : vector<512x128xf32>
    %35 = arith.truncf %34 : vector<512x128xf32> to vector<512x128xbf16>
    %c0_15 = arith.constant 0 : index
    %c0_16 = arith.constant 0 : index
    %36 = vector.load %arg5[%c0_15, %c0_16] : memref<512x128xbf16, #tpu.memory_space<vmem>>, vector<512x128xbf16>
    tpu.vector_store %arg5[%c0_15, %c0_16], %35 {strides = array<i32>} : memref<512x128xbf16, #tpu.memory_space<vmem>>, vector<512x128xbf16>,
    return
  }
  func.func @transform_0(%arg0: i32) -> (i32, i32, i32, i32) {
    %c0_i32 = arith.constant 0 : i32
    %c0_i32_0 = arith.constant 0 : i32
    %c0_i32_1 = arith.constant 0 : i32
    %c0_i32_2 = arith.constant 0 : i32
    %c0_i32_3 = arith.constant 0 : i32
    return %c0_i32, %c0_i32_0, %c0_i32_1, %c0_i32_2 : i32, i32, i32, i32
  }
  func.func @transform_1(%arg0: i32) -> (i32, i32) {
    %c0_i32 = arith.constant 0 : i32
    %c0_i32_0 = arith.constant 0 : i32
    %c0_i32_1 = arith.constant 0 : i32
    return %c0_i32, %c0_i32_0 : i32, i32
  }
  func.func @transform_2(%arg0: i32) -> (i32, i32) {
    %c0_i32 = arith.constant 0 : i32
    %c0_i32_0 = arith.constant 0 : i32
    %c0_i32_1 = arith.constant 0 : i32
    return %c0_i32, %c0_i32_0 : i32, i32
  }
  func.func @transform_3(%arg0: i32) -> (i32, i32) {
    %c0_i32 = arith.constant 0 : i32
    %c0_i32_0 = arith.constant 0 : i32
    %c0_i32_1 = arith.constant 0 : i32
    return %c0_i32, %c0_i32_0 : i32, i32
  }
  func.func @transform_4(%arg0: i32) -> (i32, i32) {
    %c0_i32 = arith.constant 0 : i32
    %c0_i32_0 = arith.constant 0 : i32
    %c0_i32_1 = arith.constant 0 : i32
    return %c0_i32, %c0_i32_0 : i32, i32
  }
}

module attributes {stable_mosaic.version = 11 : i64} {
  func.func @kernel(%arg0: i32, %arg1: memref<2x18x18x128xbf16, #tpu.memory_space<vmem>>, %arg2: memref<1152x128xbf16, #tpu.memory_space<vmem>>, %arg3: memref<1x128xf32, #tpu.memory_space<vmem>>, %arg4: memref<1x128xf32, #tpu.memory_space<vmem>>, %arg5: memref<512x128xbf16, #tpu.memory_space<vmem>>) attributes {dimension_semantics = [#tpu.dimension_semantics<arbitrary>], iteration_bounds = array<i64: 1>, scalar_prefetch = 0 : i64, scratch_operands = 0 : i64, tpu.core_type = #tpu.core_type<tc>, window_params = [{pipeline_mode = #tpu.pipeline_mode<synchronous>, transform_indices = @transform_0, window_bounds = array<i64: 2, 18, 18, 128>}, {pipeline_mode = #tpu.pipeline_mode<synchronous>, transform_indices = @transform_1, window_bounds = array<i64: 1152, 128>}, {pipeline_mode = #tpu.pipeline_mode<synchronous>, transform_indices = @transform_2, window_bounds = array<i64: 1, 128>}, {pipeline_mode = #tpu.pipeline_mode<synchronous>, transform_indices = @transform_3, window_bounds = array<i64: 1, 128>}, {pipeline_mode = #tpu.pipeline_mode<synchronous>, transform_indices = @transform_4, window_bounds = array<i64: 512, 128>}]} {
    %c0 = arith.constant 0 : index
    %c0_0 = arith.constant 0 : index
    %c0_1 = arith.constant 0 : index
    %c0_2 = arith.constant 0 : index
    %0 = vector.load %arg1[%c0, %c0_0, %c0_1, %c0_2] : memref<2x18x18x128xbf16, #tpu.memory_space<vmem>>, vector<2x18x18x128xbf16>
    %1 = vector.extract_strided_slice %0 {offsets = [0, 0, 0, 0], sizes = [2, 18, 16, 128], strides = [1, 1, 1, 1]} : vector<2x18x18x128xbf16> to vector<2x18x16x128xbf16>
    %2 = vector.extract_strided_slice %0 {offsets = [0, 0, 1, 0], sizes = [2, 18, 16, 128], strides = [1, 1, 1, 1]} : vector<2x18x18x128xbf16> to vector<2x18x16x128xbf16>
    %3 = vector.extract_strided_slice %0 {offsets = [0, 0, 2, 0], sizes = [2, 18, 16, 128], strides = [1, 1, 1, 1]} : vector<2x18x18x128xbf16> to vector<2x18x16x128xbf16>
    %4 = tpu.concatenate %1, %2, %3 in 3 : vector<2x18x16x128xbf16>, vector<2x18x16x128xbf16>, vector<2x18x16x128xbf16> -> vector<2x18x16x384xbf16>
    %5 = vector.extract_strided_slice %4 {offsets = [0, 0, 0, 0], sizes = [2, 16, 16, 384], strides = [1, 1, 1, 1]} : vector<2x18x16x384xbf16> to vector<2x16x16x384xbf16>
    %6 = vector.extract_strided_slice %4 {offsets = [0, 1, 0, 0], sizes = [2, 16, 16, 384], strides = [1, 1, 1, 1]} : vector<2x18x16x384xbf16> to vector<2x16x16x384xbf16>
    %7 = vector.extract_strided_slice %4 {offsets = [0, 2, 0, 0], sizes = [2, 16, 16, 384], strides = [1, 1, 1, 1]} : vector<2x18x16x384xbf16> to vector<2x16x16x384xbf16>
    %8 = tpu.concatenate %5, %6, %7 in 3 : vector<2x16x16x384xbf16>, vector<2x16x16x384xbf16>, vector<2x16x16x384xbf16> -> vector<2x16x16x1152xbf16>
    %9 = vector.shape_cast %8 : vector<2x16x16x1152xbf16> to vector<512x1152xbf16>
    %c0_3 = arith.constant 0 : index
    %c0_4 = arith.constant 0 : index
    %10 = vector.load %arg2[%c0_3, %c0_4] : memref<1152x128xbf16, #tpu.memory_space<vmem>>, vector<1152x128xbf16>
    %cst = arith.constant dense<0.000000e+00> : vector<512x128xf32>
    %11 = tpu.matmul %9, %10, %cst {dimension_numbers = #tpu.dot_dimension_numbers<[1], [0], [0], [1], [0, 0, 1, 1], [], []>} : vector<512x1152xbf16>, vector<1152x128xbf16>, vector<512x128xf32> -> vector<512x128xf32>
    %cst_5 = arith.constant dense<0.000000e+00> : vector<128xf32>
    %12 = vector.multi_reduction <add>, %11, %cst_5 [0] : vector<512x128xf32> to vector<128xf32>
    %13 = vector.shape_cast %12 : vector<128xf32> to vector<1x128xf32>
    %cst_6 = arith.constant 0.001953125 : f32
    %14 = vector.broadcast %cst_6 : f32 to vector<1x128xf32>
    %15 = arith.mulf %13, %14 : vector<1x128xf32>
    %16 = vector.broadcast %15 : vector<1x128xf32> to vector<512x128xf32>
    %17 = arith.subf %11, %16 : vector<512x128xf32>
    %18 = arith.mulf %17, %17 : vector<512x128xf32>
    %cst_7 = arith.constant dense<0.000000e+00> : vector<128xf32>
    %19 = vector.multi_reduction <add>, %18, %cst_7 [0] : vector<512x128xf32> to vector<128xf32>
    %20 = vector.shape_cast %19 : vector<128xf32> to vector<1x128xf32>
    %cst_8 = arith.constant 0.001953125 : f32
    %21 = vector.broadcast %cst_8 : f32 to vector<1x128xf32>
    %22 = arith.mulf %20, %21 : vector<1x128xf32>
    %c0_9 = arith.constant 0 : index
    %c0_10 = arith.constant 0 : index
    %23 = vector.load %arg3[%c0_9, %c0_10] : memref<1x128xf32, #tpu.memory_space<vmem>>, vector<1x128xf32>
    %cst_11 = arith.constant 9.99999974E-6 : f32
    %24 = vector.broadcast %cst_11 : f32 to vector<1x128xf32>
    %25 = arith.addf %22, %24 : vector<1x128xf32>
    %26 = math.rsqrt %25 : vector<1x128xf32>
    %27 = arith.mulf %23, %26 : vector<1x128xf32>
    %28 = vector.broadcast %27 : vector<1x128xf32> to vector<512x128xf32>
    %29 = arith.mulf %17, %28 : vector<512x128xf32>
    %c0_12 = arith.constant 0 : index
    %c0_13 = arith.constant 0 : index
    %30 = vector.load %arg4[%c0_12, %c0_13] : memref<1x128xf32, #tpu.memory_space<vmem>>, vector<1x128xf32>
    %31 = vector.broadcast %30 : vector<1x128xf32> to vector<512x128xf32>
    %32 = arith.addf %29, %31 : vector<512x128xf32>
    %cst_14 = arith.constant 0.000000e+00 : f32
    %33 = vector.broadcast %cst_14 : f32 to vector<512x128xf32>
    %34 = arith.maximumf %32, %33 : vector<512x128xf32>
    %35 = arith.truncf %34 : vector<512x128xf32> to vector<512x128xbf16>
    %c0_15 = arith.constant 0 : index
    %c0_16 = arith.constant 0 : index
    %36 = vector.load %arg5[%c0_15, %c0_16] : memref<512x128xbf16, #tpu.memory_space<vmem>>, vector<512x128xbf16>
    tpu.vector_store %arg5[%c0_15, %c0_16], %35 {strides = array<i32>} : memref<512x128xbf16, #tpu.memory_space<vmem>>, vector<512x128xbf16>,
    return
  }
  func.func @transform_0(%arg0: i32) -> (i32, i32, i32, i32) {
    %c0_i32 = arith.constant 0 : i32
    %c0_i32_0 = arith.constant 0 : i32
    %c0_i32_1 = arith.constant 0 : i32
    %c0_i32_2 = arith.constant 0 : i32
    %c0_i32_3 = arith.constant 0 : i32
    return %c0_i32, %c0_i32_0, %c0_i32_1, %c0_i32_2 : i32, i32, i32, i32
  }
  func.func @transform_1(%arg0: i32) -> (i32, i32) {
    %c0_i32 = arith.constant 0 : i32
    %c0_i32_0 = arith.constant 0 : i32
    %c0_i32_1 = arith.constant 0 : i32
    return %c0_i32, %c0_i32_0 : i32, i32
  }
  func.func @transform_2(%arg0: i32) -> (i32, i32) {
    %c0_i32 = arith.constant 0 : i32
    %c0_i32_0 = arith.constant 0 : i32
    %c0_i32_1 = arith.constant 0 : i32
    return %c0_i32, %c0_i32_0 : i32, i32
  }
  func.func @transform_3(%arg0: i32) -> (i32, i32) {
    %c0_i32 = arith.constant 0 : i32
    %c0_i32_0 = arith.constant 0 : i32
    %c0_i32_1 = arith.constant 0 : i32
    return %c0_i32, %c0_i32_0 : i32, i32
  }
  func.func @transform_4(%arg0: i32) -> (i32, i32) {
    %c0_i32 = arith.constant 0 : i32
    %c0_i32_0 = arith.constant 0 : i32
    %c0_i32_1 = arith.constant 0 : i32
    return %c0_i32, %c0_i32_0 : i32, i32
  }
}

</mosaic_0001>

<bundles_post_ra>
// kernel: conv_block_forward.2
= control target key start
LH: loop header
LB: loop body
LE: loop exit
PB: predicated region body
PF: predicated region fallthrough
CT: control target
= control target key end

     0   :  { %vm919_vm0 = vcmask 1046528   ;;  %vm414_vm1 = vsmask.f32 7424  ;;  %s3339_s27 = smov 8   ;;  %s3340_s10 = smov 4   ;;  %vm1623_vm2 = vcmask 1041408   ;;  %s5625_s0 = inlined_call_operand.vmem [shape: bf16[2,18,18,4], index: 0, kind: input, shape index: {}]   ;;  %s5626_s1 = inlined_call_operand.vmem [shape: bf16[36,128], index: 1, kind: input, shape index: {}]   ;;  %s5627_s2 = inlined_call_operand.vmem [shape: f32[1,128], index: 2, kind: input, shape index: {}]   ;;  %s5628_s3 = inlined_call_operand.vmem [shape: f32[1,128], index: 3, kind: input, shape index: {}]   ;;  %s5629_s4 = inlined_call_operand.vmem [shape: bf16[512,128], index: 4, kind: output, shape index: {}]  }
   0x1   :  { %v3371_v0 = vld [vmem:[%s5625_s0 + $0x18] sm:$0xff]   ;;  %v3262_v1 = vld [vmem:[%s5625_s0 + $0x20] ss:$0 sps:$4 sm:$0x11]   ;;  %v3379_v2 = vld [vmem:[%s5625_s0 + $0xc] sm:$0xff]   ;;  %vm1100_vm3 = vcmask 31744  }
   0x2   :  { %v926_v3 = vrot.slane %v3371_v0, 1  ;;  %v927_v4 = vrot.slane %v3262_v1, 1  ;;  %v3264_v5 = vld [vmem:[%s5625_s0 + $0x14] ss:$0 sps:$4 sm:$0x11]   ;;  %v3388_v6 = vld [vmem:[%s5625_s0 + $0x24] sm:$0xff]  }
   0x3   :  { %v923_v7 = vrot.slane %v3379_v2, 1  ;;  %v428_v8 = vshrl.u32 %v3379_v2, 16  ;;  %v924_v10 = vrot.slane %v3264_v5, 1  ;;  %v3266_v11 = vld [vmem:[%s5625_s0 + $0x2c] ss:$0 sps:$4 sm:$0x11]  }
   0x4   :  { %v928_v9 = vsel %vm919_vm0, %v926_v3, %v927_v4  ;;  %v929_v12 = vrot.slane %v3388_v6, 1  ;;  %v430_v13 = vshll.u32 %v3379_v2, 16  ;;  %v435_v14 = vshll.u32 %v3264_v5, 16  ;;  %v3405_v20 = vld [vmem:[%s5625_s0 + $0x30] sm:$0xff]   ;;  %v3419_v34 = vld [vmem:[%s5625_s0 + $0x3c] sm:$0xff]   ;;  %v3434_v47 = vld [vmem:[%s5625_s0 + $0x48] sm:$0xff]  }
   0x5   :  { %1032 = vrot.lane.b32.xlu0 %v928_v9, %s3339_s27  ;;  %v452_v15 = vshrl.u32 %v3388_v6, 16  ;;  %v925_v16 = vsel %vm919_vm0, %v923_v7, %v924_v10  ;;  %v930_v17 = vrot.slane %v3266_v11, 1  ;;  %v454_v18 = vshll.u32 %v3388_v6, 16  ;;  %v3268_v29 = vld [vmem:[%s5625_s0 + $0x38] ss:$0 sps:$4 sm:$0x11]  }
   0x6   :  { %v459_v19 = vshll.u32 %v3266_v11, 16  ;;  %1030 = vrot.lane.b32.xlu1 %v925_v16, %s3339_s27  ;;  %v432_v21 = vrot.slane %v430_v13, 1  ;;  %v437_v22 = vrot.slane %v435_v14, 1  ;;  %v440_v23 = vshrl.u32 %v3371_v0, 16  ;;  %v3440_v51 = vld [vmem:[%s5625_s0 + $0x54] sm:$0xff]   ;;  %v3460_v7 = vld [vmem:[%s5625_s0 + $0x60] sm:$0xff]  }
   0x7   :  { %v442_v24 = vshll.u32 %v3371_v0, 16  ;;  %v931_v25 = vsel %vm919_vm0, %v929_v12, %v930_v17  ;;  %v456_v26 = vrot.slane %v454_v18, 1  ;;  %v447_v28 = vshll.u32 %v3262_v1, 16  ;;  %v3270_v41 = vld [vmem:[%s5625_s0 + $0x44] ss:$0 sps:$4 sm:$0x11]  }
   0x8   :  { %v461_v27 = vrot.slane %v459_v19, 1  ;;  %v433_v30 = vor.u32 %v432_v21, %v428_v8  ;;  %v464_v32 = vshrl.u32 %v3405_v20, 16  ;;  %v466_v33 = vshll.u32 %v3405_v20, 16  ;;  %v3272_v55 = vld [vmem:[%s5625_s0 + $0x50] ss:$0 sps:$4 sm:$0x11]  }
   0x9   :  { %v444_v31 = vrot.slane %v442_v24, 1  ;;  %v457_v35 = vor.u32 %v456_v26, %v452_v15  ;;  %v449_v36 = vrot.slane %v447_v28, 1  ;;  %v471_v37 = vshll.u32 %v3268_v29, 16  ;;  %v3274_v63 = vld [vmem:[%s5625_s0 + $0x5c] ss:$0 sps:$4 sm:$0x11]  }
   0xa   :  { %1034 = vrot.lane.b32.xlu1 %v931_v25, %s3339_s27  ;;  %v438_v38 = vsel %vm414_vm1, %v433_v30, %v437_v22  ;;  %v468_v40 = vrot.slane %v466_v33, 1  ;;  %v476_v42 = vshrl.u32 %v3419_v34, 16  ;;  %v478_v45 = vshll.u32 %v3419_v34, 16  ;;  %v3469_v12 = vld [vmem:[%s5625_s0 + $0x68] ss:$0 sps:$4 sm:$0x11]  }
   0xb   :  { %v445_v39 = vor.u32 %v444_v31, %v440_v23  ;;  %849 = vrot.lane.b32.xlu0 %v438_v38, %s3340_s10  ;;  %v462_v43 = vsel %vm414_vm1, %v457_v35, %v461_v27  ;;  %v473_v44 = vrot.slane %v471_v37, 1  ;;  %v932_v46 = vrot.slane %v3405_v20, 1  ;;  %v3475_v14 = vld [vmem:[%s5625_s0 + $0x6c] sm:$0xff]   ;;  %v3278_v26 = vld [vmem:[%s5625_s0 + $0x74] ss:$0 sps:$4 sm:$0x11]  }
   0xc   :  { %v469_v49 = vor.u32 %v468_v40, %v464_v32  ;;  %v483_v50 = vshll.u32 %v3270_v41, 16  ;;  %v480_v52 = vrot.slane %v478_v45, 1  ;;  %v933_v53 = vrot.slane %v3268_v29, 1  ;;  %v3493_v35 = vld [vmem:[%s5625_s0 + $0x78] sm:$0xff]   ;;  %s3341_s25 = smov 12  }
   0xd   :  { %v450_v48 = vsel %vm414_vm1, %v445_v39, %v449_v36  ;;  %v935_v54 = vrot.slane %v3419_v34, 1  ;;  %v936_v57 = vrot.slane %v3270_v41, 1  ;;  %v488_v59 = vshrl.u32 %v3434_v47, 16  ;;  %v3498_v36 = vld [vmem:[%s5625_s0 + $0x84] sm:$0xff]  }
   0xe   :  { %853 = vrot.lane.b32.xlu1 %v462_v43, %s3340_s10  ;;  %v485_v56 = vrot.slane %v483_v50, 1  ;;  %v481_v58 = vor.u32 %v480_v52, %v476_v42  ;;  %v490_v60 = vshll.u32 %v3434_v47, 16  ;;  %v474_v61 = vsel %vm414_vm1, %v469_v49, %v473_v44  ;;  %v3282_v41 = vld [vmem:[%s5625_s0 + $0x8c] ss:$0 sps:$4 sm:$0x11]  }
   0xf   :  { %851 = vrot.lane.b32.xlu0 %v450_v48, %s3340_s10  ;;  %v495_v62 = vshll.u32 %v3272_v55, 16  ;;  %v500_v1 = vshrl.u32 %v3440_v51, 16  ;;  %v502_v3 = vshll.u32 %v3440_v51, 16  ;;  %v507_v9 = vshll.u32 %v3274_v63, 16 }
  0x10   :  { %v486_v4 = vsel %vm414_vm1, %v481_v58, %v485_v56  ;;  %v492_v5 = vrot.slane %v490_v60, 1  ;;  %v934_v10 = vsel %vm919_vm0, %v932_v46, %v933_v53  ;;  %v937_v11 = vsel %vm919_vm0, %v935_v54, %v936_v57  ;;  %v3280_v45 = vld [vmem:[%s5625_s0 + $0x80] ss:$0 sps:$4 sm:$0x11]  }
  0x11   :  { %v504_v8 = vrot.slane %v502_v3, 1  ;;  %v514_v13 = vshll.u32 %v3460_v7, 16  ;;  %v497_v16 = vrot.slane %v495_v62, 1  ;;  %v509_v18 = vrot.slane %v507_v9, 1  ;;  %v3522_v57 = vld [vmem:[%s5625_s0 + $0x9c] sm:$0xff]   ;;  %v3529_v62 = vld [vmem:[%s5625_s0 + $0x90] sm:$0xff]  }
  0x12   :  { %857 = vrot.lane.b32.xlu1 %v486_v4, %s3340_s10  ;;  %v493_v15 = vor.u32 %v492_v5, %v488_v59  ;;  %v938_v19 = vrot.slane %v3434_v47, 1  ;;  %v939_v21 = vrot.slane %v3272_v55, 1  ;;  %v941_v22 = vrot.slane %v3440_v51, 1  ;;  %v3286_v5 = vld [vmem:[%s5625_s0 + $0xa4] ss:$0 sps:$4 sm:$0x11]  }
  0x13   :  { %855 = vrot.lane.b32.xlu0 %v474_v61, %s3340_s10  ;;  %v505_v17 = vor.u32 %v504_v8, %v500_v1  ;;  %v942_v23 = vrot.slane %v3274_v63, 1  ;;  %v512_v24 = vshrl.u32 %v3460_v7, 16  ;;  %v516_v25 = vrot.slane %v514_v13, 1  ;;  %v3535_v1 = vld [vmem:[%s5625_s0 + $0x98] ss:$0 sps:$4 sm:$0x11]  }
  0x14   :  { %v526_v27 = vshll.u32 %v3475_v14, 16  ;;  %v519_v29 = vshll.u32 %v3469_v12, 16  ;;  %v524_v30 = vshrl.u32 %v3475_v14, 16  ;;  %v498_v31 = vsel %vm414_vm1, %v493_v15, %v497_v16 }
  0x15   :  { %v510_v28 = vsel %vm414_vm1, %v505_v17, %v509_v18  ;;  %v531_v33 = vshll.u32 %v3278_v26, 16  ;;  %v943_v37 = vsel %vm919_vm0, %v941_v22, %v942_v23  ;;  %v550_v42 = vshll.u32 %v3498_v36, 16 }
  0x16   :  { %1038 = vrot.lane.b32.xlu1 %v937_v11, %s3339_s27  ;;  %v528_v32 = vrot.slane %v526_v27, 1  ;;  %v521_v38 = vrot.slane %v519_v29, 1  ;;  %v940_v43 = vsel %vm919_vm0, %v938_v19, %v939_v21  ;;  %v517_v44 = vor.u32 %v516_v25, %v512_v24  ;;  %v3556_v25 = vld [vmem:[%s5625_s0 + $0xb4] sm:$0xff]  }
  0x17   :  { %1036 = vrot.lane.b32.xlu0 %v934_v10, %s3339_s27  ;;  %v533_v40 = vrot.slane %v531_v33, 1  ;;  %v538_v46 = vshll.u32 %v3493_v35, 16  ;;  %v944_v48 = vrot.slane %v3460_v7, 1  ;;  %v945_v49 = vrot.slane %v3469_v12, 1 }
  0x18   :  { %v529_v39 = vor.u32 %v528_v32, %v524_v30  ;;  %v947_v50 = vrot.slane %v3475_v14, 1  ;;  %v948_v52 = vrot.slane %v3278_v26, 1  ;;  %v548_v53 = vshrl.u32 %v3498_v36, 16  ;;  %v3290_v30 = vld [vmem:[%s5625_s0 + $0xbc] ss:$0 sps:$4 sm:$0x11]  }
  0x19   :  { %v555_v54 = vshll.u32 %v3282_v41, 16  ;;  %v552_v56 = vrot.slane %v550_v42, 1  ;;  %v522_v58 = vsel %vm414_vm1, %v517_v44, %v521_v38  ;;  %v536_v59 = vshrl.u32 %v3493_v35, 16 }
  0x1a   :  { %861 = vrot.lane.b32.xlu1 %v510_v28, %s3340_s10  ;;  %v534_v55 = vsel %vm414_vm1, %v529_v39, %v533_v40  ;;  %v540_v60 = vrot.slane %v538_v46, 1  ;;  %v543_v61 = vshll.u32 %v3280_v45, 16  ;;  %v949_v3 = vsel %vm919_vm0, %v947_v50, %v948_v52  ;;  %v3562_v28 = vld [vmem:[%s5625_s0 + $0xa8] sm:$0xff]  }
  0x1b   :  { %859 = vrot.lane.b32.xlu0 %v498_v31, %s3340_s10  ;;  %v557_v63 = vrot.slane %v555_v54, 1  ;;  %v553_v4 = vor.u32 %v552_v56, %v548_v53  ;;  %v574_v8 = vshll.u32 %v3522_v57, 16  ;;  %v946_v9 = vsel %vm919_vm0, %v944_v48, %v945_v49  ;;  %v3592_v54 = vld [vmem:[%s5625_s0] sm:$0xff]  }
  0x1c   :  { %v541_v10 = vor.u32 %v540_v60, %v536_v59  ;;  %v545_v11 = vrot.slane %v543_v61, 1  ;;  %v562_v12 = vshll.u32 %v3529_v62, 16  ;;  %v950_v13 = vrot.slane %v3493_v35, 1  ;;  %v3292_v59 = vld [vmem:[%s5625_s0 + $0xc8] ss:$0 sps:$4 sm:$0x11]  }
  0x1d   :  { %v951_v15 = vrot.slane %v3280_v45, 1  ;;  %v953_v16 = vrot.slane %v3498_v36, 1  ;;  %v954_v17 = vrot.slane %v3282_v41, 1  ;;  %v560_v18 = vshrl.u32 %v3529_v62, 16 }
  0x1e   :  { %1042 = vrot.lane.b32.xlu1 %v943_v37, %s3339_s27  ;;  %v567_v19 = vshll.u32 %v3535_v1, 16  ;;  %v558_v21 = vsel %vm414_vm1, %v553_v4, %v557_v63  ;;  %v572_v22 = vshrl.u32 %v3522_v57, 16  ;;  %v576_v23 = vrot.slane %v574_v8, 1  ;;  %v3288_v41 = vld [vmem:[%s5625_s0 + $0xb0] ss:$0 sps:$4 sm:$0x11]  }
  0x1f   :  { %1040 = vrot.lane.b32.xlu0 %v940_v43, %s3339_s27  ;;  %v579_v24 = vshll.u32 %v3286_v5, 16  ;;  %v546_v26 = vsel %vm414_vm1, %v541_v10, %v545_v11  ;;  %v564_v27 = vrot.slane %v562_v12, 1  ;;  %v956_v29 = vrot.slane %v3529_v62, 1  ;;  %v3580_v43 = vld [vmem:[%s5625_s0 + $0xc0] sm:$0xff]   ;;  %v3603_v63 = vld [vmem:[%s5625_s0 + $0xcc] sm:$0xff]  }
  0x20   :  { %v955_v31 = vsel %vm919_vm0, %v953_v16, %v954_v17  ;;  %v577_v32 = vor.u32 %v576_v23, %v572_v22  ;;  %v598_v37 = vshll.u32 %v3556_v25, 16  ;;  %v952_v38 = vsel %vm919_vm0, %v950_v13, %v951_v15  ;;  %v3610_v4 = vld [vmem:[%s5625_s0 + $0x8] ss:$0 sps:$4 sm:$0x11]  }
  0x21   :  { %v581_v33 = vrot.slane %v579_v24, 1  ;;  %v565_v39 = vor.u32 %v564_v27, %v560_v18  ;;  %v569_v40 = vrot.slane %v567_v19, 1  ;;  %v586_v42 = vshll.u32 %v3562_v28, 16  ;;  %v3294_v27 = vld [vmem:[%s5625_s0 + $0xd4] ss:$0 sps:$4 sm:$0x11]  }
  0x22   :  { %865 = vrot.lane.b32.xlu1 %v534_v55, %s3340_s10  ;;  %v957_v44 = vrot.slane %v3535_v1, 1  ;;  %v959_v45 = vrot.slane %v3522_v57, 1  ;;  %v584_v46 = vshrl.u32 %v3562_v28, 16  ;;  %v603_v48 = vshll.u32 %v3290_v30, 16 }
  0x23   :  { %863 = vrot.lane.b32.xlu0 %v522_v58, %s3340_s10  ;;  %v582_v49 = vsel %vm414_vm1, %v577_v32, %v581_v33  ;;  %v960_v50 = vrot.slane %v3286_v5, 1  ;;  %v596_v52 = vshrl.u32 %v3556_v25, 16  ;;  %v600_v53 = vrot.slane %v598_v37, 1 }
  0x24   :  { %v570_v55 = vsel %vm414_vm1, %v565_v39, %v569_v40  ;;  %v588_v56 = vrot.slane %v586_v42, 1  ;;  %v591_v58 = vshll.u32 %v3288_v41, 16  ;;  %v610_v60 = vshll.u32 %v3580_v43, 16  ;;  %v3634_v39 = vld [vmem:[%s5625_s0 + $0xf0] sm:$0xff]   ;;  %v3640_v42 = vld [vmem:[%s5625_s0 + $0xe4] sm:$0xff]  }
  0x25   :  { %v605_v61 = vrot.slane %v603_v48, 1  ;;  %v961_v1 = vsel %vm919_vm0, %v959_v45, %v960_v50  ;;  %v418_v5 = vshll.u32 %v3592_v54, 16  ;;  %v958_v8 = vsel %vm919_vm0, %v956_v29, %v957_v44  ;;  %v3655_v50 = vld [vmem:[%s5625_s0 + $0xf8] ss:$0 sps:$4 sm:$0x11]  }
  0x26   :  { %1046 = vrot.lane.b32.xlu1 %v949_v3, %s3339_s27  ;;  %v601_v3 = vor.u32 %v600_v53, %v596_v52  ;;  %v593_v10 = vrot.slane %v591_v58, 1  ;;  %v965_v11 = vrot.slane %v3556_v25, 1  ;;  %v966_v12 = vrot.slane %v3290_v30, 1  ;;  %v3298_v58 = vld [vmem:[%s5625_s0 + $0xec] ss:$0 sps:$4 sm:$0x11]  }
  0x27   :  { %1044 = vrot.lane.b32.xlu0 %v946_v9, %s3339_s27  ;;  %v589_v9 = vor.u32 %v588_v56, %v584_v46  ;;  %v608_v13 = vshrl.u32 %v3580_v43, 16  ;;  %v612_v15 = vrot.slane %v610_v60, 1  ;;  %v615_v16 = vshll.u32 %v3292_v59, 16  ;;  %v3647_v46 = vld [vmem:[%s5625_s0 + $0xfc] sm:$0xff]  }
  0x28   :  { %v622_v17 = vshll.u32 %v3603_v63, 16  ;;  %v416_v18 = vshrl.u32 %v3592_v54, 16  ;;  %v606_v19 = vsel %vm414_vm1, %v601_v3, %v605_v61  ;;  %v423_v22 = vshll.u32 %v3610_v4, 16 }
  0x29   :  { %v594_v23 = vsel %vm414_vm1, %v589_v9, %v593_v10  ;;  %v962_v24 = vrot.slane %v3562_v28, 1  ;;  %v967_v29 = vsel %vm919_vm0, %v965_v11, %v966_v12  ;;  %v613_v30 = vor.u32 %v612_v15, %v608_v13 }
  0x2a   :  { %869 = vrot.lane.b32.xlu1 %v558_v21, %s3340_s10  ;;  %v420_v21 = vrot.slane %v418_v5, 1  ;;  %v617_v32 = vrot.slane %v615_v16, 1  ;;  %v624_v33 = vrot.slane %v622_v17, 1  ;;  %v968_v44 = vrot.slane %v3580_v43, 1 }
  0x2b   :  { %867 = vrot.lane.b32.xlu0 %v546_v26, %s3340_s10  ;;  %v963_v26 = vrot.slane %v3288_v41, 1  ;;  %v627_v41 = vshll.u32 %v3294_v27, 16  ;;  %v969_v45 = vrot.slane %v3292_v59, 1  ;;  %v658_v52 = vshll.u32 %v3634_v39, 16 }
  0x2c   :  { %v421_v37 = vor.u32 %v420_v21, %v416_v18  ;;  %v618_v48 = vsel %vm414_vm1, %v613_v30, %v617_v32  ;;  %v920_v56 = vrot.slane %v3592_v54, 1  ;;  %v646_v59 = vshll.u32 %v3640_v42, 16  ;;  %v3302_v5 = vld [vmem:[%s5625_s0 + $0x104] ss:$0 sps:$4 sm:$0x11]  }
  0x2d   :  { %v964_v40 = vsel %vm919_vm0, %v962_v24, %v963_v26  ;;  %v921_v60 = vrot.slane %v3610_v4, 1  ;;  %v971_v61 = vrot.slane %v3603_v63, 1  ;;  %v972_v3 = vrot.slane %v3294_v27, 1  ;;  %v3689_v27 = vld [vmem:[%s5625_s0 + $0x108] sm:$0xff]  }
  0x2e   :  { %1050 = vrot.lane.b32.xlu1 %v955_v31, %s3339_s27  ;;  %v620_v31 = vshrl.u32 %v3603_v63, 16  ;;  %v656_v54 = vshrl.u32 %v3634_v39, 16  ;;  %v663_v9 = vshll.u32 %v3655_v50, 16  ;;  %v670_v4 = vshll.u32 %v3647_v46, 16 }
  0x2f   :  { %1048 = vrot.lane.b32.xlu0 %v952_v38, %s3339_s27  ;;  %v425_v38 = vrot.slane %v423_v22, 1  ;;  %v644_v11 = vshrl.u32 %v3640_v42, 16  ;;  %v648_v12 = vrot.slane %v646_v59, 1  ;;  %v651_v13 = vshll.u32 %v3298_v58, 16  ;;  %v3683_v22 = vld [vmem:[%s5625_s0 + $0x114] sm:$0xff]  }
  0x30   :  { %v625_v53 = vor.u32 %v624_v33, %v620_v31  ;;  %v973_v15 = vsel %vm919_vm0, %v971_v61, %v972_v3  ;;  %v675_v16 = vshll.u32 %v3302_v5, 16  ;;  %v665_v18 = vrot.slane %v663_v9, 1  ;;  %v3306_v33 = vld [vmem:[%s5625_s0 + $0x11c] ss:$0 sps:$4 sm:$0x11]  }
  0x31   :  { %v672_v21 = vrot.slane %v670_v4, 1  ;;  %v649_v24 = vor.u32 %v648_v12, %v644_v11  ;;  %v653_v26 = vrot.slane %v651_v13, 1  ;;  %v699_v59 = vshll.u32 %v3306_v33, 16  ;;  %v3308_v13 = vld [vmem:[%s5625_s0 + $0x128] ss:$0 sps:$4 sm:$0x11]  }
  0x32   :  { %873 = vrot.lane.b32.xlu1 %v582_v49, %s3340_s10  ;;  %v426_v49 = vsel %vm414_vm1, %v421_v37, %v425_v38  ;;  %v677_v30 = vrot.slane %v675_v16, 1  ;;  %v694_v37 = vshll.u32 %v3683_v22, 16  ;;  %v981_v61 = vrot.slane %v3655_v50, 1 }
  0x33   :  { %871 = vrot.lane.b32.xlu0 %v570_v55, %s3340_s10  ;;  %v629_v55 = vrot.slane %v627_v41, 1  ;;  %v654_v38 = vsel %vm414_vm1, %v649_v24, %v653_v26  ;;  %v978_v41 = vrot.slane %v3298_v58, 1  ;;  %v3713_v58 = vld [vmem:[%s5625_s0 + $0x12c] sm:$0xff]   ;;  %v701_v4 = vrot.slane %v699_v59, 1 }
  0x34   :  { %v986_v16 = vrot.slane %v3689_v27, 1  ;;  %vm1173_vm4 = vcmask 64512   ;;  %vm1408_vm5 = vcmask 97280   ;;  %vm1473_vm6 = vcmask 195584  }
  0x35   :  { %v630_v10 = vsel %vm414_vm1, %v625_v53, %v629_v55  ;;  %v692_v55 = vshrl.u32 %v3683_v22, 16  ;;  %vm1558_vm7 = vcmask 293888  }
  0x36   :  { %1054 = vrot.lane.b32.xlu1 %v961_v1, %s3339_s27  ;;  %v970_v1 = vsel %vm919_vm0, %v968_v44, %v969_v45  ;;  %v682_v44 = vshll.u32 %v3689_v27, 16  ;;  %v980_v45 = vrot.slane %v3634_v39, 1 }
  0x37   :  { %1052 = vrot.lane.b32.xlu0 %v958_v8, %s3339_s27  ;;  %v660_v8 = vrot.slane %v658_v52, 1 }
  0x38   :  { %v684_v3 = vrot.slane %v682_v44, 1  ;;  %v982_v11 = vsel %vm919_vm0, %v980_v45, %v981_v61 }
  0x39   :  { %v661_v17 = vor.u32 %v660_v8, %v656_v54  ;;  %v3310_v8 = vld [vmem:[%s5625_s0 + $0x134] ss:$0 sps:$4 sm:$0x11]  }
  0x3a   :  { %877 = vrot.lane.b32.xlu1 %v606_v19, %s3340_s10  ;;  %v668_v19 = vshrl.u32 %v3647_v46, 16  ;;  %v723_v26 = vshll.u32 %v3310_v8, 16 }
  0x3b   :  { %875 = vrot.lane.b32.xlu0 %v594_v23, %s3340_s10  ;;  %v922_v23 = vsel %vm919_vm0, %v920_v56, %v921_v60  ;;  %v666_v31 = vsel %vm414_vm1, %v661_v17, %v665_v18  ;;  %v696_v56 = vrot.slane %v694_v37, 1  ;;  %v989_v18 = vrot.slane %v3683_v22, 1 }
  0x3c   :  { %v673_v32 = vor.u32 %v672_v21, %v668_v19  ;;  %v990_v19 = vrot.slane %v3306_v33, 1  ;;  %v711_v37 = vshll.u32 %v3308_v13, 16 }
  0x3d   :  { %v697_v50 = vor.u32 %v696_v56, %v692_v55  ;;  %v993_v55 = vrot.slane %v3308_v13, 1 }
  0x3e   :  { %1058 = vrot.lane.b32.xlu1 %v967_v29, %s3339_s27  ;;  %v3304_v29 = vld [vmem:[%s5625_s0 + $0x110] ss:$0 sps:$4 sm:$0x11]   ;;  %v678_v53 = vsel %vm414_vm1, %v673_v32, %v677_v30  ;;  %v713_v44 = vrot.slane %v711_v37, 1 }
  0x3f   :  { %1056 = vrot.lane.b32.xlu0 %v964_v40, %s3339_s27  ;;  %v977_v40 = vrot.slane %v3640_v42, 1  ;;  %v687_v52 = vshll.u32 %v3304_v29, 16  ;;  %v987_v17 = vrot.slane %v3304_v29, 1  ;;  %v702_v21 = vsel %vm414_vm1, %v697_v50, %v701_v4 }
  0x40   :  { %v991_v29 = vsel %vm919_vm0, %v989_v18, %v990_v19 }
  0x41   :  { %v979_v60 = vsel %vm919_vm0, %v977_v40, %v978_v41  ;;  %v689_v54 = vrot.slane %v687_v52, 1  ;;  %v988_v40 = vsel %vm919_vm0, %v986_v16, %v987_v17 }
  0x42   :  { %847 = vrot.lane.b32.xlu1 %v426_v49, %s3340_s10  ;;  %v984_v49 = vrot.slane %v3302_v5, 1  ;;  %v3721_v5 = vld [vmem:[%s5625_s0 + $0x120] sm:$0xff]  }
  0x43   :  { %879 = vrot.lane.b32.xlu0 %v618_v48, %s3340_s10  ;;  %v983_v48 = vrot.slane %v3647_v46, 1 }
  0x45   :  { %v985_v9 = vsel %vm919_vm0, %v983_v48, %v984_v49  ;;  %v995_v48 = vrot.slane %v3713_v58, 1  ;;  %v996_v49 = vrot.slane %v3310_v8, 1 }
  0x46   :  { %1060 = vrot.lane.b32.xlu1 %v970_v1, %s3339_s27  ;;  %v680_v1 = vshrl.u32 %v3689_v27, 16 }
  0x47   :  { %881 = vrot.lane.b32.xlu0 %v630_v10, %s3340_s10  ;;  %v718_v10 = vshll.u32 %v3713_v58, 16  ;;  %v997_v56 = vsel %vm919_vm0, %v995_v48, %v996_v49  ;;  %v3314_v49 = vld [vmem:[%s5625_s0 + $0x14c] ss:$0 sps:$4 sm:$0x11]  }
  0x48   :  { %v685_v12 = vor.u32 %v684_v3, %v680_v1  ;;  %v3334_v1 = vld [vmem:[%s5626_s1 + $0x8] sm:$0xff]   ;;  %v3335_v3 = vld [vmem:[%s5626_s1] sm:$0xff]  }
  0x49   :  { %v720_v24 = vrot.slane %v718_v10, 1 }
  0x4a   :  { %1062 = vrot.lane.b32.xlu1 %v973_v15, %s3339_s27  ;;  %v706_v15 = vshll.u32 %v3721_v5, 16  ;;  %v690_v30 = vsel %vm414_vm1, %v685_v12, %v689_v54 }
  0x4b   :  { %1028 = vrot.lane.b32.xlu0 %v922_v23, %s3339_s27  ;;  %v716_v23 = vshrl.u32 %v3713_v58, 16 }
  0x4c   :  { %v708_v32 = vrot.slane %v706_v15, 1 }
  0x4d   :  { %v721_v33 = vor.u32 %v720_v24, %v716_v23 }
  0x4e   :  { %887 = vrot.lane.b32.xlu1 %v666_v31, %s3340_s10  ;;  %v704_v31 = vshrl.u32 %v3721_v5, 16 }
  0x4f   :  { %885 = vrot.lane.b32.xlu0 %v654_v38, %s3340_s10  ;;  %v725_v38 = vrot.slane %v723_v26, 1 }
  0x50   :  { %v709_v41 = vor.u32 %v708_v32, %v704_v31  ;;  %v3312_v31 = vld [vmem:[%s5625_s0 + $0x140] ss:$0 sps:$4 sm:$0x11]  }
  0x51   :  { %v726_v45 = vsel %vm414_vm1, %v721_v33, %v725_v38  ;;  %v3825_v33 = vld [vmem:[%s5625_s0 + $0x144] sm:$0xff]  }
  0x52   :  { %889 = vrot.lane.b32.xlu1 %v678_v53, %s3340_s10  ;;  %v714_v52 = vsel %vm414_vm1, %v709_v41, %v713_v44  ;;  %v992_v53 = vrot.slane %v3721_v5, 1  ;;  %v735_v41 = vshll.u32 %v3312_v31, 16 }
  0x53   :  { %1066 = vrot.lane.b32.xlu0 %v979_v60, %s3339_s27  ;;  %v3333_v60 = vld [vmem:[%s5626_s1 + $0x10] ss:$0 sps:$4 sm:$0x33]   ;;  %s3342_s1 = smov 24  }
  0x54   :  { %v994_v59 = vsel %vm919_vm0, %v992_v53, %v993_v55  ;;  %3255 = vmatprep.subr.msk.bf16.mxu0 %vm1623_vm2, %v3333_v60  ;;  %3256 = vmatprep.subr.msk.bf16.mxu1 %vm1623_vm2, %v3333_v60  ;;  %v1625_v61 = vsel %vm1623_vm2, %v3333_v60, 0  ;;  %v737_v55 = vrot.slane %v735_v41, 1 }
  0x55   :  { %3180 = vmatpush3.bf16.msra.mxu0 %v1625_v61  ;;  %3252 = vmatpush3.bf16.msra.mxu1 %v1625_v61 }
  0x56   :  { %1070 = vrot.lane.b32.xlu1 %v985_v9, %s3339_s27  ;;  %3181 = vmatprep.subr.bf16.mxu0 %v3334_v1 }
  0x57   :  { %1068 = vrot.lane.b32.xlu0 %v982_v11, %s3339_s27  ;;  %3250 = vmatprep.subr.bf16.mxu1 %v3334_v1 }
  0x59   :  { %3182 = vmatpush3.bf16.msra.mxu0 %v3334_v1  ;;  %3253 = vmatpush3.bf16.msra.mxu1 %v3334_v1 }
  0x5a   :  { %893 = vrot.lane.b32.xlu1 %v702_v21, %s3340_s10  ;;  %3183 = vmatprep.subr.bf16.mxu0 %v3335_v3 }
  0x5b   :  { %891 = vrot.lane.b32.xlu0 %v690_v30, %s3340_s10  ;;  %3251 = vmatprep.subr.bf16.mxu1 %v3335_v3  ;;  %v3807_v30 = vld [vmem:[%s5625_s0 + $0x138] sm:$0xff]  }
  0x5d   :  { %3184 = vmatpush3.bf16.msra.mxu0 %v3335_v3  ;;  %3254 = vmatpush3.bf16.msra.mxu1 %v3335_v3  ;;  %v747_v3 = vshll.u32 %v3314_v49, 16 }
  0x5e   :  { %1074 = vrot.lane.b32.xlu1 %v991_v29, %s3339_s27  ;;  %v730_v29 = vshll.u32 %v3807_v30, 16 }
  0x5f   :  { %1072 = vrot.lane.b32.xlu0 %v988_v40, %s3339_s27 }
  0x60   :  { %v732_v48 = vrot.slane %v730_v29, 1 }
  0x62   :  { %897 = vrot.lane.b32.xlu1 %v726_v45, %s3340_s10  ;;  %v728_v45 = vshrl.u32 %v3807_v30, 16 }
  0x63   :  { %895 = vrot.lane.b32.xlu0 %v714_v52, %s3340_s10  ;;  %v742_v52 = vshll.u32 %v3825_v33, 16 }
  0x64   :  { %v733_v61 = vor.u32 %v732_v48, %v728_v45 }
  0x65   :  { %v744_v1 = vrot.slane %v742_v52, 1 }
  0x66   :  { %1078 = vrot.lane.b32.xlu1 %v997_v56, %s3339_s27  ;;  %v740_v56 = vshrl.u32 %v3825_v33, 16 }
  0x67   :  { %1076 = vrot.lane.b32.xlu0 %v994_v59, %s3339_s27 }
  0x77   :  { %v1033_v54 = vpop.permute.xlu0 %1032 }
  0x78   :  { %v1031_v8 = vpop.permute.xlu1 %1030 }
  0x7c   :  { %v1035_v9 = vpop.permute.xlu1 %1034 }
  0x7d   :  { %v850_v50 = vpop.permute.xlu0 %849 }
  0x7e   :  { %v1104_v4 = vsel %vm1100_vm3, %v3379_v2, %v850_v50 }
  0x7f   :  { %v3771_v10 = vsel %vm1173_vm4, %v1104_v4, %v1031_v8 }
  0x80   :  { %1278 = vrot.lane.b32.xlu0 %v3771_v10, %s3341_s25  ;;  %v854_v11 = vpop.permute.xlu1 %853 }
  0x81   :  { %v852_v12 = vpop.permute.xlu0 %851  ;;  %v1108_v16 = vsel %vm1100_vm3, %v3388_v6, %v854_v11  ;;  %v999_v11 = vrot.slane %v3312_v31, 1 }
  0x82   :  { %v1106_v13 = vsel %vm1100_vm3, %v3371_v0, %v852_v12  ;;  %v3787_v18 = vsel %vm1173_vm4, %v1108_v16, %v1035_v9  ;;  %v998_v9 = vrot.slane %v3807_v30, 1  ;;  %v745_v12 = vor.u32 %v744_v1, %v740_v56  ;;  %v3865_v16 = vld [vmem:[%s5625_s0 + $0x150] sm:$0xff]  }
  0x83   :  { %v3778_v15 = vsel %vm1173_vm4, %v1106_v13, %v1033_v54  ;;  %v749_v13 = vrot.slane %v747_v3, 1  ;;  %v752_v31 = vshrl.u32 %v3865_v16, 16 }
  0x84   :  { %1344 = vrot.lane.b32.xlu0 %v3778_v15, %s3342_s1  ;;  %1280 = vrot.lane.b32.xlu1 %v3778_v15, %s3341_s25  ;;  %v858_v2 = vpop.permute.xlu1 %857 }
  0x85   :  { %v856_v17 = vpop.permute.xlu0 %855  ;;  %v1112_v23 = vsel %vm1100_vm3, %v3419_v34, %v858_v2  ;;  %v1001_v2 = vrot.slane %v3825_v33, 1 }
  0x86   :  { %v1110_v6 = vsel %vm1100_vm3, %v3405_v20, %v856_v17  ;;  %v1000_v17 = vsel %vm919_vm0, %v998_v9, %v999_v11 }
  0x88   :  { %1282 = vrot.lane.b32.xlu0 %v3787_v18, %s3341_s25  ;;  %1346 = vrot.lane.b32.xlu1 %v3787_v18, %s3342_s1  ;;  %v1039_v0 = vpop.permute.xlu1 %1038 }
  0x89   :  { %v1037_v19 = vpop.permute.xlu0 %1036  ;;  %v3810_v20 = vsel %vm1173_vm4, %v1112_v23, %v1039_v0  ;;  %v750_v0 = vsel %vm414_vm1, %v745_v12, %v749_v13  ;;  %v3316_v23 = vld [vmem:[%s5625_s0 + $0x158] ss:$0 sps:$4 sm:$0x11]  }
  0x8a   :  { %v3796_v21 = vsel %vm1173_vm4, %v1110_v6, %v1037_v19  ;;  %v1002_v19 = vrot.slane %v3314_v49, 1  ;;  %v759_v29 = vshll.u32 %v3316_v23, 16  ;;  %v1005_v3 = vrot.slane %v3316_v23, 1 }
  0x8c   :  { %1348 = vrot.lane.b32.xlu0 %v3796_v21, %s3342_s1  ;;  %1284 = vrot.lane.b32.xlu1 %v3796_v21, %s3341_s25  ;;  %v862_v24 = vpop.permute.xlu1 %861  ;;  %v761_v52 = vrot.slane %v759_v29, 1 }
  0x8d   :  { %v860_v26 = vpop.permute.xlu0 %859  ;;  %v1116_v40 = vsel %vm1100_vm3, %v3440_v51, %v862_v24  ;;  %v754_v24 = vshll.u32 %v3865_v16, 16 }
  0x8e   :  { %v1114_v32 = vsel %vm1100_vm3, %v3434_v47, %v860_v26  ;;  %v3883_v26 = vld [vmem:[%s5625_s0 + $0x15c] sm:$0xff]  }
  0x8f   :  { %v766_v41 = vshll.u32 %v3883_v26, 16  ;;  %v764_v48 = vshrl.u32 %v3883_v26, 16 }
  0x90   :  { %1286 = vrot.lane.b32.xlu0 %v3810_v20, %s3341_s25  ;;  %1350 = vrot.lane.b32.xlu1 %v3810_v20, %s3342_s1  ;;  %v1043_v34 = vpop.permute.xlu1 %1042 }
  0x91   :  { %v1041_v37 = vpop.permute.xlu0 %1040  ;;  %v3842_v51 = vsel %vm1173_vm4, %v1116_v40, %v1043_v34 }
  0x92   :  { %v3828_v38 = vsel %vm1173_vm4, %v1114_v32, %v1041_v37  ;;  %v1003_v32 = vsel %vm919_vm0, %v1001_v2, %v1002_v19  ;;  %v756_v37 = vrot.slane %v754_v24, 1 }
  0x94   :  { %1352 = vrot.lane.b32.xlu0 %v3828_v38, %s3342_s1  ;;  %1288 = vrot.lane.b32.xlu1 %v3828_v38, %s3341_s25  ;;  %v866_v47 = vpop.permute.xlu1 %865  ;;  %v757_v49 = vor.u32 %v756_v37, %v752_v31 }
  0x95   :  { %v864_v44 = vpop.permute.xlu0 %863  ;;  %v1120_v8 = vsel %vm1100_vm3, %v3475_v14, %v866_v47  ;;  %v3318_v47 = vld [vmem:[%s5625_s0 + $0x164] ss:$0 sps:$4 sm:$0x11]  }
  0x96   :  { %v1118_v59 = vsel %vm1100_vm3, %v3460_v7, %v864_v44  ;;  %v738_v7 = vsel %vm414_vm1, %v733_v61, %v737_v55  ;;  %v771_v55 = vshll.u32 %v3318_v47, 16  ;;  %v762_v1 = vsel %vm414_vm1, %v757_v49, %v761_v52 }
  0x97   :  { %v1008_v2 = vrot.slane %v3318_v47, 1 }
  0x98   :  { %1290 = vrot.lane.b32.xlu0 %v3842_v51, %s3341_s25  ;;  %1354 = vrot.lane.b32.xlu1 %v3842_v51, %s3342_s1  ;;  %v1047_v53 = vpop.permute.xlu1 %1046  ;;  %v773_v9 = vrot.slane %v771_v55, 1 }
  0x99   :  { %v1045_v60 = vpop.permute.xlu0 %1044  ;;  %v3868_v14 = vsel %vm1173_vm4, %v1120_v8, %v1047_v53  ;;  %v768_v53 = vrot.slane %v766_v41, 1 }
  0x9a   :  { %v3852_v54 = vsel %vm1173_vm4, %v1118_v59, %v1045_v60 }
  0x9b   :  { %v769_v8 = vor.u32 %v768_v53, %v764_v48 }
  0x9c   :  { %1356 = vrot.lane.b32.xlu0 %v3852_v54, %s3342_s1  ;;  %1292 = vrot.lane.b32.xlu1 %v3852_v54, %s3341_s25  ;;  %v870_v50 = vpop.permute.xlu1 %869 }
  0x9d   :  { %v868_v4 = vpop.permute.xlu0 %867  ;;  %v1124_v60 = vsel %vm1100_vm3, %v3498_v36, %v870_v50  ;;  %v3915_v36 = vld [vmem:[%s5625_s0 + $0x168] sm:$0xff]   ;;  %v774_v13 = vsel %vm414_vm1, %v769_v8, %v773_v9 }
  0x9e   :  { %v1122_v45 = vsel %vm1100_vm3, %v3493_v35, %v868_v4  ;;  %v1004_v35 = vrot.slane %v3865_v16, 1  ;;  %v1007_v4 = vrot.slane %v3883_v26, 1  ;;  %v776_v23 = vshrl.u32 %v3915_v36, 16 }
  0xa0   :  { %899 = vrot.lane.b32.xlu0 %v738_v7, %s3340_s10  ;;  %1358 = vrot.lane.b32.xlu1 %v3868_v14, %s3342_s1  ;;  %v1051_v34 = vpop.permute.xlu1 %1050  ;;  %v1006_v12 = vsel %vm919_vm0, %v1004_v35, %v1005_v3  ;;  %v1009_v24 = vsel %vm919_vm0, %v1007_v4, %v1008_v2  ;;  %v3324_v2 = vld [vmem:[%s5625_s0 + $0x188] ss:$0 sps:$4 sm:$0x11]  }
  0xa1   :  { %v1049_v6 = vpop.permute.xlu0 %1048  ;;  %v3918_v50 = vsel %vm1173_vm4, %v1124_v60, %v1051_v34 }
  0xa2   :  { %v3900_v59 = vsel %vm1173_vm4, %v1122_v45, %v1049_v6  ;;  %v3935_v6 = vld [vmem:[%s5625_s0 + $0x174] sm:$0xff]  }
  0xa3   :  { %v790_v37 = vshll.u32 %v3935_v6, 16  ;;  %v788_v41 = vshrl.u32 %v3935_v6, 16  ;;  %v1013_v9 = vrot.slane %v3935_v6, 1 }
  0xa4   :  { %1080 = vrot.lane.b32.xlu0 %v1000_v17, %s3339_s27  ;;  %901 = vrot.lane.b32.xlu1 %v750_v0, %s3340_s10  ;;  %v874_v44 = vpop.permute.xlu1 %873  ;;  %v3320_v17 = vld [vmem:[%s5625_s0 + $0x170] ss:$0 sps:$4 sm:$0x11]   ;;  %v778_v0 = vshll.u32 %v3915_v36, 16 }
  0xa5   :  { %v872_v40 = vpop.permute.xlu0 %871  ;;  %v783_v31 = vshll.u32 %v3320_v17, 16  ;;  %v792_v52 = vrot.slane %v790_v37, 1  ;;  %v1128_v60 = vsel %vm1100_vm3, %v3522_v57, %v874_v44  ;;  %v3326_v37 = vld [vmem:[%s5625_s0 + $0x194] ss:$0 sps:$4 sm:$0x11]  }
  0xa6   :  { %v780_v34 = vrot.slane %v778_v0, 1  ;;  %v1126_v47 = vsel %vm1100_vm3, %v3529_v62, %v872_v40  ;;  %v1010_v62 = vrot.slane %v3915_v36, 1 }
  0xa7   :  { %v785_v49 = vrot.slane %v783_v31, 1  ;;  %v793_v3 = vor.u32 %v792_v52, %v788_v41 }
  0xa8   :  { %1294 = vrot.lane.b32.xlu0 %v3868_v14, %s3341_s25  ;;  %1082 = vrot.lane.b32.xlu1 %v1003_v32, %s3339_s27  ;;  %v1055_v61 = vpop.permute.xlu1 %1054  ;;  %v3322_v32 = vld [vmem:[%s5625_s0 + $0x17c] ss:$0 sps:$4 sm:$0x11]   ;;  %v781_v48 = vor.u32 %v780_v34, %v776_v23 }
  0xa9   :  { %v1053_v56 = vpop.permute.xlu0 %1052  ;;  %v795_v53 = vshll.u32 %v3322_v32, 16  ;;  %v3976_v44 = vsel %vm1173_vm4, %v1128_v60, %v1055_v61  ;;  %v3991_v61 = vld [vmem:[%s5625_s0 + $0x18c] sm:$0xff]  }
  0xaa   :  { %v3956_v55 = vsel %vm1173_vm4, %v1126_v47, %v1053_v56  ;;  %v786_v35 = vsel %vm414_vm1, %v781_v48, %v785_v49  ;;  %v3971_v56 = vld [vmem:[%s5625_s0 + $0x180] sm:$0xff]   ;;  %5674 = vst [vmem:[#allocation3_spill] sm:$0xff] %v3991_v61  ;;  %v814_v47 = vshll.u32 %v3991_v61, 16  ;;  %v812_v49 = vshrl.u32 %v3991_v61, 16 }
  0xab   :  { %v797_v8 = vrot.slane %v795_v53, 1  ;;  %5673 = vst [vmem:[#allocation2_spill] sm:$0xff] %v3971_v56 }
  0xac   :  { %1360 = vrot.lane.b32.xlu0 %v3900_v59, %s3342_s1  ;;  %1296 = vrot.lane.b32.xlu1 %v3900_v59, %s3341_s25  ;;  %v3924_v11 = vpop.permute.xlu1 %877  ;;  %v816_v60 = vrot.slane %v814_v47, 1 }
  0xad   :  { %v3910_v7 = vpop.permute.xlu0 %875 }
  0xae   :  { %v1130_v41 = vsel %vm1100_vm3, %v3562_v28, %v3910_v7  ;;  %v1132_v28 = vsel %vm1100_vm3, %v3556_v25, %v3924_v11  ;;  %v1016_v7 = vrot.slane %v3971_v56, 1 }
  0xb0   :  { %903 = vrot.lane.b32.xlu0 %v762_v1, %s3340_s10  ;;  %1362 = vrot.lane.b32.xlu1 %v3918_v50, %s3342_s1  ;;  %v3945_v29 = vpop.permute.xlu1 %1058  ;;  %v1011_v1 = vrot.slane %v3320_v17, 1  ;;  %v802_v17 = vshll.u32 %v3971_v56, 16 }
  0xb1   :  { %v1057_v19 = vpop.permute.xlu0 %1056  ;;  %v4037_v25 = vsel %vm1173_vm4, %v1132_v28, %v3945_v29 }
  0xb2   :  { %v1012_v4 = vsel %vm919_vm0, %v1010_v62, %v1011_v1  ;;  %v804_v31 = vrot.slane %v802_v17, 1  ;;  %v819_v62 = vshll.u32 %v3326_v37, 16  ;;  %v4017_v1 = vsel %vm1173_vm4, %v1130_v41, %v1057_v19  ;;  %v4051_v17 = vld [vmem:[%s5625_s0 + $0x1a4] sm:$0xff]  }
  0xb3   :  { %5675 = vst [vmem:[#allocation4_spill] sm:$0xff] %v4017_v1 }
  0xb4   :  { %1084 = vrot.lane.b32.xlu0 %v1006_v12, %s3339_s27  ;;  %905 = vrot.lane.b32.xlu1 %v774_v13, %s3340_s10  ;;  %v3965_v40 = vpop.permute.xlu1 %847  ;;  %v798_v12 = vsel %vm414_vm1, %v793_v3, %v797_v8  ;;  %v1014_v13 = vrot.slane %v3322_v32, 1  ;;  %v807_v32 = vshll.u32 %v3324_v2, 16  ;;  %v4030_v3 = vld [vmem:[%s5625_s0 + $0x198] sm:$0xff]   ;;  %v1017_v8 = vrot.slane %v3324_v2, 1 }
  0xb5   :  { %v3953_v45 = vpop.permute.xlu0 %879  ;;  %v826_v2 = vshll.u32 %v4030_v3, 16  ;;  %v824_v47 = vshrl.u32 %v4030_v3, 16 }
  0xb6   :  { %v1015_v34 = vsel %vm919_vm0, %v1013_v9, %v1014_v13  ;;  %v809_v53 = vrot.slane %v807_v32, 1  ;;  %v817_v9 = vor.u32 %v816_v60, %v812_v49  ;;  %v3328_v13 = vld [vmem:[%s5625_s0 + $0x1a0] ss:$0 sps:$4 sm:$0x11]   ;;  %v1018_v29 = vsel %vm919_vm0, %v1016_v7, %v1017_v8  ;;  %v4059_v32 = vld [vmem:[%s5625_s0 + $0xd8] sm:$0xff]  }
  0xb7   :  { %v828_v49 = vrot.slane %v826_v2, 1  ;;  %v634_v28 = vshll.u32 %v4059_v32, 16  ;;  %v1134_v8 = vsel %vm1100_vm3, %v3580_v43, %v3953_v45 }
  0xb8   :  { %1298 = vrot.lane.b32.xlu0 %v3918_v50, %s3341_s25  ;;  %1086 = vrot.lane.b32.xlu1 %v1009_v24, %s3339_s27  ;;  %v3993_v0 = vpop.permute.xlu1 %1060  ;;  %v800_v24 = vshrl.u32 %v3971_v56, 16 }
  0xb9   :  { %v3973_v57 = vpop.permute.xlu0 %881  ;;  %v1207_v56 = vsel %vm1173_vm4, %v1134_v8, %v3993_v0  ;;  %v1022_v8 = vrot.slane %v4030_v3, 1 }
  0xba   :  { %v805_v52 = vor.u32 %v804_v31, %v800_v24  ;;  %v1020_v31 = vrot.slane %v3326_v37, 1  ;;  %v838_v37 = vshll.u32 %v4051_v17, 16  ;;  %v1136_v43 = vsel %vm1100_vm3, %v3603_v63, %v3973_v57 }
  0xbb   :  { %v974_v63 = vrot.slane %v4059_v32, 1 }
  0xbc   :  { %1364 = vrot.lane.b32.xlu0 %v3956_v55, %s3342_s1  ;;  %1300 = vrot.lane.b32.xlu1 %v3956_v55, %s3341_s25  ;;  %v4011_v48 = vpop.permute.xlu1 %1062  ;;  %v810_v19 = vsel %vm414_vm1, %v805_v52, %v809_v53  ;;  %v831_v52 = vshll.u32 %v3328_v13, 16  ;;  %v3330_v53 = vld [vmem:[%s5625_s0 + $0x1ac] ss:$0 sps:$4 sm:$0x11]   ;;  %v840_v2 = vrot.slane %v838_v37, 1 }
  0xbd   :  { %v3997_v23 = vpop.permute.xlu0 %1028 }
  0xc0   :  { %907 = vrot.lane.b32.xlu0 %v786_v35, %s3340_s10  ;;  %1366 = vrot.lane.b32.xlu1 %v3976_v44, %s3342_s1 }
  0xc1   :  { %v4014_v35 = vpop.permute.xlu0 %885 }
  0xc4   :  { %1088 = vrot.lane.b32.xlu0 %v1012_v4, %s3339_s27  ;;  %909 = vrot.lane.b32.xlu1 %v798_v12, %s3340_s10  ;;  %v821_v4 = vrot.slane %v819_v62, 1  ;;  %v4033_v12 = vpop.permute.xlu1 %887  ;;  %v3332_v62 = vld [vmem:[%s5625_s0 + $0xe0] ss:$0 sps:$4 sm:$0x11]  }
  0xc5   :  { %v4042_v11 = vpop.permute.xlu0 %1066  ;;  %v975_v57 = vrot.slane %v3332_v62, 1 }
  0xc6   :  { %v822_v24 = vsel %vm414_vm1, %v817_v9, %v821_v4  ;;  %v829_v9 = vor.u32 %v828_v49, %v824_v47  ;;  %v833_v4 = vrot.slane %v831_v52, 1 }
  0xc8   :  { %1302 = vrot.lane.b32.xlu0 %v3976_v44, %s3341_s25  ;;  %1090 = vrot.lane.b32.xlu1 %v1015_v34, %s3339_s27  ;;  %v1019_v34 = vrot.slane %v3991_v61, 1  ;;  %v890_v41 = vpop.permute.xlu1 %889  ;;  %v834_v47 = vsel %vm414_vm1, %v829_v9, %v833_v4  ;;  %v1023_v9 = vrot.slane %v3328_v13, 1 }
  0xc9   :  { %v1069_v7 = vpop.permute.xlu0 %1068 }
  0xca   :  { %v1021_v60 = vsel %vm919_vm0, %v1019_v34, %v1020_v31  ;;  %v636_v34 = vrot.slane %v634_v28, 1  ;;  %v639_v31 = vshll.u32 %v3332_v62, 16  ;;  %v1024_v4 = vsel %vm919_vm0, %v1022_v8, %v1023_v9 }
  0xcc   :  { %1368 = vrot.lane.b32.xlu0 %v4017_v1, %s3342_s1  ;;  %1304 = vrot.lane.b32.xlu1 %v4017_v1, %s3341_s25  ;;  %v1071_v1 = vpop.permute.xlu1 %1070  ;;  %v641_v37 = vrot.slane %v639_v31, 1 }
  0xcd   :  { %v892_v61 = vpop.permute.xlu0 %891 }
  0xd0   :  { %911 = vrot.lane.b32.xlu0 %v810_v19, %s3340_s10  ;;  %1370 = vrot.lane.b32.xlu1 %v4037_v25, %s3342_s1  ;;  %v836_v19 = vshrl.u32 %v4051_v17, 16  ;;  %v894_v0 = vpop.permute.xlu1 %893 }
  0xd1   :  { %v1073_v28 = vpop.permute.xlu0 %1072 }
  0xd2   :  { %v841_v45 = vor.u32 %v840_v2, %v836_v19  ;;  %v1025_v2 = vrot.slane %v4051_v17, 1 }
  0xd4   :  { %1092 = vrot.lane.b32.xlu0 %v1018_v29, %s3339_s27  ;;  %913 = vrot.lane.b32.xlu1 %v822_v24, %s3340_s10  ;;  %v843_v29 = vshll.u32 %v3330_v53, 16  ;;  %v632_v24 = vshrl.u32 %v4059_v32, 16 }
  0xd5   :  { %v896_v62 = vpop.permute.xlu0 %895 }
  0xd6   :  { %v845_v49 = vrot.slane %v843_v29, 1  ;;  %v637_v52 = vor.u32 %v636_v34, %v632_v24  ;;  %v1026_v29 = vrot.slane %v3330_v53, 1  ;;  %v1075_v24 = vpop.permute.xlu1 %1074  ;;  %v1140_v34 = vsel %vm1100_vm3, %v3640_v42, %v4014_v35 }
  0xd7   :  { %v4110_v31 = vsel %vm1173_vm4, %v1140_v34, %v4042_v11  ;;  %v1142_v53 = vsel %vm1100_vm3, %v3634_v39, %v4033_v12  ;;  %v3338_v39 = vld [vmem:[%s5625_s0] sm:$0xff]  }
  0xd8   :  { %1306 = vrot.lane.b32.xlu0 %v4037_v25, %s3341_s25  ;;  %1094 = vrot.lane.b32.xlu1 %v1021_v60, %s3339_s27  ;;  %v1209_v60 = vsel %vm1173_vm4, %v1136_v43, %v4011_v48  ;;  %v642_v19 = vsel %vm414_vm1, %v637_v52, %v641_v37  ;;  %v976_v48 = vsel %vm919_vm0, %v974_v63, %v975_v57 }
  0xd9   :  { %v1027_v13 = vsel %vm919_vm0, %v1025_v2, %v1026_v29  ;;  %v1077_v42 = vpop.permute.xlu0 %1076  ;;  %v4119_v35 = vsel %vm1173_vm4, %v1142_v53, %v1069_v7  ;;  %v1102_v12 = vsel %vm1100_vm3, %v3338_v39, %v3965_v40 }
  0xda   :  { %v898_v43 = vpop.permute.xlu1 %897 }
  0xdc   :  { %1372 = vrot.lane.b32.xlu0 %v1207_v56, %s3342_s1  ;;  %1308 = vrot.lane.b32.xlu1 %v1207_v56, %s3341_s25  ;;  %v846_v56 = vsel %vm414_vm1, %v841_v45, %v845_v49  ;;  %v1144_v45 = vsel %vm1100_vm3, %v3647_v46, %v890_v41  ;;  %v1146_v46 = vsel %vm1100_vm3, %v3689_v27, %v892_v61 }
  0xdd   :  { %v4133_v7 = vsel %vm1173_vm4, %v1144_v45, %v1071_v1  ;;  %v1175_v41 = vsel %vm1173_vm4, %v1102_v12, %v3997_v23  ;;  %v4145_v52 = vsel %vm1173_vm4, %v1146_v46, %v1073_v28  ;;  %v1148_v61 = vsel %vm1100_vm3, %v3683_v22, %v894_v0 }
  0xde   :  { %v1079_v11 = vpop.permute.xlu1 %1078  ;;  %v4158_v28 = vsel %vm1173_vm4, %v1148_v61, %v1075_v24  ;;  %v1150_v22 = vsel %vm1100_vm3, %v3721_v5, %v896_v62  ;;  %v1152_v5 = vsel %vm1100_vm3, %v3713_v58, %v898_v43 }
  0xe0   :  { %915 = vrot.lane.b32.xlu0 %v834_v47, %s3340_s10  ;;  %1374 = vrot.lane.b32.xlu1 %v1209_v60, %s3342_s1 }
  0xe4   :  { %917 = vrot.lane.b32.xlu0 %v846_v56, %s3340_s10  ;;  %883 = vrot.lane.b32.xlu1 %v642_v19, %s3340_s10  ;;  %v4171_v56 = vsel %vm1173_vm4, %v1150_v22, %v1077_v42 }
  0xe8   :  { %1064 = vrot.lane.b32.xlu0 %v976_v48, %s3339_s27  ;;  %1096 = vrot.lane.b32.xlu1 %v1024_v4, %s3339_s27  ;;  %v4184_v48 = vsel %vm1173_vm4, %v1152_v5, %v1079_v11 }
  0xec   :  { %1310 = vrot.lane.b32.xlu0 %v4110_v31, %s3341_s25  ;;  %1098 = vrot.lane.b32.xlu1 %v1027_v13, %s3339_s27 }
  0xf0   :  { %1376 = vrot.lane.b32.xlu0 %v4119_v35, %s3342_s1  ;;  %1312 = vrot.lane.b32.xlu1 %v4119_v35, %s3341_s25 }
  0xf2   :  { %v1279_v47 = vpop.permute.xlu0 %1278 }
  0xf3   :  { %v1410_v40 = vsel %vm1408_vm5, %v1175_v41, %v1279_v47 }
  0xf4   :  { %1314 = vrot.lane.b32.xlu0 %v4133_v7, %s3341_s25  ;;  %1378 = vrot.lane.b32.xlu1 %v4133_v7, %s3342_s1 }
  0xf6   :  { %v1345_v49 = vpop.permute.xlu0 %1344  ;;  %v1281_v1 = vpop.permute.xlu1 %1280 }
  0xf7   :  { %v1475_v27 = vsel %vm1473_vm6, %v1410_v40, %v1345_v49  ;;  %v1412_v23 = vsel %vm1408_vm5, %v3771_v10, %v1281_v1 }
  0xf8   :  { %3185 = vmatprep.mubr.msk.bf16.mxu0 %vm1558_vm7, %v1475_v27  ;;  %1380 = vrot.lane.b32.xlu0 %v4145_v52, %s3342_s1 }
  0xf9   :  { %1316 = vrot.lane.b32.xlu1 %v4145_v52, %s3341_s25 }
  0xfa   :  { %v1283_v37 = vpop.permute.xlu0 %1282  ;;  %v1347_v60 = vpop.permute.xlu1 %1346 }
  0xfb   :  { %v1477_v63 = vsel %vm1473_vm6, %v1412_v23, %v1347_v60  ;;  %v1414_v10 = vsel %vm1408_vm5, %v3778_v15, %v1283_v37 }
  0xfc   :  { %1318 = vrot.lane.b32.xlu0 %v4158_v28, %s3341_s25  ;;  %3186 = vmatmul.mubr.msk.bf16.vlgmr.msra.gmra.mxu0 %vm1558_vm7, %v1477_v63 }
  0xfd   :  { %1382 = vrot.lane.b32.xlu1 %v4158_v28, %s3342_s1 }
  0xfe   :  { %v1349_v0 = vpop.permute.xlu0 %1348  ;;  %v1285_v57 = vpop.permute.xlu1 %1284 }
  0xff   :  { %v1479_v19 = vsel %vm1473_vm6, %v1414_v10, %v1349_v0  ;;  %v1416_v15 = vsel %vm1408_vm5, %v3787_v18, %v1285_v57 }
 0x100   :  { %1384 = vrot.lane.b32.xlu0 %v4171_v56, %s3342_s1  ;;  %3189 = vmatprep.mubr.msk.bf16.mxu0 %vm1558_vm7, %v1479_v19 }
 0x101   :  { %1320 = vrot.lane.b32.xlu1 %v4171_v56, %s3341_s25 }
 0x102   :  { %v1287_v8 = vpop.permute.xlu0 %1286  ;;  %v1351_v9 = vpop.permute.xlu1 %1350 }
 0x103   :  { %v1481_v4 = vsel %vm1473_vm6, %v1416_v15, %v1351_v9  ;;  %v1418_v58 = vsel %vm1408_vm5, %v3796_v21, %v1287_v8 }
 0x104   :  { %1322 = vrot.lane.b32.xlu0 %v4184_v48, %s3341_s25  ;;  %3190 = vmatmul.mubr.msk.bf16.gmra.mxu0 %vm1558_vm7, %v1481_v4 }
 0x105   :  { %1386 = vrot.lane.b32.xlu1 %v4184_v48, %s3342_s1 }
 0x106   :  { %v1353_v2 = vpop.permute.xlu0 %1352  ;;  %v1289_v18 = vpop.permute.xlu1 %1288 }
 0x107   :  { %v1483_v29 = vsel %vm1473_vm6, %v1418_v58, %v1353_v2  ;;  %v1420_v24 = vsel %vm1408_vm5, %v3810_v20, %v1289_v18 }
 0x108   :  { %3193 = vmatprep.mubr.msk.bf16.mxu0 %vm1558_vm7, %v1483_v29 }
 0x10a   :  { %v1291_v62 = vpop.permute.xlu0 %1290  ;;  %v1355_v34 = vpop.permute.xlu1 %1354 }
 0x10b   :  { %v1485_v13 = vsel %vm1473_vm6, %v1420_v24, %v1355_v34  ;;  %v1422_v53 = vsel %vm1408_vm5, %v3828_v38, %v1291_v62 }
 0x10c   :  { %3194 = vmatmul.mubr.msk.bf16.gmra.mxu0 %vm1558_vm7, %v1485_v13 }
 0x10e   :  { %v1357_v43 = vpop.permute.xlu0 %1356  ;;  %v1293_v21 = vpop.permute.xlu1 %1292 }
 0x10f   :  { %v1487_v42 = vsel %vm1473_vm6, %v1422_v53, %v1357_v43  ;;  %v1424_v45 = vsel %vm1408_vm5, %v3842_v51, %v1293_v21 }
 0x110   :  { %3197 = vmatprep.mubr.msk.bf16.mxu0 %vm1558_vm7, %v1487_v42 }
 0x112   :  { %v900_v39 = vpop.permute.xlu0 %899  ;;  %v1359_v20 = vpop.permute.xlu1 %1358 }
 0x113   :  { %v1489_v12 = vsel %vm1473_vm6, %v1424_v45, %v1359_v20  ;;  %v1154_v11 = vsel %vm1100_vm3, %v3807_v30, %v900_v39  ;;  %v5676_v39 = vld [vmem:[#allocation2_spill] sm:$0xff] }
 0x114   :  { %3198 = vmatmul.mubr.msk.bf16.gmra.mxu0 %vm1558_vm7, %v1489_v12 }
 0x116   :  { %v1081_v47 = vpop.permute.xlu0 %1080  ;;  %v902_v38 = vpop.permute.xlu1 %901 }
 0x117   :  { %v4211_v46 = vsel %vm1173_vm4, %v1154_v11, %v1081_v47  ;;  %v1156_v51 = vsel %vm1100_vm3, %v3825_v33, %v902_v38 }
 0x118   :  { %1388 = vrot.lane.b32.xlu0 %v4211_v46, %s3342_s1  ;;  %1324 = vrot.lane.b32.xlu1 %v4211_v46, %s3341_s25 }
 0x11a   :  { %v1295_v41 = vpop.permute.xlu0 %1294  ;;  %v1083_v40 = vpop.permute.xlu1 %1082 }
 0x11b   :  { %v4220_v30 = vsel %vm1173_vm4, %v1156_v51, %v1083_v40  ;;  %v1426_v49 = vsel %vm1408_vm5, %v3852_v54, %v1295_v41  ;;  %v5678_v40 = vld [vmem:[#allocation4_spill] sm:$0xff] }
 0x11c   :  { %1326 = vrot.lane.b32.xlu0 %v4220_v30, %s3341_s25  ;;  %1390 = vrot.lane.b32.xlu1 %v4220_v30, %s3342_s1 }
 0x11e   :  { %v1361_v1 = vpop.permute.xlu0 %1360  ;;  %v1297_v27 = vpop.permute.xlu1 %1296 }
 0x11f   :  { %v1491_v61 = vsel %vm1473_vm6, %v1426_v49, %v1361_v1  ;;  %v1428_v33 = vsel %vm1408_vm5, %v3868_v14, %v1297_v27 }
 0x120   :  { %3201 = vmatprep.mubr.msk.bf16.mxu0 %vm1558_vm7, %v1491_v61 }
 0x122   :  { %v904_v23 = vpop.permute.xlu0 %903  ;;  %v1363_v37 = vpop.permute.xlu1 %1362 }
 0x123   :  { %v1493_v60 = vsel %vm1473_vm6, %v1428_v33, %v1363_v37  ;;  %v1158_v63 = vsel %vm1100_vm3, %v3865_v16, %v904_v23 }
 0x124   :  { %3202 = vmatmul.mubr.msk.bf16.gmra.mxu0 %vm1558_vm7, %v1493_v60 }
 0x126   :  { %v1085_v22 = vpop.permute.xlu0 %1084  ;;  %v906_v54 = vpop.permute.xlu1 %905 }
 0x127   :  { %v4237_v10 = vsel %vm1173_vm4, %v1158_v63, %v1085_v22  ;;  %v1160_v14 = vsel %vm1100_vm3, %v3883_v26, %v906_v54 }
 0x128   :  { %1392 = vrot.lane.b32.xlu0 %v4237_v10, %s3342_s1  ;;  %1328 = vrot.lane.b32.xlu1 %v4237_v10, %s3341_s25 }
 0x12a   :  { %v1299_v0 = vpop.permute.xlu0 %1298  ;;  %v1087_v57 = vpop.permute.xlu1 %1086 }
 0x12b   :  { %v4246_v16 = vsel %vm1173_vm4, %v1160_v14, %v1087_v57  ;;  %v1430_v19 = vsel %vm1408_vm5, %v3900_v59, %v1299_v0 }
 0x12c   :  { %1330 = vrot.lane.b32.xlu0 %v4246_v16, %s3341_s25  ;;  %1394 = vrot.lane.b32.xlu1 %v4246_v16, %s3342_s1 }
 0x12e   :  { %v1365_v5 = vpop.permute.xlu0 %1364  ;;  %v1301_v15 = vpop.permute.xlu1 %1300 }
 0x12f   :  { %v1495_v8 = vsel %vm1473_vm6, %v1430_v19, %v1365_v5  ;;  %v1432_v26 = vsel %vm1408_vm5, %v3918_v50, %v1301_v15 }
 0x130   :  { %3205 = vmatprep.mubr.msk.bf16.mxu0 %vm1558_vm7, %v1495_v8 }
 0x132   :  { %v908_v9 = vpop.permute.xlu0 %907  ;;  %v1367_v4 = vpop.permute.xlu1 %1366 }
 0x133   :  { %v1497_v58 = vsel %vm1473_vm6, %v1432_v26, %v1367_v4  ;;  %v1162_v2 = vsel %vm1100_vm3, %v3915_v36, %v908_v9 }
 0x134   :  { %3206 = vmatmul.mubr.msk.bf16.gmra.mxu0 %vm1558_vm7, %v1497_v58 }
 0x136   :  { %v1089_v18 = vpop.permute.xlu0 %1088  ;;  %v910_v59 = vpop.permute.xlu1 %909 }
 0x137   :  { %v4263_v29 = vsel %vm1173_vm4, %v1162_v2, %v1089_v18  ;;  %v1164_v50 = vsel %vm1100_vm3, %v3935_v6, %v910_v59 }
 0x138   :  { %1396 = vrot.lane.b32.xlu0 %v4263_v29, %s3342_s1  ;;  %1332 = vrot.lane.b32.xlu1 %v4263_v29, %s3341_s25 }
 0x13a   :  { %v1303_v24 = vpop.permute.xlu0 %1302  ;;  %v1091_v62 = vpop.permute.xlu1 %1090 }
 0x13b   :  { %v4272_v36 = vsel %vm1173_vm4, %v1164_v50, %v1091_v62  ;;  %v1434_v34 = vsel %vm1408_vm5, %v3956_v55, %v1303_v24 }
 0x13c   :  { %1334 = vrot.lane.b32.xlu0 %v4272_v36, %s3341_s25  ;;  %1398 = vrot.lane.b32.xlu1 %v4272_v36, %s3342_s1 }
 0x13e   :  { %v1369_v13 = vpop.permute.xlu0 %1368  ;;  %v1305_v53 = vpop.permute.xlu1 %1304 }
 0x13f   :  { %v1499_v43 = vsel %vm1473_vm6, %v1434_v34, %v1369_v13  ;;  %v1436_v6 = vsel %vm1408_vm5, %v3976_v44, %v1305_v53  ;;  %v5677_v44 = vld [vmem:[#allocation3_spill] sm:$0xff] }
 0x140   :  { %3209 = vmatprep.mubr.msk.bf16.mxu0 %vm1558_vm7, %v1499_v43 }
 0x142   :  { %v912_v21 = vpop.permute.xlu0 %911  ;;  %v1371_v42 = vpop.permute.xlu1 %1370 }
 0x143   :  { %v1501_v45 = vsel %vm1473_vm6, %v1436_v6, %v1371_v42  ;;  %v1166_v20 = vsel %vm1100_vm3, %v5676_v39, %v912_v21 }
 0x144   :  { %3210 = vmatmul.mubr.msk.bf16.gmra.mxu0 %vm1558_vm7, %v1501_v45 }
 0x146   :  { %v1093_v12 = vpop.permute.xlu0 %1092  ;;  %v914_v55 = vpop.permute.xlu1 %913 }
 0x147   :  { %v4289_v11 = vsel %vm1173_vm4, %v1166_v20, %v1093_v12  ;;  %v1168_v47 = vsel %vm1100_vm3, %v5677_v44, %v914_v55 }
 0x148   :  { %1400 = vrot.lane.b32.xlu0 %v4289_v11, %s3342_s1  ;;  %1336 = vrot.lane.b32.xlu1 %v4289_v11, %s3341_s25 }
 0x14a   :  { %v1307_v38 = vpop.permute.xlu0 %1306  ;;  %v1095_v51 = vpop.permute.xlu1 %1094 }
 0x14b   :  { %v4298_v41 = vsel %vm1173_vm4, %v1168_v47, %v1095_v51  ;;  %v1438_v49 = vsel %vm1408_vm5, %v5678_v40, %v1307_v38 }
 0x14c   :  { %1338 = vrot.lane.b32.xlu0 %v4298_v41, %s3341_s25  ;;  %1402 = vrot.lane.b32.xlu1 %v4298_v41, %s3342_s1 }
 0x14e   :  { %v1373_v1 = vpop.permute.xlu0 %1372  ;;  %v1309_v27 = vpop.permute.xlu1 %1308 }
 0x14f   :  { %v1503_v61 = vsel %vm1473_vm6, %v1438_v49, %v1373_v1  ;;  %v1440_v33 = vsel %vm1408_vm5, %v4037_v25, %v1309_v27 }
 0x150   :  { %3213 = vmatprep.mubr.msk.bf16.mxu0 %vm1558_vm7, %v1503_v61 }
 0x152   :  { %v916_v23 = vpop.permute.xlu0 %915  ;;  %v1375_v37 = vpop.permute.xlu1 %1374 }
 0x153   :  { %v1505_v60 = vsel %vm1473_vm6, %v1440_v33, %v1375_v37  ;;  %v1170_v54 = vsel %vm1100_vm3, %v4030_v3, %v916_v23 }
 0x154   :  { %3214 = vmatmul.mubr.msk.bf16.gmra.mxu0 %vm1558_vm7, %v1505_v60 }
 0x156   :  { %v918_v63 = vpop.permute.xlu0 %917  ;;  %v884_v22 = vpop.permute.xlu1 %883 }
 0x157   :  { %v1172_v19 = vsel %vm1100_vm3, %v4051_v17, %v918_v63  ;;  %v1138_v8 = vsel %vm1100_vm3, %v4059_v32, %v884_v22 }
 0x15a   :  { %v1065_v14 = vpop.permute.xlu0 %1064  ;;  %v1097_v0 = vpop.permute.xlu1 %1096 }
 0x15b   :  { %v1243_v57 = vsel %vm1173_vm4, %v1170_v54, %v1097_v0  ;;  %v1211_v3 = vsel %vm1173_vm4, %v1138_v8, %v1065_v14 }
 0x15c   :  { %1404 = vrot.lane.b32.xlu0 %v1243_v57, %s3342_s1  ;;  %1340 = vrot.lane.b32.xlu1 %v1243_v57, %s3341_s25 }
 0x15e   :  { %v1311_v25 = vpop.permute.xlu0 %1310  ;;  %v1099_v5 = vpop.permute.xlu1 %1098 }
 0x15f   :  { %v1245_v15 = vsel %vm1173_vm4, %v1172_v19, %v1099_v5  ;;  %v1442_v26 = vsel %vm1408_vm5, %v1211_v3, %v1311_v25 }
 0x160   :  { %1406 = vrot.lane.b32.xlu1 %v1245_v15, %s3342_s1 }
 0x162   :  { %v1377_v9 = vpop.permute.xlu0 %1376  ;;  %v1313_v4 = vpop.permute.xlu1 %1312 }
 0x163   :  { %v1507_v17 = vsel %vm1473_vm6, %v1442_v26, %v1377_v9  ;;  %v1444_v58 = vsel %vm1408_vm5, %v4110_v31, %v1313_v4 }
 0x164   :  { %3217 = vmatprep.mubr.msk.bf16.mxu1 %vm1558_vm7, %v1507_v17 }
 0x166   :  { %v1315_v2 = vpop.permute.xlu0 %1314  ;;  %v1379_v18 = vpop.permute.xlu1 %1378 }
 0x167   :  { %v1509_v59 = vsel %vm1473_vm6, %v1444_v58, %v1379_v18  ;;  %v1446_v32 = vsel %vm1408_vm5, %v4119_v35, %v1315_v2 }
 0x168   :  { %3218 = vmatmul.mubr.msk.bf16.vlgmr.msra.gmra.mxu1 %vm1558_vm7, %v1509_v59 }
 0x16a   :  { %v1381_v50 = vpop.permute.xlu0 %1380 }
 0x16b   :  { %v1511_v24 = vsel %vm1473_vm6, %v1446_v32, %v1381_v50  ;;  %v1317_v62 = vpop.permute.xlu1 %1316 }
 0x16c   :  { %3221 = vmatprep.mubr.msk.bf16.mxu1 %vm1558_vm7, %v1511_v24  ;;  %v1448_v13 = vsel %vm1408_vm5, %v4133_v7, %v1317_v62 }
 0x16e   :  { %v1319_v34 = vpop.permute.xlu0 %1318 }
 0x16f   :  { %v1383_v31 = vpop.permute.xlu1 %1382  ;;  %v1450_v43 = vsel %vm1408_vm5, %v4145_v52, %v1319_v34 }
 0x170   :  { %v1513_v53 = vsel %vm1473_vm6, %v1448_v13, %v1383_v31 }
 0x171   :  { %3222 = vmatmul.mubr.msk.bf16.gmra.mxu1 %vm1558_vm7, %v1513_v53 }
 0x172   :  { %v1385_v6 = vpop.permute.xlu0 %1384 }
 0x173   :  { %v1515_v35 = vsel %vm1473_vm6, %v1450_v43, %v1385_v6  ;;  %v1321_v21 = vpop.permute.xlu1 %1320 }
 0x174   :  { %3225 = vmatprep.mubr.msk.bf16.mxu1 %vm1558_vm7, %v1515_v35  ;;  %v1452_v42 = vsel %vm1408_vm5, %v4158_v28, %v1321_v21 }
 0x176   :  { %v1323_v39 = vpop.permute.xlu0 %1322 }
 0x177   :  { %v1387_v45 = vpop.permute.xlu1 %1386  ;;  %v1454_v20 = vsel %vm1408_vm5, %v4171_v56, %v1323_v39 }
 0x178   :  { %v1517_v7 = vsel %vm1473_vm6, %v1452_v42, %v1387_v45 }
 0x179   :  { %3226 = vmatmul.mubr.msk.bf16.gmra.mxu1 %vm1558_vm7, %v1517_v7 }
 0x18a   :  { %v1389_v12 = vpop.permute.xlu0 %1388  ;;  %v1325_v52 = vpop.permute.xlu1 %1324 }
 0x18b   :  { %v1519_v55 = vsel %vm1473_vm6, %v1454_v20, %v1389_v12  ;;  %v1456_v44 = vsel %vm1408_vm5, %v4184_v48, %v1325_v52 }
 0x18c   :  { %3229 = vmatprep.mubr.msk.bf16.mxu1 %vm1558_vm7, %v1519_v55 }
 0x18e   :  { %v1391_v47 = vpop.permute.xlu1 %1390  ;;  %v1327_v38 = vpop.permute.xlu0 %1326 }
 0x18f   :  { %v1521_v28 = vsel %vm1473_vm6, %v1456_v44, %v1391_v47  ;;  %v1458_v51 = vsel %vm1408_vm5, %v4211_v46, %v1327_v38 }
 0x190   :  { %3230 = vmatmul.mubr.msk.bf16.gmra.mxu1 %vm1558_vm7, %v1521_v28 }
 0x19a   :  { %v1393_v40 = vpop.permute.xlu0 %1392  ;;  %v1329_v56 = vpop.permute.xlu1 %1328 }
 0x19b   :  { %v1523_v49 = vsel %vm1473_vm6, %v1458_v51, %v1393_v40  ;;  %v1460_v1 = vsel %vm1408_vm5, %v4220_v30, %v1329_v56 }
 0x19c   :  { %3233 = vmatprep.mubr.msk.bf16.mxu1 %vm1558_vm7, %v1523_v49 }
 0x19e   :  { %v1395_v27 = vpop.permute.xlu1 %1394  ;;  %v1331_v61 = vpop.permute.xlu0 %1330 }
 0x19f   :  { %v1525_v48 = vsel %vm1473_vm6, %v1460_v1, %v1395_v27  ;;  %v1462_v33 = vsel %vm1408_vm5, %v4237_v10, %v1331_v61 }
 0x1a0   :  { %3234 = vmatmul.mubr.msk.bf16.gmra.mxu1 %vm1558_vm7, %v1525_v48 }
 0x1aa   :  { %v1397_v23 = vpop.permute.xlu0 %1396  ;;  %v1333_v46 = vpop.permute.xlu1 %1332 }
 0x1ab   :  { %v1527_v37 = vsel %vm1473_vm6, %v1462_v33, %v1397_v23  ;;  %v1464_v60 = vsel %vm1408_vm5, %v4246_v16, %v1333_v46 }
 0x1ac   :  { %3237 = vmatprep.mubr.msk.bf16.mxu1 %vm1558_vm7, %v1527_v37 }
 0x1ae   :  { %v1399_v63 = vpop.permute.xlu1 %1398  ;;  %v1335_v22 = vpop.permute.xlu0 %1334 }
 0x1af   :  { %v1529_v30 = vsel %vm1473_vm6, %v1464_v60, %v1399_v63  ;;  %v1466_v54 = vsel %vm1408_vm5, %v4263_v29, %v1335_v22 }
 0x1b0   :  { %3238 = vmatmul.mubr.msk.bf16.gmra.mxu1 %vm1558_vm7, %v1529_v30 }
 0x1ba   :  { %v1401_v14 = vpop.permute.xlu0 %1400  ;;  %v1337_v10 = vpop.permute.xlu1 %1336 }
 0x1bb   :  { %v1531_v0 = vsel %vm1473_vm6, %v1466_v54, %v1401_v14  ;;  %v1468_v16 = vsel %vm1408_vm5, %v4272_v36, %v1337_v10 }
 0x1bc   :  { %3241 = vmatprep.mubr.msk.bf16.mxu1 %vm1558_vm7, %v1531_v0  ;;  %v4375_v57 = vpop.f32.mrf.mxu0 }
 0x1be   :  { %v1403_v19 = vpop.permute.xlu1 %1402  ;;  %v4380_v5 = vpop.f32.mrf.mxu0 }
 0x1bf   :  { %v1533_v25 = vsel %vm1473_vm6, %v1468_v16, %v1403_v19  ;;  %v1339_v8 = vpop.permute.xlu0 %1338 }
 0x1c0   :  { %3242 = vmatmul.mubr.msk.bf16.gmra.mxu1 %vm1558_vm7, %v1533_v25  ;;  %v4383_v15 = vpop.f32.mrf.mxu0  ;;  %v1470_v26 = vsel %vm1408_vm5, %v4289_v11, %v1339_v8 }
 0x1c2   :  { %v4385_v29 = vpop.f32.mrf.mxu0 }
 0x1c3   :  { %v1916_v18 = vadd.f32 %v4385_v29, %v4380_v5 }
 0x1c4   :  { %v4387_v3 = vpop.f32.mrf.mxu0 }
 0x1c5   :  { %v1917_v11 = vadd.f32 %v4375_v57, %v1916_v18 }
 0x1c6   :  { %v4393_v17 = vpop.f32.mrf.mxu0 }
 0x1c7   :  { %v1918_v24 = vadd.f32 %v4383_v15, %v1917_v11 }
 0x1c8   :  { %v4400_v32 = vpop.f32.mrf.mxu0 }
 0x1ca   :  { %v4404_v50 = vpop.f32.mrf.mxu0 }
 0x1cc   :  { %v4407_v62 = vpop.f32.mrf.mxu0 }
 0x1ce   :  { %v1405_v9 = vpop.permute.xlu0 %1404  ;;  %v1341_v4 = vpop.permute.xlu1 %1340 }
 0x1cf   :  { %v1535_v36 = vsel %vm1473_vm6, %v1470_v26, %v1405_v9  ;;  %v1472_v58 = vsel %vm1408_vm5, %v4298_v41, %v1341_v4  ;;  %v1919_v41 = vadd.f32 %v1918_v24, %v4393_v17  ;;  %v4410_v34 = vpop.f32.mrf.mxu0 }
 0x1d0   :  { %3245 = vmatprep.mubr.msk.bf16.mxu1 %vm1558_vm7, %v1535_v36 }
 0x1d1   :  { %v1920_v13 = vadd.f32 %v1919_v41, %v4404_v50  ;;  %v4413_v31 = vpop.f32.mrf.mxu0 }
 0x1d2   :  { %v1407_v2 = vpop.permute.xlu1 %1406 }
 0x1d3   :  { %v1537_v59 = vsel %vm1473_vm6, %v1472_v58, %v1407_v2  ;;  %v1921_v53 = vadd.f32 %v4387_v3, %v1920_v13  ;;  %v4416_v43 = vpop.f32.mrf.mxu0 }
 0x1d4   :  { %3246 = vmatmul.mubr.msk.bf16.gmra.mxu1 %vm1558_vm7, %v1537_v59 }
 0x1d5   :  { %v1922_v6 = vadd.f32 %v4400_v32, %v1921_v53  ;;  %v4419_v35 = vpop.f32.mrf.mxu0 }
 0x1d7   :  { %v1923_v21 = vadd.f32 %v1922_v6, %v4410_v34  ;;  %v4422_v42 = vpop.f32.mrf.mxu0 }
 0x1d9   :  { %v1924_v45 = vadd.f32 %v1923_v21, %v4416_v43  ;;  %v4425_v7 = vpop.f32.mrf.mxu0 }
 0x1db   :  { %v1925_v39 = vadd.f32 %v4407_v62, %v1924_v45  ;;  %v4428_v20 = vpop.f32.mrf.mxu0 }
 0x1dd   :  { %v1926_v52 = vadd.f32 %v4413_v31, %v1925_v39 }
 0x1df   :  { %v1927_v44 = vadd.f32 %v1926_v52, %v4422_v42 }
 0x1e1   :  { %v1928_v28 = vadd.f32 %v1927_v44, %v4428_v20 }
 0x1e3   :  { %v1929_v51 = vadd.f32 %v4419_v35, %v1928_v28 }
 0x1e4   :  { %v4430_v12 = vpop.f32.mrf.mxu0 }
 0x1e5   :  { %v1930_v56 = vadd.f32 %v4425_v7, %v1929_v51 }
 0x1e6   :  { %v4433_v55 = vpop.f32.mrf.mxu0 }
 0x1e7   :  { %v1931_v1 = vadd.f32 %v1930_v56, %v4433_v55 }
 0x1e8   :  { %v4436_v47 = vpop.f32.mrf.mxu0 }
 0x1ea   :  { %v4439_v38 = vpop.f32.mrf.mxu0 }
 0x1eb   :  { %v1932_v27 = vadd.f32 %v1931_v1, %v4439_v38 }
 0x1ed   :  { %v1933_v61 = vadd.f32 %v4430_v12, %v1932_v27 }
 0x1ef   :  { %v1934_v46 = vadd.f32 %v4436_v47, %v1933_v61 }
 0x1f4   :  { %v4442_v40 = vpop.f32.mrf.mxu0 }
 0x1f6   :  { %v4445_v49 = vpop.f32.mrf.mxu0 }
 0x1f7   :  { %v1935_v37 = vadd.f32 %v1934_v46, %v4445_v49 }
 0x1f8   :  { %v4449_v48 = vpop.f32.mrf.mxu0 }
 0x1fa   :  { %v4452_v33 = vpop.f32.mrf.mxu0 }
 0x1fb   :  { %v1936_v63 = vadd.f32 %v1935_v37, %v4452_v33 }
 0x1fd   :  { %v1937_v22 = vadd.f32 %v4442_v40, %v1936_v63 }
 0x1ff   :  { %v1938_v14 = vadd.f32 %v4449_v48, %v1937_v22 }
 0x204   :  { %v4454_v23 = vpop.f32.mrf.mxu0 }
 0x206   :  { %v4458_v60 = vpop.f32.mrf.mxu0 }
 0x207   :  { %v1939_v0 = vadd.f32 %v1938_v14, %v4458_v60 }
 0x208   :  { %v4461_v30 = vpop.f32.mrf.mxu0 }
 0x20a   :  { %v4464_v54 = vpop.f32.mrf.mxu0 }
 0x20b   :  { %v1940_v16 = vadd.f32 %v1939_v0, %v4464_v54 }
 0x20d   :  { %v1941_v8 = vadd.f32 %v4454_v23, %v1940_v16 }
 0x20f   :  { %v1942_v36 = vadd.f32 %v4461_v30, %v1941_v8 }
 0x214   :  { %v4467_v10 = vpop.f32.mrf.mxu0 }
 0x216   :  { %v4471_v19 = vpop.f32.mrf.mxu0 }
 0x217   :  { %v1943_v2 = vadd.f32 %v1942_v36, %v4471_v19 }
 0x218   :  { %v4476_v26 = vpop.f32.mrf.mxu0 }
 0x21a   :  { %v4481_v4 = vpop.f32.mrf.mxu0 }
 0x21b   :  { %v1944_v18 = vadd.f32 %v1943_v2, %v4481_v4 }
 0x21d   :  { %v1945_v11 = vadd.f32 %v4467_v10, %v1944_v18 }
 0x21f   :  { %v1946_v41 = vadd.f32 %v4476_v26, %v1945_v11 }
 0x228   :  { %v4473_v25 = vpop.f32.mrf.mxu1 }
 0x22a   :  { %v4478_v9 = vpop.f32.mrf.mxu1 }
 0x22b   :  { %v1947_v53 = vadd.f32 %v1946_v41, %v4478_v9 }
 0x22c   :  { %v4483_v58 = vpop.f32.mrf.mxu1 }
 0x22e   :  { %v4487_v59 = vpop.f32.mrf.mxu1 }
 0x22f   :  { %v1948_v6 = vadd.f32 %v1947_v53, %v4487_v59 }
 0x231   :  { %v4490_v24 = vpop.f32.mrf.mxu1  ;;  %v1949_v45 = vadd.f32 %v4473_v25, %v1948_v6 }
 0x233   :  { %v4493_v13 = vpop.f32.mrf.mxu1  ;;  %v1950_v52 = vadd.f32 %v4483_v58, %v1949_v45 }
 0x235   :  { %v4497_v21 = vpop.f32.mrf.mxu1  ;;  %v1951_v28 = vadd.f32 %v1950_v52, %v4493_v13 }
 0x236   :  { %5679 = vst [vmem:[#allocation2_spill] sm:$0xff] %v4497_v21 }
 0x237   :  { %v4500_v39 = vpop.f32.mrf.mxu1 }
 0x238   :  { %v1952_v56 = vadd.f32 %v1951_v28, %v4500_v39 }
 0x239   :  { %v4503_v44 = vpop.f32.mrf.mxu1 }
 0x23a   :  { %5680 = vst [vmem:[#allocation3_spill] sm:$0xff] %v4503_v44  ;;  %v1953_v27 = vadd.f32 %v4490_v24, %v1952_v56 }
 0x23b   :  { %v4506_v51 = vpop.f32.mrf.mxu1 }
 0x23c   :  { %5681 = vst [vmem:[#allocation4_spill] sm:$0xff] %v4506_v51  ;;  %v1954_v37 = vadd.f32 %v4497_v21, %v1953_v27 }
 0x23d   :  { %v4509_v1 = vpop.f32.mrf.mxu1 }
 0x23e   :  { %5682 = vst [vmem:[#allocation5_spill] sm:$0xff] %v4509_v1  ;;  %v1955_v22 = vadd.f32 %v1954_v37, %v4506_v51 }
 0x23f   :  { %v4512_v61 = vpop.f32.mrf.mxu1 }
 0x240   :  { %5683 = vst [vmem:[#allocation6_spill] sm:$0xff] %v4512_v61  ;;  %v1956_v0 = vadd.f32 %v1955_v22, %v4512_v61 }
 0x242   :  { %v1957_v8 = vadd.f32 %v4503_v44, %v1956_v0 }
 0x244   :  { %v1958_v2 = vadd.f32 %v4509_v1, %v1957_v8 }
 0x250   :  { %v4514_v46 = vpop.f32.mrf.mxu1 }
 0x251   :  { %5684 = vst [vmem:[#allocation7_spill] sm:$0xff] %v4514_v46 }
 0x252   :  { %v4517_v63 = vpop.f32.mrf.mxu1 }
 0x253   :  { %5685 = vst [vmem:[#allocation8_spill] sm:$0xff] %v4517_v63  ;;  %v1959_v11 = vadd.f32 %v1958_v2, %v4517_v63 }
 0x254   :  { %v4520_v14 = vpop.f32.mrf.mxu1 }
 0x255   :  { %5686 = vst [vmem:[#allocation9_spill] sm:$0xff] %v4520_v14 }
 0x256   :  { %v4523_v16 = vpop.f32.mrf.mxu1 }
 0x257   :  { %5687 = vst [vmem:[#allocation10_spill] sm:$0xff] %v4523_v16  ;;  %v1960_v41 = vadd.f32 %v1959_v11, %v4523_v16 }
 0x259   :  { %v1961_v6 = vadd.f32 %v4514_v46, %v1960_v41 }
 0x25b   :  { %v1962_v28 = vadd.f32 %v4520_v14, %v1961_v6 }
 0x260   :  { %v4526_v36 = vpop.f32.mrf.mxu1 }
 0x261   :  { %5688 = vst [vmem:[#allocation11_spill] sm:$0xff] %v4526_v36 }
 0x262   :  { %v4529_v18 = vpop.f32.mrf.mxu1 }
 0x263   :  { %5689 = vst [vmem:[#allocation12_spill] sm:$0xff] %v4529_v18  ;;  %v1963_v56 = vadd.f32 %v1962_v28, %v4529_v18 }
 0x264   :  { %v4533_v53 = vpop.f32.mrf.mxu1 }
 0x265   :  { %5690 = vst [vmem:[#allocation13_spill] sm:$0xff] %v4533_v53 }
 0x266   :  { %v4536_v45 = vpop.f32.mrf.mxu1 }
 0x267   :  { %5691 = vst [vmem:[#allocation14_spill] sm:$0xff] %v4536_v45  ;;  %v1964_v37 = vadd.f32 %v1963_v56, %v4536_v45 }
 0x269   :  { %v1965_v0 = vadd.f32 %v4526_v36, %v1964_v37 }
 0x26b   :  { %v1966_v2 = vadd.f32 %v4533_v53, %v1965_v0 }
 0x270   :  { %v4538_v52 = vpop.f32.mrf.mxu1 }
 0x271   :  { %5692 = vst [vmem:[#allocation15_spill] sm:$0xff] %v4538_v52 }
 0x272   :  { %v4542_v27 = vpop.f32.mrf.mxu1 }
 0x273   :  { %5693 = vst [vmem:[#allocation16_spill] sm:$0xff] %v4542_v27  ;;  %v1967_v41 = vadd.f32 %v1966_v2, %v4542_v27 }
 0x274   :  { %v4545_v22 = vpop.f32.mrf.mxu1 }
 0x276   :  { %v4548_v8 = vpop.f32.mrf.mxu1 }
 0x277   :  { %5694 = vst [vmem:[#allocation17_spill] sm:$0xff] %v4548_v8  ;;  %v1968_v46 = vadd.f32 %v1967_v41, %v4548_v8 }
 0x279   :  { %v1969_v28 = vadd.f32 %v4538_v52, %v1968_v46 }
 0x27b   :  { %v1970_v14 = vadd.f32 %v4545_v22, %v1969_v28 }
 0x280   :  { %v3243_v11 = vpop.f32.mrf.mxu1 }
 0x282   :  { %v1885_v6 = vpop.f32.mrf.mxu1 }
 0x283   :  { %v1971_v45 = vadd.f32 %v1970_v14, %v1885_v6 }
 0x284   :  { %v3244_v18 = vpop.f32.mrf.mxu1 }
 0x286   :  { %v1888_v56 = vpop.f32.mrf.mxu1 }
 0x287   :  { %v1972_v16 = vadd.f32 %v1971_v45, %v1888_v56 }
 0x289   :  { %v1973_v63 = vadd.f32 %v3243_v11, %v1972_v16 }
 0x28b   :  { %v1974_v1 = vadd.f32 %v3244_v18, %v1973_v63 }
 0x294   :  { %v3247_v37 = vpop.f32.mrf.mxu1 }
 0x296   :  { %v1901_v36 = vpop.f32.mrf.mxu1 }
 0x297   :  { %v1975_v0 = vadd.f32 %v1974_v1, %v1901_v36 }
 0x298   :  { %v3248_v44 = vpop.f32.mrf.mxu1 }
 0x29a   :  { %v1904_v53 = vpop.f32.mrf.mxu1 }
 0x29b   :  { %v1976_v61 = vadd.f32 %v1975_v0, %v1904_v53 }
 0x29d   :  { %v1977_v2 = vadd.f32 %v3247_v37, %v1976_v61 }
 0x29f   :  { %v1978_v27 = vadd.f32 %v3248_v44, %v1977_v2 }
 0x2a1   :  { %v1979_v41 = vrot.slane %v1978_v27, 4 }
 0x2a3   :  { %v1980_v8 = vadd.f32 %v1979_v41, %v1978_v27 }
 0x2a5   :  { %v1981_v51 = vrot.slane %v1980_v8, 2 }
 0x2a7   :  { %v1982_v46 = vadd.f32 %v1981_v51, %v1980_v8 }
 0x2a9   :  { %v1983_v52 = vrot.slane %v1982_v46, 1 }
 0x2ab   :  { %v1984_v21 = vadd.f32 %v1983_v52, %v1982_v46 }
 0x2ad   :  { %v4555_v28 = vmul.f32 0.001953125, %v1984_v21 }
 0x2af   :  { %v4558_v14 = vsub.f32 %v1885_v6, %v4555_v28  ;;  %v4561_v16 = vsub.f32 %v1888_v56, %v4555_v28  ;;  %v4564_v1 = vsub.f32 %v3243_v11, %v4555_v28  ;;  %v4567_v61 = vsub.f32 %v3244_v18, %v4555_v28 }
 0x2b0   :  { %v4570_v63 = vsub.f32 %v1901_v36, %v4555_v28  ;;  %v4573_v51 = vsub.f32 %v1904_v53, %v4555_v28  ;;  %v4576_v21 = vsub.f32 %v3247_v37, %v4555_v28  ;;  %v4579_v45 = vsub.f32 %v3248_v44, %v4555_v28 }
 0x2b1   :  { %5695 = vst [vmem:[#allocation18_spill] sm:$0xff] %v4561_v16  ;;  %5696 = vst [vmem:[#allocation19_spill] sm:$0xff] %v4564_v1  ;;  %v4583_v52 = vsub.f32 %v4380_v5, %v4555_v28  ;;  %v4587_v18 = vsub.f32 %v4385_v29, %v4555_v28  ;;  %v4591_v36 = vsub.f32 %v4375_v57, %v4555_v28 }
 0x2b2   :  { %5697 = vst [vmem:[#allocation20_spill] sm:$0xff] %v4567_v61  ;;  %5698 = vst [vmem:[#allocation21_spill] sm:$0xff] %v4570_v63  ;;  %v4599_v44 = vsub.f32 %v4383_v15, %v4555_v28  ;;  %v4603_v5 = vsub.f32 %v4393_v17, %v4555_v28  ;;  %v4609_v57 = vsub.f32 %v4404_v50, %v4555_v28 }
 0x2b3   :  { %5699 = vst [vmem:[#allocation22_spill] sm:$0xff] %v4573_v51  ;;  %5700 = vst [vmem:[#allocation23_spill] sm:$0xff] %v4579_v45  ;;  %v2050_v53 = vmul.f32 %v4583_v52, %v4583_v52  ;;  %v2051_v27 = vmul.f32 %v4587_v18, %v4587_v18  ;;  %v2052_v29 = vmul.f32 %v4591_v36, %v4591_v36 }
 0x2b4   :  { %v2053_v11 = vmul.f32 %v4599_v44, %v4599_v44  ;;  %v4615_v15 = vsub.f32 %v4387_v3, %v4555_v28  ;;  %v2054_v17 = vmul.f32 %v4603_v5, %v4603_v5  ;;  %v4621_v37 = vsub.f32 %v4400_v32, %v4555_v28 }
 0x2b5   :  { %v2114_v8 = vadd.f32 %v2051_v27, %v2050_v53  ;;  %v2055_v50 = vmul.f32 %v4609_v57, %v4609_v57  ;;  %v4627_v2 = vsub.f32 %v4410_v34, %v4555_v28  ;;  %v4633_v46 = vsub.f32 %v4416_v43, %v4555_v28 }
 0x2b6   :  { %v2056_v3 = vmul.f32 %v4615_v15, %v4615_v15  ;;  %v2057_v32 = vmul.f32 %v4621_v37, %v4621_v37  ;;  %v4639_v27 = vsub.f32 %v4407_v62, %v4555_v28 }
 0x2b7   :  { %v2115_v6 = vadd.f32 %v2114_v8, %v2052_v29  ;;  %v2058_v34 = vmul.f32 %v4627_v2, %v4627_v2  ;;  %v4645_v8 = vsub.f32 %v4413_v31, %v4555_v28  ;;  %v2059_v43 = vmul.f32 %v4633_v46, %v4633_v46 }
 0x2b8   :  { %v2060_v62 = vmul.f32 %v4639_v27, %v4639_v27 }
 0x2b9   :  { %v2116_v56 = vadd.f32 %v2115_v6, %v2053_v11  ;;  %v4651_v6 = vsub.f32 %v4422_v42, %v4555_v28  ;;  %v2061_v31 = vmul.f32 %v4645_v8, %v4645_v8 }
 0x2bb   :  { %v2117_v0 = vadd.f32 %v2116_v56, %v2054_v17  ;;  %v4657_v56 = vsub.f32 %v4428_v20, %v4555_v28  ;;  %v2062_v42 = vmul.f32 %v4651_v6, %v4651_v6 }
 0x2bd   :  { %v2118_v41 = vadd.f32 %v2117_v0, %v2055_v50  ;;  %v4663_v0 = vsub.f32 %v4419_v35, %v4555_v28  ;;  %v2063_v20 = vmul.f32 %v4657_v56, %v4657_v56 }
 0x2bf   :  { %v2119_v53 = vadd.f32 %v2118_v41, %v2056_v3  ;;  %v4669_v41 = vsub.f32 %v4425_v7, %v4555_v28  ;;  %v2064_v35 = vmul.f32 %v4663_v0, %v4663_v0 }
 0x2c1   :  { %v2120_v29 = vadd.f32 %v2119_v53, %v2057_v32  ;;  %v4675_v53 = vsub.f32 %v4433_v55, %v4555_v28  ;;  %v2065_v7 = vmul.f32 %v4669_v41, %v4669_v41 }
 0x2c3   :  { %v2121_v11 = vadd.f32 %v2120_v29, %v2058_v34  ;;  %v4681_v29 = vsub.f32 %v4439_v38, %v4555_v28  ;;  %v2066_v55 = vmul.f32 %v4675_v53, %v4675_v53 }
 0x2c5   :  { %v2122_v17 = vadd.f32 %v2121_v11, %v2059_v43  ;;  %v4687_v11 = vsub.f32 %v4430_v12, %v4555_v28  ;;  %v2067_v38 = vmul.f32 %v4681_v29, %v4681_v29 }
 0x2c7   :  { %v2123_v50 = vadd.f32 %v2122_v17, %v2060_v62  ;;  %v4693_v17 = vsub.f32 %v4436_v47, %v4555_v28  ;;  %v2068_v12 = vmul.f32 %v4687_v11, %v4687_v11 }
 0x2c9   :  { %v2124_v3 = vadd.f32 %v2123_v50, %v2061_v31  ;;  %v4699_v50 = vsub.f32 %v4445_v49, %v4555_v28  ;;  %v2069_v47 = vmul.f32 %v4693_v17, %v4693_v17 }
 0x2cb   :  { %v2125_v32 = vadd.f32 %v2124_v3, %v2062_v42  ;;  %v4705_v3 = vsub.f32 %v4452_v33, %v4555_v28  ;;  %v2070_v49 = vmul.f32 %v4699_v50, %v4699_v50 }
 0x2cd   :  { %v2126_v34 = vadd.f32 %v2125_v32, %v2063_v20  ;;  %v4711_v32 = vsub.f32 %v4442_v40, %v4555_v28  ;;  %v2071_v33 = vmul.f32 %v4705_v3, %v4705_v3 }
 0x2cf   :  { %v2127_v43 = vadd.f32 %v2126_v34, %v2064_v35  ;;  %v4717_v34 = vsub.f32 %v4449_v48, %v4555_v28  ;;  %v2072_v40 = vmul.f32 %v4711_v32, %v4711_v32 }
 0x2d1   :  { %v2128_v62 = vadd.f32 %v2127_v43, %v2065_v7  ;;  %v4723_v43 = vsub.f32 %v4458_v60, %v4555_v28  ;;  %v2073_v48 = vmul.f32 %v4717_v34, %v4717_v34 }
 0x2d3   :  { %v2129_v31 = vadd.f32 %v2128_v62, %v2066_v55  ;;  %v4729_v62 = vsub.f32 %v4464_v54, %v4555_v28  ;;  %v2074_v60 = vmul.f32 %v4723_v43, %v4723_v43 }
 0x2d5   :  { %v2130_v42 = vadd.f32 %v2129_v31, %v2067_v38  ;;  %v4735_v31 = vsub.f32 %v4454_v23, %v4555_v28  ;;  %v2075_v54 = vmul.f32 %v4729_v62, %v4729_v62 }
 0x2d7   :  { %v2131_v20 = vadd.f32 %v2130_v42, %v2068_v12  ;;  %v4741_v42 = vsub.f32 %v4461_v30, %v4555_v28  ;;  %v2076_v23 = vmul.f32 %v4735_v31, %v4735_v31 }
 0x2d9   :  { %v2132_v35 = vadd.f32 %v2131_v20, %v2069_v47  ;;  %v4747_v20 = vsub.f32 %v4471_v19, %v4555_v28  ;;  %v2077_v30 = vmul.f32 %v4741_v42, %v4741_v42 }
 0x2db   :  { %v2133_v7 = vadd.f32 %v2132_v35, %v2070_v49  ;;  %v4753_v35 = vsub.f32 %v4481_v4, %v4555_v28  ;;  %v2078_v19 = vmul.f32 %v4747_v20, %v4747_v20 }
 0x2dd   :  { %v2134_v55 = vadd.f32 %v2133_v7, %v2071_v33  ;;  %v4759_v7 = vsub.f32 %v4467_v10, %v4555_v28  ;;  %v2079_v4 = vmul.f32 %v4753_v35, %v4753_v35 }
 0x2df   :  { %v2135_v38 = vadd.f32 %v2134_v55, %v2072_v40  ;;  %v4765_v55 = vsub.f32 %v4476_v26, %v4555_v28  ;;  %v2080_v10 = vmul.f32 %v4759_v7, %v4759_v7 }
 0x2e1   :  { %v2136_v12 = vadd.f32 %v2135_v38, %v2073_v48  ;;  %v4771_v38 = vsub.f32 %v4478_v9, %v4555_v28  ;;  %v2081_v26 = vmul.f32 %v4765_v55, %v4765_v55 }
 0x2e3   :  { %v2137_v47 = vadd.f32 %v2136_v12, %v2074_v60  ;;  %v4777_v12 = vsub.f32 %v4487_v59, %v4555_v28  ;;  %v2082_v9 = vmul.f32 %v4771_v38, %v4771_v38 }
 0x2e5   :  { %v2138_v49 = vadd.f32 %v2137_v47, %v2075_v54  ;;  %v4783_v47 = vsub.f32 %v4473_v25, %v4555_v28  ;;  %v2083_v59 = vmul.f32 %v4777_v12, %v4777_v12 }
 0x2e7   :  { %v2139_v33 = vadd.f32 %v2138_v49, %v2076_v23  ;;  %v4789_v49 = vsub.f32 %v4483_v58, %v4555_v28  ;;  %v2084_v25 = vmul.f32 %v4783_v47, %v4783_v47 }
 0x2e9   :  { %v2140_v40 = vadd.f32 %v2139_v33, %v2077_v30  ;;  %v4795_v33 = vsub.f32 %v4493_v13, %v4555_v28  ;;  %v2085_v58 = vmul.f32 %v4789_v49, %v4789_v49 }
 0x2eb   :  { %v2141_v48 = vadd.f32 %v2140_v40, %v2078_v19  ;;  %v4801_v40 = vsub.f32 %v4500_v39, %v4555_v28  ;;  %v2086_v13 = vmul.f32 %v4795_v33, %v4795_v33 }
 0x2ed   :  { %v2142_v60 = vadd.f32 %v2141_v48, %v2079_v4  ;;  %v4807_v48 = vsub.f32 %v4490_v24, %v4555_v28  ;;  %v2087_v39 = vmul.f32 %v4801_v40, %v4801_v40 }
 0x2ef   :  { %v2143_v54 = vadd.f32 %v2142_v60, %v2080_v10  ;;  %5701 = vst [vmem:[#allocation24_spill] sm:$0xff] %v4807_v48  ;;  %v5702_v60 = vld [vmem:[#allocation2_spill] sm:$0xff]  ;;  %v2088_v24 = vmul.f32 %v4807_v48, %v4807_v48 }
 0x2f1   :  { %v2144_v23 = vadd.f32 %v2143_v54, %v2081_v26  ;;  %v4813_v26 = vsub.f32 %v5702_v60, %v4555_v28 }
 0x2f3   :  { %v2145_v30 = vadd.f32 %v2144_v23, %v2082_v9  ;;  %5703 = vst [vmem:[#allocation2_spill] sm:$0xff] %v4813_v26  ;;  %v5704_v9 = vld [vmem:[#allocation4_spill] sm:$0xff] }
 0x2f4   :  { %v4819_v23 = vsub.f32 %v5704_v9, %v4555_v28  ;;  %v5710_v9 = vld [vmem:[#allocation5_spill] sm:$0xff] }
 0x2f5   :  { %v2146_v19 = vadd.f32 %v2145_v30, %v2083_v59  ;;  %v5706_v30 = vld [vmem:[#allocation6_spill] sm:$0xff]  ;;  %v4837_v48 = vsub.f32 %v5710_v9, %v4555_v28  ;;  %v5716_v9 = vld [vmem:[#allocation7_spill] sm:$0xff] }
 0x2f6   :  { %5705 = vst [vmem:[#allocation4_spill] sm:$0xff] %v4819_v23 }
 0x2f7   :  { %v2147_v4 = vadd.f32 %v2146_v19, %v2084_v25  ;;  %v4825_v25 = vsub.f32 %v5706_v30, %v4555_v28  ;;  %v2089_v19 = vmul.f32 %v4813_v26, %v4813_v26  ;;  %5711 = vst [vmem:[#allocation5_spill] sm:$0xff] %v4837_v48  ;;  %v5712_v30 = vld [vmem:[#allocation8_spill] sm:$0xff] }
 0x2f8   :  { %v4843_v26 = vsub.f32 %v5712_v30, %v4555_v28  ;;  %v5718_v30 = vld [vmem:[#allocation9_spill] sm:$0xff] }
 0x2f9   :  { %v2148_v10 = vadd.f32 %v2147_v4, %v2085_v58  ;;  %5707 = vst [vmem:[#allocation6_spill] sm:$0xff] %v4825_v25  ;;  %v5708_v4 = vld [vmem:[#allocation3_spill] sm:$0xff] }
 0x2fa   :  { %v4831_v60 = vsub.f32 %v5708_v4, %v4555_v28  ;;  %5713 = vst [vmem:[#allocation8_spill] sm:$0xff] %v4843_v26  ;;  %v5714_v4 = vld [vmem:[#allocation10_spill] sm:$0xff] }
 0x2fb   :  { %v2149_v54 = vadd.f32 %v2148_v10, %v2086_v13  ;;  %v2090_v13 = vmul.f32 %v4819_v23, %v4819_v23  ;;  %v4849_v23 = vsub.f32 %v5714_v4, %v4555_v28  ;;  %v5720_v4 = vld [vmem:[#allocation12_spill] sm:$0xff] }
 0x2fc   :  { %5709 = vst [vmem:[#allocation3_spill] sm:$0xff] %v4831_v60 }
 0x2fd   :  { %v2150_v59 = vadd.f32 %v2149_v54, %v2087_v39  ;;  %v2091_v39 = vmul.f32 %v4825_v25, %v4825_v25  ;;  %5715 = vst [vmem:[#allocation10_spill] sm:$0xff] %v4849_v23  ;;  %v4855_v25 = vsub.f32 %v5716_v9, %v4555_v28  ;;  %v5722_v9 = vld [vmem:[#allocation14_spill] sm:$0xff] }
 0x2ff   :  { %v2151_v58 = vadd.f32 %v2150_v59, %v2088_v24  ;;  %v2092_v24 = vmul.f32 %v4831_v60, %v4831_v60  ;;  %5717 = vst [vmem:[#allocation7_spill] sm:$0xff] %v4855_v25  ;;  %v4861_v60 = vsub.f32 %v5718_v30, %v4555_v28  ;;  %v5724_v30 = vld [vmem:[#allocation11_spill] sm:$0xff] }
 0x301   :  { %v2152_v10 = vadd.f32 %v2151_v58, %v2089_v19  ;;  %v2093_v19 = vmul.f32 %v4837_v48, %v4837_v48  ;;  %5719 = vst [vmem:[#allocation9_spill] sm:$0xff] %v4861_v60  ;;  %v4867_v48 = vsub.f32 %v5720_v4, %v4555_v28  ;;  %v5725_v4 = vld [vmem:[#allocation13_spill] sm:$0xff] }
 0x303   :  { %v2153_v54 = vadd.f32 %v2152_v10, %v2090_v13  ;;  %v2094_v13 = vmul.f32 %v4843_v26, %v4843_v26  ;;  %5721 = vst [vmem:[#allocation12_spill] sm:$0xff] %v4867_v48  ;;  %v4873_v26 = vsub.f32 %v5722_v9, %v4555_v28  ;;  %v5726_v9 = vld [vmem:[#allocation16_spill] sm:$0xff] }
 0x305   :  { %v2154_v59 = vadd.f32 %v2153_v54, %v2091_v39  ;;  %v2095_v39 = vmul.f32 %v4849_v23, %v4849_v23  ;;  %5723 = vst [vmem:[#allocation14_spill] sm:$0xff] %v4873_v26  ;;  %v4879_v23 = vsub.f32 %v5724_v30, %v4555_v28  ;;  %v5728_v30 = vld [vmem:[#allocation17_spill] sm:$0xff] }
 0x307   :  { %v2155_v58 = vadd.f32 %v2154_v59, %v2092_v24  ;;  %v2096_v24 = vmul.f32 %v4855_v25, %v4855_v25  ;;  %v4885_v25 = vsub.f32 %v5725_v4, %v4555_v28  ;;  %v5729_v4 = vld [vmem:[#allocation15_spill] sm:$0xff] }
 0x309   :  { %v2156_v10 = vadd.f32 %v2155_v58, %v2093_v19  ;;  %v2097_v19 = vmul.f32 %v4861_v60, %v4861_v60  ;;  %v4891_v60 = vsub.f32 %v5726_v9, %v4555_v28  ;;  %v4909_v9 = vsub.f32 %v4545_v22, %v4555_v28 }
 0x30a   :  { %v2107_v22 = vmul.f32 %v4561_v16, %v4561_v16 }
 0x30b   :  { %v2157_v54 = vadd.f32 %v2156_v10, %v2094_v13  ;;  %v2098_v13 = vmul.f32 %v4867_v48, %v4867_v48  ;;  %5727 = vst [vmem:[#allocation11_spill] sm:$0xff] %v4891_v60  ;;  %v4897_v48 = vsub.f32 %v5728_v30, %v4555_v28 }
 0x30d   :  { %v2158_v59 = vadd.f32 %v2157_v54, %v2095_v39  ;;  %v2099_v39 = vmul.f32 %v4873_v26, %v4873_v26  ;;  %v4903_v26 = vsub.f32 %v5729_v4, %v4555_v28 }
 0x30f   :  { %v2159_v58 = vadd.f32 %v2158_v59, %v2096_v24  ;;  %v2100_v24 = vmul.f32 %v4879_v23, %v4879_v23  ;;  %v2104_v30 = vmul.f32 %v4903_v26, %v4903_v26 }
 0x311   :  { %v2160_v10 = vadd.f32 %v2159_v58, %v2097_v19  ;;  %v2101_v19 = vmul.f32 %v4885_v25, %v4885_v25 }
 0x313   :  { %v2161_v54 = vadd.f32 %v2160_v10, %v2098_v13  ;;  %v2102_v13 = vmul.f32 %v4891_v60, %v4891_v60  ;;  %v2106_v60 = vmul.f32 %v4558_v14, %v4558_v14 }
 0x315   :  { %v2162_v59 = vadd.f32 %v2161_v54, %v2099_v39  ;;  %v2103_v39 = vmul.f32 %v4897_v48, %v4897_v48 }
 0x317   :  { %v2163_v58 = vadd.f32 %v2162_v59, %v2100_v24  ;;  %v2105_v59 = vmul.f32 %v4909_v9, %v4909_v9 }
 0x319   :  { %v2164_v10 = vadd.f32 %v2163_v58, %v2101_v19  ;;  %v2108_v58 = vmul.f32 %v4564_v1, %v4564_v1 }
 0x31b   :  { %v2165_v54 = vadd.f32 %v2164_v10, %v2102_v13  ;;  %v2109_v10 = vmul.f32 %v4567_v61, %v4567_v61 }
 0x31d   :  { %v2166_v24 = vadd.f32 %v2165_v54, %v2103_v39  ;;  %v2110_v54 = vmul.f32 %v4570_v63, %v4570_v63 }
 0x31f   :  { %v2167_v4 = vadd.f32 %v2166_v24, %v2104_v30  ;;  %v2111_v24 = vmul.f32 %v4573_v51, %v4573_v51  ;;  %v2189_v51 = vlaneseq }
 0x321   :  { %v2168_v19 = vadd.f32 %v2167_v4, %v2105_v59  ;;  %v2112_v4 = vmul.f32 %v4576_v21, %v4576_v21 }
 0x323   :  { %v2169_v28 = vadd.f32 %v2168_v19, %v2106_v60  ;;  %v2113_v19 = vmul.f32 %v4579_v45, %v4579_v45 }
 0x325   :  { %v2170_v13 = vadd.f32 %v2169_v28, %v2107_v22 }
 0x327   :  { %v2171_v39 = vadd.f32 %v2170_v13, %v2108_v58 }
 0x329   :  { %v2172_v30 = vadd.f32 %v2171_v39, %v2109_v10 }
 0x32b   :  { %v2173_v59 = vadd.f32 %v2172_v30, %v2110_v54  ;;  %v2190_v54 = vshrl.u32 %v2189_v51, 7  ;;  %v2184_v30 = vld [vmem:[%s5627_s2] sm:$0x1] }
 0x32d   :  { %v2174_v60 = vadd.f32 %v2173_v59, %v2111_v24  ;;  %v2191_v24 = vsub.s32 0, %v2190_v54  ;;  %v5737_v54 = vld [vmem:[#allocation10_spill] sm:$0xff] }
 0x32f   :  { %v2175_v22 = vadd.f32 %v2174_v60, %v2112_v4  ;;  %v5731_v60 = vld [vmem:[#allocation2_spill] sm:$0xff] }
 0x331   :  { %v2176_v28 = vadd.f32 %v2175_v22, %v2113_v19  ;;  %v5732_v19 = vld [vmem:[#allocation4_spill] sm:$0xff]  ;;  %v5733_v22 = vld [vmem:[#allocation6_spill] sm:$0xff] }
 0x333   :  { %v2177_v1 = vrot.slane %v2176_v28, 4 }
 0x335   :  { %v2178_v61 = vadd.f32 %v2177_v1, %v2176_v28  ;;  %v5734_v28 = vld [vmem:[#allocation3_spill] sm:$0xff] }
 0x337   :  { %v2179_v58 = vrot.slane %v2178_v61, 2 }
 0x339   :  { %v2180_v13 = vadd.f32 %v2179_v58, %v2178_v61  ;;  %v5735_v58 = vld [vmem:[#allocation5_spill] sm:$0xff] }
 0x33b   :  { %v2181_v16 = vrot.slane %v2180_v13, 1 }
 0x33d   :  { %v2182_v63 = vadd.f32 %v2181_v16, %v2180_v13 }
 0x33f   :  { %v2183_v10 = vmul.f32 0.001953125, %v2182_v63 }
 0x341   :  { %v2185_v39 = vadd.f32 1e-05, %v2183_v10  ;;  %v5736_v10 = vld [vmem:[#allocation8_spill] sm:$0xff] }
 0x343   :  { %3336 = vrsqrt.f32 %v2185_v39 }
 0x350   :  { %v3337_v59 = vpop.eup %3336 }
 0x351   :  { %v2187_v45 = vmul.f32 %v3337_v59, %v2184_v30 }
 0x353   :  { %v4936_v4 = vrot.slane %v2187_v45, %v2191_v24  ;;  %v5738_v24 = vld [vmem:[#allocation7_spill] sm:$0xff] }
 0x355   :  { %v4940_v1 = vmul.f32 %v4936_v4, %v4583_v52  ;;  %v4944_v16 = vmul.f32 %v4936_v4, %v4587_v18  ;;  %v4948_v61 = vmul.f32 %v4936_v4, %v4591_v36  ;;  %v4952_v63 = vmul.f32 %v4936_v4, %v4599_v44 }
 0x356   :  { %v4956_v51 = vmul.f32 %v4936_v4, %v4603_v5  ;;  %v4960_v45 = vmul.f32 %v4936_v4, %v4609_v57  ;;  %v4964_v52 = vmul.f32 %v4936_v4, %v4615_v15  ;;  %v4968_v18 = vmul.f32 %v4936_v4, %v4621_v37 }
 0x357   :  { %v4972_v36 = vmul.f32 %v4936_v4, %v4627_v2  ;;  %v4976_v44 = vmul.f32 %v4936_v4, %v4633_v46  ;;  %v4980_v5 = vmul.f32 %v4936_v4, %v4639_v27  ;;  %v4984_v57 = vmul.f32 %v4936_v4, %v4645_v8 }
 0x358   :  { %v4988_v15 = vmul.f32 %v4936_v4, %v4651_v6  ;;  %v4992_v37 = vmul.f32 %v4936_v4, %v4657_v56  ;;  %v4996_v2 = vmul.f32 %v4936_v4, %v4663_v0  ;;  %v5000_v46 = vmul.f32 %v4936_v4, %v4669_v41 }
 0x359   :  { %v5004_v27 = vmul.f32 %v4936_v4, %v4675_v53  ;;  %v5008_v8 = vmul.f32 %v4936_v4, %v4681_v29  ;;  %v5012_v6 = vmul.f32 %v4936_v4, %v4687_v11  ;;  %v5016_v56 = vmul.f32 %v4936_v4, %v4693_v17 }
 0x35a   :  { %v5020_v0 = vmul.f32 %v4936_v4, %v4699_v50  ;;  %v5024_v41 = vmul.f32 %v4936_v4, %v4705_v3  ;;  %v5028_v53 = vmul.f32 %v4936_v4, %v4711_v32  ;;  %v5032_v29 = vmul.f32 %v4936_v4, %v4717_v34 }
 0x35b   :  { %v5036_v11 = vmul.f32 %v4936_v4, %v4723_v43  ;;  %v5040_v17 = vmul.f32 %v4936_v4, %v4729_v62  ;;  %v5044_v50 = vmul.f32 %v4936_v4, %v4735_v31  ;;  %v5048_v3 = vmul.f32 %v4936_v4, %v4741_v42 }
 0x35c   :  { %v5052_v32 = vmul.f32 %v4936_v4, %v4747_v20  ;;  %v5056_v34 = vmul.f32 %v4936_v4, %v4753_v35  ;;  %v5060_v43 = vmul.f32 %v4936_v4, %v4759_v7  ;;  %v5064_v62 = vmul.f32 %v4936_v4, %v4765_v55 }
 0x35d   :  { %v5068_v31 = vmul.f32 %v4936_v4, %v4771_v38  ;;  %v5072_v42 = vmul.f32 %v4936_v4, %v4777_v12  ;;  %v5076_v20 = vmul.f32 %v4936_v4, %v4783_v47  ;;  %v5080_v35 = vmul.f32 %v4936_v4, %v4789_v49  ;;  %v5730_v38 = vld [vmem:[#allocation24_spill] sm:$0xff] }
 0x35e   :  { %v5084_v7 = vmul.f32 %v4936_v4, %v4795_v33  ;;  %v5088_v55 = vmul.f32 %v4936_v4, %v4801_v40  ;;  %v5092_v12 = vmul.f32 %v4936_v4, %v5730_v38  ;;  %v5096_v47 = vmul.f32 %v4936_v4, %v5731_v60  ;;  %v5739_v38 = vld [vmem:[#allocation9_spill] sm:$0xff] }
 0x35f   :  { %v5100_v49 = vmul.f32 %v4936_v4, %v5732_v19  ;;  %v5104_v33 = vmul.f32 %v4936_v4, %v5733_v22  ;;  %v5108_v40 = vmul.f32 %v4936_v4, %v5734_v28  ;;  %v5112_v13 = vmul.f32 %v4936_v4, %v5735_v58  ;;  %v5740_v19 = vld [vmem:[#allocation12_spill] sm:$0xff]  ;;  %v5741_v28 = vld [vmem:[#allocation14_spill] sm:$0xff] }
 0x360   :  { %v5116_v39 = vmul.f32 %v4936_v4, %v5736_v10  ;;  %v5120_v30 = vmul.f32 %v4936_v4, %v5737_v54  ;;  %v5124_v59 = vmul.f32 %v4936_v4, %v5738_v24  ;;  %v5128_v60 = vmul.f32 %v4936_v4, %v5739_v38  ;;  %v5744_v24 = vld [vmem:[#allocation11_spill] sm:$0xff] }
 0x361   :  { %v5132_v22 = vmul.f32 %v4936_v4, %v5740_v19  ;;  %v5136_v58 = vmul.f32 %v4936_v4, %v5741_v28  ;;  %v5140_v10 = vmul.f32 %v4936_v4, %v4879_v23  ;;  %v5144_v54 = vmul.f32 %v4936_v4, %v4885_v25  ;;  %v5165_v25 = vld [vmem:[%s5628_s3] ss:$0 sm:$0xff] }
 0x362   :  { %v5148_v38 = vmul.f32 %v4936_v4, %v5744_v24  ;;  %v5152_v19 = vmul.f32 %v4936_v4, %v4897_v48  ;;  %v5156_v28 = vmul.f32 %v4936_v4, %v4903_v26  ;;  %v5160_v23 = vmul.f32 %v4936_v4, %v4909_v9 }
 0x363   :  { %5742 = vst [vmem:[#allocation13_spill] sm:$0xff] %v5140_v10  ;;  %5743 = vst [vmem:[#allocation16_spill] sm:$0xff] %v5144_v54  ;;  %v5169_v24 = vmul.f32 %v4936_v4, %v4558_v14  ;;  %v5754_v10 = vld [vmem:[#allocation22_spill] sm:$0xff] }
 0x364   :  { %5745 = vst [vmem:[#allocation17_spill] sm:$0xff] %v5148_v38  ;;  %5746 = vst [vmem:[#allocation15_spill] sm:$0xff] %v5152_v19  ;;  %v5749_v38 = vld [vmem:[#allocation18_spill] sm:$0xff]  ;;  %v5751_v19 = vld [vmem:[#allocation19_spill] sm:$0xff]  ;;  %v5189_v14 = vmul.f32 %v4936_v4, %v5754_v10  ;;  %v5209_v10 = vadd.f32 %v5165_v25, %v4948_v61  ;;  %v5229_v61 = vadd.f32 %v5165_v25, %v4968_v18 }
 0x365   :  { %5747 = vst [vmem:[#allocation24_spill] sm:$0xff] %v5156_v28  ;;  %5748 = vst [vmem:[#allocation2_spill] sm:$0xff] %v5160_v23  ;;  %v5173_v48 = vmul.f32 %v4936_v4, %v5749_v38  ;;  %v5177_v26 = vmul.f32 %v4936_v4, %v5751_v19  ;;  %v5752_v28 = vld [vmem:[#allocation20_spill] sm:$0xff]  ;;  %v5753_v23 = vld [vmem:[#allocation21_spill] sm:$0xff]  ;;  %v5193_v38 = vmul.f32 %v4936_v4, %v4576_v21 }
 0x366   :  { %v5181_v9 = vmul.f32 %v4936_v4, %v5752_v28  ;;  %v5185_v54 = vmul.f32 %v4936_v4, %v5753_v23  ;;  %v5201_v28 = vadd.f32 %v5165_v25, %v4940_v1  ;;  %v5205_v23 = vadd.f32 %v5165_v25, %v4944_v16  ;;  %5758 = vst [vmem:[#allocation5_spill] sm:$0xff] %v5209_v10 }
 0x367   :  { %5750 = vst [vmem:[#allocation4_spill] sm:$0xff] %v5173_v48  ;;  %v5755_v48 = vld [vmem:[#allocation23_spill] sm:$0xff]  ;;  %v5213_v21 = vadd.f32 %v5165_v25, %v4952_v63  ;;  %v5221_v1 = vadd.f32 %v5165_v25, %v4960_v45  ;;  %v5225_v16 = vadd.f32 %v5165_v25, %v4964_v52  ;;  %v5233_v63 = vadd.f32 %v5165_v25, %v4972_v36 }
 0x368   :  { %v5197_v19 = vmul.f32 %v4936_v4, %v5755_v48  ;;  %5756 = vst [vmem:[#allocation6_spill] sm:$0xff] %v5201_v28  ;;  %5757 = vst [vmem:[#allocation3_spill] sm:$0xff] %v5205_v23  ;;  %v5217_v4 = vadd.f32 %v5165_v25, %v4956_v51  ;;  %v5237_v51 = vadd.f32 %v5165_v25, %v4976_v44 }
 0x369   :  { %5759 = vst [vmem:[#allocation8_spill] sm:$0xff] %v5213_v21  ;;  %v5241_v45 = vadd.f32 %v5165_v25, %v4980_v5  ;;  %v5245_v52 = vadd.f32 %v5165_v25, %v4984_v57  ;;  %v5249_v18 = vadd.f32 %v5165_v25, %v4988_v15  ;;  %v5253_v36 = vadd.f32 %v5165_v25, %v4992_v37 }
 0x36a   :  { %5760 = vst [vmem:[#allocation10_spill] sm:$0xff] %v5217_v4  ;;  %v5257_v44 = vadd.f32 %v5165_v25, %v4996_v2  ;;  %v5261_v5 = vadd.f32 %v5165_v25, %v5000_v46  ;;  %v5265_v57 = vadd.f32 %v5165_v25, %v5004_v27  ;;  %v5269_v15 = vadd.f32 %v5165_v25, %v5008_v8  ;;  %v5766_v48 = vld [vmem:[#allocation13_spill] sm:$0xff] }
 0x36b   :  { %v5273_v37 = vadd.f32 %v5165_v25, %v5012_v6  ;;  %v5277_v2 = vadd.f32 %v5165_v25, %v5016_v56  ;;  %v5281_v46 = vadd.f32 %v5165_v25, %v5020_v0  ;;  %v5285_v27 = vadd.f32 %v5165_v25, %v5024_v41 }
 0x36c   :  { %v5289_v8 = vadd.f32 %v5165_v25, %v5028_v53  ;;  %v5293_v6 = vadd.f32 %v5165_v25, %v5032_v29  ;;  %v5297_v56 = vadd.f32 %v5165_v25, %v5036_v11  ;;  %v5301_v0 = vadd.f32 %v5165_v25, %v5040_v17 }
 0x36d   :  { %v5305_v41 = vadd.f32 %v5165_v25, %v5044_v50  ;;  %v5309_v53 = vadd.f32 %v5165_v25, %v5048_v3  ;;  %v5313_v29 = vadd.f32 %v5165_v25, %v5052_v32  ;;  %v5317_v11 = vadd.f32 %v5165_v25, %v5056_v34 }
 0x36e   :  { %v5321_v17 = vadd.f32 %v5165_v25, %v5060_v43  ;;  %v5325_v50 = vadd.f32 %v5165_v25, %v5064_v62  ;;  %v5329_v3 = vadd.f32 %v5165_v25, %v5068_v31  ;;  %v5333_v32 = vadd.f32 %v5165_v25, %v5072_v42 }
 0x36f   :  { %v5337_v34 = vadd.f32 %v5165_v25, %v5076_v20  ;;  %v5341_v43 = vadd.f32 %v5165_v25, %v5080_v35  ;;  %v5345_v62 = vadd.f32 %v5165_v25, %v5084_v7  ;;  %v5349_v31 = vadd.f32 %v5165_v25, %v5088_v55 }
 0x370   :  { %v5353_v42 = vadd.f32 %v5165_v25, %v5092_v12  ;;  %v5357_v20 = vadd.f32 %v5165_v25, %v5096_v47  ;;  %v5361_v35 = vadd.f32 %v5165_v25, %v5100_v49  ;;  %v5365_v7 = vadd.f32 %v5165_v25, %v5104_v33 }
 0x371   :  { %v5369_v55 = vadd.f32 %v5165_v25, %v5108_v40  ;;  %v5373_v12 = vadd.f32 %v5165_v25, %v5112_v13  ;;  %v5377_v47 = vadd.f32 %v5165_v25, %v5116_v39  ;;  %v5381_v49 = vadd.f32 %v5165_v25, %v5120_v30 }
 0x372   :  { %v5385_v33 = vadd.f32 %v5165_v25, %v5124_v59  ;;  %v5389_v40 = vadd.f32 %v5165_v25, %v5128_v60  ;;  %v5393_v13 = vadd.f32 %v5165_v25, %v5132_v22  ;;  %v5397_v39 = vadd.f32 %v5165_v25, %v5136_v58 }
 0x373   :  { %5761 = vst [vmem:[#allocation7_spill] sm:$0xff] %v5381_v49  ;;  %v5401_v30 = vadd.f32 %v5165_v25, %v5766_v48  ;;  %v5767_v49 = vld [vmem:[#allocation16_spill] sm:$0xff] }
 0x374   :  { %5762 = vst [vmem:[#allocation9_spill] sm:$0xff] %v5385_v33  ;;  %5763 = vst [vmem:[#allocation12_spill] sm:$0xff] %v5389_v40  ;;  %v5405_v59 = vadd.f32 %v5165_v25, %v5767_v49  ;;  %v5769_v33 = vld [vmem:[#allocation17_spill] sm:$0xff]  ;;  %v5770_v40 = vld [vmem:[#allocation15_spill] sm:$0xff]  ;;  %v5425_v49 = vadd.f32 %v5165_v25, %v5169_v24  ;;  %v5445_v24 = vadd.f32 %v5165_v25, %v5189_v14  ;;  %v2334_v14 = vmax.f32 %v5221_v1, 0.0 }
 0x375   :  { %5764 = vst [vmem:[#allocation14_spill] sm:$0xff] %v5393_v13  ;;  %5765 = vst [vmem:[#allocation11_spill] sm:$0xff] %v5397_v39  ;;  %v5409_v60 = vadd.f32 %v5165_v25, %v5769_v33  ;;  %v5413_v22 = vadd.f32 %v5165_v25, %v5770_v40  ;;  %v5771_v13 = vld [vmem:[#allocation24_spill] sm:$0xff]  ;;  %v5772_v39 = vld [vmem:[#allocation2_spill] sm:$0xff]  ;;  %v5433_v40 = vadd.f32 %v5165_v25, %v5177_v26  ;;  %v2344_v1 = vmax.f32 %v5261_v5, 0.0 }
 0x376   :  { %5768 = vst [vmem:[#allocation18_spill] sm:$0xff] %v5405_v59  ;;  %v5417_v58 = vadd.f32 %v5165_v25, %v5771_v13  ;;  %v5421_v48 = vadd.f32 %v5165_v25, %v5772_v39  ;;  %v5773_v59 = vld [vmem:[#allocation4_spill] sm:$0xff]  ;;  %v5437_v13 = vadd.f32 %v5165_v25, %v5181_v9  ;;  %v5441_v39 = vadd.f32 %v5165_v25, %v5185_v54 }
 0x377   :  { %v5429_v33 = vadd.f32 %v5165_v25, %v5773_v59  ;;  %5774 = vst [vmem:[#allocation19_spill] sm:$0xff] %v5433_v40  ;;  %5777 = vst [vmem:[#allocation22_spill] sm:$0xff] %v5445_v24  ;;  %v5449_v59 = vadd.f32 %v5165_v25, %v5193_v38  ;;  %v5453_v26 = vadd.f32 %v5165_v25, %v5197_v19  ;;  %v2335_v24 = vmax.f32 %v5225_v16, 0.0 }
 0x378   :  { %5775 = vst [vmem:[#allocation20_spill] sm:$0xff] %v5437_v13  ;;  %5776 = vst [vmem:[#allocation21_spill] sm:$0xff] %v5441_v39  ;;  %v2336_v38 = vmax.f32 %v5229_v61, 0.0  ;;  %v2338_v25 = vmax.f32 %v5237_v51, 0.0  ;;  %v2339_v19 = vmax.f32 %v5241_v45, 0.0  ;;  %v2340_v9 = vmax.f32 %v5245_v52, 0.0 }
 0x379   :  { %5778 = vst [vmem:[#allocation23_spill] sm:$0xff] %v5449_v59  ;;  %5779 = vst [vmem:[#allocation13_spill] sm:$0xff] %v5453_v26  ;;  %v2337_v59 = vmax.f32 %v5233_v63, 0.0  ;;  %v2341_v13 = vmax.f32 %v5249_v18, 0.0  ;;  %v2342_v54 = vmax.f32 %v5253_v36, 0.0  ;;  %v2343_v39 = vmax.f32 %v5257_v44, 0.0 }
 0x37a   :  { %v2345_v16 = vmax.f32 %v5265_v57, 0.0  ;;  %v2346_v61 = vmax.f32 %v5269_v15, 0.0  ;;  %v2347_v63 = vmax.f32 %v5273_v37, 0.0  ;;  %v2348_v51 = vmax.f32 %v5277_v2, 0.0  ;;  %v5780_v40 = vld [vmem:[#allocation7_spill] sm:$0xff] }
 0x37b   :  { %v2349_v45 = vmax.f32 %v5281_v46, 0.0  ;;  %v2350_v52 = vmax.f32 %v5285_v27, 0.0  ;;  %v2351_v18 = vmax.f32 %v5289_v8, 0.0  ;;  %v2352_v36 = vmax.f32 %v5293_v6, 0.0  ;;  %v5781_v4 = vld [vmem:[#allocation9_spill] sm:$0xff]  ;;  %v5782_v21 = vld [vmem:[#allocation12_spill] sm:$0xff] }
 0x37c   :  { %v2353_v44 = vmax.f32 %v5297_v56, 0.0  ;;  %v2354_v5 = vmax.f32 %v5301_v0, 0.0  ;;  %v2355_v57 = vmax.f32 %v5305_v41, 0.0  ;;  %v2356_v15 = vmax.f32 %v5309_v53, 0.0  ;;  %v5783_v10 = vld [vmem:[#allocation14_spill] sm:$0xff]  ;;  %v5784_v23 = vld [vmem:[#allocation11_spill] sm:$0xff] }
 0x37d   :  { %v2357_v37 = vmax.f32 %v5313_v29, 0.0  ;;  %v2358_v2 = vmax.f32 %v5317_v11, 0.0  ;;  %v2359_v46 = vmax.f32 %v5321_v17, 0.0  ;;  %v2360_v27 = vmax.f32 %v5325_v50, 0.0  ;;  %v5785_v28 = vld [vmem:[#allocation18_spill] sm:$0xff] }
 0x37e   :  { %v2361_v8 = vmax.f32 %v5329_v3, 0.0  ;;  %v2362_v6 = vmax.f32 %v5333_v32, 0.0  ;;  %v2363_v56 = vmax.f32 %v5337_v34, 0.0  ;;  %v2364_v0 = vmax.f32 %v5341_v43, 0.0  ;;  %v5786_v26 = vld [vmem:[#allocation19_spill] sm:$0xff] }
 0x37f   :  { %v2365_v41 = vmax.f32 %v5345_v62, 0.0  ;;  %v2366_v53 = vmax.f32 %v5349_v31, 0.0  ;;  %v2367_v29 = vmax.f32 %v5353_v42, 0.0  ;;  %v2368_v11 = vmax.f32 %v5357_v20, 0.0 }
 0x380   :  { %v2369_v17 = vmax.f32 %v5361_v35, 0.0  ;;  %v2370_v50 = vmax.f32 %v5365_v7, 0.0  ;;  %v2371_v3 = vmax.f32 %v5369_v55, 0.0  ;;  %v2372_v32 = vmax.f32 %v5373_v12, 0.0 }
 0x381   :  { %v2373_v34 = vmax.f32 %v5377_v47, 0.0  ;;  %v2374_v43 = vmax.f32 %v5780_v40, 0.0  ;;  %v2375_v62 = vmax.f32 %v5781_v4, 0.0  ;;  %v2376_v31 = vmax.f32 %v5782_v21, 0.0 }
 0x382   :  { %v2377_v42 = vmax.f32 %v5783_v10, 0.0  ;;  %v2378_v20 = vmax.f32 %v5784_v23, 0.0  ;;  %v2379_v35 = vmax.f32 %v5401_v30, 0.0  ;;  %v2380_v7 = vmax.f32 %v5785_v28, 0.0  ;;  %v5787_v23 = vld [vmem:[#allocation20_spill] sm:$0xff]  ;;  %v5788_v28 = vld [vmem:[#allocation21_spill] sm:$0xff] }
 0x383   :  { %v2381_v55 = vmax.f32 %v5409_v60, 0.0  ;;  %v2382_v12 = vmax.f32 %v5413_v22, 0.0  ;;  %v2383_v47 = vmax.f32 %v5417_v58, 0.0  ;;  %v2384_v40 = vmax.f32 %v5421_v48, 0.0  ;;  %v5789_v22 = vld [vmem:[#allocation22_spill] sm:$0xff]  ;;  %v5790_v48 = vld [vmem:[#allocation23_spill] sm:$0xff] }
 0x384   :  { %v2385_v4 = vmax.f32 %v5425_v49, 0.0  ;;  %v2386_v21 = vmax.f32 %v5429_v33, 0.0  ;;  %v2387_v10 = vmax.f32 %v5786_v26, 0.0  ;;  %v2388_v30 = vmax.f32 %v5787_v23, 0.0  ;;  %v5791_v33 = vld [vmem:[#allocation13_spill] sm:$0xff]  ;;  %v5792_v23 = vld [vmem:[#allocation6_spill] sm:$0xff] }
 0x385   :  { %v2389_v60 = vmax.f32 %v5788_v28, 0.0  ;;  %v2390_v58 = vmax.f32 %v5789_v22, 0.0  ;;  %v2391_v49 = vmax.f32 %v5790_v48, 0.0  ;;  %v2392_v26 = vmax.f32 %v5791_v33, 0.0  ;;  %v5794_v22 = vld [vmem:[#allocation3_spill] sm:$0xff] }
 0x386   :  { %v5793_v28 = vmax.f32 %v5792_v23, 0.0  ;;  %v5795_v48 = vmax.f32 %v5794_v22, 0.0  ;;  %v5796_v23 = vld [vmem:[#allocation5_spill] sm:$0xff] }
 0x387   :  { %v5797_v22 = vmax.f32 %v5796_v23, 0.0 }
 0x388   :  { %v2956_v33 = vpack.c.bf16 %v5795_v48, %v5793_v28  ;;  %v5798_v28 = vld [vmem:[#allocation8_spill] sm:$0xff] }
 0x389   :  { %v5799_v48 = vmax.f32 %v5798_v28, 0.0  ;;  %v5800_v28 = vld [vmem:[#allocation10_spill] sm:$0xff] }
 0x38a   :  { %2957 = vst [vmem:[%s5629_s4] sm:$0xff] %v2956_v33  }
 0x38b   :  { %v2961_v23 = vpack.c.bf16 %v5799_v48, %v5797_v22  ;;  %v5801_v22 = vmax.f32 %v5800_v28, 0.0  ;;  %v2971_v28 = vpack.c.bf16 %v2336_v38, %v2335_v24  ;;  %v2986_v24 = vpack.c.bf16 %v2342_v54, %v2341_v13 }
 0x38c   :  { %v2991_v38 = vpack.c.bf16 %v2344_v1, %v2343_v39  ;;  %v3006_v13 = vpack.c.bf16 %v2350_v52, %v2349_v45  ;;  %v3011_v39 = vpack.c.bf16 %v2352_v36, %v2351_v18  ;;  %v3016_v54 = vpack.c.bf16 %v2354_v5, %v2353_v44 }
 0x38d   :  { %v2966_v48 = vpack.c.bf16 %v2334_v14, %v5801_v22  ;;  %v2976_v14 = vpack.c.bf16 %v2338_v25, %v2337_v59  ;;  %v2981_v22 = vpack.c.bf16 %v2340_v9, %v2339_v19  ;;  %3113 = vst [vmem:[%s5629_s4 + $0x8] sm:$0xff] %v2961_v23   ;;  %3115 = vst [vmem:[%s5629_s4 + $0x18] sm:$0xff] %v2971_v28  }
 0x38e   :  { %v2996_v59 = vpack.c.bf16 %v2346_v61, %v2345_v16  ;;  %v3001_v9 = vpack.c.bf16 %v2348_v51, %v2347_v63  ;;  %3118 = vst [vmem:[%s5629_s4 + $0x30] sm:$0xff] %v2986_v24   ;;  %3119 = vst [vmem:[%s5629_s4 + $0x38] sm:$0xff] %v2991_v38   ;;  %v3021_v25 = vpack.c.bf16 %v2356_v15, %v2355_v57 }
 0x38f   :  { %3114 = vst [vmem:[%s5629_s4 + $0x10] sm:$0xff] %v2966_v48   ;;  %3116 = vst [vmem:[%s5629_s4 + $0x20] sm:$0xff] %v2976_v14   ;;  %v3026_v19 = vpack.c.bf16 %v2358_v2, %v2357_v37  ;;  %v3031_v1 = vpack.c.bf16 %v2360_v27, %v2359_v46  ;;  %v3036_v16 = vpack.c.bf16 %v2362_v6, %v2361_v8 }
 0x390   :  { %3117 = vst [vmem:[%s5629_s4 + $0x28] sm:$0xff] %v2981_v22   ;;  %3120 = vst [vmem:[%s5629_s4 + $0x40] sm:$0xff] %v2996_v59   ;;  %v3041_v61 = vpack.c.bf16 %v2364_v0, %v2363_v56  ;;  %v3046_v63 = vpack.c.bf16 %v2366_v53, %v2365_v41  ;;  %v3051_v51 = vpack.c.bf16 %v2368_v11, %v2367_v29 }
 0x391   :  { %3121 = vst [vmem:[%s5629_s4 + $0x48] sm:$0xff] %v3001_v9   ;;  %3122 = vst [vmem:[%s5629_s4 + $0x50] sm:$0xff] %v3006_v13   ;;  %v3056_v45 = vpack.c.bf16 %v2370_v50, %v2369_v17  ;;  %v3061_v52 = vpack.c.bf16 %v2372_v32, %v2371_v3  ;;  %v3066_v18 = vpack.c.bf16 %v2374_v43, %v2373_v34 }
 0x392   :  { %3123 = vst [vmem:[%s5629_s4 + $0x58] sm:$0xff] %v3011_v39   ;;  %3124 = vst [vmem:[%s5629_s4 + $0x60] sm:$0xff] %v3016_v54   ;;  %v3071_v36 = vpack.c.bf16 %v2376_v31, %v2375_v62  ;;  %v3076_v44 = vpack.c.bf16 %v2378_v20, %v2377_v42  ;;  %v3081_v5 = vpack.c.bf16 %v2380_v7, %v2379_v35 }
 0x393   :  { %3125 = vst [vmem:[%s5629_s4 + $0x68] sm:$0xff] %v3021_v25   ;;  %3126 = vst [vmem:[%s5629_s4 + $0x70] sm:$0xff] %v3026_v19   ;;  %v3086_v57 = vpack.c.bf16 %v2382_v12, %v2381_v55  ;;  %v3091_v15 = vpack.c.bf16 %v2384_v40, %v2383_v47  ;;  %v3096_v37 = vpack.c.bf16 %v2386_v21, %v2385_v4 }
 0x394   :  { %3127 = vst [vmem:[%s5629_s4 + $0x78] sm:$0xff] %v3031_v1   ;;  %3128 = vst [vmem:[%s5629_s4 + $0x80] sm:$0xff] %v3036_v16   ;;  %v3101_v2 = vpack.c.bf16 %v2388_v30, %v2387_v10  ;;  %v3106_v46 = vpack.c.bf16 %v2390_v58, %v2389_v60  ;;  %v3111_v27 = vpack.c.bf16 %v2392_v26, %v2391_v49 }
 0x395   :  { %3129 = vst [vmem:[%s5629_s4 + $0x88] sm:$0xff] %v3041_v61   ;;  %3130 = vst [vmem:[%s5629_s4 + $0x90] sm:$0xff] %v3046_v63  }
 0x396   :  { %3131 = vst [vmem:[%s5629_s4 + $0x98] sm:$0xff] %v3051_v51   ;;  %3132 = vst [vmem:[%s5629_s4 + $0xa0] sm:$0xff] %v3056_v45  }
 0x397   :  { %3133 = vst [vmem:[%s5629_s4 + $0xa8] sm:$0xff] %v3061_v52   ;;  %3134 = vst [vmem:[%s5629_s4 + $0xb0] sm:$0xff] %v3066_v18  }
 0x398   :  { %3135 = vst [vmem:[%s5629_s4 + $0xb8] sm:$0xff] %v3071_v36   ;;  %3136 = vst [vmem:[%s5629_s4 + $0xc0] sm:$0xff] %v3076_v44  }
 0x399   :  { %3137 = vst [vmem:[%s5629_s4 + $0xc8] sm:$0xff] %v3081_v5   ;;  %3138 = vst [vmem:[%s5629_s4 + $0xd0] sm:$0xff] %v3086_v57  }
 0x39a   :  { %3139 = vst [vmem:[%s5629_s4 + $0xd8] sm:$0xff] %v3091_v15   ;;  %3140 = vst [vmem:[%s5629_s4 + $0xe0] sm:$0xff] %v3096_v37  }
 0x39b   :  { %3141 = vst [vmem:[%s5629_s4 + $0xe8] sm:$0xff] %v3101_v2   ;;  %3142 = vst [vmem:[%s5629_s4 + $0xf0] sm:$0xff] %v3106_v46  }
 0x39c   :  { %3143 = vst [vmem:[%s5629_s4 + $0xf8] sm:$0xff] %v3111_v27  }

// kernel: conv_block_forward.3
= control target key start
LH: loop header
LB: loop body
LE: loop exit
PB: predicated region body
PF: predicated region fallthrough
CT: control target
= control target key end

     0   :  { %v8051_v0 = vmov 0   ;;  %vm450_vm0 = vsmask.f32 7424  ;;  %vm919_vm1 = vcmask 1046528   ;;  %s8046_s1 = inlined_call_operand.vmem [shape: bf16[1152,128], index: 1, kind: input, shape index: {}]   ;;  %s8047_s0 = inlined_call_operand.vmem [shape: bf16[2,18,18,128], index: 0, kind: input, shape index: {}]   ;;  %s8048_s2 = inlined_call_operand.vmem [shape: f32[1,128], index: 2, kind: input, shape index: {}]   ;;  %s8049_s3 = inlined_call_operand.vmem [shape: f32[1,128], index: 3, kind: input, shape index: {}]   ;;  %s8050_s4 = inlined_call_operand.vmem [shape: bf16[512,128], index: 4, kind: output, shape index: {}]  }
   0x1   :  { %1640 = vmatprep.subr.bf16.mxu0 %v8051_v0  ;;  %4470 = vmatprep.subr.bf16.mxu1 %v8051_v0  ;;  %v4503_v1 = vld [vmem:[%s8046_s1 + $0x38] sm:$0xff]   ;;  %v4504_v2 = vld [vmem:[%s8046_s1 + $0x30] sm:$0xff]   ;;  %v4505_v3 = vld [vmem:[%s8046_s1 + $0x28] sm:$0xff]  }
   0x2   :  { %1641 = vmatpush1.bf16.msra.mxu0 %v4503_v1  ;;  %4486 = vmatpush1.bf16.msra.mxu1 %v4503_v1  ;;  %v4506_v4 = vld [vmem:[%s8046_s1 + $0x20] sm:$0xff]   ;;  %v4507_v5 = vld [vmem:[%s8046_s1 + $0x18] sm:$0xff]   ;;  %v4508_v6 = vld [vmem:[%s8046_s1 + $0x10] sm:$0xff]  }
   0x3   :  { %1642 = vmatprep.subr.bf16.mxu0 %v8051_v0  ;;  %4471 = vmatprep.subr.bf16.mxu1 %v8051_v0  ;;  %v4752_v7 = vld [vmem:[%s8047_s0] sm:$0xff]   ;;  %v4757_v8 = vld [vmem:[%s8047_s0 + $0x8] ss:$0 sps:$4 sm:$0x11]   ;;  %v4762_v9 = vld [vmem:[%s8047_s0 + $0x138] sm:$0xff]  }
   0x4   :  { %v452_v10 = vshrl.u32 %v4752_v7, 16  ;;  %v454_v11 = vshll.u32 %v4752_v7, 16  ;;  %v459_v12 = vshll.u32 %v4757_v8, 16  ;;  %v4522_v13 = vld [vmem:[%s8047_s0 + $0x140] ss:$0 sps:$4 sm:$0x11]  }
   0x5   :  { %v764_v14 = vshrl.u32 %v4762_v9, 16  ;;  %v766_v15 = vshll.u32 %v4762_v9, 16  ;;  %v4509_v18 = vld [vmem:[%s8046_s1 + $0x8] sm:$0xff]   ;;  %v771_v20 = vshll.u32 %v4522_v13, 16  ;;  %v4510_v25 = vld [vmem:[%s8046_s1] sm:$0xff]   ;;  %v4511_v27 = vld [vmem:[%s8046_s1 + $0x78] sm:$0xff]  }
   0x6   :  { %1643 = vmatpush1.bf16.msra.mxu0 %v4504_v2  ;;  %4487 = vmatpush1.bf16.msra.mxu1 %v4504_v2  ;;  %v456_v16 = vrot.slane %v454_v11, 1  ;;  %v461_v17 = vrot.slane %v459_v12, 1  ;;  %v4512_v28 = vld [vmem:[%s8046_s1 + $0x70] sm:$0xff]   ;;  %v4513_v29 = vld [vmem:[%s8046_s1 + $0x68] sm:$0xff]   ;;  %v4514_v30 = vld [vmem:[%s8046_s1 + $0x60] sm:$0xff]  }
   0x7   :  { %1644 = vmatprep.subr.bf16.mxu0 %v8051_v0  ;;  %4472 = vmatprep.subr.bf16.mxu1 %v8051_v0  ;;  %v768_v19 = vrot.slane %v766_v15, 1  ;;  %v773_v23 = vrot.slane %v771_v20, 1  ;;  %v4515_v31 = vld [vmem:[%s8046_s1 + $0x58] sm:$0xff]   ;;  %v4817_v32 = vld [vmem:[%s8047_s0 + $0xc] sm:$0xff]   ;;  %v4822_v33 = vld [vmem:[%s8047_s0 + $0x144] sm:$0xff]  }
   0x8   :  { %v457_v21 = vor.u32 %v456_v16, %v452_v10  ;;  %v4516_v34 = vld [vmem:[%s8046_s1 + $0x50] sm:$0xff]   ;;  %v4529_v36 = vld [vmem:[%s8047_s0 + $0x14c] ss:$0 sps:$4 sm:$0x11]   ;;  %v466_v37 = vshll.u32 %v4817_v32, 16  ;;  %v778_v38 = vshll.u32 %v4822_v33, 16 }
   0x9   :  { %v769_v22 = vor.u32 %v768_v19, %v764_v14  ;;  %v4830_v35 = vld [vmem:[%s8047_s0 + $0x14] ss:$0 sps:$4 sm:$0x11]   ;;  %v4517_v39 = vld [vmem:[%s8046_s1 + $0x48] sm:$0xff]   ;;  %v464_v40 = vshrl.u32 %v4817_v32, 16  ;;  %v4848_v41 = vld [vmem:[%s8047_s0 + $0x18] sm:$0xff]  }
   0xa   :  { %1645 = vmatpush1.bf16.msra.mxu0 %v4505_v3  ;;  %4488 = vmatpush1.bf16.msra.mxu1 %v4505_v3  ;;  %v462_v24 = vsel %vm450_vm0, %v457_v21, %v461_v17  ;;  %v468_v42 = vrot.slane %v466_v37, 1  ;;  %v471_v43 = vshll.u32 %v4830_v35, 16  ;;  %v776_v44 = vshrl.u32 %v4822_v33, 16  ;;  %v4855_v45 = vld [vmem:[%s8047_s0 + $0x150] sm:$0xff]   ;;  %v4518_v49 = vld [vmem:[%s8046_s1 + $0x40] sm:$0xff]   ;;  %v4523_v55 = vld [vmem:[%s8046_s1 + $0xb8] sm:$0xff]  }
   0xb   :  { %1646 = vmatprep.subr.bf16.mxu0 %v8051_v0  ;;  %4473 = vmatprep.subr.bf16.mxu1 %v8051_v0  ;;  %v4784_v26 = vsel %vm450_vm0, %v769_v22, %v773_v23  ;;  %v780_v46 = vrot.slane %v778_v38, 1  ;;  %v783_v47 = vshll.u32 %v4529_v36, 16  ;;  %v4860_v48 = vld [vmem:[%s8047_s0 + $0x20] ss:$0 sps:$4 sm:$0x11]   ;;  %v478_v51 = vshll.u32 %v4848_v41, 16 }
   0xc   :  { %8155 = vst [vmem:[#allocation2_spill] sm:$0xff] %v4784_v26  ;;  %1672 = vmatprep.mubr.bf16.mxu0 %v462_v24  ;;  %1864 = vmatprep.mubr.bf16.mxu1 %v4784_v26  ;;  %v4536_v50 = vld [vmem:[%s8047_s0 + $0x158] ss:$0 sps:$4 sm:$0x11]   ;;  %v469_v52 = vor.u32 %v468_v42, %v464_v40  ;;  %v473_v53 = vrot.slane %v471_v43, 1  ;;  %v790_v54 = vshll.u32 %v4855_v45, 16 }
   0xd   :  { %v4524_v56 = vld [vmem:[%s8046_s1 + $0x138] sm:$0xff]   ;;  %v781_v57 = vor.u32 %v780_v46, %v776_v44  ;;  %v785_v58 = vrot.slane %v783_v47, 1  ;;  %v476_v59 = vshrl.u32 %v4848_v41, 16  ;;  %v4882_v60 = vld [vmem:[%s8047_s0 + $0x24] sm:$0xff]   ;;  %v480_v61 = vrot.slane %v478_v51, 1  ;;  %v4532_v12 = vld [vmem:[%s8046_s1 + $0x130] sm:$0xff]  }
   0xe   :  { %1647 = vmatpush1.bf16.msra.mxu0 %v4506_v4  ;;  %4489 = vmatpush1.bf16.msra.mxu1 %v4506_v4  ;;  %v483_v62 = vshll.u32 %v4860_v48, 16  ;;  %v788_v63 = vshrl.u32 %v4855_v45, 16  ;;  %v795_v1 = vshll.u32 %v4536_v50, 16  ;;  %v4889_v2 = vsel %vm450_vm0, %v469_v52, %v473_v53  ;;  %v4894_v4 = vld [vmem:[%s8047_s0 + $0x2c] ss:$0 sps:$4 sm:$0x11]  }
   0xf   :  { %1648 = vmatprep.subr.bf16.mxu0 %v8051_v0  ;;  %4474 = vmatprep.subr.bf16.mxu1 %v8051_v0  ;;  %v792_v3 = vrot.slane %v790_v54, 1  ;;  %v4907_v10 = vsel %vm450_vm0, %v781_v57, %v785_v58  ;;  %v4542_v11 = vld [vmem:[%s8047_s0 + $0x164] ss:$0 sps:$4 sm:$0x11]   ;;  %v490_v13 = vshll.u32 %v4882_v60, 16  ;;  %v488_v19 = vshrl.u32 %v4882_v60, 16 }
  0x10   :  { %8156 = vst [vmem:[#allocation3_spill] sm:$0xff] %v4907_v10  ;;  %v485_v14 = vrot.slane %v483_v62, 1  ;;  %v797_v16 = vrot.slane %v795_v1, 1  ;;  %v495_v21 = vshll.u32 %v4894_v4, 16  ;;  %v807_v24 = vshll.u32 %v4542_v11, 16  ;;  %v4531_v36 = vld [vmem:[%s8046_s1 + $0xa0] sm:$0xff]  }
  0x11   :  { %v793_v15 = vor.u32 %v792_v3, %v788_v63  ;;  %v492_v20 = vrot.slane %v490_v13, 1  ;;  %v4552_v44 = vld [vmem:[%s8046_s1 + $0x120] sm:$0xff]   ;;  %v4537_v47 = vld [vmem:[%s8046_s1 + $0x98] sm:$0xff]  }
  0x12   :  { %1649 = vmatpush1.bf16.msra.mxu0 %v4507_v5  ;;  %4490 = vmatpush1.bf16.msra.mxu1 %v4507_v5  ;;  %v4899_v5 = vld [vmem:[%s8047_s0 + $0x15c] sm:$0xff]   ;;  %v497_v37 = vrot.slane %v495_v21, 1  ;;  %v809_v42 = vrot.slane %v807_v24, 1  ;;  %v4996_v57 = vld [vmem:[%s8047_s0 + $0x174] sm:$0xff]  }
  0x13   :  { %1650 = vmatprep.subr.bf16.mxu0 %v8051_v0  ;;  %4475 = vmatprep.subr.bf16.mxu1 %v8051_v0  ;;  %v802_v17 = vshll.u32 %v4899_v5, 16  ;;  %v800_v23 = vshrl.u32 %v4899_v5, 16  ;;  %v4987_v52 = vld [vmem:[%s8047_s0 + $0x3c] sm:$0xff]   ;;  %v5003_v58 = vld [vmem:[%s8047_s0 + $0x44] ss:$0 sps:$4 sm:$0x11]  }
  0x14   :  { %v514_v63 = vshll.u32 %v4987_v52, 16  ;;  %v4556_v1 = vld [vmem:[%s8047_s0 + $0x17c] ss:$0 sps:$4 sm:$0x11]   ;;  %v826_v11 = vshll.u32 %v4996_v57, 16  ;;  %v512_v13 = vshrl.u32 %v4987_v52, 16 }
  0x15   :  { %v5042_v21 = vld [vmem:[%s8047_s0 + $0x180] sm:$0xff]  }
  0x16   :  { %1651 = vmatpush1.bf16.msra.mxu0 %v4508_v6  ;;  %4491 = vmatpush1.bf16.msra.mxu1 %v4508_v6  ;;  %v4525_v6 = vld [vmem:[%s8046_s1 + $0xb0] sm:$0xff]   ;;  %v4545_v24 = vld [vmem:[%s8046_s1 + $0x80] sm:$0xff]  }
  0x17   :  { %1652 = vmatprep.subr.bf16.mxu0 %v8051_v0  ;;  %4476 = vmatprep.subr.bf16.mxu1 %v8051_v0 }
  0x1a   :  { %1653 = vmatpush1.bf16.msra.mxu0 %v4509_v18  ;;  %4492 = vmatpush1.bf16.msra.mxu1 %v4509_v18  ;;  %v4530_v18 = vld [vmem:[%s8046_s1 + $0xa8] sm:$0xff]  }
  0x1b   :  { %1654 = vmatprep.subr.bf16.mxu0 %v8051_v0  ;;  %4477 = vmatprep.subr.bf16.mxu1 %v8051_v0 }
  0x1e   :  { %1655 = vmatpush1.bf16.msra.mxu0 %v4510_v25  ;;  %4493 = vmatpush1.bf16.msra.mxu1 %v4510_v25  ;;  %v4544_v25 = vld [vmem:[%s8046_s1 + $0x128] sm:$0xff]  }
  0x1f   :  { %1656 = vmatprep.subr.bf16.mxu0 %v8051_v0  ;;  %4478 = vmatprep.subr.bf16.mxu1 %v8051_v0 }
  0x22   :  { %1657 = vmatpush2.bf16.msra.mxu0 %v4511_v27  ;;  %4494 = vmatpush2.bf16.msra.mxu1 %v4511_v27  ;;  %v4938_v27 = vld [vmem:[%s8047_s0 + $0x30] sm:$0xff]  }
  0x23   :  { %1658 = vmatprep.subr.bf16.mxu0 %v8051_v0  ;;  %4479 = vmatprep.subr.bf16.mxu1 %v8051_v0  ;;  %v502_v38 = vshll.u32 %v4938_v27, 16 }
  0x25   :  { %v504_v50 = vrot.slane %v502_v38, 1  ;;  %v4578_v38 = vld [vmem:[%s8046_s1 + $0x108] sm:$0xff]  }
  0x26   :  { %1659 = vmatpush2.bf16.msra.mxu0 %v4512_v28  ;;  %4495 = vmatpush2.bf16.msra.mxu1 %v4512_v28  ;;  %v4941_v28 = vsel %vm450_vm0, %v793_v15, %v797_v16  ;;  %v519_v15 = vshll.u32 %v5003_v58, 16  ;;  %v824_v16 = vshrl.u32 %v4996_v57, 16 }
  0x27   :  { %1660 = vmatprep.subr.bf16.mxu0 %v8051_v0  ;;  %4480 = vmatprep.subr.bf16.mxu1 %v8051_v0  ;;  %8157 = vst [vmem:[#allocation4_spill] sm:$0xff] %v4941_v28 }
  0x2a   :  { %1661 = vmatpush2.bf16.msra.mxu0 %v4513_v29  ;;  %4496 = vmatpush2.bf16.msra.mxu1 %v4513_v29  ;;  %v804_v29 = vrot.slane %v802_v17, 1  ;;  %v5034_v17 = vld [vmem:[%s8047_s0 + $0x48] sm:$0xff]  }
  0x2b   :  { %1662 = vmatprep.subr.bf16.mxu0 %v8051_v0  ;;  %4481 = vmatprep.subr.bf16.mxu1 %v8051_v0 }
  0x2c   :  { %v805_v40 = vor.u32 %v804_v29, %v800_v23  ;;  %v4572_v23 = vld [vmem:[%s8046_s1 + $0x110] sm:$0xff]   ;;  %v4562_v29 = vld [vmem:[%s8047_s0 + $0x188] ss:$0 sps:$4 sm:$0x11]  }
  0x2e   :  { %1663 = vmatpush2.bf16.msra.mxu0 %v4514_v30  ;;  %4497 = vmatpush2.bf16.msra.mxu1 %v4514_v30  ;;  %v4946_v30 = vld [vmem:[%s8047_s0 + $0x168] sm:$0xff]   ;;  %v4990_v53 = vsel %vm450_vm0, %v805_v40, %v809_v42  ;;  %v5075_v40 = vld [vmem:[%s8047_s0 + $0x54] sm:$0xff]  }
  0x2f   :  { %1664 = vmatprep.subr.bf16.mxu0 %v8051_v0  ;;  %4482 = vmatprep.subr.bf16.mxu1 %v8051_v0  ;;  %v814_v43 = vshll.u32 %v4946_v30, 16  ;;  %8158 = vst [vmem:[#allocation5_spill] sm:$0xff] %v4990_v53  ;;  %v812_v54 = vshrl.u32 %v4946_v30, 16 }
  0x32   :  { %1665 = vmatpush2.bf16.msra.mxu0 %v4515_v31  ;;  %4498 = vmatpush2.bf16.msra.mxu1 %v4515_v31  ;;  %v921_v31 = vrot.slane %v4757_v8, 1  ;;  %v4549_v8 = vld [vmem:[%s8047_s0 + $0x170] ss:$0 sps:$4 sm:$0x11]  }
  0x33   :  { %1666 = vmatprep.subr.bf16.mxu0 %v8051_v0  ;;  %4483 = vmatprep.subr.bf16.mxu1 %v8051_v0 }
  0x36   :  { %1667 = vmatpush2.bf16.msra.mxu0 %v4516_v34  ;;  %4499 = vmatpush2.bf16.msra.mxu1 %v4516_v34  ;;  %v4954_v34 = vld [vmem:[%s8047_s0 + $0x38] ss:$0 sps:$4 sm:$0x11]  }
  0x37   :  { %1668 = vmatprep.subr.bf16.mxu0 %v8051_v0  ;;  %4484 = vmatprep.subr.bf16.mxu1 %v8051_v0  ;;  %v507_v51 = vshll.u32 %v4954_v34, 16 }
  0x39   :  { %v509_v62 = vrot.slane %v507_v51, 1  ;;  %v836_v51 = vshrl.u32 %v5042_v21, 16 }
  0x3a   :  { %1669 = vmatpush2.bf16.msra.mxu0 %v4517_v39  ;;  %4500 = vmatpush2.bf16.msra.mxu1 %v4517_v39  ;;  %v920_v39 = vrot.slane %v4752_v7, 1 }
  0x3b   :  { %1670 = vmatprep.subr.bf16.mxu0 %v8051_v0  ;;  %4485 = vmatprep.subr.bf16.mxu1 %v8051_v0 }
  0x3c   :  { %v4973_v46 = vsel %vm919_vm1, %v920_v39, %v921_v31  ;;  %v521_v31 = vrot.slane %v519_v15, 1  ;;  %v4550_v39 = vld [vmem:[%s8046_s1 + $0xf8] sm:$0xff]  }
  0x3e   :  { %1671 = vmatpush2.bf16.msra.mxu0 %v4518_v49  ;;  %4501 = vmatpush2.bf16.msra.mxu1 %v4518_v49  ;;  %v500_v49 = vshrl.u32 %v4938_v27, 16 }
  0x3f   :  { %1929 = vmatprep.subr.bf16.mxu1 %v8051_v0  ;;  %2218 = vmatprep.subr.bf16.mxu0 %v8051_v0 }
  0x41   :  { %1673 = vmatmul.mubr.bf16.vlgmr.msra.gmra.mxu0 %v4752_v7  ;;  %1865 = vmatmul.mubr.bf16.vlgmr.msra.gmra.mxu1 %v4762_v9  ;;  %v481_v9 = vor.u32 %v480_v61, %v476_v59  ;;  %v4564_v59 = vld [vmem:[%s8046_s1 + $0x118] sm:$0xff]   ;;  %v4538_v61 = vld [vmem:[%s8046_s1 + $0x90] sm:$0xff]  }
  0x42   :  { %1930 = vmatpush1.bf16.msra.mxu1 %v4523_v55  ;;  %2219 = vmatpush1.bf16.msra.mxu0 %v4524_v56  ;;  %v816_v55 = vrot.slane %v814_v43, 1  ;;  %v819_v56 = vshll.u32 %v4549_v8, 16  ;;  %v524_v43 = vshrl.u32 %v5034_v17, 16 }
  0x43   :  { %1931 = vmatprep.subr.bf16.mxu1 %v8051_v0  ;;  %1680 = vmatprep.mubr.bf16.mxu0 %v4889_v2  ;;  %v4928_v22 = vsel %vm450_vm0, %v481_v9, %v485_v14  ;;  %v516_v14 = vrot.slane %v514_v63, 1  ;;  %v4569_v63 = vld [vmem:[%s8047_s0 + $0x194] ss:$0 sps:$4 sm:$0x11]  }
  0x44   :  { %1872 = vmatprep.mubr.bf16.mxu1 %v4907_v10  ;;  %2220 = vmatprep.subr.bf16.mxu0 %v8051_v0  ;;  %v817_v3 = vor.u32 %v816_v55, %v812_v54  ;;  %v843_v55 = vshll.u32 %v4562_v29, 16  ;;  %v4587_v29 = vld [vmem:[%s8046_s1 + $0x178] sm:$0xff]  }
  0x46   :  { %1932 = vmatpush1.bf16.msra.mxu1 %v4525_v6  ;;  %2221 = vmatpush1.bf16.msra.mxu0 %v4532_v12  ;;  %v821_v6 = vrot.slane %v819_v56, 1  ;;  %v4543_v12 = vld [vmem:[%s8046_s1 + $0x88] sm:$0xff]  }
  0x47   :  { %1933 = vmatprep.subr.bf16.mxu1 %v8051_v0  ;;  %2222 = vmatprep.subr.bf16.mxu0 %v8051_v0  ;;  %v5093_v56 = vld [vmem:[%s8047_s0 + $0x18c] sm:$0xff]  }
  0x48   :  { %v848_v15 = vshrl.u32 %v5093_v56, 16 }
  0x49   :  { %1681 = vmatmul.mubr.bf16.gmra.mxu0 %v4817_v32  ;;  %1873 = vmatmul.mubr.bf16.gmra.mxu1 %v4822_v33  ;;  %v493_v33 = vor.u32 %v492_v20, %v488_v19  ;;  %v828_v19 = vrot.slane %v826_v11, 1  ;;  %v831_v20 = vshll.u32 %v4556_v1, 16  ;;  %v4557_v11 = vld [vmem:[%s8046_s1 + $0xe8] sm:$0xff]  }
  0x4a   :  { %1934 = vmatpush1.bf16.msra.mxu1 %v4530_v18  ;;  %1688 = vmatprep.mubr.bf16.mxu0 %v4928_v22  ;;  %v5037_v18 = vsel %vm450_vm0, %v817_v3, %v821_v6  ;;  %v845_v3 = vrot.slane %v843_v55, 1  ;;  %v850_v6 = vshll.u32 %v5093_v56, 16  ;;  %v4565_v55 = vld [vmem:[%s8046_s1 + $0xd0] sm:$0xff]  }
  0x4b   :  { %1935 = vmatprep.subr.bf16.mxu1 %v8051_v0  ;;  %1880 = vmatprep.mubr.bf16.mxu1 %v4941_v28  ;;  %v4980_v7 = vsel %vm450_vm0, %v493_v33, %v497_v37  ;;  %8159 = vst [vmem:[#allocation6_spill] sm:$0xff] %v5037_v18  ;;  %v829_v37 = vor.u32 %v828_v19, %v824_v16  ;;  %v833_v8 = vrot.slane %v831_v20, 1  ;;  %v838_v33 = vshll.u32 %v5042_v21, 16  ;;  %v5128_v20 = vld [vmem:[%s8047_s0 + $0x60] sm:$0xff]   ;;  %v4632_v28 = vld [vmem:[%s8046_s1 + $0x1d0] sm:$0xff]  }
  0x4c   :  { %2223 = vmatpush1.bf16.msra.mxu0 %v4544_v25  ;;  %v5056_v25 = vld [vmem:[%s8047_s0 + $0x50] ss:$0 sps:$4 sm:$0x11]   ;;  %v855_v19 = vshll.u32 %v4569_v63, 16  ;;  %v4570_v63 = vld [vmem:[%s8046_s1 + $0xc8] sm:$0xff]  }
  0x4d   :  { %2224 = vmatprep.subr.bf16.mxu0 %v8051_v0  ;;  %v840_v54 = vrot.slane %v838_v33, 1 }
  0x4e   :  { %1936 = vmatpush1.bf16.msra.mxu1 %v4531_v36  ;;  %v526_v36 = vshll.u32 %v5034_v17, 16  ;;  %v857_v33 = vrot.slane %v855_v19, 1 }
  0x4f   :  { %1937 = vmatprep.subr.bf16.mxu1 %v8051_v0  ;;  %v841_v1 = vor.u32 %v840_v54, %v836_v51 }
  0x50   :  { %2225 = vmatpush1.bf16.msra.mxu0 %v4552_v44  ;;  %v528_v44 = vrot.slane %v526_v36, 1 }
  0x51   :  { %1689 = vmatmul.mubr.bf16.gmra.mxu0 %v4848_v41  ;;  %1881 = vmatmul.mubr.bf16.gmra.mxu1 %v4855_v45  ;;  %v505_v45 = vor.u32 %v504_v50, %v500_v49  ;;  %v4551_v49 = vld [vmem:[%s8046_s1 + $0xf0] sm:$0xff]   ;;  %v5087_v50 = vsel %vm450_vm0, %v829_v37, %v833_v8  ;;  %v5147_v37 = vld [vmem:[%s8047_s0 + $0x68] ss:$0 sps:$4 sm:$0x11]  }
  0x52   :  { %1938 = vmatpush1.bf16.msra.mxu1 %v4537_v47  ;;  %1696 = vmatprep.mubr.bf16.mxu0 %v4980_v7  ;;  %v531_v47 = vshll.u32 %v5056_v25, 16  ;;  %8160 = vst [vmem:[#allocation7_spill] sm:$0xff] %v5087_v50  ;;  %v555_v51 = vshll.u32 %v5147_v37, 16 }
  0x53   :  { %1939 = vmatprep.subr.bf16.mxu1 %v8051_v0  ;;  %1888 = vmatprep.mubr.bf16.mxu1 %v4990_v53  ;;  %v5027_v9 = vsel %vm450_vm0, %v505_v45, %v509_v62  ;;  %v538_v45 = vshll.u32 %v5075_v40, 16  ;;  %v529_v62 = vor.u32 %v528_v44, %v524_v43  ;;  %v5160_v43 = vld [vmem:[%s8047_s0 + $0x6c] sm:$0xff]  }
  0x54   :  { %2226 = vmatprep.subr.bf16.mxu0 %v8051_v0 }
  0x55   :  { %2227 = vmatpush1.bf16.msra.mxu0 %v4564_v59  ;;  %v4581_v59 = vld [vmem:[%s8046_s1 + $0x100] sm:$0xff]  }
  0x56   :  { %1940 = vmatpush1.bf16.msra.mxu1 %v4538_v61  ;;  %2228 = vmatprep.subr.bf16.mxu0 %v8051_v0  ;;  %v5104_v61 = vld [vmem:[%s8047_s0 + $0x5c] ss:$0 sps:$4 sm:$0x11]  }
  0x57   :  { %1941 = vmatprep.subr.bf16.mxu1 %v8051_v0 }
  0x59   :  { %1697 = vmatmul.mubr.bf16.gmra.mxu0 %v4882_v60  ;;  %1889 = vmatmul.mubr.bf16.gmra.mxu1 %v4899_v5  ;;  %v517_v5 = vor.u32 %v516_v14, %v512_v13  ;;  %v540_v13 = vrot.slane %v538_v45, 1  ;;  %v543_v14 = vshll.u32 %v5104_v61, 16  ;;  %v5183_v45 = vld [vmem:[%s8047_s0 + $0x74] ss:$0 sps:$4 sm:$0x11]  }
  0x5a   :  { %1942 = vmatpush1.bf16.msra.mxu1 %v4543_v12  ;;  %1704 = vmatprep.mubr.bf16.mxu0 %v5027_v9  ;;  %v536_v12 = vshrl.u32 %v5075_v40, 16 }
  0x5b   :  { %1943 = vmatprep.subr.bf16.mxu1 %v8051_v0  ;;  %1896 = vmatprep.mubr.bf16.mxu1 %v5037_v18  ;;  %v5079_v42 = vsel %vm450_vm0, %v517_v5, %v521_v31  ;;  %v4558_v5 = vld [vmem:[%s8046_s1 + $0xe0] sm:$0xff]   ;;  %v545_v31 = vrot.slane %v543_v14, 1 }
  0x5c   :  { %2229 = vmatpush1.bf16.msra.mxu0 %v4572_v23  ;;  %v5131_v23 = vsel %vm450_vm0, %v841_v1, %v845_v3  ;;  %v541_v36 = vor.u32 %v540_v13, %v536_v12  ;;  %v560_v1 = vshrl.u32 %v5160_v43, 16  ;;  %v4600_v13 = vld [vmem:[%s8046_s1 + $0x160] sm:$0xff]  }
  0x5d   :  { %2230 = vmatprep.subr.bf16.mxu0 %v8051_v0  ;;  %8161 = vst [vmem:[#allocation8_spill] sm:$0xff] %v5131_v23  ;;  %v4571_v14 = vld [vmem:[%s8046_s1 + $0xc0] sm:$0xff]  }
  0x5e   :  { %1944 = vmatpush1.bf16.msra.mxu1 %v4545_v24  ;;  %v852_v24 = vrot.slane %v850_v6, 1  ;;  %v5164_v44 = vsel %vm450_vm0, %v541_v36, %v545_v31  ;;  %v567_v6 = vshll.u32 %v5183_v45, 16 }
  0x5f   :  { %1945 = vmatprep.subr.bf16.mxu1 %v8051_v0 }
  0x60   :  { %2231 = vmatpush1.bf16.msra.mxu0 %v4578_v38  ;;  %v853_v8 = vor.u32 %v852_v24, %v848_v15  ;;  %v4591_v38 = vld [vmem:[%s8046_s1 + $0x170] sm:$0xff]   ;;  %v569_v24 = vrot.slane %v567_v6, 1 }
  0x61   :  { %1705 = vmatmul.mubr.bf16.gmra.mxu0 %v4938_v27  ;;  %1897 = vmatmul.mubr.bf16.gmra.mxu1 %v4946_v30  ;;  %v533_v30 = vrot.slane %v531_v47, 1  ;;  %v548_v47 = vshrl.u32 %v5128_v20, 16 }
  0x62   :  { %1946 = vmatpush2.bf16.msra.mxu1 %v4550_v39  ;;  %1712 = vmatprep.mubr.bf16.mxu0 %v5079_v42  ;;  %v4563_v39 = vld [vmem:[%s8046_s1 + $0xd8] sm:$0xff]   ;;  %v5169_v54 = vsel %vm450_vm0, %v853_v8, %v857_v33  ;;  %v5237_v33 = vld [vmem:[%s8047_s0 + $0x84] sm:$0xff]  }
  0x63   :  { %1947 = vmatprep.subr.bf16.mxu1 %v8051_v0  ;;  %1904 = vmatprep.mubr.bf16.mxu1 %v5087_v50  ;;  %v5123_v16 = vsel %vm450_vm0, %v529_v62, %v533_v30  ;;  %8162 = vst [vmem:[#allocation9_spill] sm:$0xff] %v5169_v54  ;;  %v562_v62 = vshll.u32 %v5160_v43, 16  ;;  %v557_v30 = vrot.slane %v555_v51, 1  ;;  %v923_v51 = vrot.slane %v4817_v32, 1 }
  0x64   :  { %2232 = vmatprep.subr.bf16.mxu0 %v8051_v0 }
  0x65   :  { %2233 = vmatpush1.bf16.msra.mxu0 %v4581_v59  ;;  %v4597_v59 = vld [vmem:[%s8046_s1 + $0x168] sm:$0xff]   ;;  %v564_v3 = vrot.slane %v562_v62, 1 }
  0x66   :  { %1948 = vmatpush2.bf16.msra.mxu1 %v4551_v49  ;;  %2234 = vmatprep.subr.bf16.mxu0 %v8051_v0 }
  0x67   :  { %1949 = vmatprep.subr.bf16.mxu1 %v8051_v0  ;;  %v565_v19 = vor.u32 %v564_v3, %v560_v1 }
  0x69   :  { %1713 = vmatmul.mubr.bf16.gmra.mxu0 %v4987_v52  ;;  %1905 = vmatmul.mubr.bf16.gmra.mxu1 %v4996_v57  ;;  %v550_v57 = vshll.u32 %v5128_v20, 16 }
  0x6a   :  { %1950 = vmatpush2.bf16.msra.mxu1 %v4557_v11  ;;  %1720 = vmatprep.mubr.bf16.mxu0 %v5123_v16  ;;  %v5197_v11 = vld [vmem:[%s8047_s0 + $0x78] sm:$0xff]  }
  0x6b   :  { %1951 = vmatprep.subr.bf16.mxu1 %v8051_v0  ;;  %1912 = vmatprep.mubr.bf16.mxu1 %v5131_v23  ;;  %v552_v49 = vrot.slane %v550_v57, 1  ;;  %v574_v15 = vshll.u32 %v5197_v11, 16  ;;  %v572_v31 = vshrl.u32 %v5197_v11, 16  ;;  %v5231_v57 = vsel %vm450_vm0, %v565_v19, %v569_v24  ;;  %v4588_v19 = vld [vmem:[%s8046_s1 + $0x1a8] sm:$0xff]  }
  0x6c   :  { %2235 = vmatpush2.bf16.msra.mxu0 %v4587_v29  ;;  %v5219_v29 = vld [vmem:[%s8047_s0 + $0x80] ss:$0 sps:$4 sm:$0x11]   ;;  %v4616_v24 = vld [vmem:[%s8046_s1 + $0x148] sm:$0xff]   ;;  %v8174_v23 = vmov 0  }
  0x6d   :  { %2236 = vmatprep.subr.bf16.mxu0 %v8051_v0  ;;  %v576_v36 = vrot.slane %v574_v15, 1  ;;  %v579_v8 = vshll.u32 %v5219_v29, 16 }
  0x6e   :  { %1952 = vmatpush2.bf16.msra.mxu1 %v4558_v5  ;;  %v4575_v5 = vld [vmem:[%s8046_s1 + $0x1b8] sm:$0xff]  }
  0x6f   :  { %1953 = vmatprep.subr.bf16.mxu1 %v8051_v0  ;;  %v581_v62 = vrot.slane %v579_v8, 1  ;;  %v4619_v8 = vld [vmem:[%s8046_s1 + $0x140] sm:$0xff]  }
  0x70   :  { %2237 = vmatpush2.bf16.msra.mxu0 %v4591_v38  ;;  %v5242_v38 = vld [vmem:[%s8047_s0 + $0x8c] ss:$0 sps:$4 sm:$0x11]  }
  0x71   :  { %1721 = vmatmul.mubr.bf16.gmra.mxu0 %v5034_v17  ;;  %1913 = vmatmul.mubr.bf16.gmra.mxu1 %v5042_v21  ;;  %v553_v21 = vor.u32 %v552_v49, %v548_v47  ;;  %v5254_v47 = vld [vmem:[%s8047_s0 + $0x98] ss:$0 sps:$4 sm:$0x11]   ;;  %v4610_v49 = vld [vmem:[%s8046_s1 + $0x150] sm:$0xff]  }
  0x72   :  { %1954 = vmatpush2.bf16.msra.mxu1 %v4563_v39  ;;  %1728 = vmatprep.mubr.bf16.mxu0 %v5164_v44  ;;  %v5247_v39 = vld [vmem:[%s8047_s0 + $0x90] sm:$0xff]   ;;  %v603_v3 = vshll.u32 %v5254_v47, 16 }
  0x73   :  { %1955 = vmatprep.subr.bf16.mxu1 %v8051_v0  ;;  %1920 = vmatprep.mubr.bf16.mxu1 %v5169_v54  ;;  %v5202_v12 = vsel %vm450_vm0, %v553_v21, %v557_v30  ;;  %v586_v21 = vshll.u32 %v5237_v33, 16  ;;  %v926_v30 = vrot.slane %v4848_v41, 1  ;;  %v598_v1 = vshll.u32 %v5247_v39, 16  ;;  %v4631_v54 = vld [vmem:[%s8046_s1 + $0x1d8] sm:$0xff]  }
  0x74   :  { %2238 = vmatprep.subr.bf16.mxu0 %v8051_v0  ;;  %v596_v15 = vshrl.u32 %v5247_v39, 16 }
  0x75   :  { %2239 = vmatpush2.bf16.msra.mxu0 %v4597_v59  ;;  %v577_v59 = vor.u32 %v576_v36, %v572_v31  ;;  %v605_v31 = vrot.slane %v603_v3, 1  ;;  %v4594_v36 = vld [vmem:[%s8046_s1 + $0x1a0] sm:$0xff]   ;;  %v5347_v3 = vld [vmem:[%s8047_s0 + $0xa8] sm:$0xff]  }
  0x76   :  { %1956 = vmatpush2.bf16.msra.mxu1 %v4565_v55  ;;  %2240 = vmatprep.subr.bf16.mxu0 %v8051_v0  ;;  %v924_v55 = vrot.slane %v4830_v35, 1  ;;  %v929_v35 = vrot.slane %v4882_v60, 1 }
  0x77   :  { %1957 = vmatprep.subr.bf16.mxu1 %v8051_v0 }
  0x78   :  { %v5276_v6 = vsel %vm919_vm1, %v923_v51, %v924_v55 }
  0x79   :  { %1729 = vmatmul.mubr.bf16.gmra.mxu0 %v5075_v40  ;;  %1921 = vmatmul.mubr.bf16.gmra.mxu1 %v5093_v56  ;;  %v4606_v56 = vld [vmem:[%s8046_s1 + $0x158] sm:$0xff]  }
  0x7a   :  { %1958 = vmatpush2.bf16.msra.mxu1 %v4570_v63  ;;  %1736 = vmatprep.mubr.bf16.mxu0 %v5202_v12  ;;  %v591_v63 = vshll.u32 %v5242_v38, 16 }
  0x7b   :  { %1959 = vmatprep.subr.bf16.mxu1 %v8051_v0  ;;  %1961 = vmatprep.mubr.bf16.mxu1 %v4817_v32  ;;  %v927_v32 = vrot.slane %v4860_v48, 1  ;;  %v588_v48 = vrot.slane %v586_v21, 1  ;;  %v4607_v21 = vld [vmem:[%s8046_s1 + $0x190] sm:$0xff]  }
  0x7c   :  { %2241 = vmatpush2.bf16.msra.mxu0 %v4600_v13  ;;  %v584_v13 = vshrl.u32 %v5237_v33, 16 }
  0x7d   :  { %2242 = vmatprep.subr.bf16.mxu0 %v8051_v0  ;;  %v5315_v55 = vsel %vm919_vm1, %v926_v30, %v927_v32 }
  0x7e   :  { %1960 = vmatpush2.bf16.msra.mxu1 %v4571_v14  ;;  %v5282_v14 = vsel %vm450_vm0, %v577_v59, %v581_v62  ;;  %v589_v51 = vor.u32 %v588_v48, %v584_v13  ;;  %8163 = vst [vmem:[#allocation10_spill] sm:$0xff] %v5315_v55  ;;  %v5327_v62 = vld [vmem:[%s8047_s0 + $0xa4] ss:$0 sps:$4 sm:$0x11]  }
  0x7f   :  { %2507 = vmatprep.subr.bf16.mxu1 %v8051_v0 }
  0x80   :  { %2243 = vmatpush2.bf16.msra.mxu0 %v4606_v56  ;;  %v593_v56 = vrot.slane %v591_v63, 1 }
  0x81   :  { %1737 = vmatmul.mubr.bf16.gmra.mxu0 %v5128_v20  ;;  %1962 = vmatmul.mubr.bf16.vlgmr.msra.gmra.mxu1 %v4973_v46  ;;  %v4582_v46 = vld [vmem:[%s8046_s1 + $0x1b0] sm:$0xff]  }
  0x82   :  { %2508 = vmatpush1.bf16.msra.mxu1 %v4575_v5  ;;  %1744 = vmatprep.mubr.bf16.mxu0 %v5231_v57  ;;  %v600_v5 = vrot.slane %v598_v1, 1  ;;  %v5322_v59 = vsel %vm450_vm0, %v589_v51, %v593_v56  ;;  %v615_v1 = vshll.u32 %v5327_v62, 16  ;;  %v5365_v56 = vld [vmem:[%s8047_s0 + $0xb0] ss:$0 sps:$4 sm:$0x11]  }
  0x83   :  { %1969 = vmatprep.mubr.bf16.mxu1 %v4848_v41  ;;  %2509 = vmatprep.subr.bf16.mxu1 %v8051_v0  ;;  %v930_v41 = vrot.slane %v4894_v4, 1  ;;  %v5295_v4 = vld [vmem:[%s8047_s0 + $0x9c] sm:$0xff]   ;;  %v627_v51 = vshll.u32 %v5365_v56, 16 }
  0x84   :  { %2244 = vmatprep.subr.bf16.mxu0 %v8051_v0  ;;  %v601_v30 = vor.u32 %v600_v5, %v596_v15  ;;  %v608_v63 = vshrl.u32 %v5295_v4, 16  ;;  %v4613_v15 = vld [vmem:[%s8046_s1 + $0x188] sm:$0xff]   ;;  %v622_v5 = vshll.u32 %v5347_v3, 16 }
  0x85   :  { %2245 = vmatpush2.bf16.msra.mxu0 %v4610_v49  ;;  %v5310_v49 = vld [vmem:[%s8046_s1 + $0x238] sm:$0xff]   ;;  %v5341_v32 = vsel %vm919_vm1, %v929_v35, %v930_v41  ;;  %v932_v35 = vrot.slane %v4938_v27, 1  ;;  %v933_v41 = vrot.slane %v4954_v34, 1 }
  0x86   :  { %2510 = vmatpush1.bf16.msra.mxu1 %v4582_v46  ;;  %2246 = vmatprep.subr.bf16.mxu0 %v8051_v0  ;;  %v610_v46 = vshll.u32 %v5295_v4, 16  ;;  %8164 = vst [vmem:[#allocation11_spill] sm:$0xff] %v5341_v32  ;;  %v5350_v13 = vsel %vm450_vm0, %v601_v30, %v605_v31  ;;  %v4620_v31 = vld [vmem:[%s8046_s1 + $0x180] sm:$0xff]   ;;  %v936_v30 = vrot.slane %v5003_v58, 1 }
  0x87   :  { %2511 = vmatprep.subr.bf16.mxu1 %v8051_v0  ;;  %8165 = vst [vmem:[#allocation12_spill] sm:$0xff] %v5350_v13 }
  0x88   :  { %v612_v48 = vrot.slane %v610_v46, 1  ;;  %v5383_v46 = vld [vmem:[%s8047_s0 + $0xb4] sm:$0xff]  }
  0x89   :  { %1745 = vmatmul.mubr.bf16.gmra.mxu0 %v5160_v43  ;;  %1970 = vmatmul.mubr.bf16.gmra.mxu1 %v5276_v6 }
  0x8a   :  { %1752 = vmatprep.mubr.bf16.mxu0 %v5282_v14  ;;  %1977 = vmatprep.mubr.bf16.mxu1 %v4882_v60  ;;  %v4601_v60 = vld [vmem:[%s8046_s1 + $0x198] sm:$0xff]  }
  0x8b   :  { %2512 = vmatpush1.bf16.msra.mxu1 %v4588_v19  ;;  %2247 = vmatpush2.bf16.msra.mxu0 %v4616_v24  ;;  %v613_v19 = vor.u32 %v612_v48, %v608_v63  ;;  %v617_v24 = vrot.slane %v615_v1, 1  ;;  %v629_v1 = vrot.slane %v627_v51, 1  ;;  %v5398_v48 = vld [vmem:[%s8047_s0 + $0xbc] ss:$0 sps:$4 sm:$0x11]  }
  0x8c   :  { %2513 = vmatprep.subr.bf16.mxu1 %v8051_v0  ;;  %2248 = vmatprep.subr.bf16.mxu0 %v8051_v0 }
  0x8d   :  { %v5376_v34 = vsel %vm450_vm0, %v613_v19, %v617_v24  ;;  %v639_v24 = vshll.u32 %v5398_v48, 16 }
  0x8e   :  { %8167 = vst [vmem:[#allocation14_spill] sm:$0xff] %v5376_v34 }
  0x8f   :  { %2514 = vmatpush1.bf16.msra.mxu1 %v4594_v36  ;;  %2249 = vmatpush2.bf16.msra.mxu0 %v4619_v8  ;;  %v620_v36 = vshrl.u32 %v5347_v3, 16  ;;  %v624_v8 = vrot.slane %v622_v5, 1  ;;  %v5416_v5 = vld [vmem:[%s8047_s0 + $0xd8] sm:$0xff]  }
  0x90   :  { %2515 = vmatprep.subr.bf16.mxu1 %v8051_v0  ;;  %4390 = vmatprep.subr.bf16.mxu0 %v5310_v49 }
  0x91   :  { %1753 = vmatmul.mubr.bf16.gmra.mxu0 %v5197_v11  ;;  %1978 = vmatmul.mubr.bf16.gmra.mxu1 %v5315_v55  ;;  %v625_v63 = vor.u32 %v624_v8, %v620_v36  ;;  %v938_v36 = vrot.slane %v5034_v17, 1  ;;  %v939_v8 = vrot.slane %v5056_v25, 1 }
  0x92   :  { %1760 = vmatprep.mubr.bf16.mxu0 %v5322_v59  ;;  %1985 = vmatprep.mubr.bf16.mxu1 %v4938_v27  ;;  %v5373_v27 = vsel %vm919_vm1, %v932_v35, %v933_v41  ;;  %v4626_v35 = vld [vmem:[%s8046_s1 + $0x1f0] sm:$0xff]   ;;  %v632_v41 = vshrl.u32 %v5383_v46, 16 }
  0x93   :  { %2516 = vmatpush1.bf16.msra.mxu1 %v4601_v60  ;;  %8166 = vst [vmem:[#allocation13_spill] sm:$0xff] %v5373_v27  ;;  %v4625_v60 = vld [vmem:[%s8046_s1 + $0x1f8] sm:$0xff]   ;;  %v5409_v58 = vsel %vm450_vm0, %v625_v63, %v629_v1  ;;  %v5436_v63 = vsel %vm919_vm1, %v938_v36, %v939_v8  ;;  %v5457_v36 = vld [vmem:[%s8047_s0 + $0xec] ss:$0 sps:$4 sm:$0x11]  }
  0x94   :  { %2517 = vmatprep.subr.bf16.mxu1 %v8051_v0  ;;  %8169 = vst [vmem:[#allocation16_spill] sm:$0xff] %v5409_v58  ;;  %8170 = vst [vmem:[#allocation17_spill] sm:$0xff] %v5436_v63 }
  0x97   :  { %2518 = vmatpush1.bf16.msra.mxu1 %v4607_v21  ;;  %v935_v21 = vrot.slane %v4987_v52, 1 }
  0x98   :  { %2519 = vmatprep.subr.bf16.mxu1 %v8051_v0 }
  0x99   :  { %1761 = vmatmul.mubr.bf16.gmra.mxu0 %v5237_v33  ;;  %1986 = vmatmul.mubr.bf16.gmra.mxu1 %v5341_v32 }
  0x9a   :  { %1768 = vmatprep.mubr.bf16.mxu0 %v5350_v13  ;;  %1993 = vmatprep.mubr.bf16.mxu1 %v4987_v52  ;;  %v5406_v52 = vsel %vm919_vm1, %v935_v21, %v936_v30  ;;  %v5431_v21 = vld [vmem:[%s8047_s0 + $0xe0] ss:$0 sps:$4 sm:$0x11]   ;;  %v670_v30 = vshll.u32 %v5416_v5, 16 }
  0x9b   :  { %2520 = vmatpush1.bf16.msra.mxu1 %v4613_v15  ;;  %v634_v15 = vshll.u32 %v5383_v46, 16  ;;  %8168 = vst [vmem:[#allocation15_spill] sm:$0xff] %v5406_v52 }
  0x9c   :  { %2521 = vmatprep.subr.bf16.mxu1 %v8051_v0  ;;  %v672_v25 = vrot.slane %v670_v30, 1 }
  0x9d   :  { %v636_v19 = vrot.slane %v634_v15, 1  ;;  %v675_v15 = vshll.u32 %v5431_v21, 16 }
  0x9f   :  { %2522 = vmatpush1.bf16.msra.mxu1 %v4620_v31  ;;  %v4628_v31 = vld [vmem:[%s8046_s1 + $0x1e8] sm:$0xff]   ;;  %v637_v51 = vor.u32 %v636_v19, %v632_v41  ;;  %v941_v41 = vrot.slane %v5075_v40, 1  ;;  %v942_v19 = vrot.slane %v5104_v61, 1 }
  0xa0   :  { %2523 = vmatprep.subr.bf16.mxu1 %v8051_v0 }
  0xa1   :  { %1769 = vmatmul.mubr.bf16.gmra.mxu0 %v5247_v39  ;;  %1994 = vmatmul.mubr.bf16.gmra.mxu1 %v5373_v27 }
  0xa2   :  { %1776 = vmatprep.mubr.bf16.mxu0 %v5376_v34  ;;  %2001 = vmatprep.mubr.bf16.mxu1 %v5034_v17  ;;  %v668_v17 = vshrl.u32 %v5416_v5, 16 }
  0xa3   :  { %2524 = vmatpush2.bf16.msra.mxu1 %v4625_v60  ;;  %v641_v60 = vrot.slane %v639_v24, 1 }
  0xa4   :  { %2525 = vmatprep.subr.bf16.mxu1 %v8051_v0  ;;  %v673_v24 = vor.u32 %v672_v25, %v668_v17  ;;  %v687_v17 = vshll.u32 %v5457_v36, 16  ;;  %v5472_v25 = vld [vmem:[%s8047_s0 + $0xf0] sm:$0xff]  }
  0xa5   :  { %v5439_v1 = vsel %vm450_vm0, %v637_v51, %v641_v60  ;;  %v4629_v51 = vld [vmem:[%s8046_s1 + $0x1e0] sm:$0xff]   ;;  %v5464_v60 = vsel %vm919_vm1, %v941_v41, %v942_v19  ;;  %v945_v41 = vrot.slane %v5147_v37, 1 }
  0xa6   :  { %8171 = vst [vmem:[#allocation18_spill] sm:$0xff] %v5464_v60 }
  0xa7   :  { %2526 = vmatpush2.bf16.msra.mxu1 %v4626_v35  ;;  %v5446_v35 = vld [vmem:[%s8047_s0 + $0xe4] sm:$0xff]  }
  0xa8   :  { %2527 = vmatprep.subr.bf16.mxu1 %v8051_v0  ;;  %v682_v8 = vshll.u32 %v5446_v35, 16  ;;  %v680_v61 = vshrl.u32 %v5446_v35, 16 }
  0xa9   :  { %1777 = vmatmul.mubr.bf16.gmra.mxu0 %v5295_v4  ;;  %2002 = vmatmul.mubr.bf16.gmra.mxu1 %v5406_v52 }
  0xaa   :  { %1784 = vmatprep.mubr.bf16.mxu0 %v5409_v58  ;;  %2009 = vmatprep.mubr.bf16.mxu1 %v5075_v40  ;;  %v684_v30 = vrot.slane %v682_v8, 1  ;;  %v694_v8 = vshll.u32 %v5472_v25, 16 }
  0xab   :  { %2528 = vmatpush2.bf16.msra.mxu1 %v4628_v31  ;;  %v677_v31 = vrot.slane %v675_v15, 1  ;;  %v944_v15 = vrot.slane %v5128_v20, 1 }
  0xac   :  { %2529 = vmatprep.subr.bf16.mxu1 %v8051_v0  ;;  %v685_v19 = vor.u32 %v684_v30, %v680_v61  ;;  %v5497_v61 = vld [vmem:[%s8047_s0 + $0xfc] sm:$0xff]   ;;  %v947_v30 = vrot.slane %v5160_v43, 1 }
  0xad   :  { %v678_v40 = vsel %vm450_vm0, %v673_v24, %v677_v31  ;;  %v689_v24 = vrot.slane %v687_v17, 1  ;;  %v5483_v31 = vld [vmem:[%s8047_s0 + $0xf8] ss:$0 sps:$4 sm:$0x11]   ;;  %v948_v17 = vrot.slane %v5183_v45, 1 }
  0xae   :  { %v699_v37 = vshll.u32 %v5483_v31, 16 }
  0xaf   :  { %2530 = vmatpush2.bf16.msra.mxu1 %v4629_v51  ;;  %v5487_v51 = vsel %vm919_vm1, %v944_v15, %v945_v41 }
  0xb0   :  { %2531 = vmatprep.subr.bf16.mxu1 %v8051_v0  ;;  %8172 = vst [vmem:[#allocation19_spill] sm:$0xff] %v5487_v51  ;;  %v692_v0 = vshrl.u32 %v5472_v25, 16  ;;  %v701_v41 = vrot.slane %v699_v37, 1  ;;  %v5525_v37 = vld [vmem:[%s8047_s0 + $0x108] sm:$0xff]  }
  0xb1   :  { %1785 = vmatmul.mubr.bf16.gmra.mxu0 %v5347_v3  ;;  %2010 = vmatmul.mubr.bf16.gmra.mxu1 %v5436_v63 }
  0xb2   :  { %1792 = vmatprep.mubr.bf16.mxu0 %v5439_v1  ;;  %2017 = vmatprep.mubr.bf16.mxu1 %v5128_v20  ;;  %v696_v20 = vrot.slane %v694_v8, 1  ;;  %v5512_v8 = vsel %vm919_vm1, %v947_v30, %v948_v17  ;;  %v950_v30 = vrot.slane %v5197_v11, 1  ;;  %v951_v17 = vrot.slane %v5219_v29, 1 }
  0xb3   :  { %8173 = vst [vmem:[#allocation20_spill] sm:$0xff] %v5512_v8  ;;  %2532 = vmatpush2.bf16.msra.mxu1 %v4631_v54  ;;  %v718_v54 = vshll.u32 %v5525_v37, 16 }
  0xb4   :  { %v697_v15 = vor.u32 %v696_v20, %v692_v0  ;;  %v704_v0 = vshrl.u32 %v5497_v61, 16  ;;  %2533 = vmatprep.subr.bf16.mxu1 %v8174_v23  ;;  %v5541_v50 = vsel %vm919_vm1, %v950_v30, %v951_v17  ;;  %v954_v30 = vrot.slane %v5242_v38, 1 }
  0xb5   :  { %8175 = vst [vmem:[#allocation21_spill] sm:$0xff] %v5541_v50  ;;  %v720_v29 = vrot.slane %v718_v54, 1 }
  0xb7   :  { %2534 = vmatpush2.bf16.msra.mxu1 %v4632_v28 }
  0xb8   :  { %2535 = vmatprep.subr.bf16.mxu1 %v8174_v23 }
  0xb9   :  { %1793 = vmatmul.mubr.bf16.gmra.mxu0 %v5383_v46  ;;  %2018 = vmatmul.mubr.bf16.gmra.mxu1 %v5464_v60 }
  0xba   :  { %1800 = vmatprep.mubr.bf16.mxu0 %v678_v40  ;;  %2025 = vmatprep.mubr.bf16.mxu1 %v5160_v43  ;;  %v5490_v40 = vsel %vm450_vm0, %v685_v19, %v689_v24  ;;  %v5508_v19 = vld [vmem:[%s8047_s0 + $0x104] ss:$0 sps:$4 sm:$0x11]   ;;  %v706_v24 = vshll.u32 %v5497_v61, 16  ;;  %v5518_v43 = vsel %vm450_vm0, %v697_v15, %v701_v41 }
  0xbb   :  { %v711_v20 = vshll.u32 %v5508_v19, 16 }
  0xbc   :  { %v708_v45 = vrot.slane %v706_v24, 1  ;;  %v5536_v24 = vld [vmem:[%s8047_s0 + $0x110] ss:$0 sps:$4 sm:$0x11]  }
  0xbd   :  { %v713_v41 = vrot.slane %v711_v20, 1  ;;  %v953_v20 = vrot.slane %v5237_v33, 1 }
  0xbe   :  { %v709_v15 = vor.u32 %v708_v45, %v704_v0  ;;  %v723_v0 = vshll.u32 %v5536_v24, 16  ;;  %v5551_v45 = vld [vmem:[%s8047_s0 + $0x114] sm:$0xff]  }
  0xbf   :  { %v730_v54 = vshll.u32 %v5551_v45, 16  ;;  %v5566_v53 = vsel %vm919_vm1, %v953_v20, %v954_v30  ;;  %v728_v38 = vshrl.u32 %v5551_v45, 16  ;;  %v956_v20 = vrot.slane %v5247_v39, 1 }
  0xc0   :  { %v5544_v18 = vsel %vm450_vm0, %v709_v15, %v713_v41  ;;  %v725_v15 = vrot.slane %v723_v0, 1  ;;  %v5562_v41 = vld [vmem:[%s8047_s0 + $0x11c] ss:$0 sps:$4 sm:$0x11]   ;;  %8176 = vst [vmem:[#allocation22_spill] sm:$0xff] %v5566_v53  ;;  %v5579_v0 = vld [vmem:[%s8047_s0 + $0x120] sm:$0xff]  }
  0xc1   :  { %1801 = vmatmul.mubr.bf16.gmra.mxu0 %v5416_v5  ;;  %2026 = vmatmul.mubr.bf16.gmra.mxu1 %v5487_v51  ;;  %v957_v30 = vrot.slane %v5254_v47, 1  ;;  %v742_v28 = vshll.u32 %v5579_v0, 16 }
  0xc2   :  { %1808 = vmatprep.mubr.bf16.mxu0 %v5490_v40  ;;  %2033 = vmatprep.mubr.bf16.mxu1 %v5197_v11  ;;  %v716_v11 = vshrl.u32 %v5525_v37, 16 }
  0xc3   :  { %v5595_v10 = vsel %vm919_vm1, %v956_v20, %v957_v30  ;;  %v744_v47 = vrot.slane %v742_v28, 1  ;;  %v960_v20 = vrot.slane %v5327_v62, 1 }
  0xc4   :  { %v721_v17 = vor.u32 %v720_v29, %v716_v11  ;;  %v732_v11 = vrot.slane %v730_v54, 1  ;;  %v735_v29 = vshll.u32 %v5562_v41, 16  ;;  %v5590_v54 = vld [vmem:[%s8047_s0 + $0x128] ss:$0 sps:$4 sm:$0x11]   ;;  %8178 = vst [vmem:[#allocation24_spill] sm:$0xff] %v5595_v10 }
  0xc9   :  { %1809 = vmatmul.mubr.bf16.gmra.mxu0 %v5446_v35  ;;  %2034 = vmatmul.mubr.bf16.gmra.mxu1 %v5512_v8 }
  0xca   :  { %1816 = vmatprep.mubr.bf16.mxu0 %v5518_v43  ;;  %2041 = vmatprep.mubr.bf16.mxu1 %v5237_v33  ;;  %v5572_v33 = vsel %vm450_vm0, %v721_v17, %v725_v15  ;;  %v733_v17 = vor.u32 %v732_v11, %v728_v38  ;;  %v737_v15 = vrot.slane %v735_v29, 1  ;;  %v747_v38 = vshll.u32 %v5590_v54, 16  ;;  %v5605_v11 = vld [vmem:[%s8047_s0 + $0x12c] sm:$0xff]  }
  0xcb   :  { %8177 = vst [vmem:[#allocation23_spill] sm:$0xff] %v5572_v33  ;;  %v959_v29 = vrot.slane %v5295_v4, 1  ;;  %v754_v28 = vshll.u32 %v5605_v11, 16  ;;  %v752_v62 = vshrl.u32 %v5605_v11, 16 }
  0xcc   :  { %v5598_v26 = vsel %vm450_vm0, %v733_v17, %v737_v15  ;;  %v749_v17 = vrot.slane %v747_v38, 1  ;;  %v5616_v15 = vld [vmem:[%s8047_s0 + $0x134] ss:$0 sps:$4 sm:$0x11]   ;;  %v962_v38 = vrot.slane %v5347_v3, 1 }
  0xcd   :  { %8179 = vst [vmem:[#allocation25_spill] sm:$0xff] %v5598_v26 }
  0xd1   :  { %1817 = vmatmul.mubr.bf16.gmra.mxu0 %v5472_v25  ;;  %2042 = vmatmul.mubr.bf16.gmra.mxu1 %v5541_v50 }
  0xd2   :  { %1824 = vmatprep.mubr.bf16.mxu0 %v5544_v18  ;;  %2049 = vmatprep.mubr.bf16.mxu1 %v5247_v39  ;;  %v740_v39 = vshrl.u32 %v5579_v0, 16 }
  0xd4   :  { %v745_v30 = vor.u32 %v744_v47, %v740_v39  ;;  %v756_v39 = vrot.slane %v754_v28, 1  ;;  %v759_v47 = vshll.u32 %v5616_v15, 16 }
  0xd9   :  { %1825 = vmatmul.mubr.bf16.gmra.mxu0 %v5497_v61  ;;  %2050 = vmatmul.mubr.bf16.gmra.mxu1 %v5566_v53 }
  0xda   :  { %1832 = vmatprep.mubr.bf16.mxu0 %v5572_v33  ;;  %2057 = vmatprep.mubr.bf16.mxu1 %v5295_v4  ;;  %v5620_v33 = vsel %vm919_vm1, %v959_v29, %v960_v20  ;;  %v5626_v4 = vsel %vm450_vm0, %v745_v30, %v749_v17  ;;  %v963_v29 = vrot.slane %v5365_v56, 1  ;;  %v757_v20 = vor.u32 %v756_v39, %v752_v62  ;;  %v4635_v62 = vld [vmem:[%s8046_s1 + $0x1c0] sm:$0xff]  }
  0xdb   :  { %8180 = vst [vmem:[#allocation26_spill] sm:$0xff] %v5620_v33  ;;  %v761_v30 = vrot.slane %v759_v47, 1  ;;  %v4627_v47 = vld [vmem:[%s8046_s1 + $0x230] sm:$0xff]  }
  0xdc   :  { %v5638_v17 = vsel %vm919_vm1, %v962_v38, %v963_v29 }
  0xdd   :  { %8181 = vst [vmem:[#allocation27_spill] sm:$0xff] %v5638_v17  ;;  %v5646_v28 = vsel %vm450_vm0, %v757_v20, %v761_v30  ;;  %v4630_v30 = vld [vmem:[%s8046_s1 + $0x228] sm:$0xff]  }
  0xe1   :  { %1833 = vmatmul.mubr.bf16.gmra.mxu0 %v5525_v37  ;;  %2058 = vmatmul.mubr.bf16.gmra.mxu1 %v5595_v10 }
  0xe2   :  { %1840 = vmatprep.mubr.bf16.mxu0 %v5598_v26  ;;  %2065 = vmatprep.mubr.bf16.mxu1 %v5347_v3  ;;  %v4634_v26 = vld [vmem:[%s8046_s1 + $0x1c8] sm:$0xff]   ;;  %v966_v3 = vrot.slane %v5398_v48, 1  ;;  %v975_v48 = vrot.slane %v5431_v21, 1 }
  0xe3   :  { %2536 = vmatpush2.bf16.msra.mxu1 %v4634_v26  ;;  %v5643_v26 = vld [vmem:[%s8047_s0 + $0xc0] sm:$0xff]  }
  0xe4   :  { %2537 = vmatprep.subr.bf16.mxu1 %v8174_v23  ;;  %v965_v23 = vrot.slane %v5383_v46, 1 }
  0xe6   :  { %v5655_v56 = vsel %vm919_vm1, %v965_v23, %v966_v3 }
  0xe7   :  { %8182 = vst [vmem:[#allocation28_spill] sm:$0xff] %v5655_v56  ;;  %2538 = vmatpush2.bf16.msra.mxu1 %v4635_v62 }
  0xe9   :  { %1841 = vmatmul.mubr.bf16.gmra.mxu0 %v5551_v45  ;;  %2066 = vmatmul.mubr.bf16.gmra.mxu1 %v5620_v33 }
  0xea   :  { %1848 = vmatprep.mubr.bf16.mxu0 %v5626_v4  ;;  %2073 = vmatprep.mubr.bf16.mxu1 %v5383_v46  ;;  %v974_v46 = vrot.slane %v5416_v5, 1  ;;  %v978_v5 = vrot.slane %v5457_v36, 1  ;;  %v4633_v36 = vld [vmem:[%s8046_s1 + $0x220] sm:$0xff]  }
  0xec   :  { %v976_v39 = vsel %vm919_vm1, %v974_v46, %v975_v48  ;;  %v980_v48 = vrot.slane %v5472_v25, 1 }
  0xf1   :  { %1849 = vmatmul.mubr.bf16.gmra.mxu0 %v5579_v0  ;;  %2074 = vmatmul.mubr.bf16.gmra.mxu1 %v5638_v17 }
  0xf2   :  { %1856 = vmatprep.mubr.bf16.mxu0 %v5646_v28  ;;  %2081 = vmatprep.mubr.bf16.mxu1 %v5643_v26 }
  0xf9   :  { %1857 = vmatmul.mubr.bf16.gmra.mxu0 %v5605_v11  ;;  %2082 = vmatmul.mubr.bf16.gmra.mxu1 %v5655_v56 }
  0xfa   :  { %2089 = vmatprep.mubr.bf16.mxu1 %v5446_v35  ;;  %2250 = vmatprep.mubr.bf16.mxu0 %v5276_v6  ;;  %v977_v6 = vrot.slane %v5446_v35, 1 }
 0x101   :  { %v5670_v38 = vpop.f32.mrf.mxu0  ;;  %v5672_v29 = vpop.f32.mrf.mxu1  ;;  %2090 = vmatmul.mubr.bf16.gmra.mxu1 %v976_v39  ;;  %2251 = vmatmul.mubr.bf16.vlgmr.msra.gmra.mxu0 %v4889_v2  ;;  %v981_v39 = vrot.slane %v5483_v31, 1 }
 0x102   :  { %8183 = vst [vmem:[#allocation29_spill] sm:$0xff] %v5672_v29  ;;  %4391 = vmatpush3.bf16.msra.mxu0 %v5310_v49  ;;  %2097 = vmatprep.mubr.bf16.mxu1 %v5472_v25  ;;  %v5688_v49 = vsel %vm919_vm1, %v977_v6, %v978_v5  ;;  %v4638_v5 = vld [vmem:[%s8046_s1 + $0x218] sm:$0xff]  }
 0x103   :  { %v1676_v21 = vpop.f32.mrf.mxu0  ;;  %v1868_v20 = vpop.f32.mrf.mxu1  ;;  %2258 = vmatprep.mubr.bf16.mxu0 %v5315_v55  ;;  %4392 = vmatprep.subr.bf16.mxu0 %v4627_v47 }
 0x105   :  { %v5683_v23 = vpop.f32.mrf.mxu0  ;;  %v5685_v2 = vpop.f32.mrf.mxu1 }
 0x106   :  { %8184 = vst [vmem:[#allocation30_spill] sm:$0xff] %v5685_v2  ;;  %4393 = vmatpush3.bf16.msra.mxu0 %v4627_v47 }
 0x107   :  { %v1679_v35 = vpop.f32.mrf.mxu0  ;;  %v1871_v3 = vpop.f32.mrf.mxu1  ;;  %4394 = vmatprep.subr.bf16.mxu0 %v4630_v30 }
 0x108   :  { %v5711_v35 = vsel %vm919_vm1, %v980_v48, %v981_v39  ;;  %v984_v48 = vrot.slane %v5508_v19, 1  ;;  %v987_v19 = vrot.slane %v5536_v24, 1  ;;  %v990_v24 = vrot.slane %v5562_v41, 1 }
 0x109   :  { %v5693_v62 = vpop.f32.mrf.mxu0  ;;  %v5695_v46 = vpop.f32.mrf.mxu1  ;;  %2098 = vmatmul.mubr.bf16.gmra.mxu1 %v5688_v49  ;;  %2259 = vmatmul.mubr.bf16.gmra.mxu0 %v4928_v22  ;;  %8187 = vst [vmem:[#allocation33_spill] sm:$0xff] %v5711_v35 }
 0x10a   :  { %8185 = vst [vmem:[#allocation31_spill] sm:$0xff] %v5695_v46  ;;  %2105 = vmatprep.mubr.bf16.mxu1 %v5497_v61  ;;  %2266 = vmatprep.mubr.bf16.mxu0 %v5341_v32 }
 0x10b   :  { %v1684_v47 = vpop.f32.mrf.mxu0  ;;  %v1876_v6 = vpop.f32.mrf.mxu1  ;;  %4395 = vmatpush3.bf16.msra.mxu0 %v4630_v30  ;;  %v983_v30 = vrot.slane %v5497_v61, 1  ;;  %v986_v61 = vrot.slane %v5525_v37, 1 }
 0x10c   :  { %4396 = vmatprep.subr.bf16.mxu0 %v4633_v36 }
 0x10d   :  { %v5706_v21 = vpop.f32.mrf.mxu0  ;;  %v5708_v20 = vpop.f32.mrf.mxu1  ;;  %v5728_v6 = vsel %vm919_vm1, %v983_v30, %v984_v48 }
 0x10e   :  { %8186 = vst [vmem:[#allocation32_spill] sm:$0xff] %v5708_v20  ;;  %8190 = vst [vmem:[#allocation36_spill] sm:$0xff] %v5728_v6 }
 0x10f   :  { %v1687_v3 = vpop.f32.mrf.mxu0  ;;  %v1879_v46 = vpop.f32.mrf.mxu1  ;;  %4397 = vmatpush3.bf16.msra.mxu0 %v4633_v36 }
 0x110   :  { %4398 = vmatprep.subr.bf16.mxu0 %v4638_v5 }
 0x111   :  { %v5713_v25 = vpop.f32.mrf.mxu0  ;;  %v5715_v31 = vpop.f32.mrf.mxu1  ;;  %2106 = vmatmul.mubr.bf16.gmra.mxu1 %v5711_v35  ;;  %2267 = vmatmul.mubr.bf16.gmra.mxu0 %v4980_v7 }
 0x112   :  { %8188 = vst [vmem:[#allocation34_spill] sm:$0xff] %v5715_v31  ;;  %2113 = vmatprep.mubr.bf16.mxu1 %v5525_v37  ;;  %2274 = vmatprep.mubr.bf16.mxu0 %v5373_v27  ;;  %v989_v37 = vrot.slane %v5551_v45, 1 }
 0x113   :  { %v1692_v39 = vpop.f32.mrf.mxu0  ;;  %v1884_v46 = vpop.f32.mrf.mxu1  ;;  %4399 = vmatpush3.bf16.msra.mxu0 %v4638_v5 }
 0x114   :  { %v5745_v39 = vsel %vm919_vm1, %v986_v61, %v987_v19  ;;  %v4639_v61 = vld [vmem:[%s8046_s1 + $0x210] sm:$0xff]  }
 0x115   :  { %v5723_v36 = vpop.f32.mrf.mxu0  ;;  %v5725_v47 = vpop.f32.mrf.mxu1  ;;  %8193 = vst [vmem:[#allocation39_spill] sm:$0xff] %v5745_v39  ;;  %4400 = vmatprep.subr.bf16.mxu0 %v4639_v61 }
 0x116   :  { %8189 = vst [vmem:[#allocation35_spill] sm:$0xff] %v5725_v47 }
 0x117   :  { %v1695_v3 = vpop.f32.mrf.mxu0  ;;  %v1887_v31 = vpop.f32.mrf.mxu1  ;;  %4401 = vmatpush3.bf16.msra.mxu0 %v4639_v61  ;;  %v993_v61 = vrot.slane %v5590_v54, 1  ;;  %v995_v54 = vrot.slane %v5605_v11, 1 }
 0x119   :  { %v5730_v20 = vpop.f32.mrf.mxu0  ;;  %v5732_v2 = vpop.f32.mrf.mxu1  ;;  %2114 = vmatmul.mubr.bf16.gmra.mxu1 %v5728_v6  ;;  %2275 = vmatmul.mubr.bf16.gmra.mxu0 %v5027_v9 }
 0x11a   :  { %8191 = vst [vmem:[#allocation37_spill] sm:$0xff] %v5732_v2  ;;  %2121 = vmatprep.mubr.bf16.mxu1 %v5551_v45  ;;  %2282 = vmatprep.mubr.bf16.mxu0 %v5406_v52 }
 0x11b   :  { %v1700_v5 = vpop.f32.mrf.mxu0  ;;  %v1892_v30 = vpop.f32.mrf.mxu1 }
 0x11d   :  { %v5740_v48 = vpop.f32.mrf.mxu0  ;;  %v5742_v31 = vpop.f32.mrf.mxu1 }
 0x11e   :  { %8192 = vst [vmem:[#allocation38_spill] sm:$0xff] %v5742_v31 }
 0x11f   :  { %v1703_v46 = vpop.f32.mrf.mxu0  ;;  %v1895_v3 = vpop.f32.mrf.mxu1 }
 0x120   :  { %v5765_v3 = vsel %vm919_vm1, %v989_v37, %v990_v24 }
 0x121   :  { %v5747_v2 = vpop.f32.mrf.mxu0  ;;  %v5749_v47 = vpop.f32.mrf.mxu1  ;;  %2122 = vmatmul.mubr.bf16.gmra.mxu1 %v5745_v39  ;;  %2283 = vmatmul.mubr.bf16.gmra.mxu0 %v5079_v42  ;;  %8196 = vst [vmem:[#allocation42_spill] sm:$0xff] %v5765_v3 }
 0x122   :  { %8194 = vst [vmem:[#allocation40_spill] sm:$0xff] %v5749_v47  ;;  %2129 = vmatprep.mubr.bf16.mxu1 %v5579_v0  ;;  %2290 = vmatprep.mubr.bf16.mxu0 %v5436_v63 }
 0x123   :  { %v1708_v19 = vpop.f32.mrf.mxu0  ;;  %v1900_v5 = vpop.f32.mrf.mxu1 }
 0x124   :  { %v992_v19 = vrot.slane %v5579_v0, 1  ;;  %v4649_v0 = vld [vmem:[%s8047_s0 + $0x138] sm:$0xff]  }
 0x125   :  { %v5760_v30 = vpop.f32.mrf.mxu0  ;;  %v5762_v46 = vpop.f32.mrf.mxu1 }
 0x126   :  { %8195 = vst [vmem:[#allocation41_spill] sm:$0xff] %v5762_v46  ;;  %v5782_v5 = vsel %vm919_vm1, %v992_v19, %v993_v61 }
 0x127   :  { %v1711_v47 = vpop.f32.mrf.mxu0  ;;  %v1903_v31 = vpop.f32.mrf.mxu1  ;;  %8199 = vst [vmem:[#allocation45_spill] sm:$0xff] %v5782_v5 }
 0x129   :  { %v5767_v45 = vpop.f32.mrf.mxu0  ;;  %v5769_v41 = vpop.f32.mrf.mxu1  ;;  %2130 = vmatmul.mubr.bf16.gmra.mxu1 %v5765_v3  ;;  %2291 = vmatmul.mubr.bf16.gmra.mxu0 %v5123_v16 }
 0x12a   :  { %8197 = vst [vmem:[#allocation43_spill] sm:$0xff] %v5769_v41  ;;  %2137 = vmatprep.mubr.bf16.mxu1 %v5605_v11  ;;  %2298 = vmatprep.mubr.bf16.mxu0 %v5464_v60  ;;  %v4650_v11 = vld [vmem:[%s8047_s0 + $0x144] sm:$0xff]  }
 0x12b   :  { %v1716_v37 = vpop.f32.mrf.mxu0  ;;  %v1908_v24 = vpop.f32.mrf.mxu1 }
 0x12d   :  { %v5777_v47 = vpop.f32.mrf.mxu0  ;;  %v5779_v31 = vpop.f32.mrf.mxu1 }
 0x12e   :  { %8198 = vst [vmem:[#allocation44_spill] sm:$0xff] %v5779_v31 }
 0x12f   :  { %v1719_v41 = vpop.f32.mrf.mxu0  ;;  %v1911_v46 = vpop.f32.mrf.mxu1 }
 0x130   :  { %v996_v41 = vrot.slane %v5616_v15, 1  ;;  %v998_v15 = vrot.slane %v4649_v0, 1 }
 0x131   :  { %v5784_v29 = vpop.f32.mrf.mxu0  ;;  %v5786_v63 = vpop.f32.mrf.mxu1  ;;  %2138 = vmatmul.mubr.bf16.gmra.mxu1 %v5782_v5  ;;  %2299 = vmatmul.mubr.bf16.gmra.mxu0 %v5164_v44 }
 0x132   :  { %8200 = vst [vmem:[#allocation46_spill] sm:$0xff] %v5786_v63  ;;  %2145 = vmatprep.mubr.bf16.mxu1 %v4649_v0  ;;  %2306 = vmatprep.mubr.bf16.mxu0 %v5487_v51  ;;  %v5801_v24 = vsel %vm919_vm1, %v995_v54, %v996_v41 }
 0x133   :  { %v1724_v46 = vpop.f32.mrf.mxu0  ;;  %v1916_v19 = vpop.f32.mrf.mxu1  ;;  %8202 = vst [vmem:[#allocation48_spill] sm:$0xff] %v5801_v24 }
 0x135   :  { %v5796_v61 = vpop.f32.mrf.mxu0  ;;  %v5798_v37 = vpop.f32.mrf.mxu1 }
 0x136   :  { %8201 = vst [vmem:[#allocation47_spill] sm:$0xff] %v5798_v37 }
 0x137   :  { %v1727_v63 = vpop.f32.mrf.mxu0  ;;  %v1919_v31 = vpop.f32.mrf.mxu1 }
 0x138   :  { %v4651_v63 = vld [vmem:[%s8047_s0 + $0x140] ss:$0 sps:$4 sm:$0x11]  }
 0x139   :  { %v5803_v60 = vpop.f32.mrf.mxu0  ;;  %v5805_v52 = vpop.f32.mrf.mxu1  ;;  %2146 = vmatmul.mubr.bf16.gmra.mxu1 %v5801_v24  ;;  %2307 = vmatmul.mubr.bf16.gmra.mxu0 %v5202_v12  ;;  %v999_v31 = vrot.slane %v4651_v63, 1  ;;  %v4652_v63 = vld [vmem:[%s8047_s0 + $0x150] sm:$0xff]  }
 0x13a   :  { %8203 = vst [vmem:[#allocation49_spill] sm:$0xff] %v5805_v52  ;;  %2153 = vmatprep.mubr.bf16.mxu1 %v4650_v11  ;;  %2314 = vmatprep.mubr.bf16.mxu0 %v5512_v8 }
 0x13b   :  { %v1732_v54 = vpop.f32.mrf.mxu0  ;;  %v1924_v41 = vpop.f32.mrf.mxu1  ;;  %v5821_v52 = vsel %vm919_vm1, %v998_v15, %v999_v31  ;;  %v1001_v15 = vrot.slane %v4650_v11, 1  ;;  %v4640_v31 = vld [vmem:[%s8046_s1 + $0x208] sm:$0xff]  }
 0x13c   :  { %8205 = vst [vmem:[#allocation51_spill] sm:$0xff] %v5821_v52  ;;  %4402 = vmatprep.subr.bf16.mxu0 %v4640_v31 }
 0x13d   :  { %v5816_v46 = vpop.f32.mrf.mxu0  ;;  %v5818_v19 = vpop.f32.mrf.mxu1  ;;  %4403 = vmatpush3.bf16.msra.mxu0 %v4640_v31 }
 0x13e   :  { %8204 = vst [vmem:[#allocation50_spill] sm:$0xff] %v5818_v19 }
 0x13f   :  { %v1735_v37 = vpop.f32.mrf.mxu0  ;;  %v1927_v51 = vpop.f32.mrf.mxu1 }
 0x140   :  { %v4653_v51 = vld [vmem:[%s8047_s0 + $0x14c] ss:$0 sps:$4 sm:$0x11]  }
 0x141   :  { %v5823_v27 = vpop.f32.mrf.mxu0  ;;  %v1963_v8 = vpop.f32.mrf.mxu1  ;;  %2154 = vmatmul.mubr.bf16.gmra.mxu1 %v5821_v52  ;;  %2315 = vmatmul.mubr.bf16.gmra.mxu0 %v5231_v57  ;;  %v1002_v37 = vrot.slane %v4653_v51, 1 }
 0x142   :  { %v5828_v0 = vadd.f32 %v1963_v8, %v5670_v38  ;;  %2161 = vmatprep.mubr.bf16.mxu1 %v4652_v63  ;;  %2322 = vmatprep.mubr.bf16.mxu0 %v5541_v50 }
 0x143   :  { %v1740_v54 = vpop.f32.mrf.mxu0  ;;  %v1965_v8 = vpop.f32.mrf.mxu1  ;;  %v5846_v11 = vsel %vm919_vm1, %v1001_v15, %v1002_v37  ;;  %v1004_v15 = vrot.slane %v4652_v63, 1 }
 0x144   :  { %8207 = vst [vmem:[#allocation53_spill] sm:$0xff] %v5846_v11 }
 0x145   :  { %v5840_v38 = vpop.f32.mrf.mxu0  ;;  %v1966_v41 = vpop.f32.mrf.mxu1 }
 0x146   :  { %v5843_v19 = vadd.f32 %v1966_v41, %v5683_v23  ;;  %v4654_v23 = vld [vmem:[%s8047_s0 + $0x15c] sm:$0xff]  }
 0x147   :  { %v1743_v50 = vpop.f32.mrf.mxu0  ;;  %v1968_v32 = vpop.f32.mrf.mxu1 }
 0x148   :  { %8206 = vst [vmem:[#allocation52_spill] sm:$0xff] %v5843_v19  ;;  %v4655_v50 = vld [vmem:[%s8047_s0 + $0x158] ss:$0 sps:$4 sm:$0x11]  }
 0x149   :  { %v5848_v51 = vpop.f32.mrf.mxu0  ;;  %v1971_v55 = vpop.f32.mrf.mxu1  ;;  %2162 = vmatmul.mubr.bf16.gmra.mxu1 %v5846_v11  ;;  %2323 = vmatmul.mubr.bf16.gmra.mxu0 %v5282_v14  ;;  %v1005_v32 = vrot.slane %v4655_v50, 1 }
 0x14a   :  { %v5853_v54 = vadd.f32 %v1971_v55, %v5693_v62  ;;  %2169 = vmatprep.mubr.bf16.mxu1 %v4654_v23  ;;  %2330 = vmatprep.mubr.bf16.mxu0 %v5566_v53 }
 0x14b   :  { %v1748_v37 = vpop.f32.mrf.mxu0  ;;  %v1973_v31 = vpop.f32.mrf.mxu1  ;;  %v5868_v62 = vsel %vm919_vm1, %v1004_v15, %v1005_v32  ;;  %v1007_v15 = vrot.slane %v4654_v23, 1 }
 0x14c   :  { %8208 = vst [vmem:[#allocation54_spill] sm:$0xff] %v5853_v54  ;;  %8210 = vst [vmem:[#allocation56_spill] sm:$0xff] %v5868_v62 }
 0x14d   :  { %v5862_v8 = vpop.f32.mrf.mxu0  ;;  %v1974_v41 = vpop.f32.mrf.mxu1 }
 0x14e   :  { %v5865_v55 = vadd.f32 %v1974_v41, %v5706_v21  ;;  %v4656_v21 = vld [vmem:[%s8047_s0 + $0x168] sm:$0xff]  }
 0x14f   :  { %v1751_v54 = vpop.f32.mrf.mxu0  ;;  %v1976_v19 = vpop.f32.mrf.mxu1 }
 0x150   :  { %8209 = vst [vmem:[#allocation55_spill] sm:$0xff] %v5865_v55  ;;  %v4657_v19 = vld [vmem:[%s8047_s0 + $0x164] ss:$0 sps:$4 sm:$0x11]  }
 0x151   :  { %v5870_v53 = vpop.f32.mrf.mxu0  ;;  %v1979_v63 = vpop.f32.mrf.mxu1  ;;  %2170 = vmatmul.mubr.bf16.gmra.mxu1 %v5868_v62  ;;  %2331 = vmatmul.mubr.bf16.gmra.mxu0 %v5322_v59  ;;  %v1008_v54 = vrot.slane %v4657_v19, 1 }
 0x152   :  { %v5875_v50 = vadd.f32 %v1979_v63, %v5713_v25  ;;  %2177 = vmatprep.mubr.bf16.mxu1 %v4656_v21  ;;  %2338 = vmatprep.mubr.bf16.mxu0 %v5595_v10 }
 0x153   :  { %v1756_v32 = vpop.f32.mrf.mxu0  ;;  %v1981_v37 = vpop.f32.mrf.mxu1  ;;  %v5890_v63 = vsel %vm919_vm1, %v1007_v15, %v1008_v54  ;;  %v1010_v15 = vrot.slane %v4656_v21, 1 }
 0x154   :  { %8211 = vst [vmem:[#allocation57_spill] sm:$0xff] %v5875_v50  ;;  %8213 = vst [vmem:[#allocation59_spill] sm:$0xff] %v5890_v63 }
 0x155   :  { %v5884_v31 = vpop.f32.mrf.mxu0  ;;  %v1982_v41 = vpop.f32.mrf.mxu1 }
 0x156   :  { %v5887_v25 = vadd.f32 %v1982_v41, %v5723_v36  ;;  %v4658_v36 = vld [vmem:[%s8047_s0 + $0x174] sm:$0xff]  }
 0x157   :  { %v1759_v50 = vpop.f32.mrf.mxu0  ;;  %v1984_v55 = vpop.f32.mrf.mxu1 }
 0x158   :  { %8212 = vst [vmem:[#allocation58_spill] sm:$0xff] %v5887_v25  ;;  %v4659_v55 = vld [vmem:[%s8047_s0 + $0x170] ss:$0 sps:$4 sm:$0x11]  }
 0x159   :  { %v5892_v10 = vpop.f32.mrf.mxu0  ;;  %v1987_v23 = vpop.f32.mrf.mxu1  ;;  %2178 = vmatmul.mubr.bf16.gmra.mxu1 %v5890_v63  ;;  %2339 = vmatmul.mubr.bf16.gmra.mxu0 %v5350_v13  ;;  %v1011_v50 = vrot.slane %v4659_v55, 1 }
 0x15a   :  { %v5897_v19 = vadd.f32 %v1987_v23, %v5730_v20  ;;  %2185 = vmatprep.mubr.bf16.mxu1 %v4658_v36  ;;  %2346 = vmatprep.mubr.bf16.mxu0 %v5620_v33 }
 0x15b   :  { %v1764_v54 = vpop.f32.mrf.mxu0  ;;  %v1989_v32 = vpop.f32.mrf.mxu1  ;;  %v5912_v23 = vsel %vm919_vm1, %v1010_v15, %v1011_v50  ;;  %v1013_v15 = vrot.slane %v4658_v36, 1  ;;  %v4641_v50 = vld [vmem:[%s8046_s1 + $0x200] sm:$0xff]  }
 0x15c   :  { %8214 = vst [vmem:[#allocation60_spill] sm:$0xff] %v5897_v19  ;;  %8216 = vst [vmem:[#allocation62_spill] sm:$0xff] %v5912_v23  ;;  %4404 = vmatprep.subr.bf16.mxu0 %v4641_v50 }
 0x15d   :  { %v5906_v37 = vpop.f32.mrf.mxu0  ;;  %v1990_v41 = vpop.f32.mrf.mxu1  ;;  %4405 = vmatpush3.bf16.msra.mxu0 %v4641_v50 }
 0x15e   :  { %v5909_v20 = vadd.f32 %v1990_v41, %v5740_v48  ;;  %v4660_v48 = vld [vmem:[%s8047_s0 + $0x180] sm:$0xff]  }
 0x15f   :  { %v1767_v19 = vpop.f32.mrf.mxu0  ;;  %v1992_v25 = vpop.f32.mrf.mxu1  ;;  %v1016_v50 = vrot.slane %v4660_v48, 1 }
 0x160   :  { %8215 = vst [vmem:[#allocation61_spill] sm:$0xff] %v5909_v20  ;;  %v4661_v25 = vld [vmem:[%s8047_s0 + $0x17c] ss:$0 sps:$4 sm:$0x11]  }
 0x161   :  { %v5914_v33 = vpop.f32.mrf.mxu0  ;;  %v1995_v21 = vpop.f32.mrf.mxu1  ;;  %2186 = vmatmul.mubr.bf16.gmra.mxu1 %v5912_v23  ;;  %2347 = vmatmul.mubr.bf16.gmra.mxu0 %v5376_v34  ;;  %v1014_v19 = vrot.slane %v4661_v25, 1  ;;  %v4637_v25 = vld [vmem:[%s8047_s0 + $0xc8] ss:$0 sps:$4 sm:$0x11]  }
 0x162   :  { %v5919_v55 = vadd.f32 %v1995_v21, %v5747_v2  ;;  %2193 = vmatprep.mubr.bf16.mxu1 %v4660_v48  ;;  %2354 = vmatprep.mubr.bf16.mxu0 %v5638_v17  ;;  %v968_v48 = vrot.slane %v5643_v26, 1 }
 0x163   :  { %v1772_v54 = vpop.f32.mrf.mxu0  ;;  %v1997_v2 = vpop.f32.mrf.mxu1  ;;  %v5937_v36 = vsel %vm919_vm1, %v1013_v15, %v1014_v19  ;;  %v646_v19 = vshll.u32 %v5643_v26, 16 }
 0x164   :  { %8217 = vst [vmem:[#allocation63_spill] sm:$0xff] %v5919_v55  ;;  %8219 = vst [vmem:[#allocation65_spill] sm:$0xff] %v5937_v36 }
 0x165   :  { %v5931_v32 = vpop.f32.mrf.mxu0  ;;  %v1998_v41 = vpop.f32.mrf.mxu1 }
 0x166   :  { %v5934_v21 = vadd.f32 %v1998_v41, %v5760_v30  ;;  %v4662_v30 = vld [vmem:[%s8047_s0 + $0x188] ss:$0 sps:$4 sm:$0x11]  }
 0x167   :  { %v1775_v17 = vpop.f32.mrf.mxu0  ;;  %v2000_v55 = vpop.f32.mrf.mxu1  ;;  %v1017_v15 = vrot.slane %v4662_v30, 1 }
 0x168   :  { %8218 = vst [vmem:[#allocation64_spill] sm:$0xff] %v5934_v21  ;;  %v4663_v55 = vld [vmem:[%s8047_s0 + $0x18c] sm:$0xff]   ;;  %v969_v21 = vrot.slane %v4637_v25, 1 }
 0x169   :  { %v5942_v20 = vpop.f32.mrf.mxu0  ;;  %v2003_v54 = vpop.f32.mrf.mxu1  ;;  %2194 = vmatmul.mubr.bf16.gmra.mxu1 %v5937_v36  ;;  %2355 = vmatmul.mubr.bf16.gmra.mxu0 %v5409_v58 }
 0x16a   :  { %v5950_v17 = vadd.f32 %v2003_v54, %v5767_v45  ;;  %2201 = vmatprep.mubr.bf16.mxu1 %v4663_v55  ;;  %2362 = vmatprep.mubr.bf16.mxu0 %v5655_v56  ;;  %v5961_v45 = vsel %vm919_vm1, %v1016_v50, %v1017_v15  ;;  %v5969_v56 = vld [vmem:[%s8047_s0 + $0x198] sm:$0xff]   ;;  %v5973_v23 = vsel %vm919_vm1, %v968_v48, %v969_v21 }
 0x16b   :  { %v1780_v2 = vpop.f32.mrf.mxu0  ;;  %v2005_v41 = vpop.f32.mrf.mxu1  ;;  %8221 = vst [vmem:[#allocation67_spill] sm:$0xff] %v5961_v45  ;;  %8223 = vst [vmem:[#allocation69_spill] sm:$0xff] %v5973_v23 }
 0x16c   :  { %8220 = vst [vmem:[#allocation66_spill] sm:$0xff] %v5950_v17  ;;  %v644_v2 = vshrl.u32 %v5643_v26, 16  ;;  %v648_v41 = vrot.slane %v646_v19, 1  ;;  %v651_v17 = vshll.u32 %v4637_v25, 16 }
 0x16d   :  { %v5958_v58 = vpop.f32.mrf.mxu0  ;;  %v2006_v30 = vpop.f32.mrf.mxu1 }
 0x16e   :  { %v5964_v54 = vadd.f32 %v2006_v30, %v5777_v47  ;;  %v1019_v47 = vrot.slane %v4663_v55, 1  ;;  %v649_v21 = vor.u32 %v648_v41, %v644_v2 }
 0x16f   :  { %v1783_v36 = vpop.f32.mrf.mxu0  ;;  %v2008_v34 = vpop.f32.mrf.mxu1 }
 0x170   :  { %8222 = vst [vmem:[#allocation68_spill] sm:$0xff] %v5964_v54  ;;  %v4664_v34 = vld [vmem:[%s8047_s0 + $0x194] ss:$0 sps:$4 sm:$0x11]   ;;  %v653_v36 = vrot.slane %v651_v17, 1 }
 0x171   :  { %v5975_v13 = vpop.f32.mrf.mxu0  ;;  %v2011_v50 = vpop.f32.mrf.mxu1  ;;  %2202 = vmatmul.mubr.bf16.gmra.mxu1 %v5961_v45  ;;  %2363 = vmatmul.mubr.bf16.gmra.mxu0 %v5439_v1  ;;  %v1020_v26 = vrot.slane %v4664_v34, 1 }
 0x172   :  { %v5980_v15 = vadd.f32 %v2011_v50, %v5784_v29  ;;  %2209 = vmatprep.mubr.bf16.mxu1 %v5969_v56  ;;  %2370 = vmatprep.mubr.bf16.mxu0 %v5973_v23  ;;  %v5996_v50 = vsel %vm450_vm0, %v649_v21, %v653_v36 }
 0x173   :  { %v1788_v25 = vpop.f32.mrf.mxu0  ;;  %v2013_v19 = vpop.f32.mrf.mxu1  ;;  %v5993_v29 = vsel %vm919_vm1, %v1019_v47, %v1020_v26 }
 0x174   :  { %8224 = vst [vmem:[#allocation70_spill] sm:$0xff] %v5980_v15  ;;  %8225 = vst [vmem:[#allocation71_spill] sm:$0xff] %v5993_v29 }
 0x175   :  { %v5987_v48 = vpop.f32.mrf.mxu0  ;;  %v2014_v30 = vpop.f32.mrf.mxu1 }
 0x176   :  { %v5990_v55 = vadd.f32 %v2014_v30, %v5796_v61 }
 0x177   :  { %v1791_v23 = vpop.f32.mrf.mxu0  ;;  %v2016_v15 = vpop.f32.mrf.mxu1 }
 0x179   :  { %v5998_v54 = vpop.f32.mrf.mxu0  ;;  %v2019_v2 = vpop.f32.mrf.mxu1  ;;  %2210 = vmatmul.mubr.bf16.gmra.mxu1 %v5993_v29  ;;  %2371 = vmatmul.mubr.bf16.gmra.mxu0 %v5996_v50 }
 0x17a   :  { %v6003_v17 = vadd.f32 %v2019_v2, %v5803_v60  ;;  %2378 = vmatprep.mubr.bf16.mxu0 %v5688_v49  ;;  %2539 = vmatprep.mubr.bf16.mxu1 %v4928_v22  ;;  %v4665_v60 = vld [vmem:[%s8047_s0 + $0x18] sm:$0xff]  }
 0x17b   :  { %v1796_v61 = vpop.f32.mrf.mxu0  ;;  %v2021_v41 = vpop.f32.mrf.mxu1 }
 0x17d   :  { %v6007_v47 = vpop.f32.mrf.mxu0  ;;  %v2022_v23 = vpop.f32.mrf.mxu1 }
 0x17e   :  { %v6010_v15 = vadd.f32 %v2022_v23, %v5816_v46 }
 0x17f   :  { %v1799_v34 = vpop.f32.mrf.mxu0  ;;  %v2024_v26 = vpop.f32.mrf.mxu1 }
 0x181   :  { %v6012_v21 = vpop.f32.mrf.mxu0  ;;  %v2027_v36 = vpop.f32.mrf.mxu1  ;;  %2379 = vmatmul.mubr.bf16.gmra.mxu0 %v5490_v40  ;;  %2540 = vmatmul.mubr.bf16.vlgmr.msra.gmra.mxu1 %v4665_v60 }
 0x182   :  { %v6019_v22 = vadd.f32 %v2027_v36, %v5823_v27  ;;  %2386 = vmatprep.mubr.bf16.mxu0 %v5711_v35  ;;  %2547 = vmatprep.mubr.bf16.mxu1 %v4980_v7  ;;  %v4666_v27 = vld [vmem:[%s8047_s0 + $0x24] sm:$0xff]  }
 0x183   :  { %v1804_v49 = vpop.f32.mrf.mxu0  ;;  %v2029_v46 = vpop.f32.mrf.mxu1 }
 0x185   :  { %v6023_v25 = vpop.f32.mrf.mxu0  ;;  %v2030_v19 = vpop.f32.mrf.mxu1 }
 0x186   :  { %v6026_v30 = vadd.f32 %v2030_v19, %v5840_v38 }
 0x187   :  { %v1807_v40 = vpop.f32.mrf.mxu0  ;;  %v2032_v2 = vpop.f32.mrf.mxu1 }
 0x189   :  { %v6028_v61 = vpop.f32.mrf.mxu0  ;;  %v2035_v41 = vpop.f32.mrf.mxu1  ;;  %2387 = vmatmul.mubr.bf16.gmra.mxu0 %v5518_v43  ;;  %2548 = vmatmul.mubr.bf16.gmra.mxu1 %v4666_v27 }
 0x18a   :  { %v6035_v7 = vadd.f32 %v2035_v41, %v5848_v51  ;;  %2394 = vmatprep.mubr.bf16.mxu0 %v5728_v6  ;;  %2555 = vmatprep.mubr.bf16.mxu1 %v5027_v9  ;;  %v4667_v51 = vld [vmem:[%s8047_s0 + $0x30] sm:$0xff]   ;;  %v8228_v6 = vld [vmem:[#allocation2_spill] sm:$0xff] }
 0x18b   :  { %v1812_v38 = vpop.f32.mrf.mxu0  ;;  %v2037_v23 = vpop.f32.mrf.mxu1 }
 0x18d   :  { %v6039_v34 = vpop.f32.mrf.mxu0  ;;  %v2038_v26 = vpop.f32.mrf.mxu1 }
 0x18e   :  { %v6042_v36 = vadd.f32 %v2038_v26, %v5862_v8 }
 0x18f   :  { %v1815_v60 = vpop.f32.mrf.mxu0  ;;  %v2040_v49 = vpop.f32.mrf.mxu1 }
 0x190   :  { %v8226_v49 = vld [vmem:[#allocation23_spill] sm:$0xff] }
 0x191   :  { %v6044_v46 = vpop.f32.mrf.mxu0  ;;  %v2043_v19 = vpop.f32.mrf.mxu1  ;;  %2395 = vmatmul.mubr.bf16.gmra.mxu0 %v5544_v18  ;;  %2556 = vmatmul.mubr.bf16.gmra.mxu1 %v4667_v51 }
 0x192   :  { %v6051_v9 = vadd.f32 %v2043_v19, %v5870_v53  ;;  %2402 = vmatprep.mubr.bf16.mxu0 %v5745_v39  ;;  %2563 = vmatprep.mubr.bf16.mxu1 %v5079_v42  ;;  %v4668_v53 = vld [vmem:[%s8047_s0 + $0x3c] sm:$0xff]  }
 0x193   :  { %v1820_v8 = vpop.f32.mrf.mxu0  ;;  %v2045_v40 = vpop.f32.mrf.mxu1  ;;  %v8227_v39 = vld [vmem:[#allocation25_spill] sm:$0xff] }
 0x195   :  { %v6055_v2 = vpop.f32.mrf.mxu0  ;;  %v2046_v41 = vpop.f32.mrf.mxu1 }
 0x196   :  { %v6058_v27 = vadd.f32 %v2046_v41, %v5884_v31 }
 0x197   :  { %v1823_v38 = vpop.f32.mrf.mxu0  ;;  %v2048_v23 = vpop.f32.mrf.mxu1 }
 0x199   :  { %v6060_v26 = vpop.f32.mrf.mxu0  ;;  %v2051_v60 = vpop.f32.mrf.mxu1  ;;  %2403 = vmatmul.mubr.bf16.gmra.mxu0 %v8226_v49  ;;  %2564 = vmatmul.mubr.bf16.gmra.mxu1 %v4668_v53 }
 0x19a   :  { %v6067_v42 = vadd.f32 %v2051_v60, %v5892_v10  ;;  %2410 = vmatprep.mubr.bf16.mxu0 %v5765_v3  ;;  %2571 = vmatprep.mubr.bf16.mxu1 %v5123_v16  ;;  %v4669_v10 = vld [vmem:[%s8047_s0 + $0x48] sm:$0xff]  }
 0x19b   :  { %v1828_v31 = vpop.f32.mrf.mxu0  ;;  %v2053_v19 = vpop.f32.mrf.mxu1 }
 0x19d   :  { %v6071_v51 = vpop.f32.mrf.mxu0  ;;  %v2054_v8 = vpop.f32.mrf.mxu1 }
 0x19e   :  { %v6074_v40 = vadd.f32 %v2054_v8, %v5906_v37 }
 0x19f   :  { %v1831_v41 = vpop.f32.mrf.mxu0  ;;  %v2056_v38 = vpop.f32.mrf.mxu1 }
 0x1a1   :  { %v6076_v23 = vpop.f32.mrf.mxu0  ;;  %v2059_v53 = vpop.f32.mrf.mxu1  ;;  %2411 = vmatmul.mubr.bf16.gmra.mxu0 %v8227_v39  ;;  %2572 = vmatmul.mubr.bf16.gmra.mxu1 %v4669_v10 }
 0x1a2   :  { %v6083_v16 = vadd.f32 %v2059_v53, %v5914_v33  ;;  %2418 = vmatprep.mubr.bf16.mxu0 %v5782_v5  ;;  %2579 = vmatprep.mubr.bf16.mxu1 %v5164_v44  ;;  %v4670_v33 = vld [vmem:[%s8047_s0 + $0x54] sm:$0xff]  }
 0x1a3   :  { %v1836_v37 = vpop.f32.mrf.mxu0  ;;  %v2061_v60 = vpop.f32.mrf.mxu1 }
 0x1a5   :  { %v6087_v31 = vpop.f32.mrf.mxu0  ;;  %v2062_v19 = vpop.f32.mrf.mxu1 }
 0x1a6   :  { %v6090_v8 = vadd.f32 %v2062_v19, %v5931_v32 }
 0x1a7   :  { %v1839_v41 = vpop.f32.mrf.mxu0  ;;  %v2064_v38 = vpop.f32.mrf.mxu1 }
 0x1a9   :  { %v6092_v3 = vpop.f32.mrf.mxu0  ;;  %v2067_v10 = vpop.f32.mrf.mxu1  ;;  %2419 = vmatmul.mubr.bf16.gmra.mxu0 %v5626_v4  ;;  %2580 = vmatmul.mubr.bf16.gmra.mxu1 %v4670_v33 }
 0x1aa   :  { %v6099_v44 = vadd.f32 %v2067_v10, %v5942_v20  ;;  %2426 = vmatprep.mubr.bf16.mxu0 %v5801_v24  ;;  %2587 = vmatprep.mubr.bf16.mxu1 %v5202_v12  ;;  %v4671_v20 = vld [vmem:[%s8047_s0 + $0x60] sm:$0xff]  }
 0x1ab   :  { %v1844_v32 = vpop.f32.mrf.mxu0  ;;  %v2069_v53 = vpop.f32.mrf.mxu1 }
 0x1ad   :  { %v6103_v37 = vpop.f32.mrf.mxu0  ;;  %v2070_v60 = vpop.f32.mrf.mxu1 }
 0x1ae   :  { %v6106_v19 = vadd.f32 %v2070_v60, %v5958_v58 }
 0x1af   :  { %v1847_v41 = vpop.f32.mrf.mxu0  ;;  %v2072_v38 = vpop.f32.mrf.mxu1 }
 0x1b1   :  { %v6108_v5 = vpop.f32.mrf.mxu0  ;;  %v2075_v33 = vpop.f32.mrf.mxu1  ;;  %2427 = vmatmul.mubr.bf16.gmra.mxu0 %v5646_v28  ;;  %2588 = vmatmul.mubr.bf16.gmra.mxu1 %v4671_v20 }
 0x1b2   :  { %v6115_v12 = vadd.f32 %v2075_v33, %v5975_v13  ;;  %2434 = vmatprep.mubr.bf16.mxu0 %v5821_v52  ;;  %2595 = vmatprep.mubr.bf16.mxu1 %v5231_v57  ;;  %v4672_v13 = vld [vmem:[%s8047_s0 + $0x6c] sm:$0xff]  }
 0x1b3   :  { %v1852_v58 = vpop.f32.mrf.mxu0  ;;  %v2077_v10 = vpop.f32.mrf.mxu1 }
 0x1b5   :  { %v6119_v32 = vpop.f32.mrf.mxu0  ;;  %v2078_v53 = vpop.f32.mrf.mxu1 }
 0x1b6   :  { %v6122_v60 = vadd.f32 %v2078_v53, %v5987_v48 }
 0x1b7   :  { %v1855_v41 = vpop.f32.mrf.mxu0  ;;  %v2080_v38 = vpop.f32.mrf.mxu1 }
 0x1b9   :  { %v6124_v24 = vpop.f32.mrf.mxu0  ;;  %v2083_v20 = vpop.f32.mrf.mxu1  ;;  %2435 = vmatmul.mubr.bf16.gmra.mxu0 %v8228_v6  ;;  %2596 = vmatmul.mubr.bf16.gmra.mxu1 %v4672_v13  ;;  %v8229_v13 = vld [vmem:[#allocation3_spill] sm:$0xff] }
 0x1ba   :  { %v6131_v57 = vadd.f32 %v2083_v20, %v5998_v54  ;;  %2442 = vmatprep.mubr.bf16.mxu0 %v5846_v11  ;;  %2603 = vmatprep.mubr.bf16.mxu1 %v5282_v14  ;;  %v4673_v54 = vld [vmem:[%s8047_s0 + $0x78] sm:$0xff]  }
 0x1bb   :  { %v1860_v48 = vpop.f32.mrf.mxu0  ;;  %v2085_v33 = vpop.f32.mrf.mxu1 }
 0x1bd   :  { %v6135_v58 = vpop.f32.mrf.mxu0  ;;  %v2086_v10 = vpop.f32.mrf.mxu1 }
 0x1be   :  { %v6138_v53 = vadd.f32 %v2086_v10, %v6007_v47 }
 0x1bf   :  { %v1863_v41 = vpop.f32.mrf.mxu0  ;;  %v2088_v38 = vpop.f32.mrf.mxu1 }
 0x1c0   :  { %v8231_v38 = vld [vmem:[#allocation52_spill] sm:$0xff] }
 0x1c1   :  { %v2091_v52 = vpop.f32.mrf.mxu1  ;;  %v2252_v35 = vpop.f32.mrf.mxu0  ;;  %2443 = vmatmul.mubr.bf16.gmra.mxu0 %v8229_v13  ;;  %2604 = vmatmul.mubr.bf16.gmra.mxu1 %v4673_v54 }
 0x1c2   :  { %v6145_v14 = vadd.f32 %v2091_v52, %v6012_v21  ;;  %v6148_v20 = vadd.f32 %v2252_v35, %v5828_v0  ;;  %2450 = vmatprep.mubr.bf16.mxu0 %v5868_v62  ;;  %2611 = vmatprep.mubr.bf16.mxu1 %v5322_v59  ;;  %v8233_v35 = vld [vmem:[#allocation4_spill] sm:$0xff]  ;;  %v4674_v59 = vld [vmem:[%s8047_s0 + $0x84] sm:$0xff]  }
 0x1c3   :  { %v2093_v47 = vpop.f32.mrf.mxu1  ;;  %v2254_v48 = vpop.f32.mrf.mxu0  ;;  %v8238_v62 = vld [vmem:[#allocation55_spill] sm:$0xff] }
 0x1c4   :  { %8230 = vst [vmem:[#allocation23_spill] sm:$0xff] %v6145_v14  ;;  %v8235_v47 = vld [vmem:[#allocation54_spill] sm:$0xff]  ;;  %v8236_v48 = vld [vmem:[#allocation12_spill] sm:$0xff] }
 0x1c5   :  { %v2094_v33 = vpop.f32.mrf.mxu1  ;;  %v2255_v10 = vpop.f32.mrf.mxu0 }
 0x1c6   :  { %v6153_v41 = vadd.f32 %v2094_v33, %v6023_v25  ;;  %v6156_v11 = vadd.f32 %v2255_v10, %v8231_v38 }
 0x1c7   :  { %v2096_v54 = vpop.f32.mrf.mxu1  ;;  %v2257_v52 = vpop.f32.mrf.mxu0 }
 0x1c8   :  { %8232 = vst [vmem:[#allocation25_spill] sm:$0xff] %v6156_v11 }
 0x1c9   :  { %v2099_v21 = vpop.f32.mrf.mxu1  ;;  %v2260_v14 = vpop.f32.mrf.mxu0  ;;  %2451 = vmatmul.mubr.bf16.gmra.mxu0 %v8233_v35  ;;  %2612 = vmatmul.mubr.bf16.gmra.mxu1 %v4674_v59 }
 0x1ca   :  { %v6163_v0 = vadd.f32 %v2099_v21, %v6028_v61  ;;  %v6166_v25 = vadd.f32 %v2260_v14, %v8235_v47  ;;  %2458 = vmatprep.mubr.bf16.mxu0 %v5890_v63  ;;  %2619 = vmatprep.mubr.bf16.mxu1 %v8236_v48  ;;  %v8240_v14 = vld [vmem:[#allocation5_spill] sm:$0xff]  ;;  %v4675_v47 = vld [vmem:[%s8047_s0 + $0x90] sm:$0xff]  }
 0x1cb   :  { %v2101_v33 = vpop.f32.mrf.mxu1  ;;  %v2262_v10 = vpop.f32.mrf.mxu0 }
 0x1cc   :  { %8234 = vst [vmem:[#allocation2_spill] sm:$0xff] %v6163_v0  ;;  %v8242_v33 = vld [vmem:[#allocation57_spill] sm:$0xff]  ;;  %v8243_v10 = vld [vmem:[#allocation62_spill] sm:$0xff] }
 0x1cd   :  { %v2102_v38 = vpop.f32.mrf.mxu1  ;;  %v2263_v54 = vpop.f32.mrf.mxu0 }
 0x1ce   :  { %v6171_v52 = vadd.f32 %v2102_v38, %v6039_v34  ;;  %v6174_v11 = vadd.f32 %v2263_v54, %v8238_v62  ;;  %v8244_v62 = vld [vmem:[#allocation14_spill] sm:$0xff] }
 0x1cf   :  { %v2104_v59 = vpop.f32.mrf.mxu1  ;;  %v2265_v61 = vpop.f32.mrf.mxu0 }
 0x1d0   :  { %8237 = vst [vmem:[#allocation3_spill] sm:$0xff] %v6171_v52  ;;  %8239 = vst [vmem:[#allocation52_spill] sm:$0xff] %v6174_v11  ;;  %v8246_v11 = vld [vmem:[#allocation58_spill] sm:$0xff] }
 0x1d1   :  { %v2107_v21 = vpop.f32.mrf.mxu1  ;;  %v2268_v0 = vpop.f32.mrf.mxu0  ;;  %2459 = vmatmul.mubr.bf16.gmra.mxu0 %v8240_v14  ;;  %2620 = vmatmul.mubr.bf16.gmra.mxu1 %v4675_v47 }
 0x1d2   :  { %v6181_v48 = vadd.f32 %v2107_v21, %v6044_v46  ;;  %v6184_v34 = vadd.f32 %v2268_v0, %v8242_v33  ;;  %2466 = vmatprep.mubr.bf16.mxu0 %v8243_v10  ;;  %2627 = vmatprep.mubr.bf16.mxu1 %v8244_v62  ;;  %v8248_v0 = vld [vmem:[#allocation6_spill] sm:$0xff] }
 0x1d3   :  { %v2109_v38 = vpop.f32.mrf.mxu1  ;;  %v2270_v54 = vpop.f32.mrf.mxu0  ;;  %v4676_v33 = vld [vmem:[%s8047_s0 + $0x9c] sm:$0xff]  }
 0x1d4   :  { %8241 = vst [vmem:[#allocation4_spill] sm:$0xff] %v6181_v48  ;;  %v8250_v38 = vld [vmem:[#allocation60_spill] sm:$0xff]  ;;  %v8252_v54 = vld [vmem:[#allocation65_spill] sm:$0xff] }
 0x1d5   :  { %v2110_v59 = vpop.f32.mrf.mxu1  ;;  %v2271_v61 = vpop.f32.mrf.mxu0 }
 0x1d6   :  { %v6189_v63 = vadd.f32 %v2110_v59, %v6055_v2  ;;  %v6192_v52 = vadd.f32 %v2271_v61, %v8246_v11  ;;  %v8253_v11 = vld [vmem:[#allocation16_spill] sm:$0xff] }
 0x1d7   :  { %v2112_v47 = vpop.f32.mrf.mxu1  ;;  %v2273_v46 = vpop.f32.mrf.mxu0 }
 0x1d8   :  { %8245 = vst [vmem:[#allocation54_spill] sm:$0xff] %v6189_v63  ;;  %8247 = vst [vmem:[#allocation12_spill] sm:$0xff] %v6192_v52  ;;  %v8255_v52 = vld [vmem:[#allocation61_spill] sm:$0xff] }
 0x1d9   :  { %v2115_v21 = vpop.f32.mrf.mxu1  ;;  %v2276_v48 = vpop.f32.mrf.mxu0  ;;  %2467 = vmatmul.mubr.bf16.gmra.mxu0 %v8248_v0  ;;  %2628 = vmatmul.mubr.bf16.gmra.mxu1 %v4676_v33 }
 0x1da   :  { %v6199_v62 = vadd.f32 %v2115_v21, %v6060_v26  ;;  %v6202_v2 = vadd.f32 %v2276_v48, %v8250_v38  ;;  %2474 = vmatprep.mubr.bf16.mxu0 %v8252_v54  ;;  %2635 = vmatprep.mubr.bf16.mxu1 %v8253_v11  ;;  %v6215_v48 = vld [vmem:[%s8047_s0 + $0xcc] sm:$0xff]  }
 0x1db   :  { %v2117_v59 = vpop.f32.mrf.mxu1  ;;  %v2278_v61 = vpop.f32.mrf.mxu0  ;;  %v8257_v11 = vld [vmem:[#allocation7_spill] sm:$0xff] }
 0x1dc   :  { %8249 = vst [vmem:[#allocation55_spill] sm:$0xff] %v6199_v62  ;;  %8251 = vst [vmem:[#allocation5_spill] sm:$0xff] %v6202_v2  ;;  %v4677_v59 = vld [vmem:[%s8047_s0 + $0xa8] sm:$0xff]  }
 0x1dd   :  { %v2118_v47 = vpop.f32.mrf.mxu1  ;;  %v2279_v46 = vpop.f32.mrf.mxu0 }
 0x1de   :  { %v6207_v10 = vadd.f32 %v2118_v47, %v6071_v51  ;;  %v6210_v63 = vadd.f32 %v2279_v46, %v8255_v52  ;;  %v8259_v52 = vld [vmem:[#allocation63_spill] sm:$0xff] }
 0x1df   :  { %v2120_v33 = vpop.f32.mrf.mxu1  ;;  %v2281_v26 = vpop.f32.mrf.mxu0 }
 0x1e0   :  { %8254 = vst [vmem:[#allocation57_spill] sm:$0xff] %v6207_v10  ;;  %8256 = vst [vmem:[#allocation14_spill] sm:$0xff] %v6210_v63  ;;  %v6232_v33 = vld [vmem:[%s8047_s0 + $0xd4] ss:$0 sps:$4 sm:$0x11]   ;;  %v658_v26 = vshll.u32 %v6215_v48, 16 }
 0x1e1   :  { %v2123_v21 = vpop.f32.mrf.mxu1  ;;  %v2284_v38 = vpop.f32.mrf.mxu0  ;;  %2475 = vmatmul.mubr.bf16.gmra.mxu0 %v8257_v11  ;;  %2636 = vmatmul.mubr.bf16.gmra.mxu1 %v4677_v59  ;;  %v8264_v10 = vld [vmem:[#allocation8_spill] sm:$0xff] }
 0x1e2   :  { %v6222_v51 = vadd.f32 %v2123_v21, %v6076_v23  ;;  %v6225_v61 = vadd.f32 %v2284_v38, %v8259_v52  ;;  %2482 = vmatprep.mubr.bf16.mxu0 %v5961_v45  ;;  %2643 = vmatprep.mubr.bf16.mxu1 %v5439_v1  ;;  %v8262_v21 = vld [vmem:[#allocation64_spill] sm:$0xff]  ;;  %v4642_v1 = vld [vmem:[%s8047_s0 + $0x1a0] ss:$0 sps:$4 sm:$0x11]  }
 0x1e3   :  { %v2125_v47 = vpop.f32.mrf.mxu1  ;;  %v2286_v46 = vpop.f32.mrf.mxu0 }
 0x1e4   :  { %8258 = vst [vmem:[#allocation58_spill] sm:$0xff] %v6222_v51  ;;  %8260 = vst [vmem:[#allocation6_spill] sm:$0xff] %v6225_v61  ;;  %v656_v47 = vshrl.u32 %v6215_v48, 16  ;;  %v660_v46 = vrot.slane %v658_v26, 1  ;;  %v663_v61 = vshll.u32 %v6232_v33, 16  ;;  %v862_v26 = vshll.u32 %v5969_v56, 16 }
 0x1e5   :  { %v2126_v59 = vpop.f32.mrf.mxu1  ;;  %v2287_v54 = vpop.f32.mrf.mxu0 }
 0x1e6   :  { %v6236_v23 = vadd.f32 %v2126_v59, %v6087_v31  ;;  %v6239_v38 = vadd.f32 %v2287_v54, %v8262_v21  ;;  %v4678_v31 = vld [vmem:[%s8047_s0 + $0xb4] sm:$0xff]   ;;  %v8266_v54 = vld [vmem:[#allocation66_spill] sm:$0xff]  ;;  %v665_v2 = vrot.slane %v663_v61, 1 }
 0x1e7   :  { %v2128_v52 = vpop.f32.mrf.mxu1  ;;  %v2289_v45 = vpop.f32.mrf.mxu0 }
 0x1e8   :  { %8261 = vst [vmem:[#allocation60_spill] sm:$0xff] %v6236_v23  ;;  %8263 = vst [vmem:[#allocation16_spill] sm:$0xff] %v6239_v38  ;;  %v1022_v38 = vrot.slane %v5969_v56, 1  ;;  %v1023_v23 = vrot.slane %v4642_v1, 1 }
 0x1e9   :  { %v2131_v51 = vpop.f32.mrf.mxu1  ;;  %v2292_v63 = vpop.f32.mrf.mxu0  ;;  %2483 = vmatmul.mubr.bf16.gmra.mxu0 %v8264_v10  ;;  %2644 = vmatmul.mubr.bf16.gmra.mxu1 %v4678_v31  ;;  %v661_v10 = vor.u32 %v660_v46, %v656_v47 }
 0x1ea   :  { %v6251_v45 = vadd.f32 %v2131_v51, %v6092_v3  ;;  %v6254_v59 = vadd.f32 %v2292_v63, %v8266_v54  ;;  %2490 = vmatprep.mubr.bf16.mxu0 %v5993_v29  ;;  %2651 = vmatprep.mubr.bf16.mxu1 %v5996_v50  ;;  %v860_v3 = vshrl.u32 %v5969_v56, 16  ;;  %v8268_v51 = vld [vmem:[#allocation68_spill] sm:$0xff]  ;;  %v864_v50 = vrot.slane %v862_v26, 1  ;;  %v4679_v56 = vld [vmem:[%s8047_s0 + $0xc0] sm:$0xff]  }
 0x1eb   :  { %v2133_v21 = vpop.f32.mrf.mxu1  ;;  %v2294_v52 = vpop.f32.mrf.mxu0  ;;  %v867_v29 = vshll.u32 %v4642_v1, 16  ;;  %v666_v47 = vsel %vm450_vm0, %v661_v10, %v665_v2 }
 0x1ec   :  { %8265 = vst [vmem:[#allocation61_spill] sm:$0xff] %v6251_v45  ;;  %8267 = vst [vmem:[#allocation7_spill] sm:$0xff] %v6254_v59  ;;  %v6268_v52 = vsel %vm919_vm1, %v1022_v38, %v1023_v23  ;;  %v8269_v45 = vld [vmem:[#allocation9_spill] sm:$0xff]  ;;  %v865_v23 = vor.u32 %v864_v50, %v860_v3 }
 0x1ed   :  { %v2134_v31 = vpop.f32.mrf.mxu1  ;;  %v2295_v62 = vpop.f32.mrf.mxu0  ;;  %v869_v10 = vrot.slane %v867_v29, 1 }
 0x1ee   :  { %v6262_v63 = vadd.f32 %v2134_v31, %v6103_v37  ;;  %v6265_v54 = vadd.f32 %v2295_v62, %v8268_v51  ;;  %v8270_v62 = vld [vmem:[#allocation70_spill] sm:$0xff] }
 0x1ef   :  { %v2136_v59 = vpop.f32.mrf.mxu1  ;;  %v2297_v21 = vpop.f32.mrf.mxu0 }
 0x1f1   :  { %v2139_v61 = vpop.f32.mrf.mxu1  ;;  %v2300_v46 = vpop.f32.mrf.mxu0  ;;  %2491 = vmatmul.mubr.bf16.gmra.mxu0 %v8269_v45  ;;  %2652 = vmatmul.mubr.bf16.gmra.mxu1 %v4679_v56 }
 0x1f2   :  { %v6276_v37 = vadd.f32 %v2139_v61, %v6108_v5  ;;  %v6279_v1 = vadd.f32 %v2300_v46, %v8270_v62  ;;  %2498 = vmatprep.mubr.bf16.mxu0 %v6268_v52  ;;  %2659 = vmatprep.mubr.bf16.mxu1 %v666_v47  ;;  %v6289_v5 = vsel %vm450_vm0, %v865_v23, %v869_v10 }
 0x1f3   :  { %v2141_v2 = vpop.f32.mrf.mxu1  ;;  %v2302_v38 = vpop.f32.mrf.mxu0 }
 0x1f5   :  { %v2142_v59 = vpop.f32.mrf.mxu1  ;;  %v2303_v26 = vpop.f32.mrf.mxu0 }
 0x1f6   :  { %v6283_v31 = vadd.f32 %v2142_v59, %v6119_v32  ;;  %v6286_v51 = vadd.f32 %v2303_v26, %v5990_v55  ;;  %v8271_v55 = vld [vmem:[#allocation10_spill] sm:$0xff]  ;;  %v8272_v59 = vld [vmem:[#allocation11_spill] sm:$0xff] }
 0x1f7   :  { %v2144_v21 = vpop.f32.mrf.mxu1  ;;  %v2305_v61 = vpop.f32.mrf.mxu0 }
 0x1f9   :  { %v2147_v46 = vpop.f32.mrf.mxu1  ;;  %v2308_v56 = vpop.f32.mrf.mxu0  ;;  %2499 = vmatmul.mubr.bf16.gmra.mxu0 %v6289_v5  ;;  %2660 = vmatmul.mubr.bf16.gmra.mxu1 %v6215_v48 }
 0x1fa   :  { %v6294_v29 = vadd.f32 %v2147_v46, %v6124_v24  ;;  %v6297_v32 = vadd.f32 %v2308_v56, %v6003_v17  ;;  %2667 = vmatprep.mubr.bf16.mxu1 %v5518_v43  ;;  %4406 = vmatprep.mubr.bf16.mxu0 %v8271_v55  ;;  %v4680_v43 = vld [vmem:[%s8047_s0 + $0xf0] sm:$0xff]  }
 0x1fb   :  { %v2149_v3 = vpop.f32.mrf.mxu1  ;;  %v2310_v50 = vpop.f32.mrf.mxu0 }
 0x1fd   :  { %v2150_v47 = vpop.f32.mrf.mxu1  ;;  %v2311_v62 = vpop.f32.mrf.mxu0 }
 0x1fe   :  { %v6302_v23 = vadd.f32 %v2150_v47, %v6135_v58  ;;  %v6305_v10 = vadd.f32 %v2311_v62, %v6010_v15  ;;  %v8273_v58 = vld [vmem:[#allocation13_spill] sm:$0xff] }
 0x1ff   :  { %v2152_v2 = vpop.f32.mrf.mxu1  ;;  %v2313_v24 = vpop.f32.mrf.mxu0 }
 0x200   :  { %v8275_v2 = vld [vmem:[#allocation17_spill] sm:$0xff] }
 0x201   :  { %v6307_v38 = vpop.f32.mrf.mxu1  ;;  %v2316_v17 = vpop.f32.mrf.mxu0  ;;  %2668 = vmatmul.mubr.bf16.gmra.mxu1 %v4680_v43  ;;  %4407 = vmatmul.mubr.bf16.vlgmr.msra.gmra.mxu0 %v8272_v59 }
 0x202   :  { %v6314_v26 = vadd.f32 %v2316_v17, %v6019_v22  ;;  %2675 = vmatprep.mubr.bf16.mxu1 %v5544_v18  ;;  %4410 = vmatprep.mubr.bf16.mxu0 %v8273_v58  ;;  %v4681_v22 = vld [vmem:[%s8047_s0 + $0xfc] sm:$0xff]   ;;  %v8274_v18 = vld [vmem:[#allocation15_spill] sm:$0xff] }
 0x203   :  { %v2157_v15 = vpop.f32.mrf.mxu1  ;;  %v2318_v21 = vpop.f32.mrf.mxu0 }
 0x205   :  { %v6318_v61 = vpop.f32.mrf.mxu1  ;;  %v2319_v46 = vpop.f32.mrf.mxu0 }
 0x206   :  { %v6321_v56 = vadd.f32 %v2319_v46, %v6026_v30 }
 0x207   :  { %v2160_v55 = vpop.f32.mrf.mxu1  ;;  %v2321_v3 = vpop.f32.mrf.mxu0 }
 0x208   :  { %v8277_v3 = vld [vmem:[#allocation19_spill] sm:$0xff] }
 0x209   :  { %v6323_v50 = vpop.f32.mrf.mxu1  ;;  %v2324_v47 = vpop.f32.mrf.mxu0  ;;  %2676 = vmatmul.mubr.bf16.gmra.mxu1 %v4681_v22  ;;  %4411 = vmatmul.mubr.bf16.gmra.mxu0 %v8274_v18 }
 0x20a   :  { %v6330_v62 = vadd.f32 %v2324_v47, %v6035_v7  ;;  %2683 = vmatprep.mubr.bf16.mxu1 %v8226_v49  ;;  %4414 = vmatprep.mubr.bf16.mxu0 %v8275_v2  ;;  %v4682_v7 = vld [vmem:[%s8047_s0 + $0x108] sm:$0xff]   ;;  %v8276_v49 = vld [vmem:[#allocation18_spill] sm:$0xff] }
 0x20b   :  { %v2165_v30 = vpop.f32.mrf.mxu1  ;;  %v2326_v24 = vpop.f32.mrf.mxu0 }
 0x20d   :  { %v6334_v17 = vpop.f32.mrf.mxu1  ;;  %v2327_v43 = vpop.f32.mrf.mxu0 }
 0x20e   :  { %v6337_v59 = vadd.f32 %v2327_v43, %v6042_v36 }
 0x20f   :  { %v2168_v58 = vpop.f32.mrf.mxu1  ;;  %v2329_v15 = vpop.f32.mrf.mxu0 }
 0x211   :  { %v6339_v21 = vpop.f32.mrf.mxu1  ;;  %v2332_v46 = vpop.f32.mrf.mxu0  ;;  %2684 = vmatmul.mubr.bf16.gmra.mxu1 %v4682_v7  ;;  %4415 = vmatmul.mubr.bf16.gmra.mxu0 %v8276_v49 }
 0x212   :  { %v6346_v55 = vadd.f32 %v2332_v46, %v6051_v9  ;;  %2691 = vmatprep.mubr.bf16.mxu1 %v8227_v39  ;;  %4418 = vmatprep.mubr.bf16.mxu0 %v8277_v3  ;;  %v4683_v9 = vld [vmem:[%s8047_s0 + $0x114] sm:$0xff]  }
 0x213   :  { %v2173_v36 = vpop.f32.mrf.mxu1  ;;  %v2334_v47 = vpop.f32.mrf.mxu0  ;;  %v8278_v39 = vld [vmem:[#allocation20_spill] sm:$0xff]  ;;  %v8279_v46 = vld [vmem:[#allocation21_spill] sm:$0xff] }
 0x215   :  { %v6350_v22 = vpop.f32.mrf.mxu1  ;;  %v2335_v18 = vpop.f32.mrf.mxu0 }
 0x216   :  { %v6353_v2 = vadd.f32 %v2335_v18, %v6058_v27 }
 0x217   :  { %v2176_v30 = vpop.f32.mrf.mxu1  ;;  %v2337_v24 = vpop.f32.mrf.mxu0 }
 0x219   :  { %v6355_v43 = vpop.f32.mrf.mxu1  ;;  %v2340_v58 = vpop.f32.mrf.mxu0  ;;  %2692 = vmatmul.mubr.bf16.gmra.mxu1 %v4683_v9  ;;  %4419 = vmatmul.mubr.bf16.gmra.mxu0 %v8278_v39  ;;  %v8281_v9 = vld [vmem:[#allocation24_spill] sm:$0xff] }
 0x21a   :  { %v6362_v15 = vadd.f32 %v2340_v58, %v6067_v42  ;;  %2699 = vmatprep.mubr.bf16.mxu1 %v5626_v4  ;;  %4422 = vmatprep.mubr.bf16.mxu0 %v8279_v46  ;;  %v4684_v42 = vld [vmem:[%s8047_s0 + $0x120] sm:$0xff]  }
 0x21b   :  { %v2181_v27 = vpop.f32.mrf.mxu1  ;;  %v2342_v7 = vpop.f32.mrf.mxu0  ;;  %v8280_v4 = vld [vmem:[#allocation22_spill] sm:$0xff] }
 0x21d   :  { %v6366_v49 = vpop.f32.mrf.mxu1  ;;  %v2343_v3 = vpop.f32.mrf.mxu0 }
 0x21e   :  { %v6369_v36 = vadd.f32 %v2343_v3, %v6074_v40 }
 0x21f   :  { %v2184_v47 = vpop.f32.mrf.mxu1  ;;  %v2345_v18 = vpop.f32.mrf.mxu0 }
 0x221   :  { %v6371_v30 = vpop.f32.mrf.mxu1  ;;  %v2348_v24 = vpop.f32.mrf.mxu0  ;;  %2700 = vmatmul.mubr.bf16.gmra.mxu1 %v4684_v42  ;;  %4423 = vmatmul.mubr.bf16.gmra.mxu0 %v8280_v4  ;;  %v8283_v4 = vld [vmem:[#allocation27_spill] sm:$0xff] }
 0x222   :  { %v6378_v58 = vadd.f32 %v2348_v24, %v6083_v16  ;;  %2707 = vmatprep.mubr.bf16.mxu1 %v5646_v28  ;;  %4426 = vmatprep.mubr.bf16.mxu0 %v8281_v9  ;;  %v4685_v16 = vld [vmem:[%s8047_s0 + $0x12c] sm:$0xff]   ;;  %v8282_v28 = vld [vmem:[#allocation26_spill] sm:$0xff] }
 0x223   :  { %v2189_v40 = vpop.f32.mrf.mxu1  ;;  %v2350_v39 = vpop.f32.mrf.mxu0 }
 0x225   :  { %v6382_v46 = vpop.f32.mrf.mxu1  ;;  %v2351_v27 = vpop.f32.mrf.mxu0 }
 0x226   :  { %v6385_v7 = vadd.f32 %v2351_v27, %v6090_v8 }
 0x227   :  { %v2192_v3 = vpop.f32.mrf.mxu1  ;;  %v2353_v47 = vpop.f32.mrf.mxu0 }
 0x229   :  { %v6387_v18 = vpop.f32.mrf.mxu1  ;;  %v2356_v42 = vpop.f32.mrf.mxu0  ;;  %2708 = vmatmul.mubr.bf16.gmra.mxu1 %v4685_v16  ;;  %4427 = vmatmul.mubr.bf16.gmra.mxu0 %v8282_v28 }
 0x22a   :  { %v6394_v24 = vadd.f32 %v2356_v42, %v6099_v44  ;;  %2715 = vmatprep.mubr.bf16.mxu1 %v8228_v6  ;;  %4430 = vmatprep.mubr.bf16.mxu0 %v8283_v4  ;;  %v4686_v44 = vld [vmem:[%s8047_s0 + $0x138] sm:$0xff]   ;;  %v8284_v6 = vld [vmem:[#allocation28_spill] sm:$0xff] }
 0x22b   :  { %v2197_v8 = vpop.f32.mrf.mxu1  ;;  %v2358_v9 = vpop.f32.mrf.mxu0  ;;  %v8286_v4 = vld [vmem:[#allocation69_spill] sm:$0xff] }
 0x22c   :  { %v972_v8 = vrot.slane %v6232_v33, 1 }
 0x22d   :  { %v6398_v40 = vpop.f32.mrf.mxu1  ;;  %v2359_v39 = vpop.f32.mrf.mxu0 }
 0x22e   :  { %v6401_v27 = vadd.f32 %v2359_v39, %v6106_v19  ;;  %v971_v19 = vrot.slane %v6215_v48, 1  ;;  %v4687_v48 = vld [vmem:[%s8047_s0 + $0x144] sm:$0xff]  }
 0x22f   :  { %v2200_v3 = vpop.f32.mrf.mxu1  ;;  %v2361_v47 = vpop.f32.mrf.mxu0 }
 0x231   :  { %v6403_v16 = vpop.f32.mrf.mxu1  ;;  %v2364_v28 = vpop.f32.mrf.mxu0  ;;  %2716 = vmatmul.mubr.bf16.gmra.mxu1 %v4686_v44  ;;  %4431 = vmatmul.mubr.bf16.gmra.mxu0 %v8284_v6  ;;  %v973_v6 = vsel %vm919_vm1, %v971_v19, %v972_v8 }
 0x232   :  { %v6410_v42 = vadd.f32 %v2364_v28, %v6115_v12  ;;  %2723 = vmatprep.mubr.bf16.mxu1 %v8229_v13  ;;  %4434 = vmatprep.mubr.bf16.mxu0 %v8286_v4 }
 0x233   :  { %v2205_v9 = vpop.f32.mrf.mxu1  ;;  %v2366_v39 = vpop.f32.mrf.mxu0 }
 0x234   :  { %8285 = vst [vmem:[#allocation63_spill] sm:$0xff] %v6410_v42 }
 0x235   :  { %v6416_v3 = vpop.f32.mrf.mxu1  ;;  %v2367_v47 = vpop.f32.mrf.mxu0 }
 0x236   :  { %v6419_v44 = vadd.f32 %v2367_v47, %v6122_v60  ;;  %v8287_v60 = vld [vmem:[#allocation33_spill] sm:$0xff] }
 0x237   :  { %v2208_v12 = vpop.f32.mrf.mxu1  ;;  %v2369_v28 = vpop.f32.mrf.mxu0 }
 0x239   :  { %v6422_v42 = vpop.f32.mrf.mxu1  ;;  %v2372_v13 = vpop.f32.mrf.mxu0  ;;  %2724 = vmatmul.mubr.bf16.gmra.mxu1 %v4687_v48  ;;  %4435 = vmatmul.mubr.bf16.gmra.mxu0 %v973_v6  ;;  %v8290_v6 = vld [vmem:[#allocation23_spill] sm:$0xff] }
 0x23a   :  { %v6428_v33 = vadd.f32 %v2372_v13, %v6131_v57  ;;  %2731 = vmatprep.mubr.bf16.mxu1 %v8233_v35  ;;  %4438 = vmatprep.mubr.bf16.mxu0 %v8287_v60  ;;  %v4688_v57 = vld [vmem:[%s8047_s0 + $0x150] sm:$0xff]  }
 0x23b   :  { %v2213_v4 = vpop.f32.mrf.mxu1  ;;  %v2374_v19 = vpop.f32.mrf.mxu0  ;;  %v8289_v35 = vld [vmem:[#allocation36_spill] sm:$0xff] }
 0x23d   :  { %v6432_v8 = vpop.f32.mrf.mxu1  ;;  %v2375_v9 = vpop.f32.mrf.mxu0 }
 0x23e   :  { %v6435_v39 = vadd.f32 %v2375_v9, %v6138_v53  ;;  %v8292_v53 = vld [vmem:[#allocation39_spill] sm:$0xff] }
 0x23f   :  { %v2216_v47 = vpop.f32.mrf.mxu1  ;;  %v2377_v12 = vpop.f32.mrf.mxu0 }
 0x240   :  { %8288 = vst [vmem:[#allocation64_spill] sm:$0xff] %v6435_v39 }
 0x241   :  { %v2380_v28 = vpop.f32.mrf.mxu0  ;;  %v2541_v48 = vpop.f32.mrf.mxu1  ;;  %2732 = vmatmul.mubr.bf16.gmra.mxu1 %v4688_v57  ;;  %4439 = vmatmul.mubr.bf16.gmra.mxu0 %v8289_v35  ;;  %v8293_v57 = vld [vmem:[#allocation25_spill] sm:$0xff] }
 0x242   :  { %v6442_v13 = vadd.f32 %v2380_v28, %v8290_v6  ;;  %v6445_v60 = vadd.f32 %v2541_v48, %v6148_v20  ;;  %2739 = vmatprep.mubr.bf16.mxu1 %v8240_v14  ;;  %4442 = vmatprep.mubr.bf16.mxu0 %v8292_v53  ;;  %v4689_v20 = vld [vmem:[%s8047_s0 + $0x15c] sm:$0xff]  }
 0x243   :  { %v2382_v4 = vpop.f32.mrf.mxu0  ;;  %v2543_v19 = vpop.f32.mrf.mxu1  ;;  %v8295_v14 = vld [vmem:[#allocation42_spill] sm:$0xff] }
 0x244   :  { %8291 = vst [vmem:[#allocation66_spill] sm:$0xff] %v6442_v13  ;;  %v8296_v48 = vld [vmem:[#allocation2_spill] sm:$0xff]  ;;  %v8299_v4 = vld [vmem:[#allocation45_spill] sm:$0xff] }
 0x245   :  { %v2383_v9 = vpop.f32.mrf.mxu0  ;;  %v2544_v47 = vpop.f32.mrf.mxu1 }
 0x246   :  { %v6450_v12 = vadd.f32 %v2383_v9, %v6153_v41  ;;  %v6453_v39 = vadd.f32 %v2544_v47, %v8293_v57 }
 0x247   :  { %v2385_v35 = vpop.f32.mrf.mxu0  ;;  %v2546_v28 = vpop.f32.mrf.mxu1 }
 0x248   :  { %8294 = vst [vmem:[#allocation68_spill] sm:$0xff] %v6453_v39  ;;  %v8300_v35 = vld [vmem:[#allocation3_spill] sm:$0xff] }
 0x249   :  { %v2388_v6 = vpop.f32.mrf.mxu0  ;;  %v2549_v13 = vpop.f32.mrf.mxu1  ;;  %2740 = vmatmul.mubr.bf16.gmra.mxu1 %v4689_v20  ;;  %4443 = vmatmul.mubr.bf16.gmra.mxu0 %v8295_v14  ;;  %v8302_v20 = vld [vmem:[#allocation52_spill] sm:$0xff] }
 0x24a   :  { %v6460_v53 = vadd.f32 %v2388_v6, %v8296_v48  ;;  %v6463_v41 = vadd.f32 %v2549_v13, %v6166_v25  ;;  %2747 = vmatprep.mubr.bf16.mxu1 %v8248_v0  ;;  %4446 = vmatprep.mubr.bf16.mxu0 %v8299_v4  ;;  %v4690_v25 = vld [vmem:[%s8047_s0 + $0x168] sm:$0xff]   ;;  %v8304_v0 = vld [vmem:[#allocation48_spill] sm:$0xff] }
 0x24b   :  { %v2390_v19 = vpop.f32.mrf.mxu0  ;;  %v2551_v9 = vpop.f32.mrf.mxu1  ;;  %v8305_v13 = vld [vmem:[#allocation4_spill] sm:$0xff] }
 0x24c   :  { %8297 = vst [vmem:[#allocation9_spill] sm:$0xff] %v6460_v53  ;;  %8298 = vst [vmem:[#allocation70_spill] sm:$0xff] %v6463_v41  ;;  %v8308_v9 = vld [vmem:[#allocation51_spill] sm:$0xff] }
 0x24d   :  { %v2391_v47 = vpop.f32.mrf.mxu0  ;;  %v2552_v57 = vpop.f32.mrf.mxu1 }
 0x24e   :  { %v6468_v28 = vadd.f32 %v2391_v47, %v8300_v35  ;;  %v6471_v39 = vadd.f32 %v2552_v57, %v8302_v20 }
 0x24f   :  { %v2393_v14 = vpop.f32.mrf.mxu0  ;;  %v2554_v6 = vpop.f32.mrf.mxu1 }
 0x250   :  { %8301 = vst [vmem:[#allocation10_spill] sm:$0xff] %v6468_v28  ;;  %8303 = vst [vmem:[#allocation11_spill] sm:$0xff] %v6471_v39  ;;  %v8309_v14 = vld [vmem:[#allocation54_spill] sm:$0xff] }
 0x251   :  { %v2396_v48 = vpop.f32.mrf.mxu0  ;;  %v2557_v53 = vpop.f32.mrf.mxu1  ;;  %2748 = vmatmul.mubr.bf16.gmra.mxu1 %v4690_v25  ;;  %4447 = vmatmul.mubr.bf16.gmra.mxu0 %v8304_v0  ;;  %v8311_v25 = vld [vmem:[#allocation12_spill] sm:$0xff] }
 0x252   :  { %v6478_v4 = vadd.f32 %v2396_v48, %v8305_v13  ;;  %v6481_v19 = vadd.f32 %v2557_v53, %v6184_v34  ;;  %2755 = vmatprep.mubr.bf16.mxu1 %v8257_v11  ;;  %4450 = vmatprep.mubr.bf16.mxu0 %v8308_v9  ;;  %v4691_v34 = vld [vmem:[%s8047_s0 + $0x174] sm:$0xff]   ;;  %v8314_v53 = vld [vmem:[#allocation55_spill] sm:$0xff] }
 0x253   :  { %v2398_v47 = vpop.f32.mrf.mxu0  ;;  %v2559_v57 = vpop.f32.mrf.mxu1  ;;  %v8313_v11 = vld [vmem:[#allocation53_spill] sm:$0xff] }
 0x254   :  { %8306 = vst [vmem:[#allocation13_spill] sm:$0xff] %v6478_v4  ;;  %8307 = vst [vmem:[#allocation15_spill] sm:$0xff] %v6481_v19  ;;  %v8316_v47 = vld [vmem:[#allocation5_spill] sm:$0xff] }
 0x255   :  { %v2399_v35 = vpop.f32.mrf.mxu0  ;;  %v2560_v20 = vpop.f32.mrf.mxu1 }
 0x256   :  { %v6486_v6 = vadd.f32 %v2399_v35, %v8309_v14  ;;  %v6489_v28 = vadd.f32 %v2560_v20, %v8311_v25  ;;  %v8318_v35 = vld [vmem:[#allocation8_spill] sm:$0xff] }
 0x257   :  { %v2401_v0 = vpop.f32.mrf.mxu0  ;;  %v2562_v48 = vpop.f32.mrf.mxu1  ;;  %v8319_v20 = vld [vmem:[#allocation56_spill] sm:$0xff] }
 0x258   :  { %8310 = vst [vmem:[#allocation17_spill] sm:$0xff] %v6486_v6  ;;  %8312 = vst [vmem:[#allocation18_spill] sm:$0xff] %v6489_v28  ;;  %v8320_v6 = vld [vmem:[#allocation57_spill] sm:$0xff] }
 0x259   :  { %v2404_v13 = vpop.f32.mrf.mxu0  ;;  %v2565_v4 = vpop.f32.mrf.mxu1  ;;  %2756 = vmatmul.mubr.bf16.gmra.mxu1 %v4691_v34  ;;  %4451 = vmatmul.mubr.bf16.gmra.mxu0 %v8313_v11  ;;  %v8322_v34 = vld [vmem:[#allocation14_spill] sm:$0xff] }
 0x25a   :  { %v6496_v9 = vadd.f32 %v2404_v13, %v8314_v53  ;;  %v6499_v57 = vadd.f32 %v2565_v4, %v8316_v47  ;;  %2763 = vmatprep.mubr.bf16.mxu1 %v8318_v35  ;;  %4454 = vmatprep.mubr.bf16.mxu0 %v8319_v20  ;;  %v6512_v4 = vld [vmem:[%s8047_s0 + $0x1a4] sm:$0xff]  }
 0x25b   :  { %v2406_v14 = vpop.f32.mrf.mxu0  ;;  %v2567_v25 = vpop.f32.mrf.mxu1  ;;  %v4692_v35 = vld [vmem:[%s8047_s0 + $0x180] sm:$0xff]   ;;  %v8324_v20 = vld [vmem:[#allocation59_spill] sm:$0xff] }
 0x25c   :  { %8315 = vst [vmem:[#allocation19_spill] sm:$0xff] %v6496_v9  ;;  %8317 = vst [vmem:[#allocation20_spill] sm:$0xff] %v6499_v57  ;;  %v8327_v25 = vld [vmem:[#allocation6_spill] sm:$0xff]  ;;  %v8330_v9 = vld [vmem:[#allocation60_spill] sm:$0xff] }
 0x25d   :  { %v2407_v0 = vpop.f32.mrf.mxu0  ;;  %v2568_v48 = vpop.f32.mrf.mxu1  ;;  %v8334_v57 = vld [vmem:[#allocation65_spill] sm:$0xff] }
 0x25e   :  { %v6504_v28 = vadd.f32 %v2407_v0, %v8320_v6  ;;  %v6507_v19 = vadd.f32 %v2568_v48, %v8322_v34  ;;  %v8325_v6 = vld [vmem:[#allocation58_spill] sm:$0xff] }
 0x25f   :  { %v2409_v11 = vpop.f32.mrf.mxu0  ;;  %v2570_v13 = vpop.f32.mrf.mxu1  ;;  %v8329_v48 = vld [vmem:[#allocation62_spill] sm:$0xff] }
 0x260   :  { %8321 = vst [vmem:[#allocation21_spill] sm:$0xff] %v6504_v28  ;;  %8323 = vst [vmem:[#allocation22_spill] sm:$0xff] %v6507_v19  ;;  %v4646_v13 = vld [vmem:[%s8047_s0 + $0x1ac] ss:$0 sps:$4 sm:$0x11]  }
 0x261   :  { %v2412_v53 = vpop.f32.mrf.mxu0  ;;  %v2573_v47 = vpop.f32.mrf.mxu1  ;;  %2764 = vmatmul.mubr.bf16.gmra.mxu1 %v4692_v35  ;;  %4455 = vmatmul.mubr.bf16.gmra.mxu0 %v8324_v20  ;;  %v874_v35 = vshll.u32 %v6512_v4, 16  ;;  %v4693_v19 = vld [vmem:[%s8047_s0 + $0x18c] sm:$0xff]  }
 0x262   :  { %v6519_v14 = vadd.f32 %v2412_v53, %v8325_v6  ;;  %v6522_v0 = vadd.f32 %v2573_v47, %v8327_v25  ;;  %2771 = vmatprep.mubr.bf16.mxu1 %v8269_v45  ;;  %4458 = vmatprep.mubr.bf16.mxu0 %v8329_v48  ;;  %v8332_v6 = vld [vmem:[#allocation16_spill] sm:$0xff]  ;;  %v872_v48 = vshrl.u32 %v6512_v4, 16 }
 0x263   :  { %v2414_v34 = vpop.f32.mrf.mxu0  ;;  %v2575_v11 = vpop.f32.mrf.mxu1 }
 0x264   :  { %8326 = vst [vmem:[#allocation24_spill] sm:$0xff] %v6519_v14  ;;  %8328 = vst [vmem:[#allocation26_spill] sm:$0xff] %v6522_v0  ;;  %v876_v34 = vrot.slane %v874_v35, 1  ;;  %v879_v11 = vshll.u32 %v4646_v13, 16 }
 0x265   :  { %v2415_v28 = vpop.f32.mrf.mxu0  ;;  %v2576_v20 = vpop.f32.mrf.mxu1 }
 0x266   :  { %v6531_v53 = vadd.f32 %v2415_v28, %v8330_v9  ;;  %v6534_v47 = vadd.f32 %v2576_v20, %v8332_v6  ;;  %v8335_v28 = vld [vmem:[#allocation61_spill] sm:$0xff]  ;;  %v8336_v20 = vld [vmem:[#allocation7_spill] sm:$0xff] }
 0x267   :  { %v2417_v25 = vpop.f32.mrf.mxu0  ;;  %v2578_v45 = vpop.f32.mrf.mxu1 }
 0x268   :  { %8331 = vst [vmem:[#allocation27_spill] sm:$0xff] %v6531_v53  ;;  %8333 = vst [vmem:[#allocation28_spill] sm:$0xff] %v6534_v47  ;;  %v8337_v25 = vld [vmem:[#allocation67_spill] sm:$0xff]  ;;  %v877_v53 = vor.u32 %v876_v34, %v872_v48  ;;  %v881_v47 = vrot.slane %v879_v11, 1 }
 0x269   :  { %v2420_v14 = vpop.f32.mrf.mxu0  ;;  %v2581_v0 = vpop.f32.mrf.mxu1  ;;  %2772 = vmatmul.mubr.bf16.gmra.mxu1 %v4693_v19  ;;  %4459 = vmatmul.mubr.bf16.gmra.mxu0 %v8334_v57  ;;  %v8338_v48 = vld [vmem:[#allocation71_spill] sm:$0xff] }
 0x26a   :  { %v6542_v9 = vadd.f32 %v2420_v14, %v8335_v28  ;;  %v6545_v6 = vadd.f32 %v2581_v0, %v8336_v20  ;;  %2779 = vmatprep.mubr.bf16.mxu1 %v6289_v5  ;;  %4462 = vmatprep.mubr.bf16.mxu0 %v8337_v25  ;;  %v882_v0 = vsel %vm450_vm0, %v877_v53, %v881_v47  ;;  %v4694_v25 = vld [vmem:[%s8047_s0 + $0x198] sm:$0xff]  }
 0x26b   :  { %v2422_v35 = vpop.f32.mrf.mxu0  ;;  %v2583_v45 = vpop.f32.mrf.mxu1 }
 0x26d   :  { %v2423_v39 = vpop.f32.mrf.mxu0  ;;  %v2584_v41 = vpop.f32.mrf.mxu1 }
 0x26e   :  { %v6550_v19 = vadd.f32 %v2423_v39, %v6262_v63  ;;  %v6553_v57 = vadd.f32 %v2584_v41, %v6265_v54  ;;  %v1025_v54 = vrot.slane %v6512_v4, 1  ;;  %v1026_v39 = vrot.slane %v4646_v13, 1 }
 0x26f   :  { %v2425_v14 = vpop.f32.mrf.mxu0  ;;  %v2586_v28 = vpop.f32.mrf.mxu1 }
 0x271   :  { %v2428_v20 = vpop.f32.mrf.mxu0  ;;  %v2589_v5 = vpop.f32.mrf.mxu1  ;;  %2780 = vmatmul.mubr.bf16.gmra.mxu1 %v4694_v25  ;;  %4463 = vmatmul.mubr.bf16.gmra.mxu0 %v8338_v48 }
 0x272   :  { %v6561_v34 = vadd.f32 %v2428_v20, %v6276_v37  ;;  %v6564_v63 = vadd.f32 %v2589_v5, %v6279_v1  ;;  %2787 = vmatprep.mubr.bf16.mxu1 %v882_v0  ;;  %4466 = vmatprep.mubr.bf16.mxu0 %v6268_v52  ;;  %v1027_v37 = vsel %vm919_vm1, %v1025_v54, %v1026_v39 }
 0x273   :  { %v2430_v41 = vpop.f32.mrf.mxu0  ;;  %v2591_v53 = vpop.f32.mrf.mxu1 }
 0x275   :  { %v2431_v47 = vpop.f32.mrf.mxu0  ;;  %v2592_v11 = vpop.f32.mrf.mxu1 }
 0x276   :  { %v6569_v35 = vadd.f32 %v2431_v47, %v6283_v31  ;;  %v6572_v45 = vadd.f32 %v2592_v11, %v6286_v51 }
 0x277   :  { %v2433_v1 = vpop.f32.mrf.mxu0  ;;  %v2594_v14 = vpop.f32.mrf.mxu1 }
 0x278   :  { %v8340_v1 = vld [vmem:[#allocation30_spill] sm:$0xff] }
 0x279   :  { %v2436_v28 = vpop.f32.mrf.mxu0  ;;  %v2597_v0 = vpop.f32.mrf.mxu1  ;;  %2788 = vmatmul.mubr.bf16.gmra.mxu1 %v6512_v4  ;;  %4467 = vmatmul.mubr.bf16.gmra.mxu0 %v1027_v37  ;;  %v8339_v4 = vld [vmem:[#allocation29_spill] sm:$0xff] }
 0x27a   :  { %v6577_v52 = vadd.f32 %v2436_v28, %v6294_v29  ;;  %v6580_v13 = vadd.f32 %v2597_v0, %v6297_v32  ;;  %v2156_v41 = vadd.f32 %v6307_v38, %v8339_v4 }
 0x27b   :  { %v2438_v31 = vpop.f32.mrf.mxu0  ;;  %v2599_v20 = vpop.f32.mrf.mxu1 }
 0x27c   :  { %v8341_v20 = vld [vmem:[#allocation31_spill] sm:$0xff] }
 0x27d   :  { %v2439_v5 = vpop.f32.mrf.mxu0  ;;  %v2600_v51 = vpop.f32.mrf.mxu1 }
 0x27e   :  { %v6583_v25 = vadd.f32 %v2439_v5, %v6302_v23  ;;  %v6586_v48 = vadd.f32 %v2600_v51, %v6305_v10  ;;  %v2159_v23 = vadd.f32 %v6318_v61, %v8340_v1  ;;  %v2164_v5 = vadd.f32 %v6323_v50, %v8341_v20 }
 0x27f   :  { %v2441_v54 = vpop.f32.mrf.mxu0  ;;  %v2602_v39 = vpop.f32.mrf.mxu1 }
 0x281   :  { %v2444_v29 = vpop.f32.mrf.mxu0  ;;  %v2605_v53 = vpop.f32.mrf.mxu1 }
 0x282   :  { %v6590_v47 = vadd.f32 %v2444_v29, %v2156_v41  ;;  %v6593_v32 = vadd.f32 %v2605_v53, %v6314_v26  ;;  %v8342_v41 = vld [vmem:[#allocation32_spill] sm:$0xff] }
 0x283   :  { %v2446_v11 = vpop.f32.mrf.mxu0  ;;  %v2607_v37 = vpop.f32.mrf.mxu1  ;;  %v2167_v29 = vadd.f32 %v6334_v17, %v8342_v41 }
 0x285   :  { %v2447_v14 = vpop.f32.mrf.mxu0  ;;  %v2608_v10 = vpop.f32.mrf.mxu1 }
 0x286   :  { %v6597_v28 = vadd.f32 %v2447_v14, %v2159_v23  ;;  %v6600_v0 = vadd.f32 %v2608_v10, %v6321_v56  ;;  %v8343_v23 = vld [vmem:[#allocation34_spill] sm:$0xff] }
 0x287   :  { %v2449_v38 = vpop.f32.mrf.mxu0  ;;  %v2610_v31 = vpop.f32.mrf.mxu1  ;;  %v2172_v14 = vadd.f32 %v6339_v21, %v8343_v23 }
 0x289   :  { %v2452_v51 = vpop.f32.mrf.mxu0  ;;  %v2613_v26 = vpop.f32.mrf.mxu1 }
 0x28a   :  { %v6604_v54 = vadd.f32 %v2452_v51, %v2164_v5  ;;  %v6607_v39 = vadd.f32 %v2613_v26, %v6330_v62  ;;  %v8344_v5 = vld [vmem:[#allocation35_spill] sm:$0xff] }
 0x28b   :  { %v2454_v61 = vpop.f32.mrf.mxu0  ;;  %v2615_v4 = vpop.f32.mrf.mxu1  ;;  %v2175_v51 = vadd.f32 %v6350_v22, %v8344_v5 }
 0x28d   :  { %v2455_v53 = vpop.f32.mrf.mxu0  ;;  %v2616_v56 = vpop.f32.mrf.mxu1 }
 0x28e   :  { %v6611_v11 = vadd.f32 %v2455_v53, %v2167_v29  ;;  %v6614_v37 = vadd.f32 %v2616_v56, %v6337_v59  ;;  %v8345_v29 = vld [vmem:[#allocation37_spill] sm:$0xff] }
 0x28f   :  { %v2457_v50 = vpop.f32.mrf.mxu0  ;;  %v2618_v1 = vpop.f32.mrf.mxu1  ;;  %v2180_v53 = vadd.f32 %v6355_v43, %v8345_v29 }
 0x291   :  { %v2460_v10 = vpop.f32.mrf.mxu0  ;;  %v2621_v62 = vpop.f32.mrf.mxu1 }
 0x292   :  { %v6618_v38 = vadd.f32 %v2460_v10, %v2172_v14  ;;  %v6621_v31 = vadd.f32 %v2621_v62, %v6346_v55  ;;  %v8346_v14 = vld [vmem:[#allocation38_spill] sm:$0xff] }
 0x293   :  { %v2462_v17 = vpop.f32.mrf.mxu0  ;;  %v2623_v20 = vpop.f32.mrf.mxu1  ;;  %v2183_v10 = vadd.f32 %v6366_v49, %v8346_v14 }
 0x295   :  { %v2463_v26 = vpop.f32.mrf.mxu0  ;;  %v2624_v59 = vpop.f32.mrf.mxu1 }
 0x296   :  { %v6625_v61 = vadd.f32 %v2463_v26, %v2175_v51  ;;  %v6628_v4 = vadd.f32 %v2624_v59, %v6353_v2  ;;  %v8347_v51 = vld [vmem:[#allocation40_spill] sm:$0xff] }
 0x297   :  { %v2465_v21 = vpop.f32.mrf.mxu0  ;;  %v2626_v41 = vpop.f32.mrf.mxu1  ;;  %v2188_v26 = vadd.f32 %v6371_v30, %v8347_v51 }
 0x299   :  { %v2468_v56 = vpop.f32.mrf.mxu0  ;;  %v2629_v55 = vpop.f32.mrf.mxu1 }
 0x29a   :  { %v6632_v50 = vadd.f32 %v2468_v56, %v2180_v53  ;;  %v6635_v1 = vadd.f32 %v2629_v55, %v6362_v15  ;;  %v8348_v53 = vld [vmem:[#allocation41_spill] sm:$0xff] }
 0x29b   :  { %v2470_v22 = vpop.f32.mrf.mxu0  ;;  %v2631_v23 = vpop.f32.mrf.mxu1  ;;  %v2191_v56 = vadd.f32 %v6382_v46, %v8348_v53 }
 0x29d   :  { %v2471_v62 = vpop.f32.mrf.mxu0  ;;  %v2632_v2 = vpop.f32.mrf.mxu1 }
 0x29e   :  { %v6639_v17 = vadd.f32 %v2471_v62, %v2183_v10  ;;  %v6642_v20 = vadd.f32 %v2632_v2, %v6369_v36  ;;  %v8349_v10 = vld [vmem:[#allocation43_spill] sm:$0xff] }
 0x29f   :  { %v2473_v43 = vpop.f32.mrf.mxu0  ;;  %v2634_v5 = vpop.f32.mrf.mxu1  ;;  %v2196_v62 = vadd.f32 %v6387_v18, %v8349_v10 }
 0x2a1   :  { %v2476_v59 = vpop.f32.mrf.mxu0  ;;  %v2637_v15 = vpop.f32.mrf.mxu1 }
 0x2a2   :  { %v6646_v21 = vadd.f32 %v2476_v59, %v2188_v26  ;;  %v6649_v41 = vadd.f32 %v2637_v15, %v6378_v58  ;;  %v8350_v26 = vld [vmem:[#allocation44_spill] sm:$0xff] }
 0x2a3   :  { %v2478_v49 = vpop.f32.mrf.mxu0  ;;  %v2639_v29 = vpop.f32.mrf.mxu1  ;;  %v2199_v59 = vadd.f32 %v6398_v40, %v8350_v26 }
 0x2a5   :  { %v2479_v55 = vpop.f32.mrf.mxu0  ;;  %v2640_v36 = vpop.f32.mrf.mxu1 }
 0x2a6   :  { %v6653_v22 = vadd.f32 %v2479_v55, %v2191_v56  ;;  %v6656_v23 = vadd.f32 %v2640_v36, %v6385_v7  ;;  %v8352_v56 = vld [vmem:[#allocation46_spill] sm:$0xff] }
 0x2a7   :  { %v2481_v30 = vpop.f32.mrf.mxu0  ;;  %v2642_v14 = vpop.f32.mrf.mxu1  ;;  %v2204_v55 = vadd.f32 %v6403_v16, %v8352_v56 }
 0x2a8   :  { %v8354_v14 = vld [vmem:[#allocation63_spill] sm:$0xff] }
 0x2a9   :  { %v2484_v2 = vpop.f32.mrf.mxu0  ;;  %v2645_v58 = vpop.f32.mrf.mxu1 }
 0x2aa   :  { %v6660_v43 = vadd.f32 %v2484_v2, %v2196_v62  ;;  %v6663_v5 = vadd.f32 %v2645_v58, %v6394_v24  ;;  %v8355_v2 = vld [vmem:[#allocation47_spill] sm:$0xff] }
 0x2ab   :  { %v2486_v46 = vpop.f32.mrf.mxu0  ;;  %v2647_v51 = vpop.f32.mrf.mxu1  ;;  %v2207_v58 = vadd.f32 %v6416_v3, %v8355_v2  ;;  %v8361_v2 = vld [vmem:[#allocation64_spill] sm:$0xff] }
 0x2ad   :  { %v2487_v15 = vpop.f32.mrf.mxu0  ;;  %v2648_v7 = vpop.f32.mrf.mxu1 }
 0x2ae   :  { %v6667_v49 = vadd.f32 %v2487_v15, %v2199_v59  ;;  %v6670_v29 = vadd.f32 %v2648_v7, %v6401_v27  ;;  %v8357_v15 = vld [vmem:[#allocation49_spill] sm:$0xff] }
 0x2af   :  { %v2489_v18 = vpop.f32.mrf.mxu0  ;;  %v2650_v53 = vpop.f32.mrf.mxu1  ;;  %v2212_v7 = vadd.f32 %v6422_v42, %v8357_v15 }
 0x2b0   :  { %8351 = vst [vmem:[#allocation69_spill] sm:$0xff] %v6667_v49 }
 0x2b1   :  { %v2492_v36 = vpop.f32.mrf.mxu0  ;;  %v2653_v24 = vpop.f32.mrf.mxu1 }
 0x2b2   :  { %v6674_v30 = vadd.f32 %v2492_v36, %v2204_v55  ;;  %v6677_v10 = vadd.f32 %v2653_v24, %v8354_v14  ;;  %v8359_v24 = vld [vmem:[#allocation50_spill] sm:$0xff] }
 0x2b3   :  { %v2494_v40 = vpop.f32.mrf.mxu0  ;;  %v2655_v62 = vpop.f32.mrf.mxu1  ;;  %v2215_v14 = vadd.f32 %v6432_v8, %v8359_v24 }
 0x2b4   :  { %8353 = vst [vmem:[#allocation33_spill] sm:$0xff] %v6674_v30 }
 0x2b5   :  { %v2495_v46 = vpop.f32.mrf.mxu0  ;;  %v2656_v27 = vpop.f32.mrf.mxu1 }
 0x2b6   :  { %v6681_v51 = vadd.f32 %v2495_v46, %v2207_v58  ;;  %v6684_v26 = vadd.f32 %v2656_v27, %v6419_v44 }
 0x2b7   :  { %v2497_v16 = vpop.f32.mrf.mxu0  ;;  %v2658_v59 = vpop.f32.mrf.mxu1 }
 0x2b8   :  { %8356 = vst [vmem:[#allocation36_spill] sm:$0xff] %v6681_v51  ;;  %v8362_v59 = vld [vmem:[#allocation66_spill] sm:$0xff] }
 0x2b9   :  { %v2500_v18 = vpop.f32.mrf.mxu0  ;;  %v2661_v53 = vpop.f32.mrf.mxu1 }
 0x2ba   :  { %v6688_v56 = vadd.f32 %v2500_v18, %v2212_v7  ;;  %v6691_v55 = vadd.f32 %v2661_v53, %v6428_v33 }
 0x2bb   :  { %v2502_v3 = vpop.f32.mrf.mxu0  ;;  %v2663_v36 = vpop.f32.mrf.mxu1 }
 0x2bc   :  { %8358 = vst [vmem:[#allocation23_spill] sm:$0xff] %v6688_v56 }
 0x2bd   :  { %v2503_v40 = vpop.f32.mrf.mxu0  ;;  %v2664_v44 = vpop.f32.mrf.mxu1 }
 0x2be   :  { %v6695_v62 = vadd.f32 %v2503_v40, %v2215_v14  ;;  %v6698_v58 = vadd.f32 %v2664_v44, %v8361_v2  ;;  %v8364_v14 = vld [vmem:[#allocation68_spill] sm:$0xff] }
 0x2bf   :  { %v2505_v42 = vpop.f32.mrf.mxu0  ;;  %v2666_v46 = vpop.f32.mrf.mxu1 }
 0x2c0   :  { %8360 = vst [vmem:[#allocation39_spill] sm:$0xff] %v6695_v62  ;;  %v8366_v42 = vld [vmem:[#allocation70_spill] sm:$0xff] }
 0x2c1   :  { %v2669_v27 = vpop.f32.mrf.mxu1  ;;  %v4408_v16 = vpop.f32.mrf.mxu0 }
 0x2c2   :  { %v6701_v15 = vadd.f32 %v2669_v27, %v8362_v59  ;;  %v6713_v46 = vadd.f32 %v4408_v16, %v8366_v42  ;;  %v8368_v59 = vld [vmem:[#allocation9_spill] sm:$0xff]  ;;  %v8373_v42 = vld [vmem:[#allocation10_spill] sm:$0xff] }
 0x2c3   :  { %v2671_v33 = vpop.f32.mrf.mxu1  ;;  %v2830_v7 = vpop.f32.mrf.mxu0 }
 0x2c4   :  { %v6707_v24 = vadd.f32 %v2830_v7, %v6445_v60  ;;  %8367 = vst [vmem:[#allocation2_spill] sm:$0xff] %v6713_v46 }
 0x2c5   :  { %v2672_v18 = vpop.f32.mrf.mxu1  ;;  %v4409_v53 = vpop.f32.mrf.mxu0 }
 0x2c6   :  { %v6704_v8 = vadd.f32 %v2672_v18, %v6450_v12  ;;  %8363 = vst [vmem:[#allocation25_spill] sm:$0xff] %v6707_v24 }
 0x2c7   :  { %v2674_v3 = vpop.f32.mrf.mxu1  ;;  %v2833_v36 = vpop.f32.mrf.mxu0 }
 0x2c8   :  { %v6710_v40 = vadd.f32 %v2833_v36, %v8364_v14  ;;  %v8369_v3 = vld [vmem:[#allocation11_spill] sm:$0xff] }
 0x2c9   :  { %v2677_v44 = vpop.f32.mrf.mxu1  ;;  %v4412_v2 = vpop.f32.mrf.mxu0  ;;  %v6721_v62 = vadd.f32 %v4409_v53, %v8369_v3  ;;  %v8371_v14 = vld [vmem:[#allocation15_spill] sm:$0xff] }
 0x2ca   :  { %8365 = vst [vmem:[#allocation42_spill] sm:$0xff] %v6710_v40  ;;  %v3085_v27 = vadd.f32 %v6710_v40, %v6707_v24  ;;  %v6718_v33 = vadd.f32 %v2677_v44, %v8368_v59 }
 0x2cb   :  { %v2679_v12 = vpop.f32.mrf.mxu1  ;;  %v2846_v18 = vpop.f32.mrf.mxu0  ;;  %8370 = vst [vmem:[#allocation45_spill] sm:$0xff] %v6721_v62 }
 0x2cc   :  { %v3086_v60 = vadd.f32 %v3085_v27, %v6713_v46  ;;  %v6725_v56 = vadd.f32 %v2846_v18, %v8371_v14  ;;  %v8374_v12 = vld [vmem:[#allocation18_spill] sm:$0xff]  ;;  %v8376_v27 = vld [vmem:[#allocation20_spill] sm:$0xff]  ;;  %v8378_v14 = vld [vmem:[#allocation13_spill] sm:$0xff] }
 0x2cd   :  { %v2680_v7 = vpop.f32.mrf.mxu1  ;;  %v4413_v36 = vpop.f32.mrf.mxu0  ;;  %v6736_v46 = vadd.f32 %v4412_v2, %v8376_v27  ;;  %v8382_v27 = vld [vmem:[#allocation17_spill] sm:$0xff] }
 0x2ce   :  { %8372 = vst [vmem:[#allocation3_spill] sm:$0xff] %v6725_v56  ;;  %v3087_v16 = vadd.f32 %v3086_v60, %v6721_v62  ;;  %v6729_v51 = vadd.f32 %v2680_v7, %v8373_v42  ;;  %v8379_v42 = vld [vmem:[#allocation22_spill] sm:$0xff] }
 0x2cf   :  { %v2682_v40 = vpop.f32.mrf.mxu1  ;;  %v2849_v44 = vpop.f32.mrf.mxu0  ;;  %8377 = vst [vmem:[#allocation48_spill] sm:$0xff] %v6736_v46 }
 0x2d0   :  { %v3088_v59 = vadd.f32 %v3087_v16, %v6725_v56  ;;  %v6733_v24 = vadd.f32 %v2849_v44, %v8374_v12  ;;  %v6743_v40 = vadd.f32 %v4413_v36, %v8379_v42  ;;  %v8380_v12 = vld [vmem:[#allocation26_spill] sm:$0xff] }
 0x2d1   :  { %v2685_v53 = vpop.f32.mrf.mxu1  ;;  %v4416_v3 = vpop.f32.mrf.mxu0 }
 0x2d2   :  { %8375 = vst [vmem:[#allocation52_spill] sm:$0xff] %v6733_v24  ;;  %v3089_v18 = vadd.f32 %v3088_v59, %v6733_v24  ;;  %v6740_v30 = vadd.f32 %v2685_v53, %v8378_v14 }
 0x2d3   :  { %v2687_v60 = vpop.f32.mrf.mxu1  ;;  %v2862_v7 = vpop.f32.mrf.mxu0 }
 0x2d4   :  { %v3090_v16 = vadd.f32 %v3089_v18, %v6736_v46  ;;  %v6747_v62 = vadd.f32 %v2862_v7, %v8380_v12  ;;  %v8383_v60 = vld [vmem:[#allocation28_spill] sm:$0xff]  ;;  %v6758_v18 = vadd.f32 %v4416_v3, %v6545_v6  ;;  %v8385_v12 = vld [vmem:[#allocation19_spill] sm:$0xff]  ;;  %v8387_v3 = vld [vmem:[#allocation21_spill] sm:$0xff] }
 0x2d5   :  { %v2688_v56 = vpop.f32.mrf.mxu1  ;;  %v4417_v44 = vpop.f32.mrf.mxu0 }
 0x2d6   :  { %8381 = vst [vmem:[#allocation4_spill] sm:$0xff] %v6747_v62  ;;  %v3091_v2 = vadd.f32 %v3090_v16, %v6743_v40  ;;  %v6751_v49 = vadd.f32 %v2688_v56, %v8382_v27  ;;  %8384 = vst [vmem:[#allocation51_spill] sm:$0xff] %v6758_v18  ;;  %v6765_v27 = vadd.f32 %v4417_v44, %v6553_v57 }
 0x2d7   :  { %v2690_v59 = vpop.f32.mrf.mxu1  ;;  %v2865_v53 = vpop.f32.mrf.mxu0 }
 0x2d8   :  { %v3092_v14 = vadd.f32 %v3091_v2, %v6747_v62  ;;  %v6755_v24 = vadd.f32 %v2865_v53, %v8383_v60 }
 0x2d9   :  { %v2693_v36 = vpop.f32.mrf.mxu1  ;;  %v4420_v42 = vpop.f32.mrf.mxu0 }
 0x2da   :  { %v3093_v7 = vadd.f32 %v3092_v14, %v6755_v24  ;;  %v6762_v46 = vadd.f32 %v2693_v36, %v8385_v12 }
 0x2db   :  { %v2695_v16 = vpop.f32.mrf.mxu1  ;;  %v2878_v56 = vpop.f32.mrf.mxu0 }
 0x2dc   :  { %v3094_v2 = vadd.f32 %v3093_v7, %v6758_v18  ;;  %v6769_v60 = vadd.f32 %v2878_v56, %v6564_v63  ;;  %v6780_v7 = vadd.f32 %v4420_v42, %v6580_v13  ;;  %v8388_v56 = vld [vmem:[#allocation24_spill] sm:$0xff]  ;;  %v8389_v42 = vld [vmem:[#allocation27_spill] sm:$0xff] }
 0x2dd   :  { %v2696_v59 = vpop.f32.mrf.mxu1  ;;  %v4421_v53 = vpop.f32.mrf.mxu0 }
 0x2de   :  { %8386 = vst [vmem:[#allocation54_spill] sm:$0xff] %v6769_v60  ;;  %v3095_v6 = vadd.f32 %v3094_v2, %v6765_v27  ;;  %v6773_v62 = vadd.f32 %v2696_v59, %v8387_v3  ;;  %v6787_v3 = vadd.f32 %v4421_v53, %v6586_v48 }
 0x2df   :  { %v2698_v14 = vpop.f32.mrf.mxu1  ;;  %v2881_v36 = vpop.f32.mrf.mxu0 }
 0x2e0   :  { %v3096_v12 = vadd.f32 %v3095_v6, %v6769_v60  ;;  %v6777_v16 = vadd.f32 %v2881_v36, %v6572_v45 }
 0x2e1   :  { %v2701_v57 = vpop.f32.mrf.mxu1  ;;  %v4424_v44 = vpop.f32.mrf.mxu0 }
 0x2e2   :  { %v3097_v63 = vadd.f32 %v3096_v12, %v6777_v16  ;;  %v6784_v18 = vadd.f32 %v2701_v57, %v8388_v56 }
 0x2e3   :  { %v2703_v2 = vpop.f32.mrf.mxu1  ;;  %v2894_v59 = vpop.f32.mrf.mxu0 }
 0x2e4   :  { %v3098_v6 = vadd.f32 %v3097_v63, %v6780_v7  ;;  %v6791_v36 = vadd.f32 %v2894_v59, %v6593_v32  ;;  %v6802_v63 = vadd.f32 %v4424_v44, %v6607_v39 }
 0x2e5   :  { %v2704_v14 = vpop.f32.mrf.mxu1  ;;  %v4425_v45 = vpop.f32.mrf.mxu0 }
 0x2e6   :  { %v3099_v13 = vadd.f32 %v3098_v6, %v6787_v3  ;;  %v6795_v60 = vadd.f32 %v2704_v14, %v8389_v42  ;;  %v6809_v42 = vadd.f32 %v4425_v45, %v6614_v37 }
 0x2e7   :  { %v2706_v12 = vpop.f32.mrf.mxu1  ;;  %v2897_v57 = vpop.f32.mrf.mxu0 }
 0x2e8   :  { %v3100_v56 = vadd.f32 %v3099_v13, %v6791_v36  ;;  %v6799_v2 = vadd.f32 %v2897_v57, %v6600_v0 }
 0x2e9   :  { %v2709_v48 = vpop.f32.mrf.mxu1  ;;  %v4428_v53 = vpop.f32.mrf.mxu0 }
 0x2ea   :  { %v3101_v32 = vadd.f32 %v3100_v56, %v6799_v2  ;;  %v6806_v59 = vadd.f32 %v2709_v48, %v6542_v9 }
 0x2eb   :  { %v2711_v6 = vpop.f32.mrf.mxu1  ;;  %v2910_v14 = vpop.f32.mrf.mxu0 }
 0x2ec   :  { %v3102_v13 = vadd.f32 %v3101_v32, %v6802_v63  ;;  %v6813_v57 = vadd.f32 %v2910_v14, %v6621_v31  ;;  %v6824_v32 = vadd.f32 %v4428_v53, %v6635_v1 }
 0x2ed   :  { %v2712_v12 = vpop.f32.mrf.mxu1  ;;  %v4429_v0 = vpop.f32.mrf.mxu0 }
 0x2ee   :  { %v3103_v39 = vadd.f32 %v3102_v13, %v6809_v42  ;;  %v6817_v44 = vadd.f32 %v2712_v12, %v6550_v19  ;;  %v6831_v12 = vadd.f32 %v4429_v0, %v6642_v20 }
 0x2ef   :  { %v2714_v56 = vpop.f32.mrf.mxu1  ;;  %v2913_v9 = vpop.f32.mrf.mxu0 }
 0x2f0   :  { %v3104_v48 = vadd.f32 %v3103_v39, %v6813_v57  ;;  %v6821_v6 = vadd.f32 %v2913_v9, %v6628_v4 }
 0x2f1   :  { %v2717_v37 = vpop.f32.mrf.mxu1  ;;  %v4432_v45 = vpop.f32.mrf.mxu0 }
 0x2f2   :  { %v3105_v31 = vadd.f32 %v3104_v48, %v6821_v6  ;;  %v6828_v14 = vadd.f32 %v2717_v37, %v6561_v34 }
 0x2f3   :  { %v2719_v13 = vpop.f32.mrf.mxu1  ;;  %v2926_v19 = vpop.f32.mrf.mxu0 }
 0x2f4   :  { %v3106_v39 = vadd.f32 %v3105_v31, %v6824_v32  ;;  %v6835_v9 = vadd.f32 %v2926_v19, %v6649_v41  ;;  %v6846_v31 = vadd.f32 %v4432_v45, %v6663_v5 }
 0x2f5   :  { %v2720_v56 = vpop.f32.mrf.mxu1  ;;  %v4433_v4 = vpop.f32.mrf.mxu0 }
 0x2f6   :  { %v3107_v1 = vadd.f32 %v3106_v39, %v6831_v12  ;;  %v6839_v53 = vadd.f32 %v2720_v56, %v6569_v35  ;;  %v6853_v56 = vadd.f32 %v4433_v4, %v6670_v29 }
 0x2f7   :  { %v2722_v48 = vpop.f32.mrf.mxu1  ;;  %v2929_v34 = vpop.f32.mrf.mxu0 }
 0x2f8   :  { %v3108_v37 = vadd.f32 %v3107_v1, %v6835_v9  ;;  %v6843_v13 = vadd.f32 %v2929_v34, %v6656_v23 }
 0x2f9   :  { %v2725_v20 = vpop.f32.mrf.mxu1  ;;  %v4436_v0 = vpop.f32.mrf.mxu0 }
 0x2fa   :  { %v3109_v41 = vadd.f32 %v3108_v37, %v6843_v13  ;;  %v6850_v19 = vadd.f32 %v2725_v20, %v6577_v52 }
 0x2fb   :  { %v2727_v39 = vpop.f32.mrf.mxu1  ;;  %v2942_v35 = vpop.f32.mrf.mxu0 }
 0x2fc   :  { %v3110_v1 = vadd.f32 %v3109_v41, %v6846_v31  ;;  %v6857_v34 = vadd.f32 %v2942_v35, %v6677_v10  ;;  %v6868_v41 = vadd.f32 %v4436_v0, %v6691_v55 }
 0x2fd   :  { %v2728_v48 = vpop.f32.mrf.mxu1  ;;  %v4437_v23 = vpop.f32.mrf.mxu0 }
 0x2fe   :  { %v3111_v5 = vadd.f32 %v3110_v1, %v6853_v56  ;;  %v6861_v45 = vadd.f32 %v2728_v48, %v6583_v25  ;;  %v6875_v48 = vadd.f32 %v4437_v23, %v6698_v58 }
 0x2ff   :  { %v2730_v37 = vpop.f32.mrf.mxu1  ;;  %v2945_v52 = vpop.f32.mrf.mxu0 }
 0x300   :  { %v3112_v20 = vadd.f32 %v3111_v5, %v6857_v34  ;;  %v6865_v39 = vadd.f32 %v2945_v52, %v6684_v26  ;;  %8390 = vst [vmem:[#allocation12_spill] sm:$0xff] %v6875_v48 }
 0x301   :  { %v2733_v29 = vpop.f32.mrf.mxu1  ;;  %v4440_v4 = vpop.f32.mrf.mxu0 }
 0x302   :  { %v3113_v10 = vadd.f32 %v3112_v20, %v6865_v39  ;;  %v6872_v35 = vadd.f32 %v2733_v29, %v6590_v47 }
 0x303   :  { %v2735_v1 = vpop.f32.mrf.mxu1  ;;  %v2958_v25 = vpop.f32.mrf.mxu0 }
 0x304   :  { %v3114_v5 = vadd.f32 %v3113_v10, %v6868_v41  ;;  %v6879_v52 = vadd.f32 %v2958_v25, %v6701_v15  ;;  %v6890_v10 = vadd.f32 %v4440_v4, %v6718_v33 }
 0x305   :  { %v2736_v37 = vpop.f32.mrf.mxu1  ;;  %v4441_v26 = vpop.f32.mrf.mxu0 }
 0x306   :  { %8391 = vst [vmem:[#allocation53_spill] sm:$0xff] %v6879_v52  ;;  %v3115_v55 = vadd.f32 %v3114_v5, %v6875_v48  ;;  %v6883_v0 = vadd.f32 %v2736_v37, %v6597_v28  ;;  %8393 = vst [vmem:[#allocation5_spill] sm:$0xff] %v6890_v10  ;;  %v6897_v37 = vadd.f32 %v4441_v26, %v6729_v51 }
 0x307   :  { %v2738_v20 = vpop.f32.mrf.mxu1  ;;  %v2961_v47 = vpop.f32.mrf.mxu0 }
 0x308   :  { %v3116_v29 = vadd.f32 %v3115_v55, %v6879_v52  ;;  %v6887_v1 = vadd.f32 %v2961_v47, %v6704_v8  ;;  %8394 = vst [vmem:[#allocation8_spill] sm:$0xff] %v6897_v37 }
 0x309   :  { %v2741_v58 = vpop.f32.mrf.mxu1  ;;  %v4444_v23 = vpop.f32.mrf.mxu0 }
 0x30a   :  { %8392 = vst [vmem:[#allocation55_spill] sm:$0xff] %v6887_v1  ;;  %v3117_v15 = vadd.f32 %v3116_v29, %v6887_v1  ;;  %v6894_v25 = vadd.f32 %v2741_v58, %v6604_v54 }
 0x30b   :  { %v2743_v5 = vpop.f32.mrf.mxu1  ;;  %v2974_v28 = vpop.f32.mrf.mxu0 }
 0x30c   :  { %v3118_v55 = vadd.f32 %v3117_v15, %v6890_v10  ;;  %v6901_v47 = vadd.f32 %v2974_v28, %v6740_v30  ;;  %v6912_v15 = vadd.f32 %v4444_v23, %v6762_v46 }
 0x30d   :  { %v2744_v20 = vpop.f32.mrf.mxu1  ;;  %v4445_v8 = vpop.f32.mrf.mxu0 }
 0x30e   :  { %8395 = vst [vmem:[#allocation56_spill] sm:$0xff] %v6901_v47  ;;  %v3119_v33 = vadd.f32 %v3118_v55, %v6897_v37  ;;  %v6905_v4 = vadd.f32 %v2744_v20, %v6611_v11  ;;  %8397 = vst [vmem:[#allocation14_spill] sm:$0xff] %v6912_v15  ;;  %v6917_v11 = vadd.f32 %v4445_v8, %v6773_v62 }
 0x30f   :  { %v2746_v29 = vpop.f32.mrf.mxu1  ;;  %v2977_v54 = vpop.f32.mrf.mxu0 }
 0x310   :  { %v3120_v58 = vadd.f32 %v3119_v33, %v6901_v47  ;;  %v6909_v5 = vadd.f32 %v2977_v54, %v6751_v49  ;;  %8398 = vst [vmem:[#allocation59_spill] sm:$0xff] %v6917_v11  ;;  %v8406_v47 = vld [vmem:[#allocation36_spill] sm:$0xff] }
 0x311   :  { %v2749_v51 = vpop.f32.mrf.mxu1  ;;  %v4448_v26 = vpop.f32.mrf.mxu0 }
 0x312   :  { %8396 = vst [vmem:[#allocation57_spill] sm:$0xff] %v6909_v5  ;;  %v3121_v30 = vadd.f32 %v3120_v58, %v6909_v5  ;;  %v2750_v28 = vadd.f32 %v2749_v51, %v6618_v38 }
 0x313   :  { %v2751_v55 = vpop.f32.mrf.mxu1  ;;  %v2990_v37 = vpop.f32.mrf.mxu0 }
 0x314   :  { %v3122_v20 = vadd.f32 %v3121_v30, %v6912_v15  ;;  %v6921_v49 = vadd.f32 %v2990_v37, %v6784_v18  ;;  %v6930_v30 = vadd.f32 %v4448_v26, %v6806_v59 }
 0x315   :  { %v2752_v33 = vpop.f32.mrf.mxu1  ;;  %v4449_v29 = vpop.f32.mrf.mxu0 }
 0x316   :  { %8399 = vst [vmem:[#allocation58_spill] sm:$0xff] %v6921_v49  ;;  %v3123_v54 = vadd.f32 %v3122_v20, %v6917_v11  ;;  %v2753_v46 = vadd.f32 %v2752_v33, %v6625_v61  ;;  %8401 = vst [vmem:[#allocation62_spill] sm:$0xff] %v6930_v30  ;;  %v6935_v61 = vadd.f32 %v4449_v29, %v6817_v44 }
 0x317   :  { %v2754_v23 = vpop.f32.mrf.mxu1  ;;  %v2993_v58 = vpop.f32.mrf.mxu0 }
 0x318   :  { %v3124_v38 = vadd.f32 %v3123_v54, %v6921_v49  ;;  %v6927_v51 = vadd.f32 %v2993_v58, %v6795_v60  ;;  %8402 = vst [vmem:[#allocation60_spill] sm:$0xff] %v6935_v61  ;;  %v8405_v49 = vld [vmem:[#allocation33_spill] sm:$0xff] }
 0x319   :  { %v2757_v62 = vpop.f32.mrf.mxu1  ;;  %v4452_v8 = vpop.f32.mrf.mxu0 }
 0x31a   :  { %8400 = vst [vmem:[#allocation6_spill] sm:$0xff] %v6927_v51  ;;  %v3125_v55 = vadd.f32 %v3124_v38, %v6927_v51  ;;  %v2758_v18 = vadd.f32 %v2757_v62, %v6632_v50 }
 0x31b   :  { %v2759_v37 = vpop.f32.mrf.mxu1  ;;  %v3006_v20 = vpop.f32.mrf.mxu0 }
 0x31c   :  { %v3126_v33 = vadd.f32 %v3125_v55, %v6930_v30  ;;  %v6939_v60 = vadd.f32 %v3006_v20, %v6828_v14  ;;  %v6948_v55 = vadd.f32 %v4452_v8, %v6850_v19 }
 0x31d   :  { %v2760_v54 = vpop.f32.mrf.mxu1  ;;  %v4453_v23 = vpop.f32.mrf.mxu0 }
 0x31e   :  { %8403 = vst [vmem:[#allocation16_spill] sm:$0xff] %v6939_v60  ;;  %v3127_v58 = vadd.f32 %v3126_v33, %v6935_v61  ;;  %v2761_v59 = vadd.f32 %v2760_v54, %v6639_v17  ;;  %v6953_v17 = vadd.f32 %v4453_v23, %v6861_v45 }
 0x31f   :  { %v2762_v26 = vpop.f32.mrf.mxu1  ;;  %v3009_v38 = vpop.f32.mrf.mxu0 }
 0x320   :  { %v3128_v50 = vadd.f32 %v3127_v58, %v6939_v60  ;;  %v6945_v62 = vadd.f32 %v3009_v38, %v6839_v53  ;;  %v8404_v60 = vld [vmem:[#allocation69_spill] sm:$0xff] }
 0x321   :  { %v2765_v44 = vpop.f32.mrf.mxu1  ;;  %v4456_v29 = vpop.f32.mrf.mxu0 }
 0x322   :  { %v3129_v37 = vadd.f32 %v3128_v50, %v6945_v62  ;;  %v2766_v14 = vadd.f32 %v2765_v44, %v6646_v21 }
 0x323   :  { %v2767_v20 = vpop.f32.mrf.mxu1  ;;  %v3022_v33 = vpop.f32.mrf.mxu0 }
 0x324   :  { %v3130_v54 = vadd.f32 %v3129_v37, %v6948_v55  ;;  %v6957_v53 = vadd.f32 %v3022_v33, %v6872_v35  ;;  %v6966_v37 = vadd.f32 %v4456_v29, %v6894_v25 }
 0x325   :  { %v2768_v58 = vpop.f32.mrf.mxu1  ;;  %v4457_v26 = vpop.f32.mrf.mxu0 }
 0x326   :  { %v3131_v38 = vadd.f32 %v3130_v54, %v6953_v17  ;;  %v2769_v19 = vadd.f32 %v2768_v58, %v6653_v22  ;;  %v6971_v22 = vadd.f32 %v4457_v26, %v6905_v4 }
 0x327   :  { %v2770_v8 = vpop.f32.mrf.mxu1  ;;  %v3025_v50 = vpop.f32.mrf.mxu0 }
 0x328   :  { %v3132_v21 = vadd.f32 %v3131_v38, %v6957_v53  ;;  %v6963_v44 = vadd.f32 %v3025_v50, %v6883_v0 }
 0x329   :  { %v2773_v45 = vpop.f32.mrf.mxu1  ;;  %v4460_v23 = vpop.f32.mrf.mxu0 }
 0x32a   :  { %v3133_v20 = vadd.f32 %v3132_v21, %v6963_v44  ;;  %v2774_v35 = vadd.f32 %v2773_v45, %v6660_v43  ;;  %v3047_v45 = vadd.f32 %v4460_v23, %v2758_v18  ;;  %v8407_v23 = vld [vmem:[#allocation23_spill] sm:$0xff] }
 0x32b   :  { %v2775_v33 = vpop.f32.mrf.mxu1  ;;  %v3038_v54 = vpop.f32.mrf.mxu0 }
 0x32c   :  { %v3134_v58 = vadd.f32 %v3133_v20, %v6966_v37  ;;  %v3039_v0 = vadd.f32 %v3038_v54, %v2750_v28 }
 0x32d   :  { %v2776_v38 = vpop.f32.mrf.mxu1  ;;  %v4461_v8 = vpop.f32.mrf.mxu0 }
 0x32e   :  { %v3135_v50 = vadd.f32 %v3134_v58, %v6971_v22  ;;  %v2777_v61 = vadd.f32 %v2776_v38, %v8404_v60  ;;  %v3050_v20 = vadd.f32 %v4461_v8, %v2761_v59 }
 0x32f   :  { %v2778_v25 = vpop.f32.mrf.mxu1  ;;  %v3041_v29 = vpop.f32.mrf.mxu0 }
 0x330   :  { %v3136_v30 = vadd.f32 %v3135_v50, %v3039_v0  ;;  %v3042_v21 = vadd.f32 %v3041_v29, %v2753_v46 }
 0x331   :  { %v2781_v51 = vpop.f32.mrf.mxu1  ;;  %v4464_v43 = vpop.f32.mrf.mxu0 }
 0x332   :  { %v3137_v33 = vadd.f32 %v3136_v30, %v3042_v21  ;;  %v2782_v4 = vadd.f32 %v2781_v51, %v8405_v49  ;;  %v3063_v18 = vadd.f32 %v4464_v43, %v2774_v35 }
 0x333   :  { %v2783_v26 = vpop.f32.mrf.mxu1  ;;  %v3054_v11 = vpop.f32.mrf.mxu0 }
 0x334   :  { %v3138_v15 = vadd.f32 %v3137_v33, %v3047_v45  ;;  %v3055_v54 = vadd.f32 %v3054_v11, %v2766_v14  ;;  %v8408_v14 = vld [vmem:[#allocation39_spill] sm:$0xff] }
 0x335   :  { %v2784_v5 = vpop.f32.mrf.mxu1  ;;  %v4465_v28 = vpop.f32.mrf.mxu0 }
 0x336   :  { %v3139_v58 = vadd.f32 %v3138_v15, %v3050_v20  ;;  %v2785_v60 = vadd.f32 %v2784_v5, %v8406_v47  ;;  %v3066_v59 = vadd.f32 %v4465_v28, %v2777_v61 }
 0x337   :  { %v2786_v38 = vpop.f32.mrf.mxu1  ;;  %v3057_v25 = vpop.f32.mrf.mxu0 }
 0x338   :  { %v3140_v50 = vadd.f32 %v3139_v58, %v3055_v54  ;;  %v3058_v46 = vadd.f32 %v3057_v25, %v2769_v19 }
 0x339   :  { %v2789_v29 = vpop.f32.mrf.mxu1  ;;  %v4468_v10 = vpop.f32.mrf.mxu0 }
 0x33a   :  { %v3141_v30 = vadd.f32 %v3140_v50, %v3058_v46  ;;  %v2790_v49 = vadd.f32 %v2789_v29, %v8407_v23 }
 0x33b   :  { %v2791_v51 = vpop.f32.mrf.mxu1  ;;  %v3070_v26 = vpop.f32.mrf.mxu0 }
 0x33c   :  { %v3142_v8 = vadd.f32 %v3141_v30, %v3063_v18  ;;  %v3071_v11 = vadd.f32 %v3070_v26, %v2782_v4  ;;  %v3079_v25 = vadd.f32 %v4468_v10, %v2790_v49 }
 0x33d   :  { %v2792_v33 = vpop.f32.mrf.mxu1  ;;  %v4469_v1 = vpop.f32.mrf.mxu0 }
 0x33e   :  { %v3143_v15 = vadd.f32 %v3142_v8, %v3066_v59  ;;  %v2793_v47 = vadd.f32 %v2792_v33, %v8408_v14  ;;  %v8417_v33 = vld [vmem:[#allocation2_spill] sm:$0xff] }
 0x33f   :  { %v2794_v5 = vpop.f32.mrf.mxu1  ;;  %v3073_v38 = vpop.f32.mrf.mxu0 }
 0x340   :  { %v3144_v58 = vadd.f32 %v3143_v15, %v3071_v11  ;;  %v3074_v19 = vadd.f32 %v3073_v38, %v2785_v60  ;;  %v3082_v35 = vadd.f32 %v4469_v1, %v2793_v47  ;;  %v8418_v47 = vld [vmem:[#allocation45_spill] sm:$0xff]  ;;  %v8419_v38 = vld [vmem:[#allocation3_spill] sm:$0xff] }
 0x342   :  { %v3145_v52 = vadd.f32 %v3144_v58, %v3074_v19 }
 0x344   :  { %v3146_v43 = vadd.f32 %v3145_v52, %v3079_v25 }
 0x346   :  { %v3147_v50 = vadd.f32 %v3146_v43, %v3082_v35 }
 0x348   :  { %v3148_v29 = vrot.slane %v3147_v50, 4 }
 0x34a   :  { %v3149_v23 = vadd.f32 %v3148_v29, %v3147_v50 }
 0x34c   :  { %v3150_v51 = vrot.slane %v3149_v23, 2 }
 0x34e   :  { %v3151_v61 = vadd.f32 %v3150_v51, %v3149_v23  ;;  %v8421_v23 = vld [vmem:[#allocation48_spill] sm:$0xff] }
 0x350   :  { %v3152_v28 = vrot.slane %v3151_v61, 1 }
 0x352   :  { %v3153_v30 = vadd.f32 %v3152_v28, %v3151_v61 }
 0x354   :  { %v6980_v48 = vmul.f32 0.001953125, %v3153_v30 }
 0x356   :  { %v6984_v4 = vsub.f32 %v6945_v62, %v6980_v48  ;;  %v6988_v60 = vsub.f32 %v6948_v55, %v6980_v48  ;;  %v6992_v52 = vsub.f32 %v6953_v17, %v6980_v48  ;;  %v6996_v1 = vsub.f32 %v6957_v53, %v6980_v48 }
 0x357   :  { %v7000_v10 = vsub.f32 %v6963_v44, %v6980_v48  ;;  %v7004_v62 = vsub.f32 %v6966_v37, %v6980_v48  ;;  %v7008_v55 = vsub.f32 %v6971_v22, %v6980_v48  ;;  %v7011_v49 = vsub.f32 %v3039_v0, %v6980_v48 }
 0x358   :  { %v7014_v17 = vsub.f32 %v3042_v21, %v6980_v48  ;;  %v7017_v53 = vsub.f32 %v3047_v45, %v6980_v48  ;;  %v7020_v44 = vsub.f32 %v3050_v20, %v6980_v48  ;;  %v7023_v26 = vsub.f32 %v3055_v54, %v6980_v48 }
 0x359   :  { %v7026_v37 = vsub.f32 %v3058_v46, %v6980_v48  ;;  %v7029_v22 = vsub.f32 %v3063_v18, %v6980_v48  ;;  %v7032_v0 = vsub.f32 %v3066_v59, %v6980_v48  ;;  %v7035_v21 = vsub.f32 %v3071_v11, %v6980_v48  ;;  %v8415_v46 = vld [vmem:[#allocation25_spill] sm:$0xff]  ;;  %v8416_v18 = vld [vmem:[#allocation42_spill] sm:$0xff] }
 0x35a   :  { %v7038_v45 = vsub.f32 %v3074_v19, %v6980_v48  ;;  %v7041_v20 = vsub.f32 %v3079_v25, %v6980_v48  ;;  %v7044_v54 = vsub.f32 %v3082_v35, %v6980_v48  ;;  %v7048_v8 = vsub.f32 %v8415_v46, %v6980_v48  ;;  %v8420_v35 = vld [vmem:[#allocation52_spill] sm:$0xff] }
 0x35b   :  { %8409 = vst [vmem:[#allocation65_spill] sm:$0xff] %v7026_v37  ;;  %8410 = vst [vmem:[#allocation61_spill] sm:$0xff] %v7029_v22  ;;  %v7052_v59 = vsub.f32 %v8416_v18, %v6980_v48  ;;  %v7056_v11 = vsub.f32 %v8417_v33, %v6980_v48  ;;  %v7064_v5 = vsub.f32 %v8418_v47, %v6980_v48  ;;  %v8422_v33 = vld [vmem:[#allocation4_spill] sm:$0xff] }
 0x35c   :  { %8411 = vst [vmem:[#allocation7_spill] sm:$0xff] %v7032_v0  ;;  %8412 = vst [vmem:[#allocation67_spill] sm:$0xff] %v7035_v21  ;;  %v3219_v15 = vmul.f32 %v7048_v8, %v7048_v8  ;;  %v7068_v58 = vsub.f32 %v8419_v38, %v6980_v48  ;;  %v7074_v43 = vsub.f32 %v8420_v35, %v6980_v48 }
 0x35d   :  { %8413 = vst [vmem:[#allocation71_spill] sm:$0xff] %v7038_v45  ;;  %8414 = vst [vmem:[#allocation29_spill] sm:$0xff] %v7044_v54  ;;  %v3220_v14 = vmul.f32 %v7052_v59, %v7052_v59  ;;  %v3221_v19 = vmul.f32 %v7056_v11, %v7056_v11  ;;  %v3222_v50 = vmul.f32 %v7064_v5, %v7064_v5 }
 0x35e   :  { %v7080_v51 = vsub.f32 %v8421_v23, %v6980_v48  ;;  %v3223_v61 = vmul.f32 %v7068_v58, %v7068_v58  ;;  %v7086_v30 = vsub.f32 %v6743_v40, %v6980_v48  ;;  %v3224_v46 = vmul.f32 %v7074_v43, %v7074_v43 }
 0x35f   :  { %v3283_v25 = vadd.f32 %v3220_v14, %v3219_v15  ;;  %v7092_v15 = vsub.f32 %v8422_v33, %v6980_v48  ;;  %v7098_v38 = vsub.f32 %v6755_v24, %v6980_v48  ;;  %v7110_v23 = vsub.f32 %v6765_v27, %v6980_v48 }
 0x360   :  { %v3225_v14 = vmul.f32 %v7080_v51, %v7080_v51  ;;  %v3226_v40 = vmul.f32 %v7086_v30, %v7086_v30 }
 0x361   :  { %v3284_v29 = vadd.f32 %v3283_v25, %v3221_v19  ;;  %v8423_v25 = vld [vmem:[#allocation51_spill] sm:$0xff]  ;;  %v3228_v24 = vmul.f32 %v7098_v38, %v7098_v38  ;;  %v3230_v27 = vmul.f32 %v7110_v23, %v7110_v23 }
 0x362   :  { %v7104_v35 = vsub.f32 %v8423_v25, %v6980_v48 }
 0x363   :  { %v3285_v28 = vadd.f32 %v3284_v29, %v3222_v50  ;;  %v3227_v50 = vmul.f32 %v7092_v15, %v7092_v15 }
 0x365   :  { %v3286_v18 = vadd.f32 %v3285_v28, %v3223_v61  ;;  %v8424_v28 = vld [vmem:[#allocation54_spill] sm:$0xff] }
 0x367   :  { %v3287_v47 = vadd.f32 %v3286_v18, %v3224_v46  ;;  %v7116_v46 = vsub.f32 %v8424_v28, %v6980_v48  ;;  %v3229_v18 = vmul.f32 %v7104_v35, %v7104_v35  ;;  %v7146_v28 = vsub.f32 %v6799_v2, %v6980_v48 }
 0x369   :  { %v3288_v19 = vadd.f32 %v3287_v47, %v3225_v14  ;;  %v7122_v14 = vsub.f32 %v6777_v16, %v6980_v48  ;;  %v3236_v2 = vmul.f32 %v7146_v28, %v7146_v28 }
 0x36b   :  { %v3289_v29 = vadd.f32 %v3288_v19, %v3226_v40  ;;  %v7128_v40 = vsub.f32 %v6780_v7, %v6980_v48  ;;  %v3231_v19 = vmul.f32 %v7116_v46, %v7116_v46  ;;  %v3232_v16 = vmul.f32 %v7122_v14, %v7122_v14 }
 0x36d   :  { %v3290_v61 = vadd.f32 %v3289_v29, %v3227_v50  ;;  %v7134_v50 = vsub.f32 %v6787_v3, %v6980_v48  ;;  %v3233_v7 = vmul.f32 %v7128_v40, %v7128_v40 }
 0x36f   :  { %v3291_v33 = vadd.f32 %v3290_v61, %v3228_v24  ;;  %v7140_v24 = vsub.f32 %v6791_v36, %v6980_v48  ;;  %v3234_v3 = vmul.f32 %v7134_v50, %v7134_v50 }
 0x371   :  { %v3292_v47 = vadd.f32 %v3291_v33, %v3229_v18  ;;  %v7152_v33 = vsub.f32 %v6802_v63, %v6980_v48  ;;  %v3235_v36 = vmul.f32 %v7140_v24, %v7140_v24 }
 0x373   :  { %v3293_v25 = vadd.f32 %v3292_v47, %v3230_v27  ;;  %v7158_v47 = vsub.f32 %v6809_v42, %v6980_v48  ;;  %v3237_v63 = vmul.f32 %v7152_v33, %v7152_v33 }
 0x375   :  { %v3294_v29 = vadd.f32 %v3293_v25, %v3231_v19  ;;  %v7164_v25 = vsub.f32 %v6813_v57, %v6980_v48  ;;  %v3238_v42 = vmul.f32 %v7158_v47, %v7158_v47 }
 0x377   :  { %v3295_v61 = vadd.f32 %v3294_v29, %v3232_v16  ;;  %v7170_v29 = vsub.f32 %v6821_v6, %v6980_v48  ;;  %v3239_v57 = vmul.f32 %v7164_v25, %v7164_v25 }
 0x379   :  { %v3296_v18 = vadd.f32 %v3295_v61, %v3233_v7  ;;  %v7176_v61 = vsub.f32 %v6824_v32, %v6980_v48  ;;  %v3240_v6 = vmul.f32 %v7170_v29, %v7170_v29 }
 0x37b   :  { %v3297_v27 = vadd.f32 %v3296_v18, %v3234_v3  ;;  %v7182_v18 = vsub.f32 %v6831_v12, %v6980_v48  ;;  %v3241_v32 = vmul.f32 %v7176_v61, %v7176_v61 }
 0x37d   :  { %v3298_v19 = vadd.f32 %v3297_v27, %v3235_v36  ;;  %v7188_v27 = vsub.f32 %v6835_v9, %v6980_v48  ;;  %v3242_v12 = vmul.f32 %v7182_v18, %v7182_v18 }
 0x37f   :  { %v3299_v16 = vadd.f32 %v3298_v19, %v3236_v2  ;;  %v7194_v19 = vsub.f32 %v6843_v13, %v6980_v48  ;;  %v3243_v9 = vmul.f32 %v7188_v27, %v7188_v27 }
 0x381   :  { %v3300_v7 = vadd.f32 %v3299_v16, %v3237_v63  ;;  %v7200_v16 = vsub.f32 %v6846_v31, %v6980_v48  ;;  %v3244_v13 = vmul.f32 %v7194_v19, %v7194_v19 }
 0x383   :  { %v3301_v3 = vadd.f32 %v3300_v7, %v3238_v42  ;;  %v7206_v7 = vsub.f32 %v6853_v56, %v6980_v48  ;;  %v3245_v31 = vmul.f32 %v7200_v16, %v7200_v16 }
 0x385   :  { %v3302_v36 = vadd.f32 %v3301_v3, %v3239_v57  ;;  %v7212_v3 = vsub.f32 %v6857_v34, %v6980_v48  ;;  %v3246_v56 = vmul.f32 %v7206_v7, %v7206_v7 }
 0x387   :  { %v3303_v2 = vadd.f32 %v3302_v36, %v3240_v6  ;;  %8425 = vst [vmem:[#allocation30_spill] sm:$0xff] %v7212_v3  ;;  %v7218_v36 = vsub.f32 %v6865_v39, %v6980_v48  ;;  %v3247_v34 = vmul.f32 %v7212_v3, %v7212_v3 }
 0x389   :  { %v3304_v63 = vadd.f32 %v3303_v2, %v3241_v32  ;;  %8426 = vst [vmem:[#allocation31_spill] sm:$0xff] %v7218_v36  ;;  %v7224_v2 = vsub.f32 %v6868_v41, %v6980_v48  ;;  %v3248_v39 = vmul.f32 %v7218_v36, %v7218_v36 }
 0x38b   :  { %v3305_v42 = vadd.f32 %v3304_v63, %v3242_v12  ;;  %8427 = vst [vmem:[#allocation32_spill] sm:$0xff] %v7224_v2  ;;  %v8428_v63 = vld [vmem:[#allocation12_spill] sm:$0xff]  ;;  %v3249_v41 = vmul.f32 %v7224_v2, %v7224_v2 }
 0x38d   :  { %v3306_v57 = vadd.f32 %v3305_v42, %v3243_v9  ;;  %v7230_v9 = vsub.f32 %v8428_v63, %v6980_v48  ;;  %v8434_v63 = vld [vmem:[#allocation5_spill] sm:$0xff] }
 0x38e   :  { %v7248_v36 = vsub.f32 %v8434_v63, %v6980_v48  ;;  %v8440_v63 = vld [vmem:[#allocation57_spill] sm:$0xff] }
 0x38f   :  { %v3307_v6 = vadd.f32 %v3306_v57, %v3244_v13  ;;  %8429 = vst [vmem:[#allocation34_spill] sm:$0xff] %v7230_v9  ;;  %v8430_v13 = vld [vmem:[#allocation53_spill] sm:$0xff] }
 0x390   :  { %v7236_v57 = vsub.f32 %v8430_v13, %v6980_v48  ;;  %8435 = vst [vmem:[#allocation38_spill] sm:$0xff] %v7248_v36  ;;  %v8436_v13 = vld [vmem:[#allocation8_spill] sm:$0xff] }
 0x391   :  { %v3308_v32 = vadd.f32 %v3307_v6, %v3245_v31  ;;  %v8432_v6 = vld [vmem:[#allocation55_spill] sm:$0xff]  ;;  %v7254_v2 = vsub.f32 %v8436_v13, %v6980_v48  ;;  %v8442_v13 = vld [vmem:[#allocation14_spill] sm:$0xff] }
 0x392   :  { %8431 = vst [vmem:[#allocation35_spill] sm:$0xff] %v7236_v57  ;;  %v7242_v3 = vsub.f32 %v8432_v6, %v6980_v48  ;;  %v8438_v6 = vld [vmem:[#allocation56_spill] sm:$0xff] }
 0x393   :  { %v3309_v12 = vadd.f32 %v3308_v32, %v3246_v56  ;;  %v3250_v56 = vmul.f32 %v7230_v9, %v7230_v9  ;;  %8437 = vst [vmem:[#allocation40_spill] sm:$0xff] %v7254_v2  ;;  %v7260_v9 = vsub.f32 %v8438_v6, %v6980_v48  ;;  %v8444_v6 = vld [vmem:[#allocation59_spill] sm:$0xff] }
 0x394   :  { %8433 = vst [vmem:[#allocation37_spill] sm:$0xff] %v7242_v3 }
 0x395   :  { %v3310_v42 = vadd.f32 %v3309_v12, %v3247_v34  ;;  %v3251_v34 = vmul.f32 %v7236_v57, %v7236_v57  ;;  %8439 = vst [vmem:[#allocation41_spill] sm:$0xff] %v7260_v9  ;;  %v7266_v57 = vsub.f32 %v8440_v63, %v6980_v48  ;;  %v8446_v63 = vld [vmem:[#allocation58_spill] sm:$0xff] }
 0x397   :  { %v3311_v31 = vadd.f32 %v3310_v42, %v3248_v39  ;;  %v3252_v39 = vmul.f32 %v7242_v3, %v7242_v3  ;;  %8441 = vst [vmem:[#allocation43_spill] sm:$0xff] %v7266_v57  ;;  %v7272_v3 = vsub.f32 %v8442_v13, %v6980_v48  ;;  %v8447_v13 = vld [vmem:[#allocation6_spill] sm:$0xff] }
 0x399   :  { %v3312_v32 = vadd.f32 %v3311_v31, %v3249_v41  ;;  %v3253_v41 = vmul.f32 %v7248_v36, %v7248_v36  ;;  %8443 = vst [vmem:[#allocation44_spill] sm:$0xff] %v7272_v3  ;;  %v7278_v36 = vsub.f32 %v8444_v6, %v6980_v48  ;;  %v8449_v6 = vld [vmem:[#allocation62_spill] sm:$0xff] }
 0x39b   :  { %v3313_v12 = vadd.f32 %v3312_v32, %v3250_v56  ;;  %v3254_v56 = vmul.f32 %v7254_v2, %v7254_v2  ;;  %8445 = vst [vmem:[#allocation46_spill] sm:$0xff] %v7278_v36  ;;  %v7284_v2 = vsub.f32 %v8446_v63, %v6980_v48  ;;  %v8450_v63 = vld [vmem:[#allocation60_spill] sm:$0xff] }
 0x39d   :  { %v3314_v42 = vadd.f32 %v3313_v12, %v3251_v34  ;;  %v3255_v34 = vmul.f32 %v7260_v9, %v7260_v9  ;;  %v7290_v9 = vsub.f32 %v8447_v13, %v6980_v48  ;;  %v8451_v13 = vld [vmem:[#allocation16_spill] sm:$0xff] }
 0x39f   :  { %v3315_v31 = vadd.f32 %v3314_v42, %v3252_v39  ;;  %v3256_v39 = vmul.f32 %v7266_v57, %v7266_v57  ;;  %8448 = vst [vmem:[#allocation63_spill] sm:$0xff] %v7290_v9  ;;  %v7296_v57 = vsub.f32 %v8449_v6, %v6980_v48 }
 0x3a1   :  { %v3316_v32 = vadd.f32 %v3315_v31, %v3253_v41  ;;  %v3257_v41 = vmul.f32 %v7272_v3, %v7272_v3  ;;  %v7302_v3 = vsub.f32 %v8450_v63, %v6980_v48 }
 0x3a3   :  { %v3317_v12 = vadd.f32 %v3316_v32, %v3254_v56  ;;  %v3258_v56 = vmul.f32 %v7278_v36, %v7278_v36  ;;  %v7308_v36 = vsub.f32 %v8451_v13, %v6980_v48  ;;  %v3262_v6 = vmul.f32 %v7302_v3, %v7302_v3 }
 0x3a4   :  { %v3265_v48 = vmul.f32 %v6988_v60, %v6988_v60  ;;  %v3266_v13 = vmul.f32 %v6992_v52, %v6992_v52 }
 0x3a5   :  { %v3318_v42 = vadd.f32 %v3317_v12, %v3255_v34  ;;  %v3259_v34 = vmul.f32 %v7284_v2, %v7284_v2 }
 0x3a7   :  { %v3319_v31 = vadd.f32 %v3318_v42, %v3256_v39  ;;  %v3260_v39 = vmul.f32 %v7290_v9, %v7290_v9  ;;  %v3264_v9 = vmul.f32 %v6984_v4, %v6984_v4 }
 0x3a9   :  { %v3320_v32 = vadd.f32 %v3319_v31, %v3257_v41  ;;  %v3261_v41 = vmul.f32 %v7296_v57, %v7296_v57 }
 0x3ab   :  { %v3321_v12 = vadd.f32 %v3320_v32, %v3258_v56  ;;  %v3263_v32 = vmul.f32 %v7308_v36, %v7308_v36 }
 0x3ad   :  { %v3322_v42 = vadd.f32 %v3321_v12, %v3259_v34 }
 0x3af   :  { %v3323_v31 = vadd.f32 %v3322_v42, %v3260_v39  ;;  %v3267_v42 = vmul.f32 %v6996_v1, %v6996_v1 }
 0x3b1   :  { %v3324_v56 = vadd.f32 %v3323_v31, %v3261_v41  ;;  %v3268_v31 = vmul.f32 %v7000_v10, %v7000_v10 }
 0x3b3   :  { %v3325_v63 = vadd.f32 %v3324_v56, %v3262_v6  ;;  %v3269_v56 = vmul.f32 %v7004_v62, %v7004_v62 }
 0x3b5   :  { %v3326_v34 = vadd.f32 %v3325_v63, %v3263_v32  ;;  %v3270_v63 = vmul.f32 %v7008_v55, %v7008_v55 }
 0x3b7   :  { %v3327_v12 = vadd.f32 %v3326_v34, %v3264_v9  ;;  %v3271_v34 = vmul.f32 %v7011_v49, %v7011_v49 }
 0x3b9   :  { %v3328_v39 = vadd.f32 %v3327_v12, %v3265_v48  ;;  %v3272_v12 = vmul.f32 %v7014_v17, %v7014_v17 }
 0x3bb   :  { %v3329_v41 = vadd.f32 %v3328_v39, %v3266_v13  ;;  %v3273_v39 = vmul.f32 %v7017_v53, %v7017_v53 }
 0x3bd   :  { %v3330_v6 = vadd.f32 %v3329_v41, %v3267_v42  ;;  %v3274_v41 = vmul.f32 %v7020_v44, %v7020_v44 }
 0x3bf   :  { %v3331_v32 = vadd.f32 %v3330_v6, %v3268_v31  ;;  %v3275_v6 = vmul.f32 %v7023_v26, %v7023_v26 }
 0x3c1   :  { %v3332_v9 = vadd.f32 %v3331_v32, %v3269_v56  ;;  %v3276_v32 = vmul.f32 %v7026_v37, %v7026_v37 }
 0x3c3   :  { %v3333_v48 = vadd.f32 %v3332_v9, %v3270_v63  ;;  %v3277_v9 = vmul.f32 %v7029_v22, %v7029_v22 }
 0x3c5   :  { %v3334_v13 = vadd.f32 %v3333_v48, %v3271_v34  ;;  %v3278_v48 = vmul.f32 %v7032_v0, %v7032_v0 }
 0x3c7   :  { %v3335_v42 = vadd.f32 %v3334_v13, %v3272_v12  ;;  %v3279_v13 = vmul.f32 %v7035_v21, %v7035_v21 }
 0x3c9   :  { %v3336_v31 = vadd.f32 %v3335_v42, %v3273_v39  ;;  %v3280_v42 = vmul.f32 %v7038_v45, %v7038_v45  ;;  %v3358_v45 = vlaneseq }
 0x3cb   :  { %v3337_v56 = vadd.f32 %v3336_v31, %v3274_v41  ;;  %v3281_v31 = vmul.f32 %v7041_v20, %v7041_v20 }
 0x3cd   :  { %v3338_v63 = vadd.f32 %v3337_v56, %v3275_v6  ;;  %v3282_v56 = vmul.f32 %v7044_v54, %v7044_v54 }
 0x3cf   :  { %v3339_v34 = vadd.f32 %v3338_v63, %v3276_v32 }
 0x3d1   :  { %v3340_v12 = vadd.f32 %v3339_v34, %v3277_v9 }
 0x3d3   :  { %v3341_v39 = vadd.f32 %v3340_v12, %v3278_v48 }
 0x3d5   :  { %v3342_v41 = vadd.f32 %v3341_v39, %v3279_v13  ;;  %v3359_v13 = vshrl.u32 %v3358_v45, 7  ;;  %v3353_v39 = vld [vmem:[%s8048_s2] sm:$0x1] }
 0x3d7   :  { %v3343_v6 = vadd.f32 %v3342_v41, %v3280_v42  ;;  %v3360_v42 = vsub.s32 0, %v3359_v13  ;;  %v8459_v13 = vld [vmem:[#allocation40_spill] sm:$0xff] }
 0x3d9   :  { %v3344_v32 = vadd.f32 %v3343_v6, %v3281_v31  ;;  %v8453_v6 = vld [vmem:[#allocation31_spill] sm:$0xff] }
 0x3db   :  { %v3345_v63 = vadd.f32 %v3344_v32, %v3282_v56  ;;  %v8454_v56 = vld [vmem:[#allocation32_spill] sm:$0xff]  ;;  %v8455_v32 = vld [vmem:[#allocation34_spill] sm:$0xff] }
 0x3dd   :  { %v3346_v22 = vrot.slane %v3345_v63, 4 }
 0x3df   :  { %v3347_v0 = vadd.f32 %v3346_v22, %v3345_v63  ;;  %v8456_v63 = vld [vmem:[#allocation35_spill] sm:$0xff] }
 0x3e1   :  { %v3348_v9 = vrot.slane %v3347_v0, 2 }
 0x3e3   :  { %v3349_v34 = vadd.f32 %v3348_v9, %v3347_v0  ;;  %v8457_v9 = vld [vmem:[#allocation37_spill] sm:$0xff] }
 0x3e5   :  { %v3350_v37 = vrot.slane %v3349_v34, 1 }
 0x3e7   :  { %v3351_v21 = vadd.f32 %v3350_v37, %v3349_v34 }
 0x3e9   :  { %v3352_v48 = vmul.f32 0.001953125, %v3351_v21 }
 0x3eb   :  { %v3354_v12 = vadd.f32 1e-05, %v3352_v48  ;;  %v8458_v48 = vld [vmem:[#allocation38_spill] sm:$0xff] }
 0x3ed   :  { %4647 = vrsqrt.f32 %v3354_v12 }
 0x3fa   :  { %v4648_v41 = vpop.eup %4647 }
 0x3fb   :  { %v3356_v54 = vmul.f32 %v4648_v41, %v3353_v39 }
 0x3fd   :  { %v7357_v31 = vrot.slane %v3356_v54, %v3360_v42  ;;  %v8460_v42 = vld [vmem:[#allocation41_spill] sm:$0xff] }
 0x3ff   :  { %v7361_v22 = vmul.f32 %v7357_v31, %v7048_v8  ;;  %v7365_v37 = vmul.f32 %v7357_v31, %v7052_v59  ;;  %v7369_v0 = vmul.f32 %v7357_v31, %v7056_v11  ;;  %v7373_v21 = vmul.f32 %v7357_v31, %v7064_v5 }
 0x400   :  { %v7377_v45 = vmul.f32 %v7357_v31, %v7068_v58  ;;  %v7381_v54 = vmul.f32 %v7357_v31, %v7074_v43  ;;  %v7385_v8 = vmul.f32 %v7357_v31, %v7080_v51  ;;  %v7389_v59 = vmul.f32 %v7357_v31, %v7086_v30 }
 0x401   :  { %v7393_v11 = vmul.f32 %v7357_v31, %v7092_v15  ;;  %v7397_v5 = vmul.f32 %v7357_v31, %v7098_v38  ;;  %v7401_v58 = vmul.f32 %v7357_v31, %v7104_v35  ;;  %v7405_v43 = vmul.f32 %v7357_v31, %v7110_v23 }
 0x402   :  { %v7409_v51 = vmul.f32 %v7357_v31, %v7116_v46  ;;  %v7413_v30 = vmul.f32 %v7357_v31, %v7122_v14  ;;  %v7417_v15 = vmul.f32 %v7357_v31, %v7128_v40  ;;  %v7421_v38 = vmul.f32 %v7357_v31, %v7134_v50 }
 0x403   :  { %v7425_v35 = vmul.f32 %v7357_v31, %v7140_v24  ;;  %v7429_v23 = vmul.f32 %v7357_v31, %v7146_v28  ;;  %v7433_v46 = vmul.f32 %v7357_v31, %v7152_v33  ;;  %v7437_v14 = vmul.f32 %v7357_v31, %v7158_v47 }
 0x404   :  { %v7441_v40 = vmul.f32 %v7357_v31, %v7164_v25  ;;  %v7445_v50 = vmul.f32 %v7357_v31, %v7170_v29  ;;  %v7449_v24 = vmul.f32 %v7357_v31, %v7176_v61  ;;  %v7453_v28 = vmul.f32 %v7357_v31, %v7182_v18  ;;  %v8452_v61 = vld [vmem:[#allocation30_spill] sm:$0xff] }
 0x405   :  { %v7457_v33 = vmul.f32 %v7357_v31, %v7188_v27  ;;  %v7461_v47 = vmul.f32 %v7357_v31, %v7194_v19  ;;  %v7465_v25 = vmul.f32 %v7357_v31, %v7200_v16  ;;  %v7469_v29 = vmul.f32 %v7357_v31, %v7206_v7 }
 0x406   :  { %v7473_v18 = vmul.f32 %v7357_v31, %v8452_v61  ;;  %v7477_v27 = vmul.f32 %v7357_v31, %v8453_v6  ;;  %v7481_v19 = vmul.f32 %v7357_v31, %v8454_v56  ;;  %v7485_v16 = vmul.f32 %v7357_v31, %v8455_v32  ;;  %v8461_v61 = vld [vmem:[#allocation43_spill] sm:$0xff]  ;;  %v8462_v56 = vld [vmem:[#allocation44_spill] sm:$0xff] }
 0x407   :  { %v7489_v7 = vmul.f32 %v7357_v31, %v8456_v63  ;;  %v7493_v34 = vmul.f32 %v7357_v31, %v8457_v9  ;;  %v7497_v12 = vmul.f32 %v7357_v31, %v8458_v48  ;;  %v7501_v39 = vmul.f32 %v7357_v31, %v8459_v13  ;;  %v8463_v63 = vld [vmem:[#allocation46_spill] sm:$0xff]  ;;  %v8464_v13 = vld [vmem:[#allocation63_spill] sm:$0xff] }
 0x408   :  { %v7505_v41 = vmul.f32 %v7357_v31, %v8460_v42  ;;  %v7509_v6 = vmul.f32 %v7357_v31, %v8461_v61  ;;  %v7513_v32 = vmul.f32 %v7357_v31, %v8462_v56  ;;  %v7517_v9 = vmul.f32 %v7357_v31, %v8463_v63 }
 0x409   :  { %v7521_v48 = vmul.f32 %v7357_v31, %v7284_v2  ;;  %v7525_v42 = vmul.f32 %v7357_v31, %v8464_v13  ;;  %v7529_v61 = vmul.f32 %v7357_v31, %v7296_v57  ;;  %v7533_v56 = vmul.f32 %v7357_v31, %v7302_v3 }
 0x40a   :  { %v7537_v63 = vmul.f32 %v7357_v31, %v7308_v36  ;;  %v7541_v2 = vmul.f32 %v7357_v31, %v6984_v4  ;;  %v7545_v13 = vmul.f32 %v7357_v31, %v6988_v60  ;;  %v7549_v57 = vmul.f32 %v7357_v31, %v6992_v52 }
 0x40b   :  { %v7553_v3 = vmul.f32 %v7357_v31, %v6996_v1  ;;  %v7557_v36 = vmul.f32 %v7357_v31, %v7000_v10  ;;  %v7561_v4 = vmul.f32 %v7357_v31, %v7004_v62  ;;  %v7565_v60 = vmul.f32 %v7357_v31, %v7008_v55  ;;  %v7586_v55 = vld [vmem:[%s8049_s3] ss:$0 sm:$0xff] }
 0x40c   :  { %v7569_v52 = vmul.f32 %v7357_v31, %v7011_v49  ;;  %v7573_v1 = vmul.f32 %v7357_v31, %v7014_v17  ;;  %v7577_v10 = vmul.f32 %v7357_v31, %v7017_v53  ;;  %v7581_v62 = vmul.f32 %v7357_v31, %v7020_v44 }
 0x40d   :  { %8465 = vst [vmem:[#allocation47_spill] sm:$0xff] %v7561_v4  ;;  %8466 = vst [vmem:[#allocation49_spill] sm:$0xff] %v7565_v60  ;;  %v7590_v49 = vmul.f32 %v7357_v31, %v7023_v26  ;;  %v8476_v4 = vld [vmem:[#allocation71_spill] sm:$0xff] }
 0x40e   :  { %8467 = vst [vmem:[#allocation50_spill] sm:$0xff] %v7569_v52  ;;  %8468 = vst [vmem:[#allocation64_spill] sm:$0xff] %v7573_v1  ;;  %v8471_v52 = vld [vmem:[#allocation65_spill] sm:$0xff]  ;;  %v7610_v26 = vmul.f32 %v7357_v31, %v8476_v4  ;;  %v7630_v4 = vadd.f32 %v7586_v55, %v7369_v0  ;;  %v7650_v0 = vadd.f32 %v7586_v55, %v7389_v59 }
 0x40f   :  { %8469 = vst [vmem:[#allocation66_spill] sm:$0xff] %v7577_v10  ;;  %8470 = vst [vmem:[#allocation68_spill] sm:$0xff] %v7581_v62  ;;  %v7594_v17 = vmul.f32 %v7357_v31, %v8471_v52  ;;  %v8473_v1 = vld [vmem:[#allocation61_spill] sm:$0xff]  ;;  %v8474_v10 = vld [vmem:[#allocation7_spill] sm:$0xff]  ;;  %v7614_v52 = vmul.f32 %v7357_v31, %v7041_v20  ;;  %v7634_v20 = vadd.f32 %v7586_v55, %v7373_v21 }
 0x410   :  { %v7598_v53 = vmul.f32 %v7357_v31, %v8473_v1  ;;  %v7602_v44 = vmul.f32 %v7357_v31, %v8474_v10  ;;  %v8475_v62 = vld [vmem:[#allocation67_spill] sm:$0xff]  ;;  %v7622_v10 = vadd.f32 %v7586_v55, %v7361_v22  ;;  %8480 = vst [vmem:[#allocation15_spill] sm:$0xff] %v7630_v4  ;;  %v7642_v22 = vadd.f32 %v7586_v55, %v7381_v54 }
 0x411   :  { %8472 = vst [vmem:[#allocation70_spill] sm:$0xff] %v7594_v17  ;;  %v7606_v60 = vmul.f32 %v7357_v31, %v8475_v62  ;;  %v8477_v17 = vld [vmem:[#allocation29_spill] sm:$0xff]  ;;  %v7626_v62 = vadd.f32 %v7586_v55, %v7365_v37  ;;  %8481 = vst [vmem:[#allocation10_spill] sm:$0xff] %v7634_v20  ;;  %v7646_v37 = vadd.f32 %v7586_v55, %v7385_v8 }
 0x412   :  { %v7618_v1 = vmul.f32 %v7357_v31, %v8477_v17  ;;  %8478 = vst [vmem:[#allocation9_spill] sm:$0xff] %v7622_v10  ;;  %v7638_v31 = vadd.f32 %v7586_v55, %v7377_v45  ;;  %v7654_v21 = vadd.f32 %v7586_v55, %v7393_v11  ;;  %v7658_v45 = vadd.f32 %v7586_v55, %v7397_v5 }
 0x413   :  { %8479 = vst [vmem:[#allocation11_spill] sm:$0xff] %v7626_v62  ;;  %v7662_v54 = vadd.f32 %v7586_v55, %v7401_v58  ;;  %v7666_v8 = vadd.f32 %v7586_v55, %v7405_v43  ;;  %v7670_v59 = vadd.f32 %v7586_v55, %v7409_v51  ;;  %v7674_v11 = vadd.f32 %v7586_v55, %v7413_v30 }
 0x414   :  { %8482 = vst [vmem:[#allocation18_spill] sm:$0xff] %v7638_v31  ;;  %v7678_v5 = vadd.f32 %v7586_v55, %v7417_v15  ;;  %v7682_v58 = vadd.f32 %v7586_v55, %v7421_v38  ;;  %v7686_v43 = vadd.f32 %v7586_v55, %v7425_v35  ;;  %v7690_v51 = vadd.f32 %v7586_v55, %v7429_v23  ;;  %v8488_v17 = vld [vmem:[#allocation47_spill] sm:$0xff] }
 0x415   :  { %v7694_v30 = vadd.f32 %v7586_v55, %v7433_v46  ;;  %v7698_v15 = vadd.f32 %v7586_v55, %v7437_v14  ;;  %v7702_v38 = vadd.f32 %v7586_v55, %v7441_v40  ;;  %v7706_v35 = vadd.f32 %v7586_v55, %v7445_v50 }
 0x416   :  { %v7710_v23 = vadd.f32 %v7586_v55, %v7449_v24  ;;  %v7714_v46 = vadd.f32 %v7586_v55, %v7453_v28  ;;  %v7718_v14 = vadd.f32 %v7586_v55, %v7457_v33  ;;  %v7722_v40 = vadd.f32 %v7586_v55, %v7461_v47 }
 0x417   :  { %v7726_v50 = vadd.f32 %v7586_v55, %v7465_v25  ;;  %v7730_v24 = vadd.f32 %v7586_v55, %v7469_v29  ;;  %v7734_v28 = vadd.f32 %v7586_v55, %v7473_v18  ;;  %v7738_v33 = vadd.f32 %v7586_v55, %v7477_v27 }
 0x418   :  { %v7742_v47 = vadd.f32 %v7586_v55, %v7481_v19  ;;  %v7746_v25 = vadd.f32 %v7586_v55, %v7485_v16  ;;  %v7750_v29 = vadd.f32 %v7586_v55, %v7489_v7  ;;  %v7754_v18 = vadd.f32 %v7586_v55, %v7493_v34 }
 0x419   :  { %v7758_v27 = vadd.f32 %v7586_v55, %v7497_v12  ;;  %v7762_v19 = vadd.f32 %v7586_v55, %v7501_v39  ;;  %v7766_v16 = vadd.f32 %v7586_v55, %v7505_v41  ;;  %v7770_v7 = vadd.f32 %v7586_v55, %v7509_v6 }
 0x41a   :  { %v7774_v34 = vadd.f32 %v7586_v55, %v7513_v32  ;;  %v7778_v12 = vadd.f32 %v7586_v55, %v7517_v9  ;;  %v7782_v39 = vadd.f32 %v7586_v55, %v7521_v48  ;;  %v7786_v41 = vadd.f32 %v7586_v55, %v7525_v42 }
 0x41b   :  { %v7790_v6 = vadd.f32 %v7586_v55, %v7529_v61  ;;  %v7794_v32 = vadd.f32 %v7586_v55, %v7533_v56  ;;  %v7798_v9 = vadd.f32 %v7586_v55, %v7537_v63  ;;  %v7802_v48 = vadd.f32 %v7586_v55, %v7541_v2 }
 0x41c   :  { %v7806_v42 = vadd.f32 %v7586_v55, %v7545_v13  ;;  %v7810_v61 = vadd.f32 %v7586_v55, %v7549_v57  ;;  %v7814_v56 = vadd.f32 %v7586_v55, %v7553_v3  ;;  %v7818_v63 = vadd.f32 %v7586_v55, %v7557_v36 }
 0x41d   :  { %8483 = vst [vmem:[#allocation20_spill] sm:$0xff] %v7802_v48  ;;  %v7822_v2 = vadd.f32 %v7586_v55, %v8488_v17  ;;  %v8489_v48 = vld [vmem:[#allocation49_spill] sm:$0xff] }
 0x41e   :  { %8484 = vst [vmem:[#allocation13_spill] sm:$0xff] %v7806_v42  ;;  %8485 = vst [vmem:[#allocation22_spill] sm:$0xff] %v7810_v61  ;;  %v7826_v13 = vadd.f32 %v7586_v55, %v8489_v48  ;;  %v8491_v42 = vld [vmem:[#allocation50_spill] sm:$0xff]  ;;  %v8492_v61 = vld [vmem:[#allocation64_spill] sm:$0xff]  ;;  %v7846_v48 = vadd.f32 %v7586_v55, %v7590_v49  ;;  %v7866_v49 = vadd.f32 %v7586_v55, %v7610_v26  ;;  %v3503_v26 = vmax.f32 %v7642_v22, 0.0 }
 0x41f   :  { %8486 = vst [vmem:[#allocation26_spill] sm:$0xff] %v7814_v56  ;;  %8487 = vst [vmem:[#allocation17_spill] sm:$0xff] %v7818_v63  ;;  %v7830_v57 = vadd.f32 %v7586_v55, %v8491_v42  ;;  %v7834_v3 = vadd.f32 %v7586_v55, %v8492_v61  ;;  %v8493_v56 = vld [vmem:[#allocation66_spill] sm:$0xff]  ;;  %v8494_v63 = vld [vmem:[#allocation68_spill] sm:$0xff]  ;;  %v7854_v61 = vadd.f32 %v7586_v55, %v7598_v53  ;;  %v3513_v22 = vmax.f32 %v7682_v58, 0.0 }
 0x420   :  { %8490 = vst [vmem:[#allocation28_spill] sm:$0xff] %v7826_v13  ;;  %v7838_v36 = vadd.f32 %v7586_v55, %v8493_v56  ;;  %v7842_v17 = vadd.f32 %v7586_v55, %v8494_v63  ;;  %v8495_v13 = vld [vmem:[#allocation70_spill] sm:$0xff]  ;;  %v7858_v56 = vadd.f32 %v7586_v55, %v7602_v44  ;;  %v7862_v63 = vadd.f32 %v7586_v55, %v7606_v60 }
 0x421   :  { %v7850_v42 = vadd.f32 %v7586_v55, %v8495_v13  ;;  %8496 = vst [vmem:[#allocation19_spill] sm:$0xff] %v7854_v61  ;;  %8499 = vst [vmem:[#allocation27_spill] sm:$0xff] %v7866_v49  ;;  %v7870_v13 = vadd.f32 %v7586_v55, %v7614_v52  ;;  %v7874_v53 = vadd.f32 %v7586_v55, %v7618_v1  ;;  %v3504_v49 = vmax.f32 %v7646_v37, 0.0 }
 0x422   :  { %8497 = vst [vmem:[#allocation21_spill] sm:$0xff] %v7858_v56  ;;  %8498 = vst [vmem:[#allocation24_spill] sm:$0xff] %v7862_v63  ;;  %v3505_v52 = vmax.f32 %v7650_v0, 0.0  ;;  %v3507_v55 = vmax.f32 %v7658_v45, 0.0  ;;  %v3508_v1 = vmax.f32 %v7662_v54, 0.0  ;;  %v3509_v44 = vmax.f32 %v7666_v8, 0.0 }
 0x423   :  { %8500 = vst [vmem:[#allocation69_spill] sm:$0xff] %v7870_v13  ;;  %8501 = vst [vmem:[#allocation33_spill] sm:$0xff] %v7874_v53  ;;  %v3506_v13 = vmax.f32 %v7654_v21, 0.0  ;;  %v3510_v56 = vmax.f32 %v7670_v59, 0.0  ;;  %v3511_v60 = vmax.f32 %v7674_v11, 0.0  ;;  %v3512_v63 = vmax.f32 %v7678_v5, 0.0 }
 0x424   :  { %v3514_v37 = vmax.f32 %v7686_v43, 0.0  ;;  %v3515_v0 = vmax.f32 %v7690_v51, 0.0  ;;  %v3516_v21 = vmax.f32 %v7694_v30, 0.0  ;;  %v3517_v45 = vmax.f32 %v7698_v15, 0.0  ;;  %v8502_v61 = vld [vmem:[#allocation20_spill] sm:$0xff] }
 0x425   :  { %v3518_v54 = vmax.f32 %v7702_v38, 0.0  ;;  %v3519_v8 = vmax.f32 %v7706_v35, 0.0  ;;  %v3520_v59 = vmax.f32 %v7710_v23, 0.0  ;;  %v3521_v11 = vmax.f32 %v7714_v46, 0.0  ;;  %v8503_v31 = vld [vmem:[#allocation13_spill] sm:$0xff]  ;;  %v8504_v20 = vld [vmem:[#allocation22_spill] sm:$0xff] }
 0x426   :  { %v3522_v5 = vmax.f32 %v7718_v14, 0.0  ;;  %v3523_v58 = vmax.f32 %v7722_v40, 0.0  ;;  %v3524_v43 = vmax.f32 %v7726_v50, 0.0  ;;  %v3525_v51 = vmax.f32 %v7730_v24, 0.0  ;;  %v8505_v4 = vld [vmem:[#allocation26_spill] sm:$0xff]  ;;  %v8506_v62 = vld [vmem:[#allocation17_spill] sm:$0xff] }
 0x427   :  { %v3526_v30 = vmax.f32 %v7734_v28, 0.0  ;;  %v3527_v15 = vmax.f32 %v7738_v33, 0.0  ;;  %v3528_v38 = vmax.f32 %v7742_v47, 0.0  ;;  %v3529_v35 = vmax.f32 %v7746_v25, 0.0  ;;  %v8507_v10 = vld [vmem:[#allocation28_spill] sm:$0xff] }
 0x428   :  { %v3530_v23 = vmax.f32 %v7750_v29, 0.0  ;;  %v3531_v46 = vmax.f32 %v7754_v18, 0.0  ;;  %v3532_v14 = vmax.f32 %v7758_v27, 0.0  ;;  %v3533_v40 = vmax.f32 %v7762_v19, 0.0  ;;  %v8508_v53 = vld [vmem:[#allocation19_spill] sm:$0xff] }
 0x429   :  { %v3534_v50 = vmax.f32 %v7766_v16, 0.0  ;;  %v3535_v24 = vmax.f32 %v7770_v7, 0.0  ;;  %v3536_v28 = vmax.f32 %v7774_v34, 0.0  ;;  %v3537_v33 = vmax.f32 %v7778_v12, 0.0 }
 0x42a   :  { %v3538_v47 = vmax.f32 %v7782_v39, 0.0  ;;  %v3539_v25 = vmax.f32 %v7786_v41, 0.0  ;;  %v3540_v29 = vmax.f32 %v7790_v6, 0.0  ;;  %v3541_v18 = vmax.f32 %v7794_v32, 0.0 }
 0x42b   :  { %v3542_v27 = vmax.f32 %v7798_v9, 0.0  ;;  %v3543_v19 = vmax.f32 %v8502_v61, 0.0  ;;  %v3544_v16 = vmax.f32 %v8503_v31, 0.0  ;;  %v3545_v7 = vmax.f32 %v8504_v20, 0.0 }
 0x42c   :  { %v3546_v34 = vmax.f32 %v8505_v4, 0.0  ;;  %v3547_v12 = vmax.f32 %v8506_v62, 0.0  ;;  %v3548_v39 = vmax.f32 %v7822_v2, 0.0  ;;  %v3549_v41 = vmax.f32 %v8507_v10, 0.0  ;;  %v8509_v62 = vld [vmem:[#allocation21_spill] sm:$0xff]  ;;  %v8510_v10 = vld [vmem:[#allocation24_spill] sm:$0xff] }
 0x42d   :  { %v3550_v6 = vmax.f32 %v7830_v57, 0.0  ;;  %v3551_v32 = vmax.f32 %v7834_v3, 0.0  ;;  %v3552_v9 = vmax.f32 %v7838_v36, 0.0  ;;  %v3553_v61 = vmax.f32 %v7842_v17, 0.0  ;;  %v8511_v3 = vld [vmem:[#allocation27_spill] sm:$0xff]  ;;  %v8512_v17 = vld [vmem:[#allocation69_spill] sm:$0xff] }
 0x42e   :  { %v3554_v31 = vmax.f32 %v7846_v48, 0.0  ;;  %v3555_v20 = vmax.f32 %v7850_v42, 0.0  ;;  %v3556_v4 = vmax.f32 %v8508_v53, 0.0  ;;  %v3557_v2 = vmax.f32 %v8509_v62, 0.0  ;;  %v8513_v42 = vld [vmem:[#allocation33_spill] sm:$0xff] }
 0x42f   :  { %v3558_v57 = vmax.f32 %v8510_v10, 0.0  ;;  %v3559_v36 = vmax.f32 %v8511_v3, 0.0  ;;  %v3560_v48 = vmax.f32 %v8512_v17, 0.0  ;;  %v3561_v53 = vmax.f32 %v8513_v42, 0.0  ;;  %v8514_v62 = vld [vmem:[#allocation9_spill] sm:$0xff]  ;;  %v8516_v3 = vld [vmem:[#allocation11_spill] sm:$0xff] }
 0x430   :  { %v8515_v10 = vmax.f32 %v8514_v62, 0.0  ;;  %v8517_v17 = vmax.f32 %v8516_v3, 0.0  ;;  %v8518_v62 = vld [vmem:[#allocation15_spill] sm:$0xff] }
 0x431   :  { %v8519_v3 = vmax.f32 %v8518_v62, 0.0 }
 0x432   :  { %v4162_v42 = vpack.c.bf16 %v8517_v17, %v8515_v10  ;;  %v8520_v10 = vld [vmem:[#allocation10_spill] sm:$0xff] }
 0x433   :  { %v8521_v17 = vmax.f32 %v8520_v10, 0.0  ;;  %v8522_v10 = vld [vmem:[#allocation18_spill] sm:$0xff] }
 0x434   :  { %4163 = vst [vmem:[%s8050_s4] sm:$0xff] %v4162_v42  }
 0x435   :  { %v4167_v62 = vpack.c.bf16 %v8521_v17, %v8519_v3  ;;  %v8523_v3 = vmax.f32 %v8522_v10, 0.0  ;;  %v4177_v10 = vpack.c.bf16 %v3505_v52, %v3504_v49  ;;  %v4192_v49 = vpack.c.bf16 %v3511_v60, %v3510_v56 }
 0x436   :  { %v4197_v52 = vpack.c.bf16 %v3513_v22, %v3512_v63  ;;  %v4212_v56 = vpack.c.bf16 %v3519_v8, %v3518_v54  ;;  %v4217_v63 = vpack.c.bf16 %v3521_v11, %v3520_v59  ;;  %v4222_v60 = vpack.c.bf16 %v3523_v58, %v3522_v5 }
 0x437   :  { %v4172_v17 = vpack.c.bf16 %v3503_v26, %v8523_v3  ;;  %v4182_v3 = vpack.c.bf16 %v3507_v55, %v3506_v13  ;;  %v4187_v26 = vpack.c.bf16 %v3509_v44, %v3508_v1  ;;  %4319 = vst [vmem:[%s8050_s4 + $0x8] sm:$0xff] %v4167_v62   ;;  %4321 = vst [vmem:[%s8050_s4 + $0x18] sm:$0xff] %v4177_v10  }
 0x438   :  { %v4202_v13 = vpack.c.bf16 %v3515_v0, %v3514_v37  ;;  %v4207_v44 = vpack.c.bf16 %v3517_v45, %v3516_v21  ;;  %4324 = vst [vmem:[%s8050_s4 + $0x30] sm:$0xff] %v4192_v49   ;;  %4325 = vst [vmem:[%s8050_s4 + $0x38] sm:$0xff] %v4197_v52   ;;  %v4227_v55 = vpack.c.bf16 %v3525_v51, %v3524_v43 }
 0x439   :  { %4320 = vst [vmem:[%s8050_s4 + $0x10] sm:$0xff] %v4172_v17   ;;  %4322 = vst [vmem:[%s8050_s4 + $0x20] sm:$0xff] %v4182_v3   ;;  %v4232_v1 = vpack.c.bf16 %v3527_v15, %v3526_v30  ;;  %v4237_v22 = vpack.c.bf16 %v3529_v35, %v3528_v38  ;;  %v4242_v37 = vpack.c.bf16 %v3531_v46, %v3530_v23 }
 0x43a   :  { %4323 = vst [vmem:[%s8050_s4 + $0x28] sm:$0xff] %v4187_v26   ;;  %4326 = vst [vmem:[%s8050_s4 + $0x40] sm:$0xff] %v4202_v13   ;;  %v4247_v0 = vpack.c.bf16 %v3533_v40, %v3532_v14  ;;  %v4252_v21 = vpack.c.bf16 %v3535_v24, %v3534_v50  ;;  %v4257_v45 = vpack.c.bf16 %v3537_v33, %v3536_v28 }
 0x43b   :  { %4327 = vst [vmem:[%s8050_s4 + $0x48] sm:$0xff] %v4207_v44   ;;  %4328 = vst [vmem:[%s8050_s4 + $0x50] sm:$0xff] %v4212_v56   ;;  %v4262_v54 = vpack.c.bf16 %v3539_v25, %v3538_v47  ;;  %v4267_v8 = vpack.c.bf16 %v3541_v18, %v3540_v29  ;;  %v4272_v59 = vpack.c.bf16 %v3543_v19, %v3542_v27 }
 0x43c   :  { %4329 = vst [vmem:[%s8050_s4 + $0x58] sm:$0xff] %v4217_v63   ;;  %4330 = vst [vmem:[%s8050_s4 + $0x60] sm:$0xff] %v4222_v60   ;;  %v4277_v11 = vpack.c.bf16 %v3545_v7, %v3544_v16  ;;  %v4282_v5 = vpack.c.bf16 %v3547_v12, %v3546_v34  ;;  %v4287_v58 = vpack.c.bf16 %v3549_v41, %v3548_v39 }
 0x43d   :  { %4331 = vst [vmem:[%s8050_s4 + $0x68] sm:$0xff] %v4227_v55   ;;  %4332 = vst [vmem:[%s8050_s4 + $0x70] sm:$0xff] %v4232_v1   ;;  %v4292_v43 = vpack.c.bf16 %v3551_v32, %v3550_v6  ;;  %v4297_v51 = vpack.c.bf16 %v3553_v61, %v3552_v9  ;;  %v4302_v30 = vpack.c.bf16 %v3555_v20, %v3554_v31 }
 0x43e   :  { %4333 = vst [vmem:[%s8050_s4 + $0x78] sm:$0xff] %v4237_v22   ;;  %4334 = vst [vmem:[%s8050_s4 + $0x80] sm:$0xff] %v4242_v37   ;;  %v4307_v15 = vpack.c.bf16 %v3557_v2, %v3556_v4  ;;  %v4312_v38 = vpack.c.bf16 %v3559_v36, %v3558_v57  ;;  %v4317_v35 = vpack.c.bf16 %v3561_v53, %v3560_v48 }
 0x43f   :  { %4335 = vst [vmem:[%s8050_s4 + $0x88] sm:$0xff] %v4247_v0   ;;  %4336 = vst [vmem:[%s8050_s4 + $0x90] sm:$0xff] %v4252_v21  }
 0x440   :  { %4337 = vst [vmem:[%s8050_s4 + $0x98] sm:$0xff] %v4257_v45   ;;  %4338 = vst [vmem:[%s8050_s4 + $0xa0] sm:$0xff] %v4262_v54  }
 0x441   :  { %4339 = vst [vmem:[%s8050_s4 + $0xa8] sm:$0xff] %v4267_v8   ;;  %4340 = vst [vmem:[%s8050_s4 + $0xb0] sm:$0xff] %v4272_v59  }
 0x442   :  { %4341 = vst [vmem:[%s8050_s4 + $0xb8] sm:$0xff] %v4277_v11   ;;  %4342 = vst [vmem:[%s8050_s4 + $0xc0] sm:$0xff] %v4282_v5  }
 0x443   :  { %4343 = vst [vmem:[%s8050_s4 + $0xc8] sm:$0xff] %v4287_v58   ;;  %4344 = vst [vmem:[%s8050_s4 + $0xd0] sm:$0xff] %v4292_v43  }
 0x444   :  { %4345 = vst [vmem:[%s8050_s4 + $0xd8] sm:$0xff] %v4297_v51   ;;  %4346 = vst [vmem:[%s8050_s4 + $0xe0] sm:$0xff] %v4302_v30  }
 0x445   :  { %4347 = vst [vmem:[%s8050_s4 + $0xe8] sm:$0xff] %v4307_v15   ;;  %4348 = vst [vmem:[%s8050_s4 + $0xf0] sm:$0xff] %v4312_v38  }
 0x446   :  { %4349 = vst [vmem:[%s8050_s4 + $0xf8] sm:$0xff] %v4317_v35  }

</bundles_post_ra>
